<compile_context>
chip_gen: v7x
topology: tpu7x:2x2x1
jax: 0.10.0
libtpu: 0.0.40
codegen_flags: <defaults>
</compile_context>

<pallas_src>
import functools
import math

import jax
import jax.numpy as jnp
from jax import lax
from jax.experimental import pallas as pl
from jax.experimental.pallas import tpu as pltpu

BN_EPS = 1e-5
ACT_DTYPE = jnp.bfloat16      # HBM storage dtype for inter-block activations
LANE = 128                    # TPU lane width   (minor dim)
SUBLANE = 8                   # TPU sublane width (second-minor dim)


def _round_up(v, m):
    return (v + m - 1) // m * m


def _act(y, nl):
    if nl == "RE":
        return jnp.maximum(y, 0.0)
    if nl == "HS":            # PyTorch Hardswish: x * relu6(x + 3) / 6
        return y * jnp.clip(y + 3.0, 0.0, 6.0) * (1.0 / 6.0)
    return y


# ------------------------------ fused Bneck kernel ------------------------------

def _make_bneck_kernel(H, W, cin, K, Ep, coutp, nl, stride, se, skip, hoist):
    p = (K - 1) // 2
    Ho, Wo = (H, W) if stride == 1 else (H // 2, W // 2)

    # The interior of the expanded feature map is stored at (OR, OC) inside the
    # scratch.  OC = 8 makes the big up-stage writeback start on a sublane
    # boundary (unmasked full-vreg stores).  q_lo/q_hi are the tap reach
    # (in interior coordinates) into the zero border.
    OC = SUBLANE
    if stride == 1:
        q_lo, q_hi = -p, p
        OR = p
    else:                                 # stride-2 parity-plane coordinates
        q_lo, q_hi = -((p + 1) // 2), p // 2
        OR = (p + 1) // 2
    Hp = OR + Ho + max(q_hi, 0)
    Wp = _round_up(OC + Wo + max(q_hi, 0), SUBLANE)

    def kernel(*refs):
        if se:
            (x_ref, wup_ref, bup_ref, wdw_ref, bdw_ref,
             w1_ref, b1_ref, w2_ref, b2_ref,
             wdn_ref, bdn_ref, o_ref, exp_ref) = refs
        else:
            (x_ref, wup_ref, bup_ref, wdw_ref, bdw_ref,
             wdn_ref, bdn_ref, o_ref, exp_ref) = refs

        # ---- zero ONLY the thin padding borders (interior is overwritten) ----
        if stride == 1:
            if q_lo < 0:
                exp_ref[OR + q_lo:OR, :, :] = (
                    jnp.zeros((-q_lo, Wp, Ep), jnp.float32))
                exp_ref[OR:OR + Ho, OC + q_lo:OC, :] = (
                    jnp.zeros((Ho, -q_lo, Ep), jnp.float32))
            if q_hi > 0:
                exp_ref[OR + Ho:OR + Ho + q_hi, :, :] = (
                    jnp.zeros((q_hi, Wp, Ep), jnp.float32))
                exp_ref[OR:OR + Ho, OC + Wo:OC + Wo + q_hi, :] = (
                    jnp.zeros((Ho, q_hi, Ep), jnp.float32))
        else:
            for a in range(2):
                for b in range(2):
                    if q_lo < 0:
                        exp_ref[a, b, OR + q_lo:OR, :, :] = (
                            jnp.zeros((-q_lo, Wp, Ep), jnp.float32))
                        exp_ref[a, b, OR:OR + Ho, OC + q_lo:OC, :] = (
                            jnp.zeros((Ho, -q_lo, Ep), jnp.float32))
                    if q_hi > 0:
                        exp_ref[a, b, OR + Ho:OR + Ho + q_hi, :, :] = (
                            jnp.zeros((q_hi, Wp, Ep), jnp.float32))
                        exp_ref[a, b, OR:OR + Ho, OC + Wo:OC + Wo + q_hi, :] = (
                            jnp.zeros((Ho, q_hi, Ep), jnp.float32))

        # ---- 1x1 up-conv (single fused matmul) -> NL.  BN1 scale is folded
        #      into the depthwise taps, so no affine pass here. ----
        wup = wup_ref[...]
        bup = bup_ref[...]
        if stride == 1:
            x2d = x_ref[0].reshape(H * W, cin)
            y = _act(jnp.dot(x2d, wup, preferred_element_type=jnp.float32)
                     + bup, nl)
            exp_ref[OR:OR + H, OC:OC + W, :] = y.reshape(H, W, Ep)
        else:
            x2d = x_ref[0].reshape(4 * Ho * Wo, cin)
            y = _act(jnp.dot(x2d, wup, preferred_element_type=jnp.float32)
                     + bup, nl)
            y5 = y.reshape(2, 2, Ho, Wo, Ep)
            for a in range(2):
                for b in range(2):
                    exp_ref[a, b, OR:OR + Ho, OC:OC + Wo, :] = y5[a, b]

        # ---- depthwise KxK (stride folded via parity planes).  BN1 scale is
        #      pre-folded into wdw; BN2*BN1 scale pre-folded into wdn / w1. ----
        acc = jnp.zeros((Ho, Wo, Ep), jnp.float32)
        for ki in range(K):
            if stride == 1:
                r0 = OR - p + ki
                band = exp_ref[r0:r0 + Ho, :, :] if hoist else None
                for kj in range(K):
                    c0 = OC - p + kj
                    t = ki * K + kj
                    if hoist:
                        win = band[:, c0:c0 + Wo, :]
                    else:
                        win = exp_ref[r0:r0 + Ho, c0:c0 + Wo, :]
                    acc = acc + win * wdw_ref[t:t + 1, :]
            else:
                ar = (ki - p) % 2
                r0 = OR + (ki - p - ar) // 2
                for bp in range(2):
                    kjs = [kj for kj in range(K) if (kj - p) % 2 == bp]
                    if not kjs:
                        continue
                    band = exp_ref[ar, bp, r0:r0 + Ho, :, :] if hoist else None
                    for kj in kjs:
                        c0 = OC + (kj - p - bp) // 2
                        t = ki * K + kj
                        if hoist:
                            win = band[:, c0:c0 + Wo, :]
                        else:
                            win = exp_ref[ar, bp, r0:r0 + Ho, c0:c0 + Wo, :]
                        acc = acc + win * wdw_ref[t:t + 1, :]
        acc = _act(acc + bdw_ref[...], nl)

        if se:
            # SE fused in-kernel: global-avg-pool -> tiny MLP -> channel scale.
            pooled = jnp.mean(acc.reshape(Ho * Wo, Ep), axis=0, keepdims=True)
            p8 = jnp.broadcast_to(pooled, (8, Ep)).astype(jnp.bfloat16)
            h1 = jnp.maximum(
                jnp.dot(p8, w1_ref[...], preferred_element_type=jnp.float32)
                + b1_ref[...], 0.0)
            g = jax.nn.sigmoid(
                jnp.dot(h1.astype(jnp.bfloat16), w2_ref[...],
                        preferred_element_type=jnp.float32) + b2_ref[...])
            acc = acc * g[0:1, :]

        # ---- 1x1 down-conv (lane-padded cout) + fused residual ----
        a2d = acc.reshape(Ho * Wo, Ep).astype(jnp.bfloat16)
        out = jnp.dot(a2d, wdn_ref[...], preferred_element_type=jnp.float32)
        out = out + bdn_ref[...]
        if skip:
            # Lane-pad the residual to coutp via a tiny identity matmul
            # (avoids an unaligned lane-dim concatenation).
            xs = x_ref[0].reshape(H * W, cin)
            ii = lax.broadcasted_iota(jnp.int32, (cin, coutp), 0)
            jj = lax.broadcasted_iota(jnp.int32, (cin, coutp), 1)
            eye_pad = (ii == jj).astype(jnp.bfloat16)
            out = out + jnp.dot(xs, eye_pad, preferred_element_type=jnp.float32)
        o_ref[...] = out.reshape(1, Ho * Wo, coutp).astype(o_ref.dtype)

    return kernel, Ho, Wo, Hp, Wp


@functools.lru_cache(maxsize=None)
def _bneck_call(N, H, W, cin, K, Ep, coutp, nl, stride, se, skip, c4p, hoist):
    kernel, Ho, Wo, Hp, Wp = _make_bneck_kernel(
        H, W, cin, K, Ep, coutp, nl, stride, se, skip, hoist)

    if stride == 1:
        x_block = (1, H, W, cin)
        x_spec = pl.BlockSpec(x_block, lambda n: (n, 0, 0, 0))
        exp_scratch = pltpu.VMEM((Hp, Wp, Ep), jnp.float32)
        scratch_bytes = Hp * Wp * Ep * 4
    else:
        x_block = (1, 2, 2, Ho, Wo, cin)
        x_spec = pl.BlockSpec(x_block, lambda n: (n, 0, 0, 0, 0, 0))
        exp_scratch = pltpu.VMEM((2, 2, Hp, Wp, Ep), jnp.float32)
        scratch_bytes = 4 * Hp * Wp * Ep * 4

    def full(shape):
        return pl.BlockSpec(shape, lambda n: (0,) * len(shape))

    in_specs = [x_spec,
                full((cin, Ep)), full((1, Ep)),
                full((K * K, Ep)), full((1, Ep))]
    blk_bytes = (math.prod(x_block) * 2 + cin * Ep * 2 + Ep * 4
                 + K * K * Ep * 4 + Ep * 4)
    if se:
        in_specs += [full((Ep, c4p)), full((1, c4p)),
                     full((c4p, Ep)), full((1, Ep))]
        blk_bytes += Ep * c4p * 2 + c4p * 4 + c4p * Ep * 2 + Ep * 4
    in_specs += [full((Ep, coutp)), full((1, coutp))]
    blk_bytes += Ep * coutp * 2 + coutp * 4
    out_bytes = Ho * Wo * coutp * 2

    # Size the scoped VMEM from actual usage (double-buffered blocks + scratch
    # + in-flight temporaries) instead of a blanket limit; stay well under the
    # 64 MiB/TC available on v7x.
    temp_bytes = 4 * ((4 if stride == 2 else 1) * Ho * Wo * Ep   # up-stage y
                      + Ho * Wo * Ep                             # depthwise acc
                      + Ho * Wp * Ep                             # hoisted band
                      + Ho * Wo * coutp)                         # down-conv out
    vmem_limit = int(min(48 << 20,
                         max(24 << 20,
                             2 * (blk_bytes + out_bytes) + scratch_bytes
                             + 2 * temp_bytes + (8 << 20))))

    call = pl.pallas_call(
        kernel,
        out_shape=jax.ShapeDtypeStruct((N, Ho * Wo, coutp), ACT_DTYPE),
        grid=(N,),
        in_specs=in_specs,
        out_specs=pl.BlockSpec((1, Ho * Wo, coutp), lambda n: (n, 0, 0)),
        scratch_shapes=[exp_scratch],
        compiler_params=pltpu.CompilerParams(
            dimension_semantics=("parallel",),
            vmem_limit_bytes=vmem_limit),
    )
    return call, Ho, Wo


# ----------------------------------- wrapper ------------------------------------

def bneck_forward(x_nhwc, params, cfg):
    """Fused Bneck forward.  x: (N, H, W, cin) NHWC; returns (N, Ho, Wo, cout)."""
    cin, K, E, cout, nl, stride, se, skip = cfg
    N, H, W, C = x_nhwc.shape
    assert C == cin and K % 2 == 1 and stride in (1, 2)
    if stride == 2:
        assert H % 2 == 0 and W % 2 == 0 and not skip
    if skip:
        assert cin == cout and stride == 1

    Ep = _round_up(E, LANE)          # lane-pad expanded channels
    coutp = _round_up(cout, LANE)    # lane-pad output channels (lane-dense vst)

    # Inference BatchNorm with PyTorch-default stats (gamma=1, beta=0, mean=0,
    # var=1, eps=1e-5) is a per-channel scale with ZERO shift, so it folds
    # exactly into the adjacent channel-linear weights:
    #   BN1 scale  -> depthwise taps;  (BN2*BN1) scale -> down-conv / SE-fc1.
    # NOTE: if real running stats / affine params are ever loaded, these folds
    # (and a bias correction for nonzero shifts) must be rebuilt from them.
    s1 = 1.0 / math.sqrt(1.0 + BN_EPS)
    s2 = s1 * s1

    wup, bup = params["up"]
    wdw, bdw = params["dw"]
    wdn, bdn = params["down"]

    def pad2(w, rows, cols):
        return jnp.pad(w, ((0, rows - w.shape[0]), (0, cols - w.shape[1])))

    def padv(v, n):
        return jnp.pad(v, (0, n - v.shape[0])).reshape(1, n)

    args = [None,                                   # x, filled below
            pad2(wup, cin, Ep).astype(jnp.bfloat16),
            padv(bup, Ep).astype(jnp.float32),
            pad2((wdw * s1).reshape(K * K, E), K * K, Ep).astype(jnp.float32),
            padv(bdw, Ep).astype(jnp.float32)]
    if se:
        (w1, b1), (w2, b2) = params["se1"], params["se2"]
        c4 = int(w1.shape[1])
        c4p = _round_up(c4, LANE)
        args += [pad2(w1 * s2, Ep, c4p).astype(jnp.bfloat16),
                 padv(b1, c4p).astype(jnp.float32),
                 pad2(w2, c4p, Ep).astype(jnp.bfloat16),
                 padv(b2, Ep).astype(jnp.float32)]
    else:
        c4p = 0
    args += [pad2(wdn * s2, Ep, coutp).astype(jnp.bfloat16),
             padv(bdn, coutp).astype(jnp.float32)]

    if stride == 2:
        # 4 (row,col)-parity planes: every stride-2 depthwise tap becomes a
        # contiguous window of one plane; only Ho*Wo outputs are computed.
        Hh, Wh = H // 2, W // 2
        x_in = x_nhwc.reshape(N, Hh, 2, Wh, 2, cin).transpose(0, 2, 4, 1, 3, 5)
    else:
        x_in = x_nhwc
    args[0] = x_in.astype(ACT_DTYPE)

    try:
        call, Ho, Wo = _bneck_call(N, H, W, cin, K, Ep, coutp, nl, stride, se,
                                   skip, c4p, True)
        out = jax.block_until_ready(call(*args))
    except Exception:
        # TODO(synk): drop this fallback once unaligned in-register band slicing
        # is confirmed on all deployed Mosaic versions.
        call, Ho, Wo = _bneck_call(N, H, W, cin, K, Ep, coutp, nl, stride, se,
                                   skip, c4p, False)
        out = jax.block_until_ready(call(*args))

    return out.reshape(N, Ho, Wo, coutp)[:, :, :, :cout]


# -------------------------------- params & reference ----------------------------

def init_bneck_params(key, cfg):
    cin, K, E, cout, nl, stride, se, skip = cfg
    keys = jax.random.split(key, 6)

    def conv(k, ci, co):
        k1, k2 = jax.random.split(k)
        w = jax.random.normal(k1, (ci, co), jnp.float32) / jnp.sqrt(float(ci))
        b = 0.05 * jax.random.normal(k2, (co,), jnp.float32)
        return w, b

    def dconv(k, kk, c):
        k1, k2 = jax.random.split(k)
        w = jax.random.normal(k1, (kk, kk, c), jnp.float32) / float(kk)
        b = 0.05 * jax.random.normal(k2, (c,), jnp.float32)
        return w, b

    p = {"up": conv(keys[0], cin, E), "dw": dconv(keys[1], K, E),
         "down": conv(keys[2], E, cout)}
    if se:
        c4 = int(E * 0.25)
        p["se1"] = conv(keys[3], E, c4)
        p["se2"] = conv(keys[4], c4, E)
    return p


def _bneck_ref(x_nhwc, params, cfg):
    """Pure-JAX (f32) reference of the intended Bneck data flow."""
    cin, K, E, cout, nl, stride, se, skip = cfg
    p = (K - 1) // 2
    s_bn = 1.0 / math.sqrt(1.0 + BN_EPS)
    act = (lambda v: jnp.maximum(v, 0.0)) if nl == "RE" else \
          (lambda v: v * jnp.clip(v + 3.0, 0.0, 6.0) / 6.0)

    wup, bup = params["up"]
    x1 = act(jnp.einsum("nhwc,ce->nhwe", x_nhwc, wup) + bup) * s_bn

    wdw, bdw = params["dw"]
    xd = lax.conv_general_dilated(
        x1, wdw.reshape(K, K, 1, E), (stride, stride), [(p, p), (p, p)],
        dimension_numbers=("NHWC", "HWIO", "NHWC"),
        feature_group_count=E) + bdw
    xd = act(xd) * (s_bn * s_bn)

    if se:
        (w1, b1), (w2, b2) = params["se1"], params["se2"]
        pooled = jnp.mean(xd, axis=(1, 2))
        g = jax.nn.sigmoid(jnp.maximum(pooled @ w1 + b1, 0.0) @ w2 + b2)
        xd = xd * g[:, None, None, :]

    wdn, bdn = params["down"]
    out = jnp.einsum("nhwe,eo->nhwo", xd, wdn) + bdn
    if skip:
        out = out + x_nhwc
    return out


# ------------------------------------- main --------------------------------------

if __name__ == "__main__":
    key = jax.random.PRNGKey(0)
    # (input_size, operator_kernel, exp_size, out_size, NL, s, SE, skip_connection)
    cfgs = [
        (16, 3, 64, 24, "RE", 2, False, False),    # stride-2 expand
        (24, 5, 72, 40, "HS", 2, True, False),     # 5x5 stride-2 + SE
        (40, 3, 120, 40, "HS", 1, True, True),     # stride-1 + SE + skip
    ]
    kx, kp = jax.random.split(key)
    x_nchw = jax.random.normal(kx, (2, 16, 32, 32), jnp.float32)   # (N, C, H, W)
    # Chained activations stay in NHWC between blocks (single transpose on entry).
    x = jnp.transpose(x_nchw, (0, 2, 3, 1))
    pkeys = jax.random.split(kp, len(cfgs))

    for i, (cfg, k) in enumerate(zip(cfgs, pkeys)):
        params = init_bneck_params(k, cfg)
        y = jax.block_until_ready(bneck_forward(x, params, cfg))

        # correctness check vs a pure-JAX reference at the kernel's bf16 input
        x_ref_in = x.astype(jnp.bfloat16).astype(jnp.float32)
        ref = _bneck_ref(x_ref_in, params, cfg)
        yf = y.astype(jnp.float32)
        err = float(jnp.max(jnp.abs(yf - ref)))
        scale = float(jnp.max(jnp.abs(ref))) + 1e-6
        assert err / scale < 5e-2, f"bneck {i}: relative error {err / scale:.4f}"
        assert bool(jnp.all(jnp.isfinite(yf)))

        x = yf                                                     # chain blocks

    assert x.shape == (2, 8, 8, 40)
    print("KERNEL_OK")
</pallas_src>

<mosaic_0001>
module attributes {stable_mosaic.version = 11 : i64} {
  func.func @kernel(%arg0: i32, %arg1: memref<1x2x2x16x16x16xbf16, #tpu.memory_space<vmem>>, %arg2: memref<16x128xbf16, #tpu.memory_space<vmem>>, %arg3: memref<1x128xf32, #tpu.memory_space<vmem>>, %arg4: memref<9x128xf32, #tpu.memory_space<vmem>>, %arg5: memref<1x128xf32, #tpu.memory_space<vmem>>, %arg6: memref<128x128xbf16, #tpu.memory_space<vmem>>, %arg7: memref<1x128xf32, #tpu.memory_space<vmem>>, %arg8: memref<1x256x128xbf16, #tpu.memory_space<vmem>>, %arg9: memref<2x2x17x24x128xf32, #tpu.memory_space<vmem>>) attributes {dimension_semantics = [#tpu.dimension_semantics<parallel>], iteration_bounds = array<i64: 2>, scalar_prefetch = 0 : i64, scratch_operands = 1 : i64, tpu.core_type = #tpu.core_type<tc>, window_params = [{transform_indices = @transform_0, window_bounds = array<i64: 1, 2, 2, 16, 16, 16>}, {pipeline_mode = #tpu.pipeline_mode<synchronous>, transform_indices = @transform_1, window_bounds = array<i64: 16, 128>}, {pipeline_mode = #tpu.pipeline_mode<synchronous>, transform_indices = @transform_2, window_bounds = array<i64: 1, 128>}, {pipeline_mode = #tpu.pipeline_mode<synchronous>, transform_indices = @transform_3, window_bounds = array<i64: 9, 128>}, {pipeline_mode = #tpu.pipeline_mode<synchronous>, transform_indices = @transform_4, window_bounds = array<i64: 1, 128>}, {pipeline_mode = #tpu.pipeline_mode<synchronous>, transform_indices = @transform_5, window_bounds = array<i64: 128, 128>}, {pipeline_mode = #tpu.pipeline_mode<synchronous>, transform_indices = @transform_6, window_bounds = array<i64: 1, 128>}, {transform_indices = @transform_7, window_bounds = array<i64: 1, 256, 128>}]} {
    %cst = arith.constant 0.000000e+00 : f32
    %0 = vector.broadcast %cst : f32 to vector<1x24x128xf32>
    %c0 = arith.constant 0 : index
    %c0_0 = arith.constant 0 : index
    %c0_1 = arith.constant 0 : index
    %c0_2 = arith.constant 0 : index
    %c0_3 = arith.constant 0 : index
    %1 = vector.load %arg9[%c0, %c0_0, %c0_1, %c0_2, %c0_3] : memref<2x2x17x24x128xf32, #tpu.memory_space<vmem>>, vector<1x1x1x24x128xf32>
    %2 = vector.shape_cast %1 : vector<1x1x1x24x128xf32> to vector<1x24x128xf32>
    %3 = vector.shape_cast %0 : vector<1x24x128xf32> to vector<1x1x1x24x128xf32>
    tpu.vector_store %arg9[%c0, %c0_0, %c0_1, %c0_2, %c0_3], %3 {strides = array<i32>} : memref<2x2x17x24x128xf32, #tpu.memory_space<vmem>>, vector<1x1x1x24x128xf32>,
    %cst_4 = arith.constant 0.000000e+00 : f32
    %4 = vector.broadcast %cst_4 : f32 to vector<16x1x128xf32>
    %c0_5 = arith.constant 0 : index
    %c0_6 = arith.constant 0 : index
    %c1 = arith.constant 1 : index
    %c7 = arith.constant 7 : index
    %c0_7 = arith.constant 0 : index
    %5 = vector.load %arg9[%c0_5, %c0_6, %c1, %c7, %c0_7] : memref<2x2x17x24x128xf32, #tpu.memory_space<vmem>>, vector<1x1x16x1x128xf32>
    %6 = vector.shape_cast %5 : vector<1x1x16x1x128xf32> to vector<16x1x128xf32>
    %7 = vector.shape_cast %4 : vector<16x1x128xf32> to vector<1x1x16x1x128xf32>
    tpu.vector_store %arg9[%c0_5, %c0_6, %c1, %c7, %c0_7], %7 {strides = array<i32>} : memref<2x2x17x24x128xf32, #tpu.memory_space<vmem>>, vector<1x1x16x1x128xf32>,
    %cst_8 = arith.constant 0.000000e+00 : f32
    %8 = vector.broadcast %cst_8 : f32 to vector<1x24x128xf32>
    %c0_9 = arith.constant 0 : index
    %c1_10 = arith.constant 1 : index
    %c0_11 = arith.constant 0 : index
    %c0_12 = arith.constant 0 : index
    %c0_13 = arith.constant 0 : index
    %9 = vector.load %arg9[%c0_9, %c1_10, %c0_11, %c0_12, %c0_13] : memref<2x2x17x24x128xf32, #tpu.memory_space<vmem>>, vector<1x1x1x24x128xf32>
    %10 = vector.shape_cast %9 : vector<1x1x1x24x128xf32> to vector<1x24x128xf32>
    %11 = vector.shape_cast %8 : vector<1x24x128xf32> to vector<1x1x1x24x128xf32>
    tpu.vector_store %arg9[%c0_9, %c1_10, %c0_11, %c0_12, %c0_13], %11 {strides = array<i32>} : memref<2x2x17x24x128xf32, #tpu.memory_space<vmem>>, vector<1x1x1x24x128xf32>,
    %cst_14 = arith.constant 0.000000e+00 : f32
    %12 = vector.broadcast %cst_14 : f32 to vector<16x1x128xf32>
    %c0_15 = arith.constant 0 : index
    %c1_16 = arith.constant 1 : index
    %c1_17 = arith.constant 1 : index
    %c7_18 = arith.constant 7 : index
    %c0_19 = arith.constant 0 : index
    %13 = vector.load %arg9[%c0_15, %c1_16, %c1_17, %c7_18, %c0_19] : memref<2x2x17x24x128xf32, #tpu.memory_space<vmem>>, vector<1x1x16x1x128xf32>
    %14 = vector.shape_cast %13 : vector<1x1x16x1x128xf32> to vector<16x1x128xf32>
    %15 = vector.shape_cast %12 : vector<16x1x128xf32> to vector<1x1x16x1x128xf32>
    tpu.vector_store %arg9[%c0_15, %c1_16, %c1_17, %c7_18, %c0_19], %15 {strides = array<i32>} : memref<2x2x17x24x128xf32, #tpu.memory_space<vmem>>, vector<1x1x16x1x128xf32>,
    %cst_20 = arith.constant 0.000000e+00 : f32
    %16 = vector.broadcast %cst_20 : f32 to vector<1x24x128xf32>
    %c1_21 = arith.constant 1 : index
    %c0_22 = arith.constant 0 : index
    %c0_23 = arith.constant 0 : index
    %c0_24 = arith.constant 0 : index
    %c0_25 = arith.constant 0 : index
    %17 = vector.load %arg9[%c1_21, %c0_22, %c0_23, %c0_24, %c0_25] : memref<2x2x17x24x128xf32, #tpu.memory_space<vmem>>, vector<1x1x1x24x128xf32>
    %18 = vector.shape_cast %17 : vector<1x1x1x24x128xf32> to vector<1x24x128xf32>
    %19 = vector.shape_cast %16 : vector<1x24x128xf32> to vector<1x1x1x24x128xf32>
    tpu.vector_store %arg9[%c1_21, %c0_22, %c0_23, %c0_24, %c0_25], %19 {strides = array<i32>} : memref<2x2x17x24x128xf32, #tpu.memory_space<vmem>>, vector<1x1x1x24x128xf32>,
    %cst_26 = arith.constant 0.000000e+00 : f32
    %20 = vector.broadcast %cst_26 : f32 to vector<16x1x128xf32>
    %c1_27 = arith.constant 1 : index
    %c0_28 = arith.constant 0 : index
    %c1_29 = arith.constant 1 : index
    %c7_30 = arith.constant 7 : index
    %c0_31 = arith.constant 0 : index
    %21 = vector.load %arg9[%c1_27, %c0_28, %c1_29, %c7_30, %c0_31] : memref<2x2x17x24x128xf32, #tpu.memory_space<vmem>>, vector<1x1x16x1x128xf32>
    %22 = vector.shape_cast %21 : vector<1x1x16x1x128xf32> to vector<16x1x128xf32>
    %23 = vector.shape_cast %20 : vector<16x1x128xf32> to vector<1x1x16x1x128xf32>
    tpu.vector_store %arg9[%c1_27, %c0_28, %c1_29, %c7_30, %c0_31], %23 {strides = array<i32>} : memref<2x2x17x24x128xf32, #tpu.memory_space<vmem>>, vector<1x1x16x1x128xf32>,
    %cst_32 = arith.constant 0.000000e+00 : f32
    %24 = vector.broadcast %cst_32 : f32 to vector<1x24x128xf32>
    %c1_33 = arith.constant 1 : index
    %c1_34 = arith.constant 1 : index
    %c0_35 = arith.constant 0 : index
    %c0_36 = arith.constant 0 : index
    %c0_37 = arith.constant 0 : index
    %25 = vector.load %arg9[%c1_33, %c1_34, %c0_35, %c0_36, %c0_37] : memref<2x2x17x24x128xf32, #tpu.memory_space<vmem>>, vector<1x1x1x24x128xf32>
    %26 = vector.shape_cast %25 : vector<1x1x1x24x128xf32> to vector<1x24x128xf32>
    %27 = vector.shape_cast %24 : vector<1x24x128xf32> to vector<1x1x1x24x128xf32>
    tpu.vector_store %arg9[%c1_33, %c1_34, %c0_35, %c0_36, %c0_37], %27 {strides = array<i32>} : memref<2x2x17x24x128xf32, #tpu.memory_space<vmem>>, vector<1x1x1x24x128xf32>,
    %cst_38 = arith.constant 0.000000e+00 : f32
    %28 = vector.broadcast %cst_38 : f32 to vector<16x1x128xf32>
    %c1_39 = arith.constant 1 : index
    %c1_40 = arith.constant 1 : index
    %c1_41 = arith.constant 1 : index
    %c7_42 = arith.constant 7 : index
    %c0_43 = arith.constant 0 : index
    %29 = vector.load %arg9[%c1_39, %c1_40, %c1_41, %c7_42, %c0_43] : memref<2x2x17x24x128xf32, #tpu.memory_space<vmem>>, vector<1x1x16x1x128xf32>
    %30 = vector.shape_cast %29 : vector<1x1x16x1x128xf32> to vector<16x1x128xf32>
    %31 = vector.shape_cast %28 : vector<16x1x128xf32> to vector<1x1x16x1x128xf32>
    tpu.vector_store %arg9[%c1_39, %c1_40, %c1_41, %c7_42, %c0_43], %31 {strides = array<i32>} : memref<2x2x17x24x128xf32, #tpu.memory_space<vmem>>, vector<1x1x16x1x128xf32>,
    %c0_44 = arith.constant 0 : index
    %c0_45 = arith.constant 0 : index
    %32 = vector.load %arg2[%c0_44, %c0_45] : memref<16x128xbf16, #tpu.memory_space<vmem>>, vector<16x128xbf16>
    %c0_46 = arith.constant 0 : index
    %c0_47 = arith.constant 0 : index
    %33 = vector.load %arg3[%c0_46, %c0_47] : memref<1x128xf32, #tpu.memory_space<vmem>>, vector<1x128xf32>
    %c0_48 = arith.constant 0 : index
    %c0_49 = arith.constant 0 : index
    %c0_50 = arith.constant 0 : index
    %c0_51 = arith.constant 0 : index
    %c0_52 = arith.constant 0 : index
    %c0_53 = arith.constant 0 : index
    %34 = vector.load %arg1[%c0_48, %c0_49, %c0_50, %c0_51, %c0_52, %c0_53] : memref<1x2x2x16x16x16xbf16, #tpu.memory_space<vmem>>, vector<1x2x2x16x16x16xbf16>
    %35 = vector.shape_cast %34 : vector<1x2x2x16x16x16xbf16> to vector<2x2x16x16x16xbf16>
    %36 = vector.shape_cast %35 : vector<2x2x16x16x16xbf16> to vector<1024x16xbf16>
    %cst_54 = arith.constant dense<0.000000e+00> : vector<1024x128xf32>
    %37 = tpu.matmul %36, %32, %cst_54 {dimension_numbers = #tpu.dot_dimension_numbers<[1], [0], [0], [1], [0, 0, 1, 1], [], []>} : vector<1024x16xbf16>, vector<16x128xbf16>, vector<1024x128xf32> -> vector<1024x128xf32>
    %38 = vector.broadcast %33 : vector<1x128xf32> to vector<1024x128xf32>
    %39 = arith.addf %37, %38 : vector<1024x128xf32>
    %cst_55 = arith.constant 0.000000e+00 : f32
    %40 = vector.broadcast %cst_55 : f32 to vector<1024x128xf32>
    %41 = arith.maximumf %39, %40 : vector<1024x128xf32>
    %42 = vector.shape_cast %41 : vector<1024x128xf32> to vector<2x2x16x16x128xf32>
    %43 = vector.extract_strided_slice %42 {offsets = [0, 0, 0, 0, 0], sizes = [1, 1, 16, 16, 128], strides = [1, 1, 1, 1, 1]} : vector<2x2x16x16x128xf32> to vector<1x1x16x16x128xf32>
    %44 = vector.shape_cast %43 : vector<1x1x16x16x128xf32> to vector<16x16x128xf32>
    %c0_56 = arith.constant 0 : index
    %c0_57 = arith.constant 0 : index
    %c1_58 = arith.constant 1 : index
    %c8 = arith.constant 8 : index
    %c0_59 = arith.constant 0 : index
    %45 = vector.load %arg9[%c0_56, %c0_57, %c1_58, %c8, %c0_59] : memref<2x2x17x24x128xf32, #tpu.memory_space<vmem>>, vector<1x1x16x16x128xf32>
    %46 = vector.shape_cast %45 : vector<1x1x16x16x128xf32> to vector<16x16x128xf32>
    %47 = vector.shape_cast %44 : vector<16x16x128xf32> to vector<1x1x16x16x128xf32>
    tpu.vector_store %arg9[%c0_56, %c0_57, %c1_58, %c8, %c0_59], %47 {strides = array<i32>} : memref<2x2x17x24x128xf32, #tpu.memory_space<vmem>>, vector<1x1x16x16x128xf32>,
    %48 = vector.extract_strided_slice %42 {offsets = [0, 1, 0, 0, 0], sizes = [1, 1, 16, 16, 128], strides = [1, 1, 1, 1, 1]} : vector<2x2x16x16x128xf32> to vector<1x1x16x16x128xf32>
    %49 = vector.shape_cast %48 : vector<1x1x16x16x128xf32> to vector<16x16x128xf32>
    %c0_60 = arith.constant 0 : index
    %c1_61 = arith.constant 1 : index
    %c1_62 = arith.constant 1 : index
    %c8_63 = arith.constant 8 : index
    %c0_64 = arith.constant 0 : index
    %50 = vector.load %arg9[%c0_60, %c1_61, %c1_62, %c8_63, %c0_64] : memref<2x2x17x24x128xf32, #tpu.memory_space<vmem>>, vector<1x1x16x16x128xf32>
    %51 = vector.shape_cast %50 : vector<1x1x16x16x128xf32> to vector<16x16x128xf32>
    %52 = vector.shape_cast %49 : vector<16x16x128xf32> to vector<1x1x16x16x128xf32>
    tpu.vector_store %arg9[%c0_60, %c1_61, %c1_62, %c8_63, %c0_64], %52 {strides = array<i32>} : memref<2x2x17x24x128xf32, #tpu.memory_space<vmem>>, vector<1x1x16x16x128xf32>,
    %53 = vector.extract_strided_slice %42 {offsets = [1, 0, 0, 0, 0], sizes = [1, 1, 16, 16, 128], strides = [1, 1, 1, 1, 1]} : vector<2x2x16x16x128xf32> to vector<1x1x16x16x128xf32>
    %54 = vector.shape_cast %53 : vector<1x1x16x16x128xf32> to vector<16x16x128xf32>
    %c1_65 = arith.constant 1 : index
    %c0_66 = arith.constant 0 : index
    %c1_67 = arith.constant 1 : index
    %c8_68 = arith.constant 8 : index
    %c0_69 = arith.constant 0 : index
    %55 = vector.load %arg9[%c1_65, %c0_66, %c1_67, %c8_68, %c0_69] : memref<2x2x17x24x128xf32, #tpu.memory_space<vmem>>, vector<1x1x16x16x128xf32>
    %56 = vector.shape_cast %55 : vector<1x1x16x16x128xf32> to vector<16x16x128xf32>
    %57 = vector.shape_cast %54 : vector<16x16x128xf32> to vector<1x1x16x16x128xf32>
    tpu.vector_store %arg9[%c1_65, %c0_66, %c1_67, %c8_68, %c0_69], %57 {strides = array<i32>} : memref<2x2x17x24x128xf32, #tpu.memory_space<vmem>>, vector<1x1x16x16x128xf32>,
    %58 = vector.extract_strided_slice %42 {offsets = [1, 1, 0, 0, 0], sizes = [1, 1, 16, 16, 128], strides = [1, 1, 1, 1, 1]} : vector<2x2x16x16x128xf32> to vector<1x1x16x16x128xf32>
    %59 = vector.shape_cast %58 : vector<1x1x16x16x128xf32> to vector<16x16x128xf32>
    %c1_70 = arith.constant 1 : index
    %c1_71 = arith.constant 1 : index
    %c1_72 = arith.constant 1 : index
    %c8_73 = arith.constant 8 : index
    %c0_74 = arith.constant 0 : index
    %60 = vector.load %arg9[%c1_70, %c1_71, %c1_72, %c8_73, %c0_74] : memref<2x2x17x24x128xf32, #tpu.memory_space<vmem>>, vector<1x1x16x16x128xf32>
    %61 = vector.shape_cast %60 : vector<1x1x16x16x128xf32> to vector<16x16x128xf32>
    %62 = vector.shape_cast %59 : vector<16x16x128xf32> to vector<1x1x16x16x128xf32>
    tpu.vector_store %arg9[%c1_70, %c1_71, %c1_72, %c8_73, %c0_74], %62 {strides = array<i32>} : memref<2x2x17x24x128xf32, #tpu.memory_space<vmem>>, vector<1x1x16x16x128xf32>,
    %cst_75 = arith.constant 0.000000e+00 : f32
    %63 = vector.broadcast %cst_75 : f32 to vector<16x16x128xf32>
    %c1_76 = arith.constant 1 : index
    %c0_77 = arith.constant 0 : index
    %c0_78 = arith.constant 0 : index
    %c0_79 = arith.constant 0 : index
    %c0_80 = arith.constant 0 : index
    %64 = vector.load %arg9[%c1_76, %c0_77, %c0_78, %c0_79, %c0_80] : memref<2x2x17x24x128xf32, #tpu.memory_space<vmem>>, vector<1x1x16x24x128xf32>
    %65 = vector.shape_cast %64 : vector<1x1x16x24x128xf32> to vector<16x24x128xf32>
    %66 = vector.extract_strided_slice %65 {offsets = [0, 8, 0], sizes = [16, 16, 128], strides = [1, 1, 1]} : vector<16x24x128xf32> to vector<16x16x128xf32>
    %c1_81 = arith.constant 1 : index
    %c0_82 = arith.constant 0 : index
    %67 = vector.load %arg4[%c1_81, %c0_82] : memref<9x128xf32, #tpu.memory_space<vmem>>, vector<1x128xf32>
    %68 = vector.shape_cast %67 : vector<1x128xf32> to vector<1x1x128xf32>
    %69 = vector.broadcast %68 : vector<1x1x128xf32> to vector<16x16x128xf32>
    %70 = arith.mulf %66, %69 : vector<16x16x128xf32>
    %71 = arith.addf %63, %70 : vector<16x16x128xf32>
    %c1_83 = arith.constant 1 : index
    %c1_84 = arith.constant 1 : index
    %c0_85 = arith.constant 0 : index
    %c0_86 = arith.constant 0 : index
    %c0_87 = arith.constant 0 : index
    %72 = vector.load %arg9[%c1_83, %c1_84, %c0_85, %c0_86, %c0_87] : memref<2x2x17x24x128xf32, #tpu.memory_space<vmem>>, vector<1x1x16x24x128xf32>
    %73 = vector.shape_cast %72 : vector<1x1x16x24x128xf32> to vector<16x24x128xf32>
    %74 = vector.extract_strided_slice %73 {offsets = [0, 7, 0], sizes = [16, 16, 128], strides = [1, 1, 1]} : vector<16x24x128xf32> to vector<16x16x128xf32>
    %c0_88 = arith.constant 0 : index
    %c0_89 = arith.constant 0 : index
    %75 = vector.load %arg4[%c0_88, %c0_89] : memref<9x128xf32, #tpu.memory_space<vmem>>, vector<1x128xf32>
    %76 = vector.shape_cast %75 : vector<1x128xf32> to vector<1x1x128xf32>
    %77 = vector.broadcast %76 : vector<1x1x128xf32> to vector<16x16x128xf32>
    %78 = arith.mulf %74, %77 : vector<16x16x128xf32>
    %79 = arith.addf %71, %78 : vector<16x16x128xf32>
    %80 = vector.extract_strided_slice %73 {offsets = [0, 8, 0], sizes = [16, 16, 128], strides = [1, 1, 1]} : vector<16x24x128xf32> to vector<16x16x128xf32>
    %c2 = arith.constant 2 : index
    %c0_90 = arith.constant 0 : index
    %81 = vector.load %arg4[%c2, %c0_90] : memref<9x128xf32, #tpu.memory_space<vmem>>, vector<1x128xf32>
    %82 = vector.shape_cast %81 : vector<1x128xf32> to vector<1x1x128xf32>
    %83 = vector.broadcast %82 : vector<1x1x128xf32> to vector<16x16x128xf32>
    %84 = arith.mulf %80, %83 : vector<16x16x128xf32>
    %85 = arith.addf %79, %84 : vector<16x16x128xf32>
    %c0_91 = arith.constant 0 : index
    %c0_92 = arith.constant 0 : index
    %c1_93 = arith.constant 1 : index
    %c0_94 = arith.constant 0 : index
    %c0_95 = arith.constant 0 : index
    %86 = vector.load %arg9[%c0_91, %c0_92, %c1_93, %c0_94, %c0_95] : memref<2x2x17x24x128xf32, #tpu.memory_space<vmem>>, vector<1x1x16x24x128xf32>
    %87 = vector.shape_cast %86 : vector<1x1x16x24x128xf32> to vector<16x24x128xf32>
    %88 = vector.extract_strided_slice %87 {offsets = [0, 8, 0], sizes = [16, 16, 128], strides = [1, 1, 1]} : vector<16x24x128xf32> to vector<16x16x128xf32>
    %c4 = arith.constant 4 : index
    %c0_96 = arith.constant 0 : index
    %89 = vector.load %arg4[%c4, %c0_96] : memref<9x128xf32, #tpu.memory_space<vmem>>, vector<1x128xf32>
    %90 = vector.shape_cast %89 : vector<1x128xf32> to vector<1x1x128xf32>
    %91 = vector.broadcast %90 : vector<1x1x128xf32> to vector<16x16x128xf32>
    %92 = arith.mulf %88, %91 : vector<16x16x128xf32>
    %93 = arith.addf %85, %92 : vector<16x16x128xf32>
    %c0_97 = arith.constant 0 : index
    %c1_98 = arith.constant 1 : index
    %c1_99 = arith.constant 1 : index
    %c0_100 = arith.constant 0 : index
    %c0_101 = arith.constant 0 : index
    %94 = vector.load %arg9[%c0_97, %c1_98, %c1_99, %c0_100, %c0_101] : memref<2x2x17x24x128xf32, #tpu.memory_space<vmem>>, vector<1x1x16x24x128xf32>
    %95 = vector.shape_cast %94 : vector<1x1x16x24x128xf32> to vector<16x24x128xf32>
    %96 = vector.extract_strided_slice %95 {offsets = [0, 7, 0], sizes = [16, 16, 128], strides = [1, 1, 1]} : vector<16x24x128xf32> to vector<16x16x128xf32>
    %c3 = arith.constant 3 : index
    %c0_102 = arith.constant 0 : index
    %97 = vector.load %arg4[%c3, %c0_102] : memref<9x128xf32, #tpu.memory_space<vmem>>, vector<1x128xf32>
    %98 = vector.shape_cast %97 : vector<1x128xf32> to vector<1x1x128xf32>
    %99 = vector.broadcast %98 : vector<1x1x128xf32> to vector<16x16x128xf32>
    %100 = arith.mulf %96, %99 : vector<16x16x128xf32>
    %101 = arith.addf %93, %100 : vector<16x16x128xf32>
    %102 = vector.extract_strided_slice %95 {offsets = [0, 8, 0], sizes = [16, 16, 128], strides = [1, 1, 1]} : vector<16x24x128xf32> to vector<16x16x128xf32>
    %c5 = arith.constant 5 : index
    %c0_103 = arith.constant 0 : index
    %103 = vector.load %arg4[%c5, %c0_103] : memref<9x128xf32, #tpu.memory_space<vmem>>, vector<1x128xf32>
    %104 = vector.shape_cast %103 : vector<1x128xf32> to vector<1x1x128xf32>
    %105 = vector.broadcast %104 : vector<1x1x128xf32> to vector<16x16x128xf32>
    %106 = arith.mulf %102, %105 : vector<16x16x128xf32>
    %107 = arith.addf %101, %106 : vector<16x16x128xf32>
    %c1_104 = arith.constant 1 : index
    %c0_105 = arith.constant 0 : index
    %c1_106 = arith.constant 1 : index
    %c0_107 = arith.constant 0 : index
    %c0_108 = arith.constant 0 : index
    %108 = vector.load %arg9[%c1_104, %c0_105, %c1_106, %c0_107, %c0_108] : memref<2x2x17x24x128xf32, #tpu.memory_space<vmem>>, vector<1x1x16x24x128xf32>
    %109 = vector.shape_cast %108 : vector<1x1x16x24x128xf32> to vector<16x24x128xf32>
    %110 = vector.extract_strided_slice %109 {offsets = [0, 8, 0], sizes = [16, 16, 128], strides = [1, 1, 1]} : vector<16x24x128xf32> to vector<16x16x128xf32>
    %c7_109 = arith.constant 7 : index
    %c0_110 = arith.constant 0 : index
    %111 = vector.load %arg4[%c7_109, %c0_110] : memref<9x128xf32, #tpu.memory_space<vmem>>, vector<1x128xf32>
    %112 = vector.shape_cast %111 : vector<1x128xf32> to vector<1x1x128xf32>
    %113 = vector.broadcast %112 : vector<1x1x128xf32> to vector<16x16x128xf32>
    %114 = arith.mulf %110, %113 : vector<16x16x128xf32>
    %115 = arith.addf %107, %114 : vector<16x16x128xf32>
    %c1_111 = arith.constant 1 : index
    %c1_112 = arith.constant 1 : index
    %c1_113 = arith.constant 1 : index
    %c0_114 = arith.constant 0 : index
    %c0_115 = arith.constant 0 : index
    %116 = vector.load %arg9[%c1_111, %c1_112, %c1_113, %c0_114, %c0_115] : memref<2x2x17x24x128xf32, #tpu.memory_space<vmem>>, vector<1x1x16x24x128xf32>
    %117 = vector.shape_cast %116 : vector<1x1x16x24x128xf32> to vector<16x24x128xf32>
    %118 = vector.extract_strided_slice %117 {offsets = [0, 7, 0], sizes = [16, 16, 128], strides = [1, 1, 1]} : vector<16x24x128xf32> to vector<16x16x128xf32>
    %c6 = arith.constant 6 : index
    %c0_116 = arith.constant 0 : index
    %119 = vector.load %arg4[%c6, %c0_116] : memref<9x128xf32, #tpu.memory_space<vmem>>, vector<1x128xf32>
    %120 = vector.shape_cast %119 : vector<1x128xf32> to vector<1x1x128xf32>
    %121 = vector.broadcast %120 : vector<1x1x128xf32> to vector<16x16x128xf32>
    %122 = arith.mulf %118, %121 : vector<16x16x128xf32>
    %123 = arith.addf %115, %122 : vector<16x16x128xf32>
    %124 = vector.extract_strided_slice %117 {offsets = [0, 8, 0], sizes = [16, 16, 128], strides = [1, 1, 1]} : vector<16x24x128xf32> to vector<16x16x128xf32>
    %c8_117 = arith.constant 8 : index
    %c0_118 = arith.constant 0 : index
    %125 = vector.load %arg4[%c8_117, %c0_118] : memref<9x128xf32, #tpu.memory_space<vmem>>, vector<1x128xf32>
    %126 = vector.shape_cast %125 : vector<1x128xf32> to vector<1x1x128xf32>
    %127 = vector.broadcast %126 : vector<1x1x128xf32> to vector<16x16x128xf32>
    %128 = arith.mulf %124, %127 : vector<16x16x128xf32>
    %129 = arith.addf %123, %128 : vector<16x16x128xf32>
    %c0_119 = arith.constant 0 : index
    %c0_120 = arith.constant 0 : index
    %130 = vector.load %arg5[%c0_119, %c0_120] : memref<1x128xf32, #tpu.memory_space<vmem>>, vector<1x128xf32>
    %131 = vector.shape_cast %130 : vector<1x128xf32> to vector<1x1x128xf32>
    %132 = vector.broadcast %131 : vector<1x1x128xf32> to vector<16x16x128xf32>
    %133 = arith.addf %129, %132 : vector<16x16x128xf32>
    %cst_121 = arith.constant 0.000000e+00 : f32
    %134 = vector.broadcast %cst_121 : f32 to vector<16x16x128xf32>
    %135 = arith.maximumf %133, %134 : vector<16x16x128xf32>
    %136 = vector.shape_cast %135 : vector<16x16x128xf32> to vector<256x128xf32>
    %137 = arith.truncf %136 : vector<256x128xf32> to vector<256x128xbf16>
    %c0_122 = arith.constant 0 : index
    %c0_123 = arith.constant 0 : index
    %138 = vector.load %arg6[%c0_122, %c0_123] : memref<128x128xbf16, #tpu.memory_space<vmem>>, vector<128x128xbf16>
    %cst_124 = arith.constant dense<0.000000e+00> : vector<256x128xf32>
    %139 = tpu.matmul %137, %138, %cst_124 {dimension_numbers = #tpu.dot_dimension_numbers<[1], [0], [0], [1], [0, 0, 1, 1], [], []>} : vector<256x128xbf16>, vector<128x128xbf16>, vector<256x128xf32> -> vector<256x128xf32>
    %c0_125 = arith.constant 0 : index
    %c0_126 = arith.constant 0 : index
    %140 = vector.load %arg7[%c0_125, %c0_126] : memref<1x128xf32, #tpu.memory_space<vmem>>, vector<1x128xf32>
    %141 = vector.broadcast %140 : vector<1x128xf32> to vector<256x128xf32>
    %142 = arith.addf %139, %141 : vector<256x128xf32>
    %143 = vector.shape_cast %142 : vector<256x128xf32> to vector<1x256x128xf32>
    %144 = arith.truncf %143 : vector<1x256x128xf32> to vector<1x256x128xbf16>
    %c0_127 = arith.constant 0 : index
    %c0_128 = arith.constant 0 : index
    %c0_129 = arith.constant 0 : index
    %145 = vector.load %arg8[%c0_127, %c0_128, %c0_129] : memref<1x256x128xbf16, #tpu.memory_space<vmem>>, vector<1x256x128xbf16>
    tpu.vector_store %arg8[%c0_127, %c0_128, %c0_129], %144 {strides = array<i32>} : memref<1x256x128xbf16, #tpu.memory_space<vmem>>, vector<1x256x128xbf16>,
    return
  }
  func.func @transform_0(%arg0: i32) -> (i32, i32, i32, i32, i32, i32) {
    %c0_i32 = arith.constant 0 : i32
    %c0_i32_0 = arith.constant 0 : i32
    %c0_i32_1 = arith.constant 0 : i32
    %c0_i32_2 = arith.constant 0 : i32
    %c0_i32_3 = arith.constant 0 : i32
    %c0_i32_4 = arith.constant 0 : i32
    return %arg0, %c0_i32, %c0_i32_0, %c0_i32_1, %c0_i32_2, %c0_i32_3 : i32, i32, i32, i32, i32, i32
  }
  func.func @transform_1(%arg0: i32) -> (i32, i32) {
    %c0_i32 = arith.constant 0 : i32
    %c0_i32_0 = arith.constant 0 : i32
    %c0_i32_1 = arith.constant 0 : i32
    return %c0_i32, %c0_i32_0 : i32, i32
  }
  func.func @transform_2(%arg0: i32) -> (i32, i32) {
    %c0_i32 = arith.constant 0 : i32
    %c0_i32_0 = arith.constant 0 : i32
    %c0_i32_1 = arith.constant 0 : i32
    return %c0_i32, %c0_i32_0 : i32, i32
  }
  func.func @transform_3(%arg0: i32) -> (i32, i32) {
    %c0_i32 = arith.constant 0 : i32
    %c0_i32_0 = arith.constant 0 : i32
    %c0_i32_1 = arith.constant 0 : i32
    return %c0_i32, %c0_i32_0 : i32, i32
  }
  func.func @transform_4(%arg0: i32) -> (i32, i32) {
    %c0_i32 = arith.constant 0 : i32
    %c0_i32_0 = arith.constant 0 : i32
    %c0_i32_1 = arith.constant 0 : i32
    return %c0_i32, %c0_i32_0 : i32, i32
  }
  func.func @transform_5(%arg0: i32) -> (i32, i32) {
    %c0_i32 = arith.constant 0 : i32
    %c0_i32_0 = arith.constant 0 : i32
    %c0_i32_1 = arith.constant 0 : i32
    return %c0_i32, %c0_i32_0 : i32, i32
  }
  func.func @transform_6(%arg0: i32) -> (i32, i32) {
    %c0_i32 = arith.constant 0 : i32
    %c0_i32_0 = arith.constant 0 : i32
    %c0_i32_1 = arith.constant 0 : i32
    return %c0_i32, %c0_i32_0 : i32, i32
  }
  func.func @transform_7(%arg0: i32) -> (i32, i32, i32) {
    %c0_i32 = arith.constant 0 : i32
    %c0_i32_0 = arith.constant 0 : i32
    %c0_i32_1 = arith.constant 0 : i32
    return %arg0, %c0_i32, %c0_i32_0 : i32, i32, i32
  }
}

module attributes {stable_mosaic.version = 11 : i64} {
  func.func @kernel(%arg0: i32, %arg1: memref<1x2x2x16x16x16xbf16, #tpu.memory_space<vmem>>, %arg2: memref<16x128xbf16, #tpu.memory_space<vmem>>, %arg3: memref<1x128xf32, #tpu.memory_space<vmem>>, %arg4: memref<9x128xf32, #tpu.memory_space<vmem>>, %arg5: memref<1x128xf32, #tpu.memory_space<vmem>>, %arg6: memref<128x128xbf16, #tpu.memory_space<vmem>>, %arg7: memref<1x128xf32, #tpu.memory_space<vmem>>, %arg8: memref<1x256x128xbf16, #tpu.memory_space<vmem>>, %arg9: memref<2x2x17x24x128xf32, #tpu.memory_space<vmem>>) attributes {dimension_semantics = [#tpu.dimension_semantics<parallel>], iteration_bounds = array<i64: 2>, scalar_prefetch = 0 : i64, scratch_operands = 1 : i64, tpu.core_type = #tpu.core_type<tc>, window_params = [{transform_indices = @transform_0, window_bounds = array<i64: 1, 2, 2, 16, 16, 16>}, {pipeline_mode = #tpu.pipeline_mode<synchronous>, transform_indices = @transform_1, window_bounds = array<i64: 16, 128>}, {pipeline_mode = #tpu.pipeline_mode<synchronous>, transform_indices = @transform_2, window_bounds = array<i64: 1, 128>}, {pipeline_mode = #tpu.pipeline_mode<synchronous>, transform_indices = @transform_3, window_bounds = array<i64: 9, 128>}, {pipeline_mode = #tpu.pipeline_mode<synchronous>, transform_indices = @transform_4, window_bounds = array<i64: 1, 128>}, {pipeline_mode = #tpu.pipeline_mode<synchronous>, transform_indices = @transform_5, window_bounds = array<i64: 128, 128>}, {pipeline_mode = #tpu.pipeline_mode<synchronous>, transform_indices = @transform_6, window_bounds = array<i64: 1, 128>}, {transform_indices = @transform_7, window_bounds = array<i64: 1, 256, 128>}]} {
    %cst = arith.constant 0.000000e+00 : f32
    %0 = vector.broadcast %cst : f32 to vector<1x24x128xf32>
    %c0 = arith.constant 0 : index
    %c0_0 = arith.constant 0 : index
    %c0_1 = arith.constant 0 : index
    %c0_2 = arith.constant 0 : index
    %c0_3 = arith.constant 0 : index
    %1 = vector.load %arg9[%c0, %c0_0, %c0_1, %c0_2, %c0_3] : memref<2x2x17x24x128xf32, #tpu.memory_space<vmem>>, vector<1x1x1x24x128xf32>
    %2 = vector.shape_cast %1 : vector<1x1x1x24x128xf32> to vector<1x24x128xf32>
    %3 = vector.shape_cast %0 : vector<1x24x128xf32> to vector<1x1x1x24x128xf32>
    tpu.vector_store %arg9[%c0, %c0_0, %c0_1, %c0_2, %c0_3], %3 {strides = array<i32>} : memref<2x2x17x24x128xf32, #tpu.memory_space<vmem>>, vector<1x1x1x24x128xf32>,
    %cst_4 = arith.constant 0.000000e+00 : f32
    %4 = vector.broadcast %cst_4 : f32 to vector<16x1x128xf32>
    %c0_5 = arith.constant 0 : index
    %c0_6 = arith.constant 0 : index
    %c1 = arith.constant 1 : index
    %c7 = arith.constant 7 : index
    %c0_7 = arith.constant 0 : index
    %5 = vector.load %arg9[%c0_5, %c0_6, %c1, %c7, %c0_7] : memref<2x2x17x24x128xf32, #tpu.memory_space<vmem>>, vector<1x1x16x1x128xf32>
    %6 = vector.shape_cast %5 : vector<1x1x16x1x128xf32> to vector<16x1x128xf32>
    %7 = vector.shape_cast %4 : vector<16x1x128xf32> to vector<1x1x16x1x128xf32>
    tpu.vector_store %arg9[%c0_5, %c0_6, %c1, %c7, %c0_7], %7 {strides = array<i32>} : memref<2x2x17x24x128xf32, #tpu.memory_space<vmem>>, vector<1x1x16x1x128xf32>,
    %cst_8 = arith.constant 0.000000e+00 : f32
    %8 = vector.broadcast %cst_8 : f32 to vector<1x24x128xf32>
    %c0_9 = arith.constant 0 : index
    %c1_10 = arith.constant 1 : index
    %c0_11 = arith.constant 0 : index
    %c0_12 = arith.constant 0 : index
    %c0_13 = arith.constant 0 : index
    %9 = vector.load %arg9[%c0_9, %c1_10, %c0_11, %c0_12, %c0_13] : memref<2x2x17x24x128xf32, #tpu.memory_space<vmem>>, vector<1x1x1x24x128xf32>
    %10 = vector.shape_cast %9 : vector<1x1x1x24x128xf32> to vector<1x24x128xf32>
    %11 = vector.shape_cast %8 : vector<1x24x128xf32> to vector<1x1x1x24x128xf32>
    tpu.vector_store %arg9[%c0_9, %c1_10, %c0_11, %c0_12, %c0_13], %11 {strides = array<i32>} : memref<2x2x17x24x128xf32, #tpu.memory_space<vmem>>, vector<1x1x1x24x128xf32>,
    %cst_14 = arith.constant 0.000000e+00 : f32
    %12 = vector.broadcast %cst_14 : f32 to vector<16x1x128xf32>
    %c0_15 = arith.constant 0 : index
    %c1_16 = arith.constant 1 : index
    %c1_17 = arith.constant 1 : index
    %c7_18 = arith.constant 7 : index
    %c0_19 = arith.constant 0 : index
    %13 = vector.load %arg9[%c0_15, %c1_16, %c1_17, %c7_18, %c0_19] : memref<2x2x17x24x128xf32, #tpu.memory_space<vmem>>, vector<1x1x16x1x128xf32>
    %14 = vector.shape_cast %13 : vector<1x1x16x1x128xf32> to vector<16x1x128xf32>
    %15 = vector.shape_cast %12 : vector<16x1x128xf32> to vector<1x1x16x1x128xf32>
    tpu.vector_store %arg9[%c0_15, %c1_16, %c1_17, %c7_18, %c0_19], %15 {strides = array<i32>} : memref<2x2x17x24x128xf32, #tpu.memory_space<vmem>>, vector<1x1x16x1x128xf32>,
    %cst_20 = arith.constant 0.000000e+00 : f32
    %16 = vector.broadcast %cst_20 : f32 to vector<1x24x128xf32>
    %c1_21 = arith.constant 1 : index
    %c0_22 = arith.constant 0 : index
    %c0_23 = arith.constant 0 : index
    %c0_24 = arith.constant 0 : index
    %c0_25 = arith.constant 0 : index
    %17 = vector.load %arg9[%c1_21, %c0_22, %c0_23, %c0_24, %c0_25] : memref<2x2x17x24x128xf32, #tpu.memory_space<vmem>>, vector<1x1x1x24x128xf32>
    %18 = vector.shape_cast %17 : vector<1x1x1x24x128xf32> to vector<1x24x128xf32>
    %19 = vector.shape_cast %16 : vector<1x24x128xf32> to vector<1x1x1x24x128xf32>
    tpu.vector_store %arg9[%c1_21, %c0_22, %c0_23, %c0_24, %c0_25], %19 {strides = array<i32>} : memref<2x2x17x24x128xf32, #tpu.memory_space<vmem>>, vector<1x1x1x24x128xf32>,
    %cst_26 = arith.constant 0.000000e+00 : f32
    %20 = vector.broadcast %cst_26 : f32 to vector<16x1x128xf32>
    %c1_27 = arith.constant 1 : index
    %c0_28 = arith.constant 0 : index
    %c1_29 = arith.constant 1 : index
    %c7_30 = arith.constant 7 : index
    %c0_31 = arith.constant 0 : index
    %21 = vector.load %arg9[%c1_27, %c0_28, %c1_29, %c7_30, %c0_31] : memref<2x2x17x24x128xf32, #tpu.memory_space<vmem>>, vector<1x1x16x1x128xf32>
    %22 = vector.shape_cast %21 : vector<1x1x16x1x128xf32> to vector<16x1x128xf32>
    %23 = vector.shape_cast %20 : vector<16x1x128xf32> to vector<1x1x16x1x128xf32>
    tpu.vector_store %arg9[%c1_27, %c0_28, %c1_29, %c7_30, %c0_31], %23 {strides = array<i32>} : memref<2x2x17x24x128xf32, #tpu.memory_space<vmem>>, vector<1x1x16x1x128xf32>,
    %cst_32 = arith.constant 0.000000e+00 : f32
    %24 = vector.broadcast %cst_32 : f32 to vector<1x24x128xf32>
    %c1_33 = arith.constant 1 : index
    %c1_34 = arith.constant 1 : index
    %c0_35 = arith.constant 0 : index
    %c0_36 = arith.constant 0 : index
    %c0_37 = arith.constant 0 : index
    %25 = vector.load %arg9[%c1_33, %c1_34, %c0_35, %c0_36, %c0_37] : memref<2x2x17x24x128xf32, #tpu.memory_space<vmem>>, vector<1x1x1x24x128xf32>
    %26 = vector.shape_cast %25 : vector<1x1x1x24x128xf32> to vector<1x24x128xf32>
    %27 = vector.shape_cast %24 : vector<1x24x128xf32> to vector<1x1x1x24x128xf32>
    tpu.vector_store %arg9[%c1_33, %c1_34, %c0_35, %c0_36, %c0_37], %27 {strides = array<i32>} : memref<2x2x17x24x128xf32, #tpu.memory_space<vmem>>, vector<1x1x1x24x128xf32>,
    %cst_38 = arith.constant 0.000000e+00 : f32
    %28 = vector.broadcast %cst_38 : f32 to vector<16x1x128xf32>
    %c1_39 = arith.constant 1 : index
    %c1_40 = arith.constant 1 : index
    %c1_41 = arith.constant 1 : index
    %c7_42 = arith.constant 7 : index
    %c0_43 = arith.constant 0 : index
    %29 = vector.load %arg9[%c1_39, %c1_40, %c1_41, %c7_42, %c0_43] : memref<2x2x17x24x128xf32, #tpu.memory_space<vmem>>, vector<1x1x16x1x128xf32>
    %30 = vector.shape_cast %29 : vector<1x1x16x1x128xf32> to vector<16x1x128xf32>
    %31 = vector.shape_cast %28 : vector<16x1x128xf32> to vector<1x1x16x1x128xf32>
    tpu.vector_store %arg9[%c1_39, %c1_40, %c1_41, %c7_42, %c0_43], %31 {strides = array<i32>} : memref<2x2x17x24x128xf32, #tpu.memory_space<vmem>>, vector<1x1x16x1x128xf32>,
    %c0_44 = arith.constant 0 : index
    %c0_45 = arith.constant 0 : index
    %32 = vector.load %arg2[%c0_44, %c0_45] : memref<16x128xbf16, #tpu.memory_space<vmem>>, vector<16x128xbf16>
    %c0_46 = arith.constant 0 : index
    %c0_47 = arith.constant 0 : index
    %33 = vector.load %arg3[%c0_46, %c0_47] : memref<1x128xf32, #tpu.memory_space<vmem>>, vector<1x128xf32>
    %c0_48 = arith.constant 0 : index
    %c0_49 = arith.constant 0 : index
    %c0_50 = arith.constant 0 : index
    %c0_51 = arith.constant 0 : index
    %c0_52 = arith.constant 0 : index
    %c0_53 = arith.constant 0 : index
    %34 = vector.load %arg1[%c0_48, %c0_49, %c0_50, %c0_51, %c0_52, %c0_53] : memref<1x2x2x16x16x16xbf16, #tpu.memory_space<vmem>>, vector<1x2x2x16x16x16xbf16>
    %35 = vector.shape_cast %34 : vector<1x2x2x16x16x16xbf16> to vector<2x2x16x16x16xbf16>
    %36 = vector.shape_cast %35 : vector<2x2x16x16x16xbf16> to vector<1024x16xbf16>
    %cst_54 = arith.constant dense<0.000000e+00> : vector<1024x128xf32>
    %37 = tpu.matmul %36, %32, %cst_54 {dimension_numbers = #tpu.dot_dimension_numbers<[1], [0], [0], [1], [0, 0, 1, 1], [], []>} : vector<1024x16xbf16>, vector<16x128xbf16>, vector<1024x128xf32> -> vector<1024x128xf32>
    %38 = vector.broadcast %33 : vector<1x128xf32> to vector<1024x128xf32>
    %39 = arith.addf %37, %38 : vector<1024x128xf32>
    %cst_55 = arith.constant 0.000000e+00 : f32
    %40 = vector.broadcast %cst_55 : f32 to vector<1024x128xf32>
    %41 = arith.maximumf %39, %40 : vector<1024x128xf32>
    %42 = vector.shape_cast %41 : vector<1024x128xf32> to vector<2x2x16x16x128xf32>
    %43 = vector.extract_strided_slice %42 {offsets = [0, 0, 0, 0, 0], sizes = [1, 1, 16, 16, 128], strides = [1, 1, 1, 1, 1]} : vector<2x2x16x16x128xf32> to vector<1x1x16x16x128xf32>
    %44 = vector.shape_cast %43 : vector<1x1x16x16x128xf32> to vector<16x16x128xf32>
    %c0_56 = arith.constant 0 : index
    %c0_57 = arith.constant 0 : index
    %c1_58 = arith.constant 1 : index
    %c8 = arith.constant 8 : index
    %c0_59 = arith.constant 0 : index
    %45 = vector.load %arg9[%c0_56, %c0_57, %c1_58, %c8, %c0_59] : memref<2x2x17x24x128xf32, #tpu.memory_space<vmem>>, vector<1x1x16x16x128xf32>
    %46 = vector.shape_cast %45 : vector<1x1x16x16x128xf32> to vector<16x16x128xf32>
    %47 = vector.shape_cast %44 : vector<16x16x128xf32> to vector<1x1x16x16x128xf32>
    tpu.vector_store %arg9[%c0_56, %c0_57, %c1_58, %c8, %c0_59], %47 {strides = array<i32>} : memref<2x2x17x24x128xf32, #tpu.memory_space<vmem>>, vector<1x1x16x16x128xf32>,
    %48 = vector.extract_strided_slice %42 {offsets = [0, 1, 0, 0, 0], sizes = [1, 1, 16, 16, 128], strides = [1, 1, 1, 1, 1]} : vector<2x2x16x16x128xf32> to vector<1x1x16x16x128xf32>
    %49 = vector.shape_cast %48 : vector<1x1x16x16x128xf32> to vector<16x16x128xf32>
    %c0_60 = arith.constant 0 : index
    %c1_61 = arith.constant 1 : index
    %c1_62 = arith.constant 1 : index
    %c8_63 = arith.constant 8 : index
    %c0_64 = arith.constant 0 : index
    %50 = vector.load %arg9[%c0_60, %c1_61, %c1_62, %c8_63, %c0_64] : memref<2x2x17x24x128xf32, #tpu.memory_space<vmem>>, vector<1x1x16x16x128xf32>
    %51 = vector.shape_cast %50 : vector<1x1x16x16x128xf32> to vector<16x16x128xf32>
    %52 = vector.shape_cast %49 : vector<16x16x128xf32> to vector<1x1x16x16x128xf32>
    tpu.vector_store %arg9[%c0_60, %c1_61, %c1_62, %c8_63, %c0_64], %52 {strides = array<i32>} : memref<2x2x17x24x128xf32, #tpu.memory_space<vmem>>, vector<1x1x16x16x128xf32>,
    %53 = vector.extract_strided_slice %42 {offsets = [1, 0, 0, 0, 0], sizes = [1, 1, 16, 16, 128], strides = [1, 1, 1, 1, 1]} : vector<2x2x16x16x128xf32> to vector<1x1x16x16x128xf32>
    %54 = vector.shape_cast %53 : vector<1x1x16x16x128xf32> to vector<16x16x128xf32>
    %c1_65 = arith.constant 1 : index
    %c0_66 = arith.constant 0 : index
    %c1_67 = arith.constant 1 : index
    %c8_68 = arith.constant 8 : index
    %c0_69 = arith.constant 0 : index
    %55 = vector.load %arg9[%c1_65, %c0_66, %c1_67, %c8_68, %c0_69] : memref<2x2x17x24x128xf32, #tpu.memory_space<vmem>>, vector<1x1x16x16x128xf32>
    %56 = vector.shape_cast %55 : vector<1x1x16x16x128xf32> to vector<16x16x128xf32>
    %57 = vector.shape_cast %54 : vector<16x16x128xf32> to vector<1x1x16x16x128xf32>
    tpu.vector_store %arg9[%c1_65, %c0_66, %c1_67, %c8_68, %c0_69], %57 {strides = array<i32>} : memref<2x2x17x24x128xf32, #tpu.memory_space<vmem>>, vector<1x1x16x16x128xf32>,
    %58 = vector.extract_strided_slice %42 {offsets = [1, 1, 0, 0, 0], sizes = [1, 1, 16, 16, 128], strides = [1, 1, 1, 1, 1]} : vector<2x2x16x16x128xf32> to vector<1x1x16x16x128xf32>
    %59 = vector.shape_cast %58 : vector<1x1x16x16x128xf32> to vector<16x16x128xf32>
    %c1_70 = arith.constant 1 : index
    %c1_71 = arith.constant 1 : index
    %c1_72 = arith.constant 1 : index
    %c8_73 = arith.constant 8 : index
    %c0_74 = arith.constant 0 : index
    %60 = vector.load %arg9[%c1_70, %c1_71, %c1_72, %c8_73, %c0_74] : memref<2x2x17x24x128xf32, #tpu.memory_space<vmem>>, vector<1x1x16x16x128xf32>
    %61 = vector.shape_cast %60 : vector<1x1x16x16x128xf32> to vector<16x16x128xf32>
    %62 = vector.shape_cast %59 : vector<16x16x128xf32> to vector<1x1x16x16x128xf32>
    tpu.vector_store %arg9[%c1_70, %c1_71, %c1_72, %c8_73, %c0_74], %62 {strides = array<i32>} : memref<2x2x17x24x128xf32, #tpu.memory_space<vmem>>, vector<1x1x16x16x128xf32>,
    %cst_75 = arith.constant 0.000000e+00 : f32
    %63 = vector.broadcast %cst_75 : f32 to vector<16x16x128xf32>
    %c1_76 = arith.constant 1 : index
    %c0_77 = arith.constant 0 : index
    %c0_78 = arith.constant 0 : index
    %c8_79 = arith.constant 8 : index
    %c0_80 = arith.constant 0 : index
    %64 = vector.load %arg9[%c1_76, %c0_77, %c0_78, %c8_79, %c0_80] : memref<2x2x17x24x128xf32, #tpu.memory_space<vmem>>, vector<1x1x16x16x128xf32>
    %65 = vector.shape_cast %64 : vector<1x1x16x16x128xf32> to vector<16x16x128xf32>
    %c1_81 = arith.constant 1 : index
    %c0_82 = arith.constant 0 : index
    %66 = vector.load %arg4[%c1_81, %c0_82] : memref<9x128xf32, #tpu.memory_space<vmem>>, vector<1x128xf32>
    %67 = vector.shape_cast %66 : vector<1x128xf32> to vector<1x1x128xf32>
    %68 = vector.broadcast %67 : vector<1x1x128xf32> to vector<16x16x128xf32>
    %69 = arith.mulf %65, %68 : vector<16x16x128xf32>
    %70 = arith.addf %63, %69 : vector<16x16x128xf32>
    %c1_83 = arith.constant 1 : index
    %c1_84 = arith.constant 1 : index
    %c0_85 = arith.constant 0 : index
    %c7_86 = arith.constant 7 : index
    %c0_87 = arith.constant 0 : index
    %71 = vector.load %arg9[%c1_83, %c1_84, %c0_85, %c7_86, %c0_87] : memref<2x2x17x24x128xf32, #tpu.memory_space<vmem>>, vector<1x1x16x16x128xf32>
    %72 = vector.shape_cast %71 : vector<1x1x16x16x128xf32> to vector<16x16x128xf32>
    %c0_88 = arith.constant 0 : index
    %c0_89 = arith.constant 0 : index
    %73 = vector.load %arg4[%c0_88, %c0_89] : memref<9x128xf32, #tpu.memory_space<vmem>>, vector<1x128xf32>
    %74 = vector.shape_cast %73 : vector<1x128xf32> to vector<1x1x128xf32>
    %75 = vector.broadcast %74 : vector<1x1x128xf32> to vector<16x16x128xf32>
    %76 = arith.mulf %72, %75 : vector<16x16x128xf32>
    %77 = arith.addf %70, %76 : vector<16x16x128xf32>
    %c1_90 = arith.constant 1 : index
    %c1_91 = arith.constant 1 : index
    %c0_92 = arith.constant 0 : index
    %c8_93 = arith.constant 8 : index
    %c0_94 = arith.constant 0 : index
    %78 = vector.load %arg9[%c1_90, %c1_91, %c0_92, %c8_93, %c0_94] : memref<2x2x17x24x128xf32, #tpu.memory_space<vmem>>, vector<1x1x16x16x128xf32>
    %79 = vector.shape_cast %78 : vector<1x1x16x16x128xf32> to vector<16x16x128xf32>
    %c2 = arith.constant 2 : index
    %c0_95 = arith.constant 0 : index
    %80 = vector.load %arg4[%c2, %c0_95] : memref<9x128xf32, #tpu.memory_space<vmem>>, vector<1x128xf32>
    %81 = vector.shape_cast %80 : vector<1x128xf32> to vector<1x1x128xf32>
    %82 = vector.broadcast %81 : vector<1x1x128xf32> to vector<16x16x128xf32>
    %83 = arith.mulf %79, %82 : vector<16x16x128xf32>
    %84 = arith.addf %77, %83 : vector<16x16x128xf32>
    %c0_96 = arith.constant 0 : index
    %c0_97 = arith.constant 0 : index
    %c1_98 = arith.constant 1 : index
    %c8_99 = arith.constant 8 : index
    %c0_100 = arith.constant 0 : index
    %85 = vector.load %arg9[%c0_96, %c0_97, %c1_98, %c8_99, %c0_100] : memref<2x2x17x24x128xf32, #tpu.memory_space<vmem>>, vector<1x1x16x16x128xf32>
    %86 = vector.shape_cast %85 : vector<1x1x16x16x128xf32> to vector<16x16x128xf32>
    %c4 = arith.constant 4 : index
    %c0_101 = arith.constant 0 : index
    %87 = vector.load %arg4[%c4, %c0_101] : memref<9x128xf32, #tpu.memory_space<vmem>>, vector<1x128xf32>
    %88 = vector.shape_cast %87 : vector<1x128xf32> to vector<1x1x128xf32>
    %89 = vector.broadcast %88 : vector<1x1x128xf32> to vector<16x16x128xf32>
    %90 = arith.mulf %86, %89 : vector<16x16x128xf32>
    %91 = arith.addf %84, %90 : vector<16x16x128xf32>
    %c0_102 = arith.constant 0 : index
    %c1_103 = arith.constant 1 : index
    %c1_104 = arith.constant 1 : index
    %c7_105 = arith.constant 7 : index
    %c0_106 = arith.constant 0 : index
    %92 = vector.load %arg9[%c0_102, %c1_103, %c1_104, %c7_105, %c0_106] : memref<2x2x17x24x128xf32, #tpu.memory_space<vmem>>, vector<1x1x16x16x128xf32>
    %93 = vector.shape_cast %92 : vector<1x1x16x16x128xf32> to vector<16x16x128xf32>
    %c3 = arith.constant 3 : index
    %c0_107 = arith.constant 0 : index
    %94 = vector.load %arg4[%c3, %c0_107] : memref<9x128xf32, #tpu.memory_space<vmem>>, vector<1x128xf32>
    %95 = vector.shape_cast %94 : vector<1x128xf32> to vector<1x1x128xf32>
    %96 = vector.broadcast %95 : vector<1x1x128xf32> to vector<16x16x128xf32>
    %97 = arith.mulf %93, %96 : vector<16x16x128xf32>
    %98 = arith.addf %91, %97 : vector<16x16x128xf32>
    %c0_108 = arith.constant 0 : index
    %c1_109 = arith.constant 1 : index
    %c1_110 = arith.constant 1 : index
    %c8_111 = arith.constant 8 : index
    %c0_112 = arith.constant 0 : index
    %99 = vector.load %arg9[%c0_108, %c1_109, %c1_110, %c8_111, %c0_112] : memref<2x2x17x24x128xf32, #tpu.memory_space<vmem>>, vector<1x1x16x16x128xf32>
    %100 = vector.shape_cast %99 : vector<1x1x16x16x128xf32> to vector<16x16x128xf32>
    %c5 = arith.constant 5 : index
    %c0_113 = arith.constant 0 : index
    %101 = vector.load %arg4[%c5, %c0_113] : memref<9x128xf32, #tpu.memory_space<vmem>>, vector<1x128xf32>
    %102 = vector.shape_cast %101 : vector<1x128xf32> to vector<1x1x128xf32>
    %103 = vector.broadcast %102 : vector<1x1x128xf32> to vector<16x16x128xf32>
    %104 = arith.mulf %100, %103 : vector<16x16x128xf32>
    %105 = arith.addf %98, %104 : vector<16x16x128xf32>
    %c1_114 = arith.constant 1 : index
    %c0_115 = arith.constant 0 : index
    %c1_116 = arith.constant 1 : index
    %c8_117 = arith.constant 8 : index
    %c0_118 = arith.constant 0 : index
    %106 = vector.load %arg9[%c1_114, %c0_115, %c1_116, %c8_117, %c0_118] : memref<2x2x17x24x128xf32, #tpu.memory_space<vmem>>, vector<1x1x16x16x128xf32>
    %107 = vector.shape_cast %106 : vector<1x1x16x16x128xf32> to vector<16x16x128xf32>
    %c7_119 = arith.constant 7 : index
    %c0_120 = arith.constant 0 : index
    %108 = vector.load %arg4[%c7_119, %c0_120] : memref<9x128xf32, #tpu.memory_space<vmem>>, vector<1x128xf32>
    %109 = vector.shape_cast %108 : vector<1x128xf32> to vector<1x1x128xf32>
    %110 = vector.broadcast %109 : vector<1x1x128xf32> to vector<16x16x128xf32>
    %111 = arith.mulf %107, %110 : vector<16x16x128xf32>
    %112 = arith.addf %105, %111 : vector<16x16x128xf32>
    %c1_121 = arith.constant 1 : index
    %c1_122 = arith.constant 1 : index
    %c1_123 = arith.constant 1 : index
    %c7_124 = arith.constant 7 : index
    %c0_125 = arith.constant 0 : index
    %113 = vector.load %arg9[%c1_121, %c1_122, %c1_123, %c7_124, %c0_125] : memref<2x2x17x24x128xf32, #tpu.memory_space<vmem>>, vector<1x1x16x16x128xf32>
    %114 = vector.shape_cast %113 : vector<1x1x16x16x128xf32> to vector<16x16x128xf32>
    %c6 = arith.constant 6 : index
    %c0_126 = arith.constant 0 : index
    %115 = vector.load %arg4[%c6, %c0_126] : memref<9x128xf32, #tpu.memory_space<vmem>>, vector<1x128xf32>
    %116 = vector.shape_cast %115 : vector<1x128xf32> to vector<1x1x128xf32>
    %117 = vector.broadcast %116 : vector<1x1x128xf32> to vector<16x16x128xf32>
    %118 = arith.mulf %114, %117 : vector<16x16x128xf32>
    %119 = arith.addf %112, %118 : vector<16x16x128xf32>
    %c1_127 = arith.constant 1 : index
    %c1_128 = arith.constant 1 : index
    %c1_129 = arith.constant 1 : index
    %c8_130 = arith.constant 8 : index
    %c0_131 = arith.constant 0 : index
    %120 = vector.load %arg9[%c1_127, %c1_128, %c1_129, %c8_130, %c0_131] : memref<2x2x17x24x128xf32, #tpu.memory_space<vmem>>, vector<1x1x16x16x128xf32>
    %121 = vector.shape_cast %120 : vector<1x1x16x16x128xf32> to vector<16x16x128xf32>
    %c8_132 = arith.constant 8 : index
    %c0_133 = arith.constant 0 : index
    %122 = vector.load %arg4[%c8_132, %c0_133] : memref<9x128xf32, #tpu.memory_space<vmem>>, vector<1x128xf32>
    %123 = vector.shape_cast %122 : vector<1x128xf32> to vector<1x1x128xf32>
    %124 = vector.broadcast %123 : vector<1x1x128xf32> to vector<16x16x128xf32>
    %125 = arith.mulf %121, %124 : vector<16x16x128xf32>
    %126 = arith.addf %119, %125 : vector<16x16x128xf32>
    %c0_134 = arith.constant 0 : index
    %c0_135 = arith.constant 0 : index
    %127 = vector.load %arg5[%c0_134, %c0_135] : memref<1x128xf32, #tpu.memory_space<vmem>>, vector<1x128xf32>
    %128 = vector.shape_cast %127 : vector<1x128xf32> to vector<1x1x128xf32>
    %129 = vector.broadcast %128 : vector<1x1x128xf32> to vector<16x16x128xf32>
    %130 = arith.addf %126, %129 : vector<16x16x128xf32>
    %cst_136 = arith.constant 0.000000e+00 : f32
    %131 = vector.broadcast %cst_136 : f32 to vector<16x16x128xf32>
    %132 = arith.maximumf %130, %131 : vector<16x16x128xf32>
    %133 = vector.shape_cast %132 : vector<16x16x128xf32> to vector<256x128xf32>
    %134 = arith.truncf %133 : vector<256x128xf32> to vector<256x128xbf16>
    %c0_137 = arith.constant 0 : index
    %c0_138 = arith.constant 0 : index
    %135 = vector.load %arg6[%c0_137, %c0_138] : memref<128x128xbf16, #tpu.memory_space<vmem>>, vector<128x128xbf16>
    %cst_139 = arith.constant dense<0.000000e+00> : vector<256x128xf32>
    %136 = tpu.matmul %134, %135, %cst_139 {dimension_numbers = #tpu.dot_dimension_numbers<[1], [0], [0], [1], [0, 0, 1, 1], [], []>} : vector<256x128xbf16>, vector<128x128xbf16>, vector<256x128xf32> -> vector<256x128xf32>
    %c0_140 = arith.constant 0 : index
    %c0_141 = arith.constant 0 : index
    %137 = vector.load %arg7[%c0_140, %c0_141] : memref<1x128xf32, #tpu.memory_space<vmem>>, vector<1x128xf32>
    %138 = vector.broadcast %137 : vector<1x128xf32> to vector<256x128xf32>
    %139 = arith.addf %136, %138 : vector<256x128xf32>
    %140 = vector.shape_cast %139 : vector<256x128xf32> to vector<1x256x128xf32>
    %141 = arith.truncf %140 : vector<1x256x128xf32> to vector<1x256x128xbf16>
    %c0_142 = arith.constant 0 : index
    %c0_143 = arith.constant 0 : index
    %c0_144 = arith.constant 0 : index
    %142 = vector.load %arg8[%c0_142, %c0_143, %c0_144] : memref<1x256x128xbf16, #tpu.memory_space<vmem>>, vector<1x256x128xbf16>
    tpu.vector_store %arg8[%c0_142, %c0_143, %c0_144], %141 {strides = array<i32>} : memref<1x256x128xbf16, #tpu.memory_space<vmem>>, vector<1x256x128xbf16>,
    return
  }
  func.func @transform_0(%arg0: i32) -> (i32, i32, i32, i32, i32, i32) {
    %c0_i32 = arith.constant 0 : i32
    %c0_i32_0 = arith.constant 0 : i32
    %c0_i32_1 = arith.constant 0 : i32
    %c0_i32_2 = arith.constant 0 : i32
    %c0_i32_3 = arith.constant 0 : i32
    %c0_i32_4 = arith.constant 0 : i32
    return %arg0, %c0_i32, %c0_i32_0, %c0_i32_1, %c0_i32_2, %c0_i32_3 : i32, i32, i32, i32, i32, i32
  }
  func.func @transform_1(%arg0: i32) -> (i32, i32) {
    %c0_i32 = arith.constant 0 : i32
    %c0_i32_0 = arith.constant 0 : i32
    %c0_i32_1 = arith.constant 0 : i32
    return %c0_i32, %c0_i32_0 : i32, i32
  }
  func.func @transform_2(%arg0: i32) -> (i32, i32) {
    %c0_i32 = arith.constant 0 : i32
    %c0_i32_0 = arith.constant 0 : i32
    %c0_i32_1 = arith.constant 0 : i32
    return %c0_i32, %c0_i32_0 : i32, i32
  }
  func.func @transform_3(%arg0: i32) -> (i32, i32) {
    %c0_i32 = arith.constant 0 : i32
    %c0_i32_0 = arith.constant 0 : i32
    %c0_i32_1 = arith.constant 0 : i32
    return %c0_i32, %c0_i32_0 : i32, i32
  }
  func.func @transform_4(%arg0: i32) -> (i32, i32) {
    %c0_i32 = arith.constant 0 : i32
    %c0_i32_0 = arith.constant 0 : i32
    %c0_i32_1 = arith.constant 0 : i32
    return %c0_i32, %c0_i32_0 : i32, i32
  }
  func.func @transform_5(%arg0: i32) -> (i32, i32) {
    %c0_i32 = arith.constant 0 : i32
    %c0_i32_0 = arith.constant 0 : i32
    %c0_i32_1 = arith.constant 0 : i32
    return %c0_i32, %c0_i32_0 : i32, i32
  }
  func.func @transform_6(%arg0: i32) -> (i32, i32) {
    %c0_i32 = arith.constant 0 : i32
    %c0_i32_0 = arith.constant 0 : i32
    %c0_i32_1 = arith.constant 0 : i32
    return %c0_i32, %c0_i32_0 : i32, i32
  }
  func.func @transform_7(%arg0: i32) -> (i32, i32, i32) {
    %c0_i32 = arith.constant 0 : i32
    %c0_i32_0 = arith.constant 0 : i32
    %c0_i32_1 = arith.constant 0 : i32
    return %arg0, %c0_i32, %c0_i32_0 : i32, i32, i32
  }
}

</mosaic_0001>

<bundles_post_ra>
// kernel: tpu_custom_call.1
= control target key start
LH: loop header
LB: loop body
LE: loop exit
PB: predicated region body
PF: predicated region fallthrough
CT: control target
= control target key end

     0   :  { %s6531_s0 = inlined_call_operand.hbm [shape: bf16[2,2,2,16,16,16], index: 0, kind: input, shape index: {}]   ;;  %s6532_s1 = inlined_call_operand.hbm [shape: bf16[16,128], index: 1, kind: input, shape index: {}]   ;;  %s6533_s2 = inlined_call_operand.vmem [shape: f32[1,128], index: 2, kind: input, shape index: {}]   ;;  %s6534_s3 = inlined_call_operand.hbm [shape: f32[9,128], index: 3, kind: input, shape index: {}]   ;;  %s6535_s4 = inlined_call_operand.vmem [shape: f32[1,128], index: 4, kind: input, shape index: {}]   ;;  %s6536_s5 = inlined_call_operand.hbm [shape: bf16[128,128], index: 5, kind: input, shape index: {}]   ;;  %s6537_s6 = inlined_call_operand.vmem [shape: f32[1,128], index: 6, kind: input, shape index: {}]   ;;  %s6538_s7 = inlined_call_operand.hbm [shape: bf16[2,256,128], index: 7, kind: output, shape index: {}]  }
   0x1   :  { %6555 = sst [smem:[#allocation94_spill]] %s6532_s1 }
   0x2   :  { %12 = vsyncpa [#allocation4], 0 }
   0x3   :  { %14 = vsyncpa [#allocation4 + $0x1], 0 }
   0x4   :  { %15 = vsyncpa [#allocation7], 0 }
   0x5   :  { %16 = vsyncpa [#allocation10], 0 }
   0x6   :  { %17 = vsyncpa [#allocation5], 0 }
   0x7   :  { %19 = vsyncpa [#allocation5 + $0x1], 0  ;;  %s4884_s24 = smov 0   ;;  %s4886_s25 = smov 0  }
   0x8   :  { %s4888_s26 = smov 0   ;;  %s4890_s27 = smov 0  }
   0x9 LB: > { %s4905_s28 = sadd.s32 4294967295, %s4830_s27   ;;  %s3867_s29 = sadd.s32 4294967294, %s4830_s27   ;;  %s4830_s27 = sphi %s4890_s27, %s6748_s27   ;;  %s4826_s26 = sphi %s4888_s26, %s6747_s26   ;;  %s4822_s25 = sphi %s4886_s25, %s6746_s25   ;;  %s4818_s24 = sphi %s4884_s24, %s6745_s24  }
   0xa   : > { %p45_p0 = scmp.ne.s32.totalorder %s4822_s25, %s4818_s24  ;;  %p6539_p1 = scmp.eq.s32.totalorder %s4905_s28, 0 }
   0xb   : > { %p201_p3 = scmp.eq.s32.totalorder %s3867_s29, 1  ;;  %p3868_p5 = scmp.ge.s32.totalorder %s4830_s27, 1 }
   0xc   : > { %p4914_p4 = por %p6539_p1, %p45_p0  ;;  %p208_p7 = scmp.lt.s32.totalorder %s4830_s27, 3 }
   0xd   : > { %p4919_p6 = por %p201_p3, %p45_p0  ;;  %s4832_s10 = smov [#allocation6]  }
   0xe   : > { %s6556_s30 = scalar_select %p4914_p4, 1, 0 }
   0xf   : > { %s6557_s8 = scalar_select %p4919_p6, 1, 0 }
  0x10   : > { %p4924_p8 = pnand %p3868_p5, %p208_p7  ;;  %s220_s11 = sshll.u32 %s4832_s10, 4  ;;  %s4928_s11 = int_to_ptr.vmem [resolvable:$true] %s220_s11 }
  0x11   : > { %6558 = sst [smem:[#allocation16_spill]] %s6557_s8  ;;  %s4833_s13 = smov [#allocation8]  }
  0x12   : > { %s6559_s9 = scalar_select %p4924_p8, 1, 0 }
  0x13   : > { %p4482_p9 = pneg %p4924_p8  ;;  %s236_s14 = sshll.u32 %s4833_s13, 4  ;;  %s4939_s14 = int_to_ptr.vmem [resolvable:$true] %s236_s14 }
  0x14   : > { %s6561_s1 = sld [smem:[#allocation94_spill]] }
  0x15   : > { %p4935_p11 = pnand %p4482_p9, %p6539_p1 }
  0x17   : > { %p4949_p13 = pneg %p4935_p11 }
  0x1a   : > { %s4642_s17 = scalar_lea.hbm %s6561_s1, 128 }
  0x1b   : > { %p4643_p12 = scmp.ne.s32.totalorder %s6561_s1, %s4642_s17  ;;  %p4649_p5 = scmp.lt.u32.totalorder %s4642_s17, %s6561_s1 }
  0x1d   : > { %p4645_p0 = pnand %p4949_p13, %p4643_p12 }
  0x1f   : > { %p4646_p3 = pneg %p4645_p0 }
  0x21   : > { %p4651_p7 = pnand %p4649_p5, %p4646_p3 }
  0x23   : > { %4654 = shalt.err (!%p4651_p7)
}
  0x24   : > { %s4655_s23 = scalar_lea.vmem %s4928_s11, 128  ;;  %p4663_p2 = scmp.lt.s32.totalorder %s4928_s11, %s4928_s11 }
  0x25   : > { %p4656_p9 = scmp.ne.s32.totalorder %s4928_s11, %s4655_s23  ;;  %p4664_p6 = scmp.lt.s32.totalorder %s4655_s23, %s4655_s23 }
  0x27   : > { %p4658_p10 = pnand %p4656_p9, %p4949_p13  ;;  %p4665_p12 = por %p4664_p6, %p4663_p2 }
  0x29   : > { %p4659_p1 = pneg %p4658_p10 }
  0x2b   : > { %p4666_p0 = pnand %p4665_p12, %p4659_p1 }
  0x2d   : > { %4669 = shalt.err (!%p4666_p0)
}
  0x2e   : > { %s6540_s29 = smov 64   ;;  %s6542_s10 = smov 4  }
  0x2f   : > { %4485 = dma.hbm_to_vmem [thread:$0]  (!%p4935_p11), %s6561_s1, 128, %s4928_s11, [#allocation7], %s6540_s29, %s6540_s29, %s6542_s10  }
  0x30   : > { %s4670_s18 = scalar_lea.hbm %s6534_s3, 256 }
  0x31   : > { %p4671_p1 = scmp.ne.s32.totalorder %s6534_s3, %s4670_s18  ;;  %p4677_p10 = scmp.lt.u32.totalorder %s4670_s18, %s6534_s3 }
  0x33   : > { %p4673_p2 = pnand %p4671_p1, %p4949_p13 }
  0x35   : > { %p4674_p6 = pneg %p4673_p2 }
  0x37   : > { %p4679_p3 = pnand %p4677_p10, %p4674_p6 }
  0x39   : > { %4682 = shalt.err (!%p4679_p3)
}
  0x3a   : > { %s4683_s11 = scalar_lea.vmem %s4939_s14, 256  ;;  %p4691_p12 = scmp.lt.s32.totalorder %s4939_s14, %s4939_s14 }
  0x3b   : > { %p4684_p5 = scmp.ne.s32.totalorder %s4939_s14, %s4683_s11  ;;  %p4692_p0 = scmp.lt.s32.totalorder %s4683_s11, %s4683_s11 }
  0x3d   : > { %p4686_p7 = pnand %p4684_p5, %p4949_p13  ;;  %p4693_p1 = por %p4692_p0, %p4691_p12 }
  0x3f   : > { %p4687_p9 = pneg %p4686_p7 }
  0x41   : > { %p4694_p2 = pnand %p4693_p1, %p4687_p9 }
  0x43   : > { %4697 = shalt.err (!%p4694_p2)
}
  0x44   : > { %s4836_s13 = smov 128   ;;  %s4837_s15 = smov 8  }
  0x45   : > { %4488 = dma.hbm_to_vmem [thread:$0]  (!%p4935_p11), %s6534_s3, 256, %s4939_s14, [#allocation7], %s4836_s13, %s4836_s13, %s4837_s15  }
  0x46   : > { %s4838_s18 = smov [#allocation9]   ;;  %s4997_s21 = sadd.s32 1, %s4830_s27  }
  0x47   : > { %s252_s19 = sshll.u32 %s4838_s18, 4  ;;  %s4698_s11 = scalar_lea.hbm %s6536_s5, 1024  ;;  %s253_s19 = int_to_ptr.vmem [resolvable:$true] %s252_s19 }
  0x48   : > { %p4699_p6 = scmp.ne.s32.totalorder %s6536_s5, %s4698_s11  ;;  %p4705_p5 = scmp.lt.u32.totalorder %s4698_s11, %s6536_s5 }
  0x4a   : > { %p4701_p10 = pnand %p4699_p6, %p4949_p13 }
  0x4c   : > { %p4702_p3 = pneg %p4701_p10 }
  0x4e   : > { %p4707_p7 = pnand %p4705_p5, %p4702_p3 }
  0x50   : > { %4710 = shalt.err (!%p4707_p7)
}
  0x51   : > { %s4711_s14 = scalar_lea.vmem %s253_s19, 1024  ;;  %p4719_p1 = scmp.lt.s32.totalorder %s253_s19, %s253_s19 }
  0x52   : > { %p4712_p9 = scmp.ne.s32.totalorder %s253_s19, %s4711_s14  ;;  %p4720_p2 = scmp.lt.s32.totalorder %s4711_s14, %s4711_s14 }
  0x54   : > { %p4714_p12 = pnand %p4712_p9, %p4949_p13  ;;  %p4721_p4 = por %p4720_p2, %p4719_p1 }
  0x56   : > { %p4715_p0 = pneg %p4714_p12 }
  0x58   : > { %p4722_p8 = pnand %p4721_p4, %p4715_p0 }
  0x5a   : > { %4725 = shalt.err (!%p4722_p8)
}
  0x5b   : > { %s6563_s29 = smov 4   ;;  %s6564_s10 = smov 64  }
  0x5c   : > { %4491 = dma.hbm_to_vmem [thread:$0]  (!%p4935_p11), %s6536_s5, 1024, %s253_s19, [#allocation10], %s6564_s10, %s6564_s10, %s6563_s29  }
  0x5d   : > { %s29_s20 = ssub.s32 %s4830_s27, %s4997_s21  ;;  %s32_s12 = sadd.s32 1, %s4826_s26 }
  0x5e   : > { %p30_p4 = scmp.eq.s32.totalorder %s29_s20, 0  ;;  %p39_p8 = scmp.ne.s32.totalorder %s4826_s26, %s4822_s25 }
  0x5f   : > { %p40_p13 = scmp.eq.s32.totalorder %s4830_s27, 0  ;;  %p4503_p6 = scmp.lt.s32.totalorder %s4830_s27, 2 }
  0x60   : > { %s5028_s13 = scalar_select %p30_p4, %s4826_s26, %s32_s12  }
  0x61   : > { %p41_p10 = por %p40_p13, %p39_p8  ;;  %p6565_p3 = scmp.eq.s32.totalorder %s4905_s28, 1 }
  0x62   : > { %s269_s16 = sand.u32 1, %s4826_s26   ;;  %s4068_s17 = sshll.u32 %s4830_s27, 13 }
  0x63   : > { %p5032_p5 = por %p6565_p3, %p39_p8  ;;  %s3873_s18 = sshll.u32 %s269_s16, 9 }
  0x64   : > { %s5041_s19 = scalar_lea.hbm %s6531_s0, %s4068_s17  ;;  %s273_s11 = scalar_lea.vmem [#allocation3], %s3873_s18 }
  0x65   : > { %s280_s14 = sshll.u32 %s273_s11, 4  ;;  %p5043_p11 = pnand %p4503_p6, %p41_p10  ;;  %s5047_s14 = int_to_ptr.vmem [resolvable:$true] %s280_s14 }
  0x66   : > { %s5049_s8 = scalar_lea.sflag [#allocation4], %s269_s16  ;;  %s4726_s20 = scalar_lea.hbm %s5041_s19, 8192 }
  0x67   : > { %p4727_p7 = scmp.ne.s32.totalorder %s5041_s19, %s4726_s20  ;;  %p4728_p9 = pneg %p5043_p11 }
  0x68   : > { %s4731_s18 = scalar_lea.hbm %s6531_s0, 16384  ;;  %p4732_p1 = scmp.lt.u32.totalorder %s5041_s19, %s6531_s0 }
  0x69   : > { %p4729_p12 = pnand %p4728_p9, %p4727_p7  ;;  %p4733_p2 = scmp.lt.u32.totalorder %s4731_s18, %s4726_s20 }
  0x6a   : > { %p4735_p8 = scmp.lt.u32.totalorder %s4726_s20, %s5041_s19 }
  0x6b   : > { %p4730_p0 = pneg %p4729_p12  ;;  %p4734_p4 = por %p4733_p2, %p4732_p1 }
  0x6d   : > { %p4736_p13 = por %p4735_p8, %p4734_p4 }
  0x6f   : > { %p4737_p6 = pnand %p4736_p13, %p4730_p0 }
  0x71   : > { %4740 = shalt.err (!%p4737_p6)
}
  0x72   : > { %s4741_s16 = scalar_lea.vmem %s5047_s14, 8192  ;;  %s4839_s11 = smov [#allocation3]  }
  0x73   : > { %p4742_p10 = scmp.ne.s32.totalorder %s5047_s14, %s4741_s16  ;;  %s4746_s12 = sshll.u32 %s4839_s11, 4  ;;  %s4747_s12 = int_to_ptr.vmem [resolvable:$false] %s4746_s12 }
  0x74   : > { %s4748_s17 = scalar_lea.vmem %s4747_s12, 16384  ;;  %p4749_p12 = scmp.lt.s32.totalorder %s5047_s14, %s4747_s12 }
  0x75   : > { %p4744_p3 = pnand %p4742_p10, %p4728_p9  ;;  %p4750_p1 = scmp.lt.s32.totalorder %s4748_s17, %s4741_s16 }
  0x77   : > { %p4745_p7 = pneg %p4744_p3  ;;  %p4751_p2 = por %p4750_p1, %p4749_p12 }
  0x79   : > { %p4752_p4 = pnand %p4751_p2, %p4745_p7 }
  0x7b   : > { %4755 = shalt.err (!%p4752_p4)
}
  0x7c   : > { %4495 = dma.hbm_to_vmem [thread:$0]  (!%p5043_p11), %s5041_s19, 8192, %s5047_s14, %s5049_s8, %s6564_s10, %s6564_s10, %s6563_s29  }
  0x7d   : > { %p6568_p9 = scmp.ne.s32.totalorder %s6559_s9, 0 }
  0x7f   : > { %292 = sbr.rel (%p6568_p9) target bundleno = 906 (0x38a), region = 48 }
  0x86   : > { %s5083_s20 = sand.u32 1, %s4822_s25   ;;  %p6569_p0 = scmp.ne.s32.totalorder %s6556_s30, 0 }
  0x87   : > { %s3877_s18 = sshll.u32 %s5083_s20, 9  ;;  %s295_s22 = scalar_lea.sflag [#allocation4], %s5083_s20 }
  0x88   : > { %s5087_s23 = scalar_lea.vmem [#allocation3], %s3877_s18 }
  0x89   : > { %4801 = dma.done.wait (%p6569_p0), %s295_s22, 8192  }
  0x8a   : > { %4803 = vsyncadd (%p6569_p0), %s295_s22, 4294959104  ;;  %p6570_p11 = scmp.eq.s32.totalorder %s4905_s28, 0 }
  0x8c   : > { %4805 = dma.done.wait (%p6570_p11), [#allocation7], 384   ;;  %p6571_p8 = pmov %p6570_p11 }
  0x8e   : > { %4807 = vsyncadd (%p6571_p8), [#allocation7], 4294966912  ;;  %p6572_p13 = pmov %p6571_p8 }
  0x8f   : > { %p6573_p6 = pmov %p6571_p8 }
  0x90   : > { %4809 = dma.done.wait (%p6572_p13), [#allocation10], 1024  }
  0x91   : > { %4811 = vsyncadd (%p6573_p6), [#allocation10], 4294966272  ;;  %v4840_v0 = vmov 0.0   ;;  %v4550_v1 = vld [vmem:[#allocation6] sm:$0xff]   ;;  %vm888_vm0 = vcmask 130048   ;;  %v4553_v4 = vld [vmem:[%s5087_s23 + $0x8] sm:$0xff]  }
  0x92   : > { %367 = vst [vmem:[#allocation2 + $0x1b7] sm:$0x1] %v4840_v0  ;;  %368 = vst [vmem:[#allocation2 + $0x1cf] sm:$0x1] %v4840_v0  ;;  %v4551_v2 = vld [vmem:[%s5087_s23] sm:$0xff]   ;;  %4286 = vmatprep.subr.bf16.mxu0 %v4550_v1  ;;  %4464 = vmatprep.subr.bf16.mxu1 %v4550_v1  ;;  %v4554_v5 = vld [vmem:[%s5087_s23 + $0x148] sm:$0xff]  }
  0x93   : > { %369 = vst [vmem:[#allocation2 + $0x1e7] sm:$0x1] %v4840_v0  ;;  %370 = vst [vmem:[#allocation2 + $0x1ff] sm:$0x1] %v4840_v0  ;;  %v4552_v3 = vld [vmem:[%s5087_s23 + $0x140] sm:$0xff]   ;;  %4287 = vmatpush3.bf16.msra.mxu0 %v4550_v1  ;;  %4465 = vmatpush3.bf16.msra.mxu1 %v4550_v1  ;;  %v4555_v6 = vld [vmem:[%s5087_s23 + $0x10] sm:$0xff]  }
  0x94   : > { %371 = vst [vmem:[#allocation2 + $0x217] sm:$0x1] %v4840_v0  ;;  %372 = vst [vmem:[#allocation2 + $0x22f] sm:$0x1] %v4840_v0  ;;  %4288 = vmatprep.mubr.msk.bf16.mxu0 %vm888_vm0, %v4551_v2  ;;  %4368 = vmatprep.mubr.msk.bf16.mxu1 %vm888_vm0, %v4552_v3  ;;  %v4556_v7 = vld [vmem:[%s5087_s23 + $0x150] sm:$0xff]   ;;  %v4557_v8 = vld [vmem:[%s5087_s23 + $0x18] sm:$0xff]  }
  0x95   : > { %373 = vst [vmem:[#allocation2 + $0x247] sm:$0x1] %v4840_v0  ;;  %374 = vst [vmem:[#allocation2 + $0x25f] sm:$0x1] %v4840_v0  ;;  %v4558_v9 = vld [vmem:[%s5087_s23 + $0x158] sm:$0xff]   ;;  %v4559_v10 = vld [vmem:[%s5087_s23 + $0x20] sm:$0xff]  }
  0x96   : > { %375 = vst [vmem:[#allocation2 + $0x277] sm:$0x1] %v4840_v0  ;;  %376 = vst [vmem:[#allocation2 + $0x28f] sm:$0x1] %v4840_v0  ;;  %4289 = vmatmul.mubr.msk.bf16.vlgmr.msra.gmra.mrb[0].mxu0 %vm888_vm0, %v4553_v4  ;;  %4369 = vmatmul.mubr.msk.bf16.vlgmr.msra.gmra.mrb[0].mxu1 %vm888_vm0, %v4554_v5  ;;  %v4560_v11 = vld [vmem:[%s5087_s23 + $0x160] sm:$0xff]   ;;  %v4561_v12 = vld [vmem:[%s5087_s23 + $0x28] sm:$0xff]  }
  0x97   : > { %377 = vst [vmem:[#allocation2 + $0x2a7] sm:$0x1] %v4840_v0  ;;  %378 = vst [vmem:[#allocation2 + $0x2bf] sm:$0x1] %v4840_v0  ;;  %4292 = vmatprep.mubr.msk.bf16.mxu0 %vm888_vm0, %v4555_v6  ;;  %4372 = vmatprep.mubr.msk.bf16.mxu1 %vm888_vm0, %v4556_v7  ;;  %v4562_v13 = vld [vmem:[%s5087_s23 + $0x168] sm:$0xff]   ;;  %v4563_v14 = vld [vmem:[%s5087_s23 + $0x30] sm:$0xff]  }
  0x98   : > { %379 = vst [vmem:[#allocation2 + $0x2d7] sm:$0x1] %v4840_v0  ;;  %380 = vst [vmem:[#allocation2 + $0x2ef] sm:$0x1] %v4840_v0  ;;  %v4564_v15 = vld [vmem:[%s5087_s23 + $0x170] sm:$0xff]   ;;  %v4565_v16 = vld [vmem:[%s5087_s23 + $0x38] sm:$0xff]  }
  0x99   : > { %381 = vst [vmem:[#allocation2 + $0x307] sm:$0x1] %v4840_v0  ;;  %382 = vst [vmem:[#allocation2 + $0x31f] sm:$0x1] %v4840_v0  ;;  %v4566_v17 = vld [vmem:[%s5087_s23 + $0x178] sm:$0xff]   ;;  %v4567_v18 = vld [vmem:[%s5087_s23 + $0x40] sm:$0xff]  }
  0x9a   : > { %409 = vst [vmem:[#allocation2 + $0x4e7] sm:$0x1] %v4840_v0  ;;  %410 = vst [vmem:[#allocation2 + $0x4ff] sm:$0x1] %v4840_v0  ;;  %v4568_v19 = vld [vmem:[%s5087_s23 + $0x180] sm:$0xff]   ;;  %v4569_v20 = vld [vmem:[%s5087_s23 + $0x48] sm:$0xff]  }
  0x9b   : > { %411 = vst [vmem:[#allocation2 + $0x517] sm:$0x1] %v4840_v0  ;;  %412 = vst [vmem:[#allocation2 + $0x52f] sm:$0x1] %v4840_v0  ;;  %v4570_v21 = vld [vmem:[%s5087_s23 + $0x188] sm:$0xff]   ;;  %v4571_v22 = vld [vmem:[%s5087_s23 + $0x50] sm:$0xff]  }
  0x9c   : > { %413 = vst [vmem:[#allocation2 + $0x547] sm:$0x1] %v4840_v0  ;;  %414 = vst [vmem:[#allocation2 + $0x55f] sm:$0x1] %v4840_v0  ;;  %v4572_v23 = vld [vmem:[%s5087_s23 + $0x190] sm:$0xff]   ;;  %v4573_v24 = vld [vmem:[%s5087_s23 + $0x58] sm:$0xff]  }
  0x9d   : > { %415 = vst [vmem:[#allocation2 + $0x577] sm:$0x1] %v4840_v0  ;;  %416 = vst [vmem:[#allocation2 + $0x58f] sm:$0x1] %v4840_v0  ;;  %v4574_v25 = vld [vmem:[%s5087_s23 + $0x198] sm:$0xff]   ;;  %v4575_v26 = vld [vmem:[%s5087_s23 + $0x60] sm:$0xff]  }
  0x9e   : > { %417 = vst [vmem:[#allocation2 + $0x5a7] sm:$0x1] %v4840_v0  ;;  %418 = vst [vmem:[#allocation2 + $0x5bf] sm:$0x1] %v4840_v0  ;;  %4293 = vmatmul.mubr.msk.bf16.gmra.mrb[4].mxu0 %vm888_vm0, %v4557_v8  ;;  %4373 = vmatmul.mubr.msk.bf16.gmra.mrb[4].mxu1 %vm888_vm0, %v4558_v9  ;;  %v4576_v27 = vld [vmem:[%s5087_s23 + $0x1a0] sm:$0xff]   ;;  %v4577_v28 = vld [vmem:[%s5087_s23 + $0x68] sm:$0xff]  }
  0x9f   : > { %419 = vst [vmem:[#allocation2 + $0x5d7] sm:$0x1] %v4840_v0  ;;  %420 = vst [vmem:[#allocation2 + $0x5ef] sm:$0x1] %v4840_v0  ;;  %4296 = vmatprep.mubr.msk.bf16.mxu0 %vm888_vm0, %v4559_v10  ;;  %4376 = vmatprep.mubr.msk.bf16.mxu1 %vm888_vm0, %v4560_v11  ;;  %v4578_v29 = vld [vmem:[%s5087_s23 + $0x1a8] sm:$0xff]   ;;  %v4579_v30 = vld [vmem:[%s5087_s23 + $0x70] sm:$0xff]  }
  0xa0   : > { %421 = vst [vmem:[#allocation2 + $0x607] sm:$0x1] %v4840_v0  ;;  %422 = vst [vmem:[#allocation2 + $0x61f] sm:$0x1] %v4840_v0  ;;  %v4580_v31 = vld [vmem:[%s5087_s23 + $0x1b0] sm:$0xff]   ;;  %v4581_v32 = vld [vmem:[%s5087_s23 + $0x78] sm:$0xff]  }
  0xa1   : > { %423 = vst [vmem:[#allocation2 + $0x637] sm:$0x1] %v4840_v0  ;;  %424 = vst [vmem:[#allocation2 + $0x64f] sm:$0x1] %v4840_v0  ;;  %v4582_v33 = vld [vmem:[%s5087_s23 + $0x1b8] sm:$0xff]   ;;  %v4583_v34 = vld [vmem:[%s5087_s23 + $0x80] sm:$0xff]  }
  0xa2   : > { %v4584_v35 = vld [vmem:[%s5087_s23 + $0x1c0] sm:$0xff]   ;;  %v4585_v36 = vld [vmem:[%s5087_s23 + $0x88] sm:$0xff]   ;;  %v4587_v38 = vld [vmem:[%s5087_s23 + $0x90] sm:$0xff]   ;;  %vm2132_vm1 = vcmask 1040384   ;;  %s3881_s12 = sshll.u32 %s5083_s20, 7  ;;  %s4101_s18 = sshll.u32 %s4905_s28, 11 }
  0xa3   : > { %v4586_v37 = vld [vmem:[%s5087_s23 + $0x1c8] sm:$0xff]   ;;  %v4588_v39 = vld [vmem:[%s5087_s23 + $0x1d0] sm:$0xff]   ;;  %v4589_v40 = vld [vmem:[%s5087_s23 + $0x98] sm:$0xff]   ;;  %s6434_s17 = scalar_lea.vmem [#allocation11], %s3881_s12  ;;  %s6483_s9 = scalar_lea.hbm %s6538_s7, %s4101_s18 }
  0xa4   : > { %v4590_v41 = vld [vmem:[%s5087_s23 + $0x1d8] sm:$0xff]   ;;  %v4591_v42 = vld [vmem:[%s5087_s23 + $0xa0] sm:$0xff]   ;;  %v4593_v44 = vld [vmem:[%s5087_s23 + $0xa8] sm:$0xff]   ;;  %s3765_s22 = sshll.u32 %s6434_s17, 4  ;;  %s3752_s28 = scalar_lea.sflag [#allocation5], %s5083_s20  ;;  %s6485_s22 = int_to_ptr.vmem [resolvable:$true] %s3765_s22 }
  0xa5   : > { %v4592_v43 = vld [vmem:[%s5087_s23 + $0x1e0] sm:$0xff]   ;;  %v4594_v45 = vld [vmem:[%s5087_s23 + $0x1e8] sm:$0xff]   ;;  %v4595_v46 = vld [vmem:[%s5087_s23 + $0xb0] sm:$0xff]   ;;  %s4756_s29 = scalar_lea.vmem %s6485_s22, 2048  ;;  %s4841_s10 = smov [#allocation11]  }
  0xa6   : > { %4297 = vmatmul.mubr.msk.bf16.gmra.mrb[8].mxu0 %vm888_vm0, %v4561_v12  ;;  %4377 = vmatmul.mubr.msk.bf16.gmra.mrb[8].mxu1 %vm888_vm0, %v4562_v13  ;;  %v4596_v47 = vld [vmem:[%s5087_s23 + $0x1f0] sm:$0xff]   ;;  %v4597_v48 = vld [vmem:[%s5087_s23 + $0xb8] sm:$0xff]   ;;  %v4599_v50 = vld [vmem:[%s5087_s23 + $0xc0] sm:$0xff]   ;;  %p4757_p10 = scmp.ne.s32.totalorder %s6485_s22, %s4756_s29  ;;  %s4760_s19 = sshll.u32 %s4841_s10, 4  ;;  %s4761_s19 = int_to_ptr.vmem [resolvable:$false] %s4760_s19 }
  0xa7   : > { %4300 = vmatprep.mubr.msk.bf16.mxu0 %vm888_vm0, %v4563_v14  ;;  %4380 = vmatprep.mubr.msk.bf16.mxu1 %vm888_vm0, %v4564_v15  ;;  %v4598_v49 = vld [vmem:[%s5087_s23 + $0x1f8] sm:$0xff]   ;;  %v4600_v51 = vld [vmem:[%s5087_s23 + $0xc8] sm:$0xff]   ;;  %v4601_v52 = vld [vmem:[%s5087_s23 + $0xd0] sm:$0xff]   ;;  %s4762_s14 = scalar_lea.vmem %s4761_s19, 4096  ;;  %p4763_p12 = scmp.lt.s32.totalorder %s6485_s22, %s4761_s19 }
  0xa8   : > { %v4602_v53 = vld [vmem:[%s5087_s23 + $0xd8] sm:$0xff]   ;;  %v4603_v54 = vld [vmem:[%s5087_s23 + $0xe0] sm:$0xff]   ;;  %v4604_v55 = vld [vmem:[%s5087_s23 + $0xe8] sm:$0xff]   ;;  %p4758_p3 = pnand %p4757_p10, %p5032_p5  ;;  %p4764_p1 = scmp.lt.s32.totalorder %s4762_s14, %s4756_s29 }
  0xa9   : > { %v4605_v56 = vld [vmem:[%s5087_s23 + $0xf0] sm:$0xff]   ;;  %v4606_v57 = vld [vmem:[%s5087_s23 + $0xf8] sm:$0xff]   ;;  %v4607_v58 = vld [vmem:[%s5087_s23 + $0x100] sm:$0xff]  }
  0xaa   : > { %v4608_v59 = vld [vmem:[%s5087_s23 + $0x108] sm:$0xff]   ;;  %v4609_v60 = vld [vmem:[%s5087_s23 + $0x110] sm:$0xff]   ;;  %v4610_v61 = vld [vmem:[%s5087_s23 + $0x118] sm:$0xff]   ;;  %p4759_p7 = pneg %p4758_p3  ;;  %p4765_p2 = por %p4764_p1, %p4763_p12 }
  0xab   : > { %v4611_v62 = vld [vmem:[%s5087_s23 + $0x120] sm:$0xff]   ;;  %v4612_v63 = vld [vmem:[%s5087_s23 + $0x128] sm:$0xff]   ;;  %v4613_v0 = vld [vmem:[%s5087_s23 + $0x130] sm:$0xff]  }
  0xac   : > { %v4614_v1 = vld [vmem:[%s5087_s23 + $0x138] sm:$0xff]   ;;  %v4616_v3 = vld [vmem:[#allocation9 + $0x8] sm:$0xff]   ;;  %v4617_v4 = vld [vmem:[#allocation9 + $0x10] sm:$0xff]   ;;  %p4766_p4 = pnand %p4765_p2, %p4759_p7 }
  0xad   : > { %v4615_v2 = vld [vmem:[#allocation9] sm:$0xff]   ;;  %v4618_v5 = vld [vmem:[#allocation9 + $0x18] sm:$0xff]   ;;  %v5229_v7 = vld [vmem:[#allocation8] ss:$0 sm:$0xff] }
  0xae   : > { %4301 = vmatmul.mubr.msk.bf16.gmra.mrb[12].mxu0 %vm888_vm0, %v4565_v16  ;;  %4381 = vmatmul.mubr.msk.bf16.gmra.mrb[12].mxu1 %vm888_vm0, %v4566_v17  ;;  %v4619_v6 = vld [vmem:[#allocation9 + $0x20] sm:$0xff]   ;;  %v5234_v8 = vld [vmem:[%s6533_s2] ss:$0 sm:$0xff]  ;;  %v2036_v9 = vmul.f32 0.0, %v5229_v7 }
  0xaf   : > { %4304 = vmatprep.mubr.msk.bf16.mxu0 %vm888_vm0, %v4567_v18  ;;  %4384 = vmatprep.mubr.msk.bf16.mxu1 %vm888_vm0, %v4568_v19 }
  0xb0   : > { %4416 = vmatprep.subr.bf16.mxu1 %v4615_v2 }
  0xb1   : > { %4417 = vmatpush3.bf16.msra.mxu1 %v4615_v2 }
  0xb2   : > { %4418 = vmatprep.subr.bf16.mxu1 %v4616_v3 }
  0xb5   : > { %4419 = vmatpush3.bf16.msra.mxu1 %v4616_v3  ;;  %v2453_v3 = vld [vmem:[#allocation2 + $0x1e0] sm:$0xff] }
  0xb6   : > { %4305 = vmatmul.mubr.msk.bf16.gmra.mrb[16].mxu0 %vm888_vm0, %v4569_v20  ;;  %4385 = vmatmul.mubr.msk.bf16.gmra.mrb[16].mxu1 %vm888_vm0, %v4570_v21  ;;  %v5241_v20 = vld [vmem:[#allocation8 + $0x1] ss:$0 sm:$0xff]  ;;  %v2133_v21 = vrot.slane %v2036_v9, 7 }
  0xb7   : > { %4308 = vmatprep.mubr.msk.bf16.mxu0 %vm888_vm0, %v4571_v22  ;;  %4388 = vmatprep.mubr.msk.bf16.mxu1 %vm888_vm0, %v4572_v23 }
  0xb8   : > { %4420 = vmatprep.subr.bf16.mxu1 %v4617_v4 }
  0xb9   : > { %4421 = vmatpush3.bf16.msra.mxu1 %v4617_v4  ;;  %v2456_v4 = vld [vmem:[#allocation2 + $0x1f8] sm:$0xff] }
  0xba   : > { %4422 = vmatprep.subr.bf16.mxu1 %v4618_v5 }
  0xbd   : > { %4423 = vmatpush3.bf16.msra.mxu1 %v4618_v5  ;;  %v2462_v5 = vld [vmem:[#allocation2 + $0x228] sm:$0xff] }
  0xbe   : > { %4309 = vmatmul.mubr.msk.bf16.gmra.mrb[20].mxu0 %vm888_vm0, %v4573_v24  ;;  %4389 = vmatmul.mubr.msk.bf16.gmra.mrb[20].mxu1 %vm888_vm0, %v4574_v25 }
  0xbf   : > { %4312 = vmatprep.mubr.msk.bf16.mxu0 %vm888_vm0, %v4575_v26  ;;  %4392 = vmatprep.mubr.msk.bf16.mxu1 %vm888_vm0, %v4576_v27 }
  0xc0   : > { %4424 = vmatprep.subr.bf16.mxu1 %v4619_v6 }
  0xc1   : > { %4425 = vmatpush3.bf16.msra.mxu1 %v4619_v6 }
  0xc6   : > { %4313 = vmatmul.mubr.msk.bf16.gmra.mrb[24].mxu0 %vm888_vm0, %v4577_v28  ;;  %4393 = vmatmul.mubr.msk.bf16.gmra.mrb[24].mxu1 %vm888_vm0, %v4578_v29 }
  0xc7   : > { %4316 = vmatprep.mubr.msk.bf16.mxu0 %vm888_vm0, %v4579_v30  ;;  %4396 = vmatprep.mubr.msk.bf16.mxu1 %vm888_vm0, %v4580_v31 }
  0xce   : > { %4317 = vmatmul.mubr.msk.bf16.gmra.mrb[28].mxu0 %vm888_vm0, %v4581_v32  ;;  %4397 = vmatmul.mubr.msk.bf16.gmra.mrb[28].mxu1 %vm888_vm0, %v4582_v33 }
  0xcf   : > { %4320 = vmatprep.mubr.msk.bf16.mxu0 %vm888_vm0, %v4583_v34  ;;  %4400 = vmatprep.mubr.msk.bf16.mxu1 %vm888_vm0, %v4584_v35  ;;  %v1919_v34 = vmul.f32 0.0, %v5241_v20 }
  0xd6   : > { %4321 = vmatmul.mubr.msk.bf16.gmra.mrb[32].mxu0 %vm888_vm0, %v4585_v36  ;;  %4401 = vmatmul.mubr.msk.bf16.gmra.mrb[32].mxu1 %vm888_vm0, %v4586_v37  ;;  %v5248_v37 = vld [vmem:[#allocation8 + $0x2] ss:$0 sm:$0xff] }
  0xd7   : > { %4324 = vmatprep.mubr.msk.bf16.mxu0 %vm888_vm0, %v4587_v38  ;;  %4404 = vmatprep.mubr.msk.bf16.mxu1 %vm888_vm0, %v4588_v39  ;;  %v2447_v38 = vld [vmem:[#allocation2 + $0x1b0] sm:$0xff]  ;;  %v5250_v39 = vld [vmem:[#allocation8 + $0x3] ss:$0 sm:$0xff] }
  0xde   : > { %4325 = vmatmul.mubr.msk.bf16.gmra.mrb[36].mxu0 %vm888_vm0, %v4589_v40  ;;  %4405 = vmatmul.mubr.msk.bf16.gmra.mrb[36].mxu1 %vm888_vm0, %v4590_v41 }
  0xdf   : > { %4328 = vmatprep.mubr.msk.bf16.mxu0 %vm888_vm0, %v4591_v42  ;;  %4408 = vmatprep.mubr.msk.bf16.mxu1 %vm888_vm0, %v4592_v43  ;;  %v4620_v42 = vld [vmem:[#allocation9 + $0x28] sm:$0xff]  }
  0xe0   : > { %4426 = vmatprep.subr.bf16.mxu1 %v4620_v42 }
  0xe1   : > { %4427 = vmatpush3.bf16.msra.mxu1 %v4620_v42 }
  0xe6   : > { %4329 = vmatmul.mubr.msk.bf16.gmra.mrb[40].mxu0 %vm888_vm0, %v4593_v44  ;;  %4409 = vmatmul.mubr.msk.bf16.gmra.mrb[40].mxu1 %vm888_vm0, %v4594_v45 }
  0xe7   : > { %4332 = vmatprep.mubr.msk.bf16.mxu0 %vm888_vm0, %v4595_v46  ;;  %4412 = vmatprep.mubr.msk.bf16.mxu1 %vm888_vm0, %v4596_v47  ;;  %v2245_v47 = vadd.f32 %v2133_v21, %v1919_v34  ;;  %v5273_v21 = vmul.f32 %v5250_v39, %v2453_v3 }
  0xee   : > { %4333 = vmatmul.mubr.msk.bf16.gmra.mrb[44].mxu0 %vm888_vm0, %v4597_v48  ;;  %4413 = vmatmul.mubr.msk.bf16.gmra.mrb[44].mxu1 %vm888_vm0, %v4598_v49 }
  0xef   : > { %4336 = vmatprep.mubr.msk.bf16.mxu0 %vm888_vm0, %v4599_v50 }
  0xf6   : > { %4337 = vmatmul.mubr.msk.bf16.gmra.mrb[48].mxu0 %vm888_vm0, %v4600_v51 }
  0xf7   : > { %4340 = vmatprep.mubr.msk.bf16.mxu0 %vm888_vm0, %v4601_v52  ;;  %v2282_v52 = vmul.f32 0.0, %v5248_v37 }
  0xfe   : > { %4341 = vmatmul.mubr.msk.bf16.gmra.mrb[52].mxu0 %vm888_vm0, %v4602_v53  ;;  %v5258_v53 = vmul.f32 %v5250_v39, %v2447_v38 }
  0xff   : > { %4344 = vmatprep.mubr.msk.bf16.mxu0 %vm888_vm0, %v4603_v54 }
 0x106   : > { %4345 = vmatmul.mubr.msk.bf16.gmra.mrb[56].mxu0 %vm888_vm0, %v4604_v55 }
 0x107   : > { %4348 = vmatprep.mubr.msk.bf16.mxu0 %vm888_vm0, %v4605_v56 }
 0x10e   : > { %4349 = vmatmul.mubr.msk.bf16.gmra.mrb[60].mxu0 %vm888_vm0, %v4606_v57 }
 0x10f   : > { %4352 = vmatprep.mubr.msk.bf16.mxu0 %vm888_vm0, %v4607_v58 }
 0x116   : > { %4353 = vmatmul.mubr.msk.bf16.gmra.mrb[64].mxu0 %vm888_vm0, %v4608_v59 }
 0x117   : > { %4356 = vmatprep.mubr.msk.bf16.mxu0 %vm888_vm0, %v4609_v60 }
 0x11e   : > { %4357 = vmatmul.mubr.msk.bf16.gmra.mrb[68].mxu0 %vm888_vm0, %v4610_v61 }
 0x11f   : > { %4360 = vmatprep.mubr.msk.bf16.mxu0 %vm888_vm0, %v4611_v62 }
 0x126   : > { %4361 = vmatmul.mubr.msk.bf16.gmra.mrb[72].mxu0 %vm888_vm0, %v4612_v63 }
 0x127   : > { %4364 = vmatprep.mubr.msk.bf16.mxu0 %vm888_vm0, %v4613_v0  ;;  %v2450_v0 = vld [vmem:[#allocation2 + $0x1c8] sm:$0xff] }
 0x12e   : > { %4365 = vmatmul.mubr.msk.bf16.gmra.mrb[76].mxu0 %vm888_vm0, %v4614_v1 }
 0x169   : > { %v4290_v10 = vpop.f32.mrb[0].mxu0  ;;  %v4370_v11 = vpop.f32.mrb[0].mxu1 }
 0x16a   : > { %v1124_v12 = vadd.f32 %v4290_v10, %v5234_v8  ;;  %v1115_v13 = vpop.f32.mrb[1].mxu0  ;;  %v1444_v14 = vadd.f32 %v4370_v11, %v5234_v8  ;;  %v1435_v15 = vpop.f32.mrb[1].mxu1  ;;  %v2910_v10 = vld [vmem:[#allocation2 + $0x4e0] sm:$0xff]  ;;  %v2459_v11 = vld [vmem:[#allocation2 + $0x210] sm:$0xff] }
 0x16b   : > { %v1116_v16 = vadd.f32 %v5234_v8, %v1115_v13  ;;  %v4291_v17 = vpop.f32.mrb[2].mxu0  ;;  %v1436_v18 = vadd.f32 %v5234_v8, %v1435_v15  ;;  %v4371_v19 = vpop.f32.mrb[2].mxu1  ;;  %v5267_v13 = vmul.f32 %v5250_v39, %v2450_v0  ;;  %v5292_v34 = vmul.f32 %v5229_v7, %v2910_v10  ;;  %v2916_v0 = vld [vmem:[#allocation2 + $0x510] sm:$0xff] }
 0x16c   : > { %v1628_v22 = vmax.f32 %v1124_v12, 0.0  ;;  %v1127_v23 = vadd.f32 %v4291_v17, %v5234_v8  ;;  %v1118_v24 = vpop.f32.mrb[3].mxu0  ;;  %v1708_v25 = vmax.f32 %v1444_v14, 0.0  ;;  %v1447_v26 = vadd.f32 %v4371_v19, %v5234_v8  ;;  %v1438_v27 = vpop.f32.mrb[3].mxu1  ;;  %v2913_v14 = vld [vmem:[#allocation2 + $0x4f8] sm:$0xff]  ;;  %v4621_v17 = vld [vmem:[#allocation9 + $0x30] sm:$0xff]  }
 0x16d   : > { %v1626_v28 = vmax.f32 %v1116_v16, 0.0  ;;  %v1119_v29 = vadd.f32 %v5234_v8, %v1118_v24  ;;  %v1706_v30 = vmax.f32 %v1436_v18, 0.0  ;;  %v1439_v31 = vadd.f32 %v5234_v8, %v1438_v27  ;;  %v5270_v19 = vld [vmem:[#allocation8 + $0x6] ss:$0 sm:$0xff]  ;;  %4428 = vmatprep.subr.bf16.mxu1 %v4621_v17 }
 0x16e   : > { %1756 = vst [vmem:[#allocation2 + $0x38] sm:$0xff] %v1628_v22  ;;  %v1629_v32 = vmax.f32 %v1127_v23, 0.0  ;;  %1836 = vst [vmem:[#allocation2 + $0x428] sm:$0xff] %v1708_v25  ;;  %v1709_v33 = vmax.f32 %v1447_v26, 0.0  ;;  %v5264_v12 = vadd.f32 %v2282_v52, %v2245_v47  ;;  %v5276_v22 = vmul.f32 %v5250_v39, %v2456_v4  ;;  %4429 = vmatpush3.bf16.msra.mxu1 %v4621_v17 }
 0x16f   : > { %1754 = vst [vmem:[#allocation2 + $0x20] sm:$0xff] %v1626_v28  ;;  %v1627_v35 = vmax.f32 %v1119_v29, 0.0  ;;  %1834 = vst [vmem:[#allocation2 + $0x410] sm:$0xff] %v1706_v30  ;;  %v1707_v36 = vmax.f32 %v1439_v31, 0.0  ;;  %v5279_v23 = vmul.f32 %v5250_v39, %v2462_v5  ;;  %v5284_v28 = vmul.f32 %v5270_v19, %v2910_v10 }
 0x170   : > { %1757 = vst [vmem:[#allocation2 + $0x40] sm:$0xff] %v1629_v32  ;;  %1837 = vst [vmem:[#allocation2 + $0x430] sm:$0xff] %v1709_v33  ;;  %v5287_v29 = vmul.f32 %v5250_v39, %v2459_v11 }
 0x171   : > { %1755 = vst [vmem:[#allocation2 + $0x28] sm:$0xff] %v1627_v35  ;;  %v4294_v40 = vpop.f32.mrb[4].mxu0  ;;  %1835 = vst [vmem:[#allocation2 + $0x418] sm:$0xff] %v1707_v36  ;;  %v4374_v41 = vpop.f32.mrb[4].mxu1  ;;  %v5295_v35 = vmul.f32 %v5229_v7, %v2913_v14 }
 0x172   : > { %v1140_v43 = vadd.f32 %v4294_v40, %v5234_v8  ;;  %v1131_v44 = vpop.f32.mrb[5].mxu0  ;;  %v1460_v45 = vadd.f32 %v4374_v41, %v5234_v8  ;;  %v1451_v46 = vpop.f32.mrb[5].mxu1 }
 0x173   : > { %v1132_v48 = vadd.f32 %v5234_v8, %v1131_v44  ;;  %v4295_v49 = vpop.f32.mrb[6].mxu0  ;;  %v1452_v50 = vadd.f32 %v5234_v8, %v1451_v46  ;;  %v4375_v51 = vpop.f32.mrb[6].mxu1 }
 0x174   : > { %v1632_v54 = vmax.f32 %v1140_v43, 0.0  ;;  %v1143_v55 = vadd.f32 %v4295_v49, %v5234_v8  ;;  %v1134_v56 = vpop.f32.mrb[7].mxu0  ;;  %v1712_v57 = vmax.f32 %v1460_v45, 0.0  ;;  %v1463_v58 = vadd.f32 %v4375_v51, %v5234_v8  ;;  %v1454_v59 = vpop.f32.mrb[7].mxu1 }
 0x175   : > { %v1630_v60 = vmax.f32 %v1132_v48, 0.0  ;;  %v1135_v61 = vadd.f32 %v5234_v8, %v1134_v56  ;;  %v1710_v62 = vmax.f32 %v1452_v50, 0.0  ;;  %v1455_v63 = vadd.f32 %v5234_v8, %v1454_v59  ;;  %v5301_v48 = vld [vmem:[#allocation8 + $0x4] ss:$0 sm:$0xff]  ;;  %v2348_v52 = vld [vmem:[#allocation2 + $0x38] sm:$0xff] }
 0x176   : > { %1760 = vst [vmem:[#allocation2 + $0x68] sm:$0xff] %v1632_v54  ;;  %v1633_v1 = vmax.f32 %v1143_v55, 0.0  ;;  %1840 = vst [vmem:[#allocation2 + $0x458] sm:$0xff] %v1712_v57  ;;  %v1713_v2 = vmax.f32 %v1463_v58, 0.0  ;;  %v2346_v51 = vld [vmem:[#allocation2 + $0x20] sm:$0xff]  ;;  %v5305_v56 = vmul.f32 %v5270_v19, %v2913_v14 }
 0x177   : > { %1758 = vst [vmem:[#allocation2 + $0x50] sm:$0xff] %v1630_v60  ;;  %v1631_v6 = vmax.f32 %v1135_v61, 0.0  ;;  %1838 = vst [vmem:[#allocation2 + $0x440] sm:$0xff] %v1710_v62  ;;  %v1711_v9 = vmax.f32 %v1455_v63, 0.0  ;;  %v2349_v54 = vld [vmem:[#allocation2 + $0x40] sm:$0xff]  ;;  %v2383_v5 = vmul.f32 %v5301_v48, %v2346_v51 }
 0x178   : > { %1761 = vst [vmem:[#allocation2 + $0x70] sm:$0xff] %v1633_v1  ;;  %1841 = vst [vmem:[#allocation2 + $0x460] sm:$0xff] %v1713_v2  ;;  %v2347_v59 = vld [vmem:[#allocation2 + $0x28] sm:$0xff]  ;;  %v5385_v2 = vld [vmem:[#allocation2 + $0x558] sm:$0xff] }
 0x179   : > { %1759 = vst [vmem:[#allocation2 + $0x58] sm:$0xff] %v1631_v6  ;;  %v4298_v15 = vpop.f32.mrb[8].mxu0  ;;  %1839 = vst [vmem:[#allocation2 + $0x448] sm:$0xff] %v1711_v9  ;;  %v4378_v16 = vpop.f32.mrb[8].mxu1  ;;  %v5315_v6 = vmul.f32 %v5301_v48, %v2348_v52  ;;  %v5318_v9 = vmul.f32 %v5301_v48, %v2349_v54  ;;  %v2384_v17 = vmul.f32 %v5301_v48, %v2347_v59 }
 0x17a   : > { %v1156_v24 = vadd.f32 %v4298_v15, %v5234_v8  ;;  %v1147_v25 = vpop.f32.mrb[9].mxu0  ;;  %v1476_v26 = vadd.f32 %v4378_v16, %v5234_v8  ;;  %v1467_v27 = vpop.f32.mrb[9].mxu1 }
 0x17b   : > { %v1148_v30 = vadd.f32 %v5234_v8, %v1147_v25  ;;  %v4299_v31 = vpop.f32.mrb[10].mxu0  ;;  %v1468_v32 = vadd.f32 %v5234_v8, %v1467_v27  ;;  %v4379_v33 = vpop.f32.mrb[10].mxu1  ;;  %6574 = vst [vmem:[#allocation17_spill] sm:$0xff] %v5318_v9 }
 0x17c   : > { %v1636_v36 = vmax.f32 %v1156_v24, 0.0  ;;  %v1159_v38 = vadd.f32 %v4299_v31, %v5234_v8  ;;  %v1150_v40 = vpop.f32.mrb[11].mxu0  ;;  %v1716_v41 = vmax.f32 %v1476_v26, 0.0  ;;  %v1479_v42 = vadd.f32 %v4379_v33, %v5234_v8  ;;  %v1470_v43 = vpop.f32.mrb[11].mxu1  ;;  %v4622_v31 = vld [vmem:[#allocation9 + $0x38] sm:$0xff]  }
 0x17d   : > { %v1634_v44 = vmax.f32 %v1148_v30, 0.0  ;;  %v1151_v45 = vadd.f32 %v5234_v8, %v1150_v40  ;;  %v1714_v46 = vmax.f32 %v1468_v32, 0.0  ;;  %v1471_v47 = vadd.f32 %v5234_v8, %v1470_v43  ;;  %4430 = vmatprep.subr.bf16.mxu1 %v4622_v31  ;;  %v2352_v51 = vld [vmem:[#allocation2 + $0x68] sm:$0xff] }
 0x17e   : > { %1764 = vst [vmem:[#allocation2 + $0x98] sm:$0xff] %v1636_v36  ;;  %v1637_v49 = vmax.f32 %v1159_v38, 0.0  ;;  %1844 = vst [vmem:[#allocation2 + $0x488] sm:$0xff] %v1716_v41  ;;  %v1717_v50 = vmax.f32 %v1479_v42, 0.0  ;;  %v5328_v32 = vmul.f32 %v5270_v19, %v2916_v0  ;;  %v5331_v33 = vmul.f32 %v5229_v7, %v2916_v0  ;;  %v2919_v36 = vld [vmem:[#allocation2 + $0x528] sm:$0xff]  ;;  %4431 = vmatpush3.bf16.msra.mxu1 %v4622_v31 }
 0x17f   : > { %1762 = vst [vmem:[#allocation2 + $0x80] sm:$0xff] %v1634_v44  ;;  %v1635_v57 = vmax.f32 %v1151_v45, 0.0  ;;  %1842 = vst [vmem:[#allocation2 + $0x470] sm:$0xff] %v1714_v46  ;;  %v1715_v58 = vmax.f32 %v1471_v47, 0.0  ;;  %v2353_v52 = vld [vmem:[#allocation2 + $0x70] sm:$0xff]  ;;  %v5338_v59 = vmul.f32 %v5270_v19, %v2919_v36  ;;  %v5341_v0 = vmul.f32 %v5229_v7, %v2919_v36 }
 0x180   : > { %1765 = vst [vmem:[#allocation2 + $0xa0] sm:$0xff] %v1637_v49  ;;  %1845 = vst [vmem:[#allocation2 + $0x490] sm:$0xff] %v1717_v50  ;;  %v2350_v50 = vld [vmem:[#allocation2 + $0x50] sm:$0xff] }
 0x181   : > { %1763 = vst [vmem:[#allocation2 + $0x88] sm:$0xff] %v1635_v57  ;;  %v4302_v3 = vpop.f32.mrb[12].mxu0  ;;  %1843 = vst [vmem:[#allocation2 + $0x478] sm:$0xff] %v1715_v58  ;;  %v4382_v4 = vpop.f32.mrb[12].mxu1  ;;  %v2351_v58 = vld [vmem:[#allocation2 + $0x58] sm:$0xff] }
 0x182   : > { %v1172_v11 = vadd.f32 %v4302_v3, %v5234_v8  ;;  %v1163_v14 = vpop.f32.mrb[13].mxu0  ;;  %v1492_v15 = vadd.f32 %v4382_v4, %v5234_v8  ;;  %v1483_v16 = vpop.f32.mrb[13].mxu1 }
 0x183   : > { %v1164_v25 = vadd.f32 %v5234_v8, %v1163_v14  ;;  %v4303_v26 = vpop.f32.mrb[14].mxu0  ;;  %v1484_v27 = vadd.f32 %v5234_v8, %v1483_v16  ;;  %v4383_v30 = vpop.f32.mrb[14].mxu1  ;;  %v5347_v16 = vadd.f32 %v2384_v17, %v5264_v12  ;;  %v5361_v17 = vmul.f32 %v5301_v48, %v2353_v52 }
 0x184   : > { %v1640_v38 = vmax.f32 %v1172_v11, 0.0  ;;  %v1175_v40 = vadd.f32 %v4303_v26, %v5234_v8  ;;  %v1166_v41 = vpop.f32.mrb[15].mxu0  ;;  %v1720_v42 = vmax.f32 %v1492_v15, 0.0  ;;  %v1495_v43 = vadd.f32 %v4383_v30, %v5234_v8  ;;  %v1486_v44 = vpop.f32.mrb[15].mxu1 }
 0x185   : > { %v1638_v45 = vmax.f32 %v1164_v25, 0.0  ;;  %v1167_v46 = vadd.f32 %v5234_v8, %v1166_v41  ;;  %v1718_v47 = vmax.f32 %v1484_v27, 0.0  ;;  %v1487_v49 = vadd.f32 %v5234_v8, %v1486_v44  ;;  %v2356_v4 = vld [vmem:[#allocation2 + $0x98] sm:$0xff]  ;;  %6577 = vst [vmem:[#allocation20_spill] sm:$0xff] %v5361_v17 }
 0x186   : > { %1768 = vst [vmem:[#allocation2 + $0xc8] sm:$0xff] %v1640_v38  ;;  %v1641_v54 = vmax.f32 %v1175_v40, 0.0  ;;  %1848 = vst [vmem:[#allocation2 + $0x4b8] sm:$0xff] %v1720_v42  ;;  %v1721_v57 = vmax.f32 %v1495_v43, 0.0  ;;  %v2354_v3 = vld [vmem:[#allocation2 + $0x80] sm:$0xff]  ;;  %v5344_v15 = vadd.f32 %v2383_v5, %v5264_v12  ;;  %v5350_v25 = vmul.f32 %v5301_v48, %v2350_v50 }
 0x187   : > { %1766 = vst [vmem:[#allocation2 + $0xb0] sm:$0xff] %v1638_v45  ;;  %v1639_v11 = vmax.f32 %v1167_v46, 0.0  ;;  %1846 = vst [vmem:[#allocation2 + $0x4a0] sm:$0xff] %v1718_v47  ;;  %v1719_v14 = vmax.f32 %v1487_v49, 0.0  ;;  %v5355_v30 = vmul.f32 %v5301_v48, %v2352_v51  ;;  %v2357_v36 = vld [vmem:[#allocation2 + $0xa0] sm:$0xff]  ;;  %v5358_v12 = vmul.f32 %v5301_v48, %v2351_v58  ;;  %v2825_v58 = vld [vmem:[#allocation2 + $0x410] sm:$0xff] }
 0x188   : > { %1769 = vst [vmem:[#allocation2 + $0xd0] sm:$0xff] %v1641_v54  ;;  %1849 = vst [vmem:[#allocation2 + $0x4c0] sm:$0xff] %v1721_v57  ;;  %v2355_v31 = vld [vmem:[#allocation2 + $0x88] sm:$0xff]  ;;  %v5364_v40 = vmul.f32 %v5301_v48, %v2354_v3  ;;  %v5367_v41 = vmul.f32 %v5301_v48, %v2356_v4  ;;  %v5379_v57 = vmul.f32 %v5301_v48, %v2357_v36 }
 0x189   : > { %6575 = vst [vmem:[#allocation18_spill] sm:$0xff] %v5355_v30  ;;  %1767 = vst [vmem:[#allocation2 + $0xb8] sm:$0xff] %v1639_v11  ;;  %v4306_v5 = vpop.f32.mrb[16].mxu0  ;;  %v4386_v38 = vpop.f32.mrb[16].mxu1  ;;  %v5376_v54 = vmul.f32 %v5301_v48, %v2355_v31 }
 0x18a   : > { %1847 = vst [vmem:[#allocation2 + $0x4a8] sm:$0xff] %v1719_v14  ;;  %6576 = vst [vmem:[#allocation19_spill] sm:$0xff] %v5358_v12  ;;  %v1188_v42 = vadd.f32 %v4306_v5, %v5234_v8  ;;  %v1179_v43 = vpop.f32.mrb[17].mxu0  ;;  %v1508_v44 = vadd.f32 %v4386_v38, %v5234_v8  ;;  %v1499_v45 = vpop.f32.mrb[17].mxu1 }
 0x18b   : > { %6578 = vst [vmem:[#allocation21_spill] sm:$0xff] %v5364_v40  ;;  %6579 = vst [vmem:[#allocation22_spill] sm:$0xff] %v5367_v41  ;;  %v1180_v49 = vadd.f32 %v5234_v8, %v1179_v43  ;;  %v4307_v50 = vpop.f32.mrb[18].mxu0  ;;  %v1500_v51 = vadd.f32 %v5234_v8, %v1499_v45  ;;  %v4387_v52 = vpop.f32.mrb[18].mxu1  ;;  %v5383_v43 = vld [vmem:[#allocation2 + $0x540] sm:$0xff] }
 0x18c   : > { %6580 = vst [vmem:[#allocation23_spill] sm:$0xff] %v5376_v54  ;;  %6581 = vst [vmem:[#allocation24_spill] sm:$0xff] %v5379_v57  ;;  %v1644_v3 = vmax.f32 %v1188_v42, 0.0  ;;  %v1191_v4 = vadd.f32 %v4307_v50, %v5234_v8  ;;  %v1182_v11 = vpop.f32.mrb[19].mxu0  ;;  %v1724_v14 = vmax.f32 %v1508_v44, 0.0  ;;  %v1511_v5 = vadd.f32 %v4387_v52, %v5234_v8  ;;  %v1502_v38 = vpop.f32.mrb[19].mxu1 }
 0x18d   : > { %v1642_v45 = vmax.f32 %v1180_v49, 0.0  ;;  %v1183_v31 = vadd.f32 %v5234_v8, %v1182_v11  ;;  %v1722_v1 = vmax.f32 %v1500_v51, 0.0  ;;  %v1503_v48 = vadd.f32 %v5234_v8, %v1502_v38  ;;  %v5397_v11 = vld [vmem:[#allocation8 + $0x8] ss:$0 sm:$0xff] }
 0x18e   : > { %1772 = vst [vmem:[#allocation2 + $0xf8] sm:$0xff] %v1644_v3  ;;  %v1645_v36 = vmax.f32 %v1191_v4, 0.0  ;;  %1852 = vst [vmem:[#allocation2 + $0x500] sm:$0xff] %v1724_v14  ;;  %v1725_v42 = vmax.f32 %v1511_v5, 0.0  ;;  %v5391_v44 = vmul.f32 %v5229_v7, %v5383_v43  ;;  %v5394_v50 = vmul.f32 %v5241_v20, %v2825_v58 }
 0x18f   : > { %1770 = vst [vmem:[#allocation2 + $0xe0] sm:$0xff] %v1642_v45  ;;  %v1643_v52 = vmax.f32 %v1183_v31, 0.0  ;;  %v1723_v61 = vmax.f32 %v1503_v48, 0.0  ;;  %v2964_v49 = vmul.f32 %v5270_v19, %v1722_v1  ;;  %v5401_v51 = vmul.f32 %v5229_v7, %v5385_v2 }
 0x190   : > { %6582 = vst [vmem:[#allocation25_spill] sm:$0xff] %v5394_v50  ;;  %1773 = vst [vmem:[#allocation2 + $0x100] sm:$0xff] %v1645_v36  ;;  %v5404_v3 = vmul.f32 %v5397_v11, %v1722_v1  ;;  %v2040_v4 = vmul.f32 %v5229_v7, %v1722_v1  ;;  %v5408_v20 = vmul.f32 %v5248_v37, %v1722_v1 }
 0x191   : > { %1853 = vst [vmem:[#allocation2 + $0x508] sm:$0xff] %v1725_v42  ;;  %v5411_v58 = vmul.f32 %v5270_v19, %v1725_v42  ;;  %1771 = vst [vmem:[#allocation2 + $0xe8] sm:$0xff] %v1643_v52  ;;  %v4310_v14 = vpop.f32.mrb[20].mxu0  ;;  %v4390_v5 = vpop.f32.mrb[20].mxu1  ;;  %v2965_v38 = vmul.f32 %v5270_v19, %v1723_v61  ;;  %v3060_v45 = vrot.slane %v2964_v49, 7  ;;  %v5415_v31 = vmul.f32 %v5397_v11, %v1723_v61 }
 0x192   : > { %v5418_v48 = vmul.f32 %v5397_v11, %v1725_v42  ;;  %v1204_v36 = vadd.f32 %v4310_v14, %v5234_v8  ;;  %v1195_v60 = vpop.f32.mrb[21].mxu0  ;;  %v1524_v1 = vadd.f32 %v4390_v5, %v5234_v8  ;;  %v1515_v55 = vpop.f32.mrb[21].mxu1  ;;  %v2041_v18 = vmul.f32 %v5229_v7, %v1723_v61 }
 0x193   : > { %v2139_v52 = vrot.slane %v2040_v4, 7  ;;  %v1196_v47 = vadd.f32 %v5234_v8, %v1195_v60  ;;  %v4311_v46 = vpop.f32.mrb[22].mxu0  ;;  %v1516_v49 = vadd.f32 %v5234_v8, %v1515_v55  ;;  %v4391_v27 = vpop.f32.mrb[22].mxu1  ;;  %v3062_v26 = vrot.slane %v2965_v38, 7 }
 0x194   : > { %6583 = vst [vmem:[#allocation26_spill] sm:$0xff] %v5418_v48  ;;  %v5426_v10 = vmul.f32 %v5248_v37, %v1723_v61  ;;  %v1648_v42 = vmax.f32 %v1204_v36, 0.0  ;;  %v1207_v14 = vadd.f32 %v4311_v46, %v5234_v8  ;;  %v1198_v24 = vpop.f32.mrb[23].mxu0  ;;  %v1728_v63 = vmax.f32 %v1524_v1, 0.0  ;;  %v1518_v62 = vpop.f32.mrb[23].mxu1 }
 0x195   : > { %v1527_v5 = vadd.f32 %v4391_v27, %v5234_v8  ;;  %v1646_v50 = vmax.f32 %v1196_v47, 0.0  ;;  %v1199_v4 = vadd.f32 %v5234_v8, %v1198_v24  ;;  %v1726_v60 = vmax.f32 %v1516_v49, 0.0  ;;  %v2914_v55 = vld [vmem:[#allocation2 + $0x500] sm:$0xff] }
 0x196   : > { %v1519_v57 = vadd.f32 %v5234_v8, %v1518_v62  ;;  %1776 = vst [vmem:[#allocation2 + $0x128] sm:$0xff] %v1648_v42  ;;  %v1649_v38 = vmax.f32 %v1207_v14, 0.0  ;;  %1856 = vst [vmem:[#allocation2 + $0x530] sm:$0xff] %v1728_v63  ;;  %v6584_v36 = vrot.slane %v5284_v28, 7  ;;  %v5438_v1 = vsel %vm2132_vm1, %v3060_v45, %v3062_v26 }
 0x197   : > { %v1729_v61 = vmax.f32 %v1527_v5, 0.0  ;;  %1774 = vst [vmem:[#allocation2 + $0x110] sm:$0xff] %v1646_v50  ;;  %v1647_v27 = vmax.f32 %v1199_v4, 0.0  ;;  %1854 = vst [vmem:[#allocation2 + $0x518] sm:$0xff] %v1726_v60  ;;  %v2141_v47 = vrot.slane %v2041_v18, 7  ;;  %v2967_v62 = vmul.f32 %v5270_v19, %v2914_v55 }
 0x198   : > { %v5435_v46 = vsel %vm2132_vm1, %v6584_v36, %v3060_v45  ;;  %v1727_v24 = vmax.f32 %v1519_v57, 0.0  ;;  %v1991_v49 = vld [vmem:[#allocation2 + $0x508] sm:$0xff]  ;;  %1777 = vst [vmem:[#allocation2 + $0x130] sm:$0xff] %v1649_v38  ;;  %v6585_v63 = vrot.slane %v5292_v34, 7  ;;  %v3067_v42 = vrot.slane %v5411_v58, 7 }
 0x199   : > { %1857 = vst [vmem:[#allocation2 + $0x538] sm:$0xff] %v1729_v61  ;;  %v2043_v26 = vmul.f32 %v5229_v7, %v2914_v55  ;;  %v2044_v50 = vmul.f32 %v5229_v7, %v1991_v49  ;;  %1775 = vst [vmem:[#allocation2 + $0x118] sm:$0xff] %v1647_v27  ;;  %v4314_v45 = vpop.f32.mrb[24].mxu0  ;;  %v4394_v18 = vpop.f32.mrb[24].mxu1  ;;  %v5450_v57 = vsel %vm2132_vm1, %v2139_v52, %v2141_v47  ;;  %v3065_v14 = vrot.slane %v2967_v62, 7 }
 0x19a   : > { %v5444_v28 = vsel %vm2132_vm1, %v6585_v63, %v2139_v52  ;;  %1855 = vst [vmem:[#allocation2 + $0x520] sm:$0xff] %v1727_v24  ;;  %v5453_v5 = vmul.f32 %v5397_v11, %v2914_v55  ;;  %v5456_v34 = vmul.f32 %v5248_v37, %v2914_v55  ;;  %v1220_v58 = vadd.f32 %v4314_v45, %v5234_v8  ;;  %v1211_v4 = vpop.f32.mrb[25].mxu0  ;;  %v1531_v38 = vpop.f32.mrb[25].mxu1 }
 0x19b   : > { %v1540_v60 = vadd.f32 %v4394_v18, %v5234_v8  ;;  %v2144_v61 = vrot.slane %v2043_v26, 7  ;;  %v5461_v36 = vmul.f32 %v5248_v37, %v1991_v49  ;;  %v1212_v52 = vadd.f32 %v5234_v8, %v1211_v4  ;;  %v4315_v27 = vpop.f32.mrb[26].mxu0  ;;  %v4395_v47 = vpop.f32.mrb[26].mxu1 }
 0x19c   : > { %6586 = vst [vmem:[#allocation27_spill] sm:$0xff] %v5453_v5  ;;  %v1532_v24 = vadd.f32 %v5234_v8, %v1531_v38  ;;  %v6587_v62 = vrot.slane %v5305_v56, 7  ;;  %v2146_v63 = vrot.slane %v2044_v50, 7  ;;  %v1652_v45 = vmax.f32 %v1220_v58, 0.0  ;;  %v1214_v41 = vpop.f32.mrb[27].mxu0  ;;  %v1534_v54 = vpop.f32.mrb[27].mxu1 }
 0x19d   : > { %v1223_v18 = vadd.f32 %v4315_v27, %v5234_v8  ;;  %v1732_v26 = vmax.f32 %v1540_v60, 0.0  ;;  %v1543_v49 = vadd.f32 %v4395_v47, %v5234_v8  ;;  %v1650_v40 = vmax.f32 %v1212_v52, 0.0  ;;  %v5486_v47 = vld [vmem:[#allocation2 + $0x530] sm:$0xff] }
 0x19e   : > { %v5468_v55 = vsel %vm2132_vm1, %v6587_v62, %v3065_v14  ;;  %v1215_v4 = vadd.f32 %v5234_v8, %v1214_v41  ;;  %v1730_v17 = vmax.f32 %v1532_v24, 0.0  ;;  %v1535_v38 = vadd.f32 %v5234_v8, %v1534_v54  ;;  %1780 = vst [vmem:[#allocation2 + $0x158] sm:$0xff] %v1652_v45  ;;  %v2917_v27 = vld [vmem:[#allocation2 + $0x518] sm:$0xff] }
 0x19f   : > { %6588 = vst [vmem:[#allocation28_spill] sm:$0xff] %v5468_v55  ;;  %v1653_v56 = vmax.f32 %v1223_v18, 0.0  ;;  %1860 = vst [vmem:[#allocation2 + $0x560] sm:$0xff] %v1732_v26  ;;  %v1733_v62 = vmax.f32 %v1543_v49, 0.0  ;;  %v5475_v50 = vsel %vm2132_vm1, %v3065_v14, %v3067_v42  ;;  %v6590_v58 = vrot.slane %v5295_v35, 7 }
 0x1a0   : > { %6589 = vst [vmem:[#allocation29_spill] sm:$0xff] %v5475_v50  ;;  %1778 = vst [vmem:[#allocation2 + $0x140] sm:$0xff] %v1650_v40  ;;  %v1651_v52 = vmax.f32 %v1215_v4, 0.0  ;;  %v1731_v41 = vmax.f32 %v1535_v38, 0.0  ;;  %v5483_v24 = vsel %vm2132_vm1, %v2144_v61, %v2146_v63  ;;  %v2970_v54 = vmul.f32 %v5270_v19, %v2917_v27 }
 0x1a1   : > { %v5480_v60 = vsel %vm2132_vm1, %v6590_v58, %v2144_v61  ;;  %1858 = vst [vmem:[#allocation2 + $0x548] sm:$0xff] %v1730_v17  ;;  %1781 = vst [vmem:[#allocation2 + $0x160] sm:$0xff] %v1653_v56  ;;  %v2918_v42 = vld [vmem:[#allocation2 + $0x520] sm:$0xff]  ;;  %v5489_v35 = vmul.f32 %v5397_v11, %v2917_v27  ;;  %v2046_v14 = vmul.f32 %v5229_v7, %v2917_v27  ;;  %v5495_v17 = vld [vmem:[#allocation2 + $0x538] sm:$0xff]  ;;  %v4318_v63 = vpop.f32.mrb[28].mxu0  ;;  %v4398_v45 = vpop.f32.mrb[28].mxu1 }
 0x1a2   : > { %1861 = vst [vmem:[#allocation2 + $0x568] sm:$0xff] %v1733_v62  ;;  %v5493_v40 = vmul.f32 %v5248_v37, %v2917_v27  ;;  %v5499_v61 = vmul.f32 %v5270_v19, %v5486_v47  ;;  %1779 = vst [vmem:[#allocation2 + $0x148] sm:$0xff] %v1651_v52  ;;  %v2971_v18 = vmul.f32 %v5270_v19, %v2918_v42  ;;  %v3070_v26 = vrot.slane %v2970_v54, 7  ;;  %v1227_v56 = vpop.f32.mrb[29].mxu0  ;;  %v1547_v58 = vpop.f32.mrb[29].mxu1 }
 0x1a3   : > { %6591 = vst [vmem:[#allocation30_spill] sm:$0xff] %v5489_v35  ;;  %1859 = vst [vmem:[#allocation2 + $0x550] sm:$0xff] %v1731_v41  ;;  %v5503_v49 = vmul.f32 %v5397_v11, %v2918_v42  ;;  %v2974_v4 = vmul.f32 %v5270_v19, %v5495_v17  ;;  %v1236_v38 = vadd.f32 %v4318_v63, %v5234_v8  ;;  %v2149_v52 = vrot.slane %v2046_v14, 7  ;;  %v4319_v30 = vpop.f32.mrb[30].mxu0  ;;  %v4399_v48 = vpop.f32.mrb[30].mxu1 }
 0x1a4   : > { %6592 = vst [vmem:[#allocation31_spill] sm:$0xff] %v5493_v40  ;;  %v1556_v62 = vadd.f32 %v4398_v45, %v5234_v8  ;;  %v2047_v27 = vmul.f32 %v5229_v7, %v2918_v42  ;;  %v1228_v41 = vadd.f32 %v5234_v8, %v1227_v56  ;;  %v1548_v54 = vadd.f32 %v5234_v8, %v1547_v58  ;;  %v1230_v5 = vpop.f32.mrb[31].mxu0  ;;  %v1550_v55 = vpop.f32.mrb[31].mxu1 }
 0x1a5   : > { %6593 = vst [vmem:[#allocation32_spill] sm:$0xff] %v5503_v49  ;;  %v3072_v40 = vrot.slane %v2971_v18, 7  ;;  %v5513_v49 = vmul.f32 %v5248_v37, %v2918_v42  ;;  %v1656_v35 = vmax.f32 %v1236_v38, 0.0  ;;  %v1239_v63 = vadd.f32 %v4319_v30, %v5234_v8 }
 0x1a6   : > { %v1736_v50 = vmax.f32 %v1556_v62, 0.0  ;;  %v1559_v45 = vadd.f32 %v4399_v48, %v5234_v8  ;;  %v1654_v9 = vmax.f32 %v1228_v41, 0.0  ;;  %v1231_v14 = vadd.f32 %v5234_v8, %v1230_v5 }
 0x1a7   : > { %6594 = vst [vmem:[#allocation33_spill] sm:$0xff] %v5513_v49  ;;  %v1734_v56 = vmax.f32 %v1548_v54, 0.0  ;;  %v1551_v12 = vadd.f32 %v5234_v8, %v1550_v55  ;;  %1784 = vst [vmem:[#allocation2 + $0x188] sm:$0xff] %v1656_v35  ;;  %v1657_v58 = vmax.f32 %v1239_v63, 0.0  ;;  %v6595_v42 = vrot.slane %v5328_v32, 7 }
 0x1a8   : > { %1864 = vst [vmem:[#allocation2 + $0x590] sm:$0xff] %v1736_v50  ;;  %v1737_v18 = vmax.f32 %v1559_v45, 0.0  ;;  %v5525_v30 = vsel %vm2132_vm1, %v3070_v26, %v3072_v40  ;;  %1782 = vst [vmem:[#allocation2 + $0x170] sm:$0xff] %v1654_v9  ;;  %v1655_v48 = vmax.f32 %v1231_v14, 0.0  ;;  %v2151_v5 = vrot.slane %v2047_v27, 7 }
 0x1a9   : > { %v5522_v38 = vsel %vm2132_vm1, %v6595_v42, %v3070_v26  ;;  %6596 = vst [vmem:[#allocation34_spill] sm:$0xff] %v5525_v30  ;;  %1862 = vst [vmem:[#allocation2 + $0x578] sm:$0xff] %v1734_v56  ;;  %v1735_v62 = vmax.f32 %v1551_v12, 0.0  ;;  %v3075_v41 = vrot.slane %v5499_v61, 7  ;;  %v6597_v55 = vrot.slane %v5331_v33, 7  ;;  %v4322_v12 = vpop.f32.mrb[32].mxu0 }
 0x1aa   : > { %1785 = vst [vmem:[#allocation2 + $0x190] sm:$0xff] %v1657_v58  ;;  %1865 = vst [vmem:[#allocation2 + $0x598] sm:$0xff] %v1737_v18  ;;  %v3077_v32 = vrot.slane %v2974_v4, 7  ;;  %v5535_v35 = vmul.f32 %v5397_v11, %v5486_v47  ;;  %v2049_v9 = vmul.f32 %v5229_v7, %v5486_v47  ;;  %v4402_v40 = vpop.f32.mrb[32].mxu1  ;;  %v5540_v61 = vsel %vm2132_vm1, %v2149_v52, %v2151_v5  ;;  %v1243_v45 = vpop.f32.mrb[33].mxu0 }
 0x1ab   : > { %v5531_v50 = vsel %vm2132_vm1, %v6597_v55, %v2149_v52  ;;  %1783 = vst [vmem:[#allocation2 + $0x178] sm:$0xff] %v1655_v48  ;;  %1863 = vst [vmem:[#allocation2 + $0x580] sm:$0xff] %v1735_v62  ;;  %v6600_v33 = vrot.slane %v5338_v59, 7  ;;  %v5549_v4 = vmul.f32 %v5397_v11, %v5495_v17  ;;  %v2050_v27 = vmul.f32 %v5229_v7, %v5495_v17  ;;  %v1563_v14 = vpop.f32.mrb[33].mxu1  ;;  %v4323_v18 = vpop.f32.mrb[34].mxu0 }
 0x1ac   : > { %6598 = vst [vmem:[#allocation35_spill] sm:$0xff] %v5535_v35  ;;  %6599 = vst [vmem:[#allocation36_spill] sm:$0xff] %v5540_v61  ;;  %v1252_v54 = vadd.f32 %v4322_v12, %v5234_v8  ;;  %v1572_v63 = vadd.f32 %v4402_v40, %v5234_v8  ;;  %v5556_v52 = vsel %vm2132_vm1, %v3075_v41, %v3077_v32  ;;  %v4403_v42 = vpop.f32.mrb[34].mxu1  ;;  %v2154_v7 = vrot.slane %v2049_v9, 7  ;;  %v5566_v40 = vld [vmem:[#allocation8 + $0x5] ss:$0 sm:$0xff] }
 0x1ad   : > { %v5545_v26 = vsel %vm2132_vm1, %v6600_v33, %v3075_v41  ;;  %6602 = vst [vmem:[#allocation38_spill] sm:$0xff] %v5549_v4  ;;  %6603 = vst [vmem:[#allocation39_spill] sm:$0xff] %v5556_v52  ;;  %v5560_v59 = vmul.f32 %v5248_v37, %v5486_v47  ;;  %v1244_v56 = vadd.f32 %v5234_v8, %v1243_v45  ;;  %v2156_v48 = vrot.slane %v2050_v27, 7  ;;  %v1246_v41 = vpop.f32.mrb[35].mxu0  ;;  %v1566_v32 = vpop.f32.mrb[35].mxu1 }
 0x1ae   : > { %6601 = vst [vmem:[#allocation37_spill] sm:$0xff] %v5545_v26  ;;  %v1564_v58 = vadd.f32 %v5234_v8, %v1563_v14  ;;  %v1660_v62 = vmax.f32 %v1252_v54, 0.0  ;;  %v1740_v5 = vmax.f32 %v1572_v63, 0.0  ;;  %v1255_v55 = vadd.f32 %v4323_v18, %v5234_v8 }
 0x1af   : > { %6604 = vst [vmem:[#allocation40_spill] sm:$0xff] %v5560_v59  ;;  %v1575_v12 = vadd.f32 %v4403_v42, %v5234_v8  ;;  %v1658_v47 = vmax.f32 %v1244_v56, 0.0  ;;  %v1247_v45 = vadd.f32 %v5234_v8, %v1246_v41  ;;  %v1567_v14 = vadd.f32 %v5234_v8, %v1566_v32 }
 0x1b0   : > { %v1738_v33 = vmax.f32 %v1564_v58, 0.0  ;;  %1868 = vst [vmem:[#allocation2 + $0x5c0] sm:$0xff] %v1740_v5  ;;  %v1661_v4 = vmax.f32 %v1255_v55, 0.0  ;;  %v2504_v27 = vmul.f32 %v5250_v39, %v1660_v62  ;;  %v5573_v54 = vmul.f32 %v5248_v37, %v5495_v17 }
 0x1b1   : > { %v1741_v9 = vmax.f32 %v1575_v12, 0.0  ;;  %v1659_v63 = vmax.f32 %v1247_v45, 0.0  ;;  %v1739_v18 = vmax.f32 %v1567_v14, 0.0  ;;  %v2501_v42 = vmul.f32 %v5250_v39, %v1658_v47  ;;  %v4326_v37 = vpop.f32.mrb[36].mxu0  ;;  %v4406_v17 = vpop.f32.mrb[36].mxu1 }
 0x1b2   : > { %6605 = vst [vmem:[#allocation41_spill] sm:$0xff] %v5573_v54  ;;  %1866 = vst [vmem:[#allocation2 + $0x5a8] sm:$0xff] %v1738_v33  ;;  %v5577_v56 = vmul.f32 %v5566_v40, %v1660_v62  ;;  %v2745_v58 = vmul.f32 %v5566_v40, %v1658_v47  ;;  %v2505_v5 = vmul.f32 %v5250_v39, %v1661_v4  ;;  %v2602_v55 = vrot.slane %v2504_v27, 7 }
 0x1b3   : > { %1869 = vst [vmem:[#allocation2 + $0x5c8] sm:$0xff] %v1741_v9  ;;  %v5582_v12 = vmul.f32 %v5566_v40, %v1661_v4  ;;  %1867 = vst [vmem:[#allocation2 + $0x5b0] sm:$0xff] %v1739_v18  ;;  %v2502_v41 = vmul.f32 %v5250_v39, %v1659_v63  ;;  %v2597_v32 = vrot.slane %v2501_v42, 7  ;;  %v2746_v33 = vmul.f32 %v5566_v40, %v1659_v63  ;;  %v1259_v9 = vpop.f32.mrb[37].mxu0  ;;  %v1579_v4 = vpop.f32.mrb[37].mxu1 }
 0x1b4   : > { %v6606_v62 = vrot.slane %v5341_v0, 7  ;;  %v1268_v47 = vadd.f32 %v4326_v37, %v5234_v8  ;;  %v1588_v14 = vadd.f32 %v4406_v17, %v5234_v8  ;;  %v2604_v27 = vrot.slane %v2505_v5, 7  ;;  %v4327_v63 = vpop.f32.mrb[38].mxu0  ;;  %v4407_v52 = vpop.f32.mrb[38].mxu1 }
 0x1b5   : > { %v5594_v18 = vsel %vm2132_vm1, %v2154_v7, %v2156_v48  ;;  %v1260_v35 = vadd.f32 %v5234_v8, %v1259_v9  ;;  %v1580_v42 = vadd.f32 %v5234_v8, %v1579_v4  ;;  %v6609_v0 = vrot.slane %v5258_v53, 7  ;;  %v1262_v59 = vpop.f32.mrb[39].mxu0 }
 0x1b6   : > { %v5589_v45 = vsel %vm2132_vm1, %v6606_v62, %v2154_v7  ;;  %6608 = vst [vmem:[#allocation43_spill] sm:$0xff] %v5594_v18  ;;  %v2599_v26 = vrot.slane %v2502_v41, 7  ;;  %v1664_v37 = vmax.f32 %v1268_v47, 0.0  ;;  %v1744_v54 = vmax.f32 %v1588_v14, 0.0  ;;  %v1582_v7 = vpop.f32.mrb[39].mxu1 }
 0x1b7   : > { %6607 = vst [vmem:[#allocation42_spill] sm:$0xff] %v5589_v45  ;;  %v2598_v62 = vsel %vm2132_vm1, %v6609_v0, %v2597_v32  ;;  %v1271_v17 = vadd.f32 %v4327_v63, %v5234_v8  ;;  %v1591_v5 = vadd.f32 %v4407_v52, %v5234_v8  ;;  %v1662_v48 = vmax.f32 %v1260_v35, 0.0 }
 0x1b8   : > { %v1742_v18 = vmax.f32 %v1580_v42, 0.0  ;;  %v1263_v9 = vadd.f32 %v5234_v8, %v1262_v59  ;;  %v1583_v4 = vadd.f32 %v5234_v8, %v1582_v7  ;;  %1792 = vst [vmem:[#allocation2 + $0x200] sm:$0xff] %v1664_v37  ;;  %1872 = vst [vmem:[#allocation2 + $0x5f0] sm:$0xff] %v1744_v54  ;;  %v2600_v41 = vsel %vm2132_vm1, %v2597_v32, %v2599_v26 }
 0x1b9   : > { %v1665_v53 = vmax.f32 %v1271_v17, 0.0  ;;  %v1745_v45 = vmax.f32 %v1591_v5, 0.0  ;;  %v2708_v47 = vadd.f32 %v2598_v62, %v5344_v15  ;;  %v2709_v52 = vadd.f32 %v2600_v41, %v5347_v16  ;;  %v4330_v32 = vpop.f32.mrb[40].mxu0 }
 0x1ba   : > { %1870 = vst [vmem:[#allocation2 + $0x5d8] sm:$0xff] %v1742_v18  ;;  %v1663_v14 = vmax.f32 %v1263_v9, 0.0  ;;  %v1743_v63 = vmax.f32 %v1583_v4, 0.0  ;;  %v5609_v35 = vsel %vm2132_vm1, %v2602_v55, %v2604_v27  ;;  %v6610_v8 = vrot.slane %v5267_v13, 7  ;;  %v4410_v18 = vpop.f32.mrb[40].mxu1  ;;  %v1275_v0 = vpop.f32.mrb[41].mxu0 }
 0x1bb   : > { %1873 = vst [vmem:[#allocation2 + $0x5f8] sm:$0xff] %v1745_v45  ;;  %v5611_v59 = vadd.f32 %v2745_v58, %v2708_v47  ;;  %v2507_v26 = vmul.f32 %v5250_v39, %v1662_v48  ;;  %v5620_v15 = vmul.f32 %v5566_v40, %v1662_v48  ;;  %v5622_v16 = vadd.f32 %v2746_v33, %v2709_v52  ;;  %v1595_v33 = vpop.f32.mrb[41].mxu1  ;;  %v4331_v7 = vpop.f32.mrb[42].mxu0 }
 0x1bc   : > { %v5616_v54 = vsel %vm2132_vm1, %v6610_v8, %v2602_v55  ;;  %1871 = vst [vmem:[#allocation2 + $0x5e0] sm:$0xff] %v1743_v63  ;;  %v2508_v27 = vmul.f32 %v5250_v39, %v1663_v14  ;;  %v5626_v58 = vmul.f32 %v5566_v40, %v1663_v14  ;;  %v5629_v13 = vmul.f32 %v5250_v39, %v1665_v53  ;;  %v5634_v55 = vld [vmem:[%s6533_s2] ss:$0 sm:$0xff]  ;;  %v4411_v48 = vpop.f32.mrb[42].mxu1  ;;  %v1278_v52 = vpop.f32.mrb[43].mxu0 }
 0x1bd   : > { %v1284_v45 = vadd.f32 %v5634_v55, %v4330_v32  ;;  %v1604_v42 = vadd.f32 %v5634_v55, %v4410_v18  ;;  %v2607_v62 = vrot.slane %v2507_v26, 7  ;;  %v5639_v37 = vmul.f32 %v5566_v40, %v1665_v53  ;;  %v1598_v53 = vpop.f32.mrb[43].mxu1 }
 0x1be   : > { %v1276_v17 = vadd.f32 %v5634_v55, %v1275_v0  ;;  %v1596_v5 = vadd.f32 %v5634_v55, %v1595_v33  ;;  %v2609_v9 = vrot.slane %v2508_v27, 7  ;;  %v5645_v4 = vmul.f32 %v5270_v19, %v5383_v43  ;;  %v5655_v33 = vld [vmem:[#allocation2 + $0x548] sm:$0xff] }
 0x1bf   : > { %6611 = vst [vmem:[#allocation44_spill] sm:$0xff] %v5639_v37  ;;  %v1668_v41 = vmax.f32 %v1284_v45, 0.0  ;;  %v1748_v47 = vmax.f32 %v1604_v42, 0.0  ;;  %v1287_v14 = vadd.f32 %v5634_v55, %v4331_v7  ;;  %v1607_v63 = vadd.f32 %v5634_v55, %v4411_v48  ;;  %v2457_v0 = vld [vmem:[#allocation2 + $0x200] sm:$0xff] }
 0x1c0   : > { %v1666_v8 = vmax.f32 %v1276_v17, 0.0  ;;  %v1746_v26 = vmax.f32 %v1596_v5, 0.0  ;;  %v1279_v32 = vadd.f32 %v5634_v55, %v1278_v52  ;;  %v1599_v18 = vadd.f32 %v5634_v55, %v1598_v53 }
 0x1c1   : > { %1796 = vst [vmem:[#allocation2 + $0x230] sm:$0xff] %v1668_v41  ;;  %1876 = vst [vmem:[#allocation2 + $0x620] sm:$0xff] %v1748_v47  ;;  %v1669_v27 = vmax.f32 %v1287_v14, 0.0  ;;  %v1749_v43 = vmax.f32 %v1607_v63, 0.0  ;;  %v5652_v45 = vsel %vm2132_vm1, %v2607_v62, %v2609_v9  ;;  %v2614_v42 = vrot.slane %v5629_v13, 7  ;;  %v5663_v47 = vld [vmem:[#allocation2 + $0x550] sm:$0xff] }
 0x1c2   : > { %1794 = vst [vmem:[#allocation2 + $0x218] sm:$0xff] %v1666_v8  ;;  %1874 = vst [vmem:[#allocation2 + $0x608] sm:$0xff] %v1746_v26  ;;  %v1667_v17 = vmax.f32 %v1279_v32, 0.0  ;;  %v1747_v5 = vmax.f32 %v1599_v18, 0.0  ;;  %v6612_v7 = vrot.slane %v5273_v21, 7  ;;  %v2510_v41 = vmul.f32 %v5250_v39, %v2457_v0  ;;  %v4414_v63 = vpop.f32.mrb[44].mxu1 }
 0x1c3   : > { %1797 = vst [vmem:[#allocation2 + $0x238] sm:$0xff] %v1669_v27  ;;  %1877 = vst [vmem:[#allocation2 + $0x628] sm:$0xff] %v1749_v43  ;;  %v5666_v9 = vmul.f32 %v5566_v40, %v2457_v0  ;;  %v2976_v13 = vmul.f32 %v5270_v19, %v5655_v33  ;;  %v2977_v14 = vmul.f32 %v5270_v19, %v5663_v47  ;;  %v3079_v21 = vrot.slane %v5645_v4, 7  ;;  %v5681_v8 = vld [vmem:[#allocation8] ss:$0 sm:$0xff]  ;;  %v1611_v18 = vpop.f32.mrb[45].mxu1 }
 0x1c4   : > { %v5660_v48 = vsel %vm2132_vm1, %v6612_v7, %v2607_v62  ;;  %1795 = vst [vmem:[#allocation2 + $0x220] sm:$0xff] %v1667_v17  ;;  %1875 = vst [vmem:[#allocation2 + $0x610] sm:$0xff] %v1747_v5  ;;  %v4334_v62 = vpop.f32.mrb[44].mxu0  ;;  %v2612_v39 = vrot.slane %v2510_v41, 7  ;;  %v5675_v52 = vmul.f32 %v5397_v11, %v5655_v33  ;;  %v5679_v53 = vmul.f32 %v5397_v11, %v5663_v47  ;;  %v4415_v7 = vpop.f32.mrb[46].mxu1 }
 0x1c5   : > { %6613 = vst [vmem:[#allocation45_spill] sm:$0xff] %v5666_v9  ;;  %v5685_v19 = vmul.f32 %v5681_v8, %v5655_v33  ;;  %v1300_v4 = vadd.f32 %v5634_v55, %v4334_v62  ;;  %v1620_v26 = vadd.f32 %v5634_v55, %v4414_v63  ;;  %v1291_v32 = vpop.f32.mrb[45].mxu0  ;;  %v3080_v0 = vrot.slane %v2976_v13, 7  ;;  %v1614_v49 = vpop.f32.mrb[47].mxu1 }
 0x1c6   : > { %6614 = vst [vmem:[#allocation46_spill] sm:$0xff] %v5675_v52  ;;  %6615 = vst [vmem:[#allocation47_spill] sm:$0xff] %v5679_v53  ;;  %v2053_v27 = vmul.f32 %v5681_v8, %v5663_v47  ;;  %v1292_v43 = vadd.f32 %v5634_v55, %v1291_v32  ;;  %v1612_v17 = vadd.f32 %v5634_v55, %v1611_v18  ;;  %v4335_v5 = vpop.f32.mrb[46].mxu0  ;;  %v6616_v41 = vrot.slane %v5276_v22, 7 }
 0x1c7   : > { %v3082_v62 = vrot.slane %v2977_v14, 7  ;;  %v1672_v52 = vmax.f32 %v1300_v4, 0.0  ;;  %v1752_v63 = vmax.f32 %v1620_v26, 0.0  ;;  %v1303_v37 = vadd.f32 %v5634_v55, %v4335_v5  ;;  %v1294_v9 = vpop.f32.mrb[47].mxu0 }
 0x1c8   : > { %v5696_v53 = vsel %vm2132_vm1, %v6616_v41, %v2612_v39  ;;  %v1623_v13 = vadd.f32 %v5634_v55, %v4415_v7  ;;  %v1670_v61 = vmax.f32 %v1292_v43, 0.0  ;;  %v1750_v32 = vmax.f32 %v1612_v17, 0.0  ;;  %v5708_v17 = vld [vmem:[#allocation8 + $0x3] ss:$0 sm:$0xff] }
 0x1c9   : > { %v1295_v18 = vadd.f32 %v5634_v55, %v1294_v9  ;;  %v1615_v30 = vadd.f32 %v5634_v55, %v1614_v49  ;;  %1800 = vst [vmem:[#allocation2 + $0x260] sm:$0xff] %v1672_v52  ;;  %1880 = vst [vmem:[#allocation2 + $0x650] sm:$0xff] %v1752_v63  ;;  %v1673_v22 = vmax.f32 %v1303_v37, 0.0  ;;  %v5703_v14 = vsel %vm2132_vm1, %v2612_v39, %v2614_v42  ;;  %v2460_v4 = vld [vmem:[#allocation2 + $0x218] sm:$0xff]  ;;  %v2463_v37 = vld [vmem:[#allocation2 + $0x230] sm:$0xff]  ;;  %v4338_v7 = vpop.f32.mrb[48].mxu0 }
 0x1ca   : > { %v1753_v41 = vmax.f32 %v1623_v13, 0.0  ;;  %v5706_v26 = vsel %vm2132_vm1, %v3079_v21, %v3080_v0  ;;  %1798 = vst [vmem:[#allocation2 + $0x248] sm:$0xff] %v1670_v61  ;;  %1878 = vst [vmem:[#allocation2 + $0x638] sm:$0xff] %v1750_v32  ;;  %v2513_v9 = vmul.f32 %v5708_v17, %v2460_v4  ;;  %v5712_v49 = vsel %vm2132_vm1, %v3080_v0, %v3082_v62  ;;  %v5723_v13 = vld [vmem:[#allocation8 + $0x2] ss:$0 sm:$0xff] }
 0x1cb   : > { %6617 = vst [vmem:[#allocation48_spill] sm:$0xff] %v5706_v26  ;;  %v1671_v5 = vmax.f32 %v1295_v18, 0.0  ;;  %v1751_v43 = vmax.f32 %v1615_v30, 0.0  ;;  %6618 = vst [vmem:[#allocation49_spill] sm:$0xff] %v5712_v49  ;;  %v2461_v42 = vld [vmem:[#allocation2 + $0x220] sm:$0xff]  ;;  %v5715_v39 = vmul.f32 %v5566_v40, %v2460_v4  ;;  %v2158_v21 = vrot.slane %v5391_v44, 7 }
 0x1cc   : > { %1801 = vst [vmem:[#allocation2 + $0x268] sm:$0xff] %v1673_v22  ;;  %1881 = vst [vmem:[#allocation2 + $0x658] sm:$0xff] %v1753_v41  ;;  %v2159_v61 = vrot.slane %v5685_v19, 7  ;;  %v2161_v52 = vrot.slane %v2053_v27, 7  ;;  %v2464_v30 = vld [vmem:[#allocation2 + $0x238] sm:$0xff]  ;;  %v2514_v63 = vmul.f32 %v5708_v17, %v2461_v42  ;;  %v2617_v0 = vrot.slane %v2513_v9, 7 }
 0x1cd   : > { %6619 = vst [vmem:[#allocation50_spill] sm:$0xff] %v5715_v39  ;;  %1799 = vst [vmem:[#allocation2 + $0x250] sm:$0xff] %v1671_v5  ;;  %v5721_v62 = vmul.f32 %v5566_v40, %v2461_v42  ;;  %v5727_v32 = vmul.f32 %v5723_v13, %v5655_v33  ;;  %v1316_v44 = vadd.f32 %v5634_v55, %v4338_v7  ;;  %v1307_v19 = vpop.f32.mrb[49].mxu0  ;;  %v6623_v7 = vrot.slane %v5287_v29, 7 }
 0x1ce   : > { %1879 = vst [vmem:[#allocation2 + $0x640] sm:$0xff] %v1751_v43  ;;  %6621 = vst [vmem:[#allocation52_spill] sm:$0xff] %v5723_v13  ;;  %v5731_v27 = vsel %vm2132_vm1, %v2158_v21, %v2159_v61  ;;  %v5735_v18 = vmul.f32 %v5723_v13, %v5663_v47  ;;  %v2516_v22 = vmul.f32 %v5708_v17, %v2463_v37  ;;  %v4339_v4 = vpop.f32.mrb[50].mxu0  ;;  %v2619_v5 = vrot.slane %v2514_v63, 7 }
 0x1cf   : > { %6620 = vst [vmem:[#allocation51_spill] sm:$0xff] %v5721_v62  ;;  %v1308_v41 = vadd.f32 %v5634_v55, %v1307_v19  ;;  %v5740_v43 = vsel %vm2132_vm1, %v2159_v61, %v2161_v52  ;;  %v2517_v33 = vmul.f32 %v5708_v17, %v2464_v30  ;;  %v1676_v9 = vmax.f32 %v1316_v44, 0.0  ;;  %v1310_v21 = vpop.f32.mrb[51].mxu0  ;;  %v2926_v61 = vld [vmem:[#allocation2 + $0x560] sm:$0xff] }
 0x1d0   : > { %6622 = vst [vmem:[#allocation53_spill] sm:$0xff] %v5735_v18  ;;  %v1319_v42 = vadd.f32 %v5634_v55, %v4339_v4  ;;  %v5747_v47 = vsel %vm2132_vm1, %v6623_v7, %v2617_v0  ;;  %v2622_v49 = vrot.slane %v2516_v22, 7  ;;  %v1311_v19 = vadd.f32 %v5634_v55, %v1310_v21  ;;  %v2927_v7 = vld [vmem:[#allocation2 + $0x568] sm:$0xff] }
 0x1d1   : > { %6624 = vst [vmem:[#allocation54_spill] sm:$0xff] %v5747_v47  ;;  %v1674_v26 = vmax.f32 %v1308_v41, 0.0  ;;  %v2624_v62 = vrot.slane %v2517_v33, 7  ;;  %v5751_v63 = vmul.f32 %v5566_v40, %v2463_v37  ;;  %1804 = vst [vmem:[#allocation2 + $0x290] sm:$0xff] %v1676_v9  ;;  %v5754_v44 = vsel %vm2132_vm1, %v2617_v0, %v2619_v5  ;;  %v5761_v22 = vld [vmem:[#allocation8 + $0x6] ss:$0 sm:$0xff] }
 0x1d2   : > { %v1677_v52 = vmax.f32 %v1319_v42, 0.0  ;;  %6626 = vst [vmem:[#allocation56_spill] sm:$0xff] %v5754_v44  ;;  %v6627_v4 = vrot.slane %v5279_v23, 7  ;;  %6629 = vst [vmem:[#allocation58_spill] sm:$0xff] %v5761_v22  ;;  %v2978_v41 = vmul.f32 %v5761_v22, %v5385_v2  ;;  %v1675_v37 = vmax.f32 %v1311_v19, 0.0  ;;  %v4342_v2 = vpop.f32.mrb[52].mxu0 }
 0x1d3   : > { %6625 = vst [vmem:[#allocation55_spill] sm:$0xff] %v5751_v63  ;;  %1802 = vst [vmem:[#allocation2 + $0x278] sm:$0xff] %v1674_v26  ;;  %v5766_v33 = vmul.f32 %v5566_v40, %v2464_v30  ;;  %v2979_v9 = vmul.f32 %v5761_v22, %v2926_v61  ;;  %v2980_v0 = vmul.f32 %v5761_v22, %v2927_v7  ;;  %v2469_v47 = vld [vmem:[#allocation2 + $0x260] sm:$0xff]  ;;  %v2931_v18 = vld [vmem:[#allocation2 + $0x588] sm:$0xff] }
 0x1d4   : > { %v5759_v29 = vsel %vm2132_vm1, %v6627_v4, %v2622_v49  ;;  %1805 = vst [vmem:[#allocation2 + $0x298] sm:$0xff] %v1677_v52  ;;  %v5771_v23 = vsel %vm2132_vm1, %v2622_v49, %v2624_v62  ;;  %v3084_v5 = vrot.slane %v2978_v41, 7  ;;  %v5774_v42 = vmul.f32 %v5397_v11, %v2926_v61  ;;  %1803 = vst [vmem:[#allocation2 + $0x280] sm:$0xff] %v1675_v37  ;;  %v1323_v52 = vpop.f32.mrb[53].mxu0 }
 0x1d5   : > { %6628 = vst [vmem:[#allocation57_spill] sm:$0xff] %v5759_v29  ;;  %6630 = vst [vmem:[#allocation59_spill] sm:$0xff] %v5766_v33  ;;  %v2055_v21 = vmul.f32 %v5681_v8, %v2926_v61  ;;  %v3085_v26 = vrot.slane %v2979_v9, 7  ;;  %v3087_v19 = vrot.slane %v2980_v0, 7  ;;  %v2056_v30 = vmul.f32 %v5681_v8, %v2927_v7  ;;  %v4343_v63 = vpop.f32.mrb[54].mxu0  ;;  %v2467_v29 = vld [vmem:[#allocation2 + $0x250] sm:$0xff] }
 0x1d6   : > { %6631 = vst [vmem:[#allocation60_spill] sm:$0xff] %v5771_v23  ;;  %6632 = vst [vmem:[#allocation61_spill] sm:$0xff] %v5774_v42  ;;  %v2163_v4 = vrot.slane %v5401_v51, 7  ;;  %v1332_v33 = vadd.f32 %v5634_v55, %v4342_v2  ;;  %v5781_v49 = vmul.f32 %v5397_v11, %v2927_v7  ;;  %v5784_v41 = vmul.f32 %v5723_v13, %v2926_v61  ;;  %v2358_v42 = vld [vmem:[#allocation2 + $0xb0] sm:$0xff]  ;;  %v2465_v2 = vld [vmem:[#allocation2 + $0x240] sm:$0xff] }
 0x1d7   : > { %v2164_v62 = vrot.slane %v2055_v21, 7  ;;  %v1324_v37 = vadd.f32 %v5634_v55, %v1323_v52  ;;  %v5788_v9 = vsel %vm2132_vm1, %v3084_v5, %v3085_v26  ;;  %v2166_v0 = vrot.slane %v2056_v30, 7  ;;  %v2466_v23 = vld [vmem:[#allocation2 + $0x248] sm:$0xff]  ;;  %v2928_v5 = vld [vmem:[#allocation2 + $0x570] sm:$0xff] }
 0x1d8   : > { %6633 = vst [vmem:[#allocation62_spill] sm:$0xff] %v5781_v49  ;;  %6634 = vst [vmem:[#allocation63_spill] sm:$0xff] %v5784_v41  ;;  %v5791_v51 = vmul.f32 %v5723_v13, %v2927_v7  ;;  %v1680_v39 = vmax.f32 %v1332_v33, 0.0  ;;  %v1335_v21 = vadd.f32 %v5634_v55, %v4343_v63  ;;  %v1326_v49 = vpop.f32.mrb[55].mxu0  ;;  %v5795_v61 = vsel %vm2132_vm1, %v3085_v26, %v3087_v19  ;;  %v2359_v41 = vld [vmem:[#allocation2 + $0xb8] sm:$0xff] }
 0x1d9   : > { %6635 = vst [vmem:[#allocation64_spill] sm:$0xff] %v5788_v9  ;;  %6637 = vst [vmem:[#allocation66_spill] sm:$0xff] %v5795_v61  ;;  %v5798_v52 = vsel %vm2132_vm1, %v2163_v4, %v2164_v62  ;;  %v1678_v9 = vmax.f32 %v1324_v37, 0.0  ;;  %v1327_v30 = vadd.f32 %v5634_v55, %v1326_v49  ;;  %v5802_v7 = vsel %vm2132_vm1, %v2164_v62, %v2166_v0  ;;  %v2929_v63 = vld [vmem:[#allocation2 + $0x578] sm:$0xff]  ;;  %v2930_v37 = vld [vmem:[#allocation2 + $0x580] sm:$0xff] }
 0x1da   : > { %6636 = vst [vmem:[#allocation65_spill] sm:$0xff] %v5791_v51  ;;  %6638 = vst [vmem:[#allocation67_spill] sm:$0xff] %v5798_v52  ;;  %v5804_v51 = vld [vmem:[#allocation8 + $0x4] ss:$0 sm:$0xff]  ;;  %v1681_v26 = vmax.f32 %v1335_v21, 0.0  ;;  %v2518_v19 = vmul.f32 %v5708_v17, %v2465_v2  ;;  %v2519_v4 = vmul.f32 %v5708_v17, %v2466_v23  ;;  %v2520_v61 = vmul.f32 %v5708_v17, %v2467_v29 }
 0x1db   : > { %6639 = vst [vmem:[#allocation68_spill] sm:$0xff] %v5802_v7  ;;  %6640 = vst [vmem:[#allocation69_spill] sm:$0xff] %v5804_v51  ;;  %v5807_v33 = vmul.f32 %v5804_v51, %v2358_v42  ;;  %v1679_v49 = vmax.f32 %v1327_v30, 0.0  ;;  %v5813_v62 = vmul.f32 %v5804_v51, %v2359_v41  ;;  %v5816_v0 = vmul.f32 %v5566_v40, %v2466_v23  ;;  %v4346_v7 = vpop.f32.mrb[56].mxu0 }
 0x1dc   : > { %1808 = vst [vmem:[#allocation2 + $0x2c0] sm:$0xff] %v1680_v39  ;;  %1806 = vst [vmem:[#allocation2 + $0x2a8] sm:$0xff] %v1678_v9  ;;  %v2981_v42 = vmul.f32 %v5761_v22, %v2928_v5  ;;  %v2626_v39 = vrot.slane %v2518_v19, 7  ;;  %v2627_v21 = vrot.slane %v2519_v4, 7  ;;  %v2982_v2 = vmul.f32 %v5761_v22, %v2929_v63 }
 0x1dd   : > { %6641 = vst [vmem:[#allocation70_spill] sm:$0xff] %v5807_v33  ;;  %6642 = vst [vmem:[#allocation71_spill] sm:$0xff] %v5813_v62  ;;  %v2629_v33 = vrot.slane %v2520_v61, 7  ;;  %v5821_v52 = vmul.f32 %v5566_v40, %v2467_v29  ;;  %v2983_v9 = vmul.f32 %v5761_v22, %v2930_v37  ;;  %v5825_v30 = vmul.f32 %v5397_v11, %v2929_v63 }
 0x1de   : > { %6643 = vst [vmem:[#allocation72_spill] sm:$0xff] %v5816_v0  ;;  %1809 = vst [vmem:[#allocation2 + $0x2c8] sm:$0xff] %v1681_v26  ;;  %v3089_v41 = vrot.slane %v2981_v42, 7  ;;  %v1348_v23 = vadd.f32 %v5634_v55, %v4346_v7  ;;  %v1339_v0 = vpop.f32.mrb[57].mxu0  ;;  %v5829_v26 = vsel %vm2132_vm1, %v2626_v39, %v2627_v21  ;;  %v3090_v61 = vrot.slane %v2982_v2, 7  ;;  %v2360_v2 = vld [vmem:[#allocation2 + $0xc8] sm:$0xff] }
 0x1df   : > { %1807 = vst [vmem:[#allocation2 + $0x2b0] sm:$0xff] %v1679_v49  ;;  %6644 = vst [vmem:[#allocation73_spill] sm:$0xff] %v5821_v52  ;;  %v5832_v19 = vmul.f32 %v5397_v11, %v2930_v37  ;;  %v1340_v4 = vadd.f32 %v5634_v55, %v1339_v0  ;;  %v4347_v29 = vpop.f32.mrb[58].mxu0  ;;  %v3092_v49 = vrot.slane %v2983_v9, 7  ;;  %v2057_v52 = vmul.f32 %v5681_v8, %v2928_v5  ;;  %v2361_v5 = vld [vmem:[#allocation2 + $0xd0] sm:$0xff] }
 0x1e0   : > { %6645 = vst [vmem:[#allocation74_spill] sm:$0xff] %v5825_v30  ;;  %6646 = vst [vmem:[#allocation75_spill] sm:$0xff] %v5829_v26  ;;  %v2058_v42 = vmul.f32 %v5681_v8, %v2929_v63  ;;  %v1684_v62 = vmax.f32 %v1348_v23, 0.0  ;;  %v1351_v30 = vadd.f32 %v5634_v55, %v4347_v29  ;;  %v1342_v7 = vpop.f32.mrb[59].mxu0  ;;  %v5839_v44 = vsel %vm2132_vm1, %v2627_v21, %v2629_v33  ;;  %v2468_v26 = vld [vmem:[#allocation2 + $0x258] sm:$0xff] }
 0x1e1   : > { %6647 = vst [vmem:[#allocation76_spill] sm:$0xff] %v5832_v19  ;;  %6648 = vst [vmem:[#allocation77_spill] sm:$0xff] %v5839_v44  ;;  %v2059_v39 = vmul.f32 %v5681_v8, %v2930_v37  ;;  %v1682_v11 = vmax.f32 %v1340_v4, 0.0  ;;  %v1343_v19 = vadd.f32 %v5634_v55, %v1342_v7  ;;  %v5844_v0 = vsel %vm2132_vm1, %v3089_v41, %v3090_v61  ;;  %v2470_v44 = vld [vmem:[#allocation2 + $0x268] sm:$0xff] }
 0x1e2   : > { %6649 = vst [vmem:[#allocation78_spill] sm:$0xff] %v5844_v0  ;;  %v2168_v9 = vrot.slane %v2057_v52, 7  ;;  %1812 = vst [vmem:[#allocation2 + $0x2f0] sm:$0xff] %v1684_v62  ;;  %v1685_v23 = vmax.f32 %v1351_v30, 0.0  ;;  %v5847_v29 = vsel %vm2132_vm1, %v3090_v61, %v3092_v49  ;;  %v2169_v33 = vrot.slane %v2058_v42, 7  ;;  %v2932_v62 = vld [vmem:[#allocation2 + $0x590] sm:$0xff] }
 0x1e3   : > { %6650 = vst [vmem:[#allocation79_spill] sm:$0xff] %v5847_v29  ;;  %v2171_v21 = vrot.slane %v2059_v39, 7  ;;  %1810 = vst [vmem:[#allocation2 + $0x2d8] sm:$0xff] %v1682_v11  ;;  %v1683_v4 = vmax.f32 %v1343_v19, 0.0  ;;  %v5850_v7 = vmul.f32 %v5723_v13, %v2929_v63  ;;  %v5853_v41 = vmul.f32 %v5723_v13, %v2930_v37  ;;  %v2933_v63 = vld [vmem:[#allocation2 + $0x598] sm:$0xff]  ;;  %v4350_v42 = vpop.f32.mrb[60].mxu0 }
 0x1e4   : > { %v5856_v52 = vmul.f32 %v5804_v51, %v2360_v2  ;;  %1813 = vst [vmem:[#allocation2 + $0x2f8] sm:$0xff] %v1685_v23  ;;  %v5859_v30 = vsel %vm2132_vm1, %v2168_v9, %v2169_v33  ;;  %v5862_v61 = vmul.f32 %v5804_v51, %v2361_v5  ;;  %v2521_v49 = vmul.f32 %v5708_v17, %v2468_v26  ;;  %v1355_v5 = vpop.f32.mrb[61].mxu0 }
 0x1e5   : > { %6651 = vst [vmem:[#allocation80_spill] sm:$0xff] %v5850_v7  ;;  %6652 = vst [vmem:[#allocation81_spill] sm:$0xff] %v5853_v41  ;;  %v2522_v19 = vmul.f32 %v5708_v17, %v2469_v47  ;;  %v5867_v37 = vsel %vm2132_vm1, %v2169_v33, %v2171_v21  ;;  %v2523_v39 = vmul.f32 %v5708_v17, %v2470_v44 }
 0x1e6   : > { %6653 = vst [vmem:[#allocation82_spill] sm:$0xff] %v5856_v52  ;;  %6654 = vst [vmem:[#allocation83_spill] sm:$0xff] %v5862_v61  ;;  %v5871_v2 = vmul.f32 %v5566_v40, %v2469_v47  ;;  %v2984_v11 = vmul.f32 %v5761_v22, %v2931_v18  ;;  %v1364_v9 = vadd.f32 %v5634_v55, %v4350_v42  ;;  %v2631_v23 = vrot.slane %v2521_v49, 7  ;;  %v4351_v52 = vpop.f32.mrb[62].mxu0 }
 0x1e7   : > { %1811 = vst [vmem:[#allocation2 + $0x2e0] sm:$0xff] %v1683_v4  ;;  %v2632_v26 = vrot.slane %v2522_v19, 7  ;;  %v2985_v61 = vmul.f32 %v5761_v22, %v2932_v62  ;;  %v1356_v4 = vadd.f32 %v5634_v55, %v1355_v5  ;;  %v2634_v41 = vrot.slane %v2523_v39, 7 }
 0x1e8   : > { %6655 = vst [vmem:[#allocation84_spill] sm:$0xff] %v5871_v2  ;;  %v2986_v33 = vmul.f32 %v5761_v22, %v2933_v63  ;;  %v3094_v21 = vrot.slane %v2984_v11, 7  ;;  %v1688_v7 = vmax.f32 %v1364_v9, 0.0  ;;  %v1367_v47 = vadd.f32 %v5634_v55, %v4351_v52  ;;  %v1358_v2 = vpop.f32.mrb[63].mxu0  ;;  %v5892_v52 = vld [vmem:[#allocation8 + $0x8] ss:$0 sm:$0xff] }
 0x1e9   : > { %v5880_v29 = vmul.f32 %v5566_v40, %v2470_v44  ;;  %v3095_v42 = vrot.slane %v2985_v61, 7  ;;  %v1686_v0 = vmax.f32 %v1356_v4, 0.0  ;;  %v1359_v49 = vadd.f32 %v5634_v55, %v1358_v2  ;;  %6657 = vst [vmem:[#allocation86_spill] sm:$0xff] %v5892_v52  ;;  %v2362_v61 = vld [vmem:[#allocation2 + $0xe0] sm:$0xff]  ;;  %v2471_v9 = vld [vmem:[#allocation2 + $0x270] sm:$0xff] }
 0x1ea   : > { %v5884_v19 = vsel %vm2132_vm1, %v2631_v23, %v2632_v26  ;;  %v3097_v5 = vrot.slane %v2986_v33, 7  ;;  %1816 = vst [vmem:[#allocation2 + $0x320] sm:$0xff] %v1688_v7  ;;  %v1689_v39 = vmax.f32 %v1367_v47, 0.0  ;;  %v5887_v22 = vsel %vm2132_vm1, %v2632_v26, %v2634_v41  ;;  %v2472_v26 = vld [vmem:[#allocation2 + $0x278] sm:$0xff]  ;;  %v2473_v4 = vld [vmem:[#allocation2 + $0x280] sm:$0xff] }
 0x1eb   : > { %v5890_v11 = vsel %vm2132_vm1, %v3094_v21, %v3095_v42  ;;  %v5895_v44 = vmul.f32 %v5892_v52, %v2932_v62  ;;  %1814 = vst [vmem:[#allocation2 + $0x308] sm:$0xff] %v1686_v0  ;;  %v1687_v2 = vmax.f32 %v1359_v49, 0.0  ;;  %v5898_v23 = vmul.f32 %v5892_v52, %v2933_v63  ;;  %v2363_v49 = vld [vmem:[#allocation2 + $0xe8] sm:$0xff] }
 0x1ec   : > { %6656 = vst [vmem:[#allocation85_spill] sm:$0xff] %v5890_v11  ;;  %v2060_v7 = vmul.f32 %v5681_v8, %v2931_v18  ;;  %v2061_v41 = vmul.f32 %v5681_v8, %v2932_v62  ;;  %1817 = vst [vmem:[#allocation2 + $0x328] sm:$0xff] %v1689_v39  ;;  %v5903_v33 = vsel %vm2132_vm1, %v3095_v42, %v3097_v5 }
 0x1ed   : > { %6658 = vst [vmem:[#allocation87_spill] sm:$0xff] %v5895_v44  ;;  %6659 = vst [vmem:[#allocation88_spill] sm:$0xff] %v5898_v23  ;;  %v2062_v21 = vmul.f32 %v5681_v8, %v2933_v63  ;;  %v5907_v47 = vmul.f32 %v5723_v13, %v2932_v62  ;;  %v5910_v0 = vmul.f32 %v5723_v13, %v2933_v63  ;;  %v4354_v23 = vpop.f32.mrb[64].mxu0 }
 0x1ee   : > { %6660 = vst [vmem:[#allocation89_spill] sm:$0xff] %v5903_v33  ;;  %1815 = vst [vmem:[#allocation2 + $0x310] sm:$0xff] %v1687_v2  ;;  %v2173_v18 = vrot.slane %v2060_v7, 7  ;;  %v2174_v44 = vrot.slane %v2061_v41, 7  ;;  %v5913_v11 = vmul.f32 %v5804_v51, %v2362_v61  ;;  %v2524_v39 = vmul.f32 %v5708_v17, %v2471_v9  ;;  %v1371_v5 = vpop.f32.mrb[65].mxu0 }
 0x1ef   : > { %6661 = vst [vmem:[#allocation90_spill] sm:$0xff] %v5910_v0  ;;  %v1380_v42 = vadd.f32 %v5634_v55, %v4354_v23  ;;  %v2176_v8 = vrot.slane %v2062_v21, 7  ;;  %v2525_v62 = vmul.f32 %v5708_v17, %v2472_v26  ;;  %v2526_v33 = vmul.f32 %v5708_v17, %v2473_v4  ;;  %v4355_v13 = vpop.f32.mrb[66].mxu0 }
 0x1f0   : > { %6662 = vst [vmem:[#allocation91_spill] sm:$0xff] %v5913_v11  ;;  %v1372_v63 = vadd.f32 %v5634_v55, %v1371_v5  ;;  %v5921_v2 = vsel %vm2132_vm1, %v2173_v18, %v2174_v44  ;;  %v5924_v7 = vmul.f32 %v5804_v51, %v2363_v49  ;;  %v2636_v61 = vrot.slane %v2524_v39, 7  ;;  %v1374_v23 = vpop.f32.mrb[67].mxu0  ;;  %v5931_v5 = vld [vmem:[#allocation8 + $0x7] ss:$0 sm:$0xff] }
 0x1f1   : > { %v1692_v41 = vmax.f32 %v1380_v42, 0.0  ;;  %v1383_v9 = vadd.f32 %v5634_v55, %v4355_v13  ;;  %v2637_v52 = vrot.slane %v2525_v62, 7  ;;  %v5928_v21 = vmul.f32 %v5566_v40, %v2472_v26  ;;  %v5939_v42 = vld [vmem:[#allocation8 + $0x1] ss:$0 sm:$0xff] }
 0x1f2   : > { %v1690_v11 = vmax.f32 %v1372_v63, 0.0  ;;  %v1375_v17 = vadd.f32 %v5634_v55, %v1374_v23  ;;  %v5934_v18 = vsel %vm2132_vm1, %v2174_v44, %v2176_v8  ;;  %v2639_v0 = vrot.slane %v2526_v33, 7 }
 0x1f3   : > { %6663 = vst [vmem:[#allocation92_spill] sm:$0xff] %v5928_v21  ;;  %v1693_v49 = vmax.f32 %v1383_v9, 0.0  ;;  %v5937_v39 = vmul.f32 %v5931_v5, %v1692_v41  ;;  %v1923_v13 = vmul.f32 %v5939_v42, %v1692_v41  ;;  %v5943_v26 = vmul.f32 %v5566_v40, %v2473_v4  ;;  %v4358_v40 = vpop.f32.mrb[68].mxu0 }
 0x1f4   : > { %v1691_v62 = vmax.f32 %v1375_v17, 0.0  ;;  %v2846_v63 = vmul.f32 %v5931_v5, %v1690_v11  ;;  %v1921_v23 = vmul.f32 %v5939_v42, %v1690_v11  ;;  %v5948_v44 = vsel %vm2132_vm1, %v2636_v61, %v2637_v52 }
 0x1f5   : > { %6664 = vst [vmem:[#allocation93_spill] sm:$0xff] %v5943_v26  ;;  %v5951_v33 = vmul.f32 %v5931_v5, %v1693_v49  ;;  %v1924_v8 = vmul.f32 %v5939_v42, %v1693_v49  ;;  %v2249_v9 = vadd.f32 %v5480_v60, %v1923_v13  ;;  %v5956_v41 = vsel %vm2132_vm1, %v2637_v52, %v2639_v0  ;;  %v1387_v26 = vpop.f32.mrb[69].mxu0  ;;  %v4631_v13 = vld [vmem:[#allocation2 + $0x410] sm:$0xff] }
 0x1f6   : > { %v2847_v4 = vmul.f32 %v5931_v5, %v1691_v62  ;;  %v2878_v17 = vadd.f32 %v2846_v63, %v5611_v59  ;;  %v1922_v11 = vmul.f32 %v5939_v42, %v1691_v62  ;;  %v2247_v61 = vadd.f32 %v5444_v28, %v1921_v23  ;;  %v4359_v21 = vpop.f32.mrb[70].mxu0 }
 0x1f7   : > { %v5963_v51 = vadd.f32 %v5634_v55, %v4358_v40  ;;  %v2250_v49 = vadd.f32 %v5483_v24, %v1924_v8  ;;  %v2318_v60 = vadd.f32 %v5456_v34, %v2249_v9  ;;  %v5968_v52 = vmul.f32 %v4631_v13, %v5931_v5  ;;  %v1390_v24 = vpop.f32.mrb[71].mxu0 }
 0x1f8   : > { %v1388_v0 = vadd.f32 %v5634_v55, %v1387_v26  ;;  %v2879_v59 = vadd.f32 %v2847_v4, %v5622_v16  ;;  %v3171_v62 = vadd.f32 %v5435_v46, %v2878_v17  ;;  %v2248_v28 = vadd.f32 %v5450_v57, %v1922_v11  ;;  %v5987_v57 = vld [vmem:[%s6535_s4] ss:$0 sm:$0xff]  ;;  %v6665_v11 = vld [vmem:[#allocation19_spill] sm:$0xff] }
 0x1f9   : > { %v1696_v63 = vmax.f32 %v5963_v51, 0.0  ;;  %v5976_v23 = vadd.f32 %v5634_v55, %v4359_v21  ;;  %v2316_v34 = vadd.f32 %v5408_v20, %v2247_v61  ;;  %v2319_v8 = vadd.f32 %v5461_v36, %v2250_v49  ;;  %v6666_v61 = vld [vmem:[#allocation17_spill] sm:$0xff] }
 0x1fa   : > { %v1694_v9 = vmax.f32 %v1388_v0, 0.0  ;;  %v1391_v26 = vadd.f32 %v5634_v55, %v1390_v24  ;;  %v3172_v40 = vadd.f32 %v5438_v1, %v2879_v59  ;;  %v3240_v16 = vadd.f32 %v5404_v3, %v3171_v62 }
 0x1fb   : > { %v1697_v46 = vmax.f32 %v5976_v23, 0.0  ;;  %v2317_v21 = vadd.f32 %v5426_v10, %v2248_v28  ;;  %v2417_v20 = vadd.f32 %v5315_v6, %v2316_v34  ;;  %v2419_v36 = vadd.f32 %v5350_v25, %v2318_v60  ;;  %v4362_v10 = vpop.f32.mrb[72].mxu0 }
 0x1fc   : > { %v1695_v4 = vmax.f32 %v1391_v26, 0.0  ;;  %v3241_v17 = vadd.f32 %v5415_v31, %v3172_v40  ;;  %v3279_v1 = vadd.f32 %v5987_v57, %v3240_v16  ;;  %v2420_v3 = vadd.f32 %v6665_v11, %v2319_v8  ;;  %v1403_v28 = vpop.f32.mrb[73].mxu0  ;;  %v6667_v11 = vld [vmem:[#allocation28_spill] sm:$0xff] }
 0x1fd   : > { %v2418_v49 = vadd.f32 %v6666_v61, %v2317_v21  ;;  %v2710_v13 = vadd.f32 %v5616_v54, %v2417_v20  ;;  %v2712_v0 = vadd.f32 %v5660_v48, %v2419_v36  ;;  %v2850_v59 = vmul.f32 %v5931_v5, %v1694_v9  ;;  %v4363_v8 = vpop.f32.mrb[74].mxu0 }
 0x1fe   : > { %v3280_v6 = vadd.f32 %v5987_v57, %v3241_v17  ;;  %v3311_v62 = vmax.f32 %v3279_v1, 0.0  ;;  %v2713_v25 = vadd.f32 %v5652_v45, %v2420_v3  ;;  %v2851_v31 = vmul.f32 %v5931_v5, %v1695_v4  ;;  %v1406_v20 = vpop.f32.mrb[75].mxu0 }
 0x1ff   : > { %v6003_v60 = vadd.f32 %v5634_v55, %v4362_v10  ;;  %v2711_v24 = vadd.f32 %v5609_v35, %v2418_v49  ;;  %v2779_v54 = vadd.f32 %v5577_v56, %v2710_v13  ;;  %v2781_v48 = vadd.f32 %v5620_v15, %v2712_v0  ;;  %v6668_v0 = vld [vmem:[#allocation29_spill] sm:$0xff] }
 0x200   : > { %v6009_v34 = vadd.f32 %v5634_v55, %v1403_v28  ;;  %v3312_v26 = vmax.f32 %v3280_v6, 0.0  ;;  %v2782_v40 = vadd.f32 %v5626_v58, %v2713_v25  ;;  %v1925_v45 = vmul.f32 %v5939_v42, %v1694_v9  ;;  %v6669_v6 = vld [vmem:[#allocation27_spill] sm:$0xff]  ;;  %v6671_v28 = vld [vmem:[#allocation30_spill] sm:$0xff] }
 0x201   : > { %v1700_v16 = vmax.f32 %v6003_v60, 0.0  ;;  %v6015_v21 = vadd.f32 %v5634_v55, %v4363_v8  ;;  %v2780_v35 = vadd.f32 %v5582_v12, %v2711_v24  ;;  %v2880_v56 = vadd.f32 %v5937_v39, %v2779_v54  ;;  %v6672_v54 = vld [vmem:[#allocation36_spill] sm:$0xff] }
 0x202   : > { %v1698_v15 = vmax.f32 %v6009_v34, 0.0  ;;  %v6021_v36 = vadd.f32 %v5634_v55, %v1406_v20  ;;  %v3343_v17 = vpack.c.bf16 %v3312_v26, %v3311_v62  ;;  %v2882_v1 = vadd.f32 %v2850_v59, %v2781_v48  ;;  %v6670_v62 = vld [vmem:[#allocation34_spill] sm:$0xff] }
 0x203   : > { %v1701_v58 = vmax.f32 %v6015_v21, 0.0  ;;  %v2881_v9 = vadd.f32 %v5951_v33, %v2780_v35  ;;  %v3173_v3 = vadd.f32 %v6667_v11, %v2880_v56  ;;  %v2883_v61 = vadd.f32 %v2851_v31, %v2782_v40  ;;  %v4366_v31 = vpop.f32.mrb[76].mxu0  ;;  %v6674_v40 = vld [vmem:[#allocation26_spill] sm:$0xff]  ;;  %v6675_v35 = vld [vmem:[#allocation32_spill] sm:$0xff] }
 0x204   : > { %v1699_v49 = vmax.f32 %v6021_v36, 0.0  ;;  %4432 = vmatprep.mubr.bf16.mxu1 %v3343_v17  ;;  %v3175_v12 = vadd.f32 %v5522_v38, %v2882_v1  ;;  %v1926_v39 = vmul.f32 %v5939_v42, %v1695_v4  ;;  %v2251_v13 = vadd.f32 %v5531_v50, %v1925_v45  ;;  %v6673_v38 = vld [vmem:[#allocation31_spill] sm:$0xff]  ;;  %v1419_v26 = vpop.f32.mrb[77].mxu0 }
 0x205   : > { %v3174_v10 = vadd.f32 %v6668_v0, %v2881_v9  ;;  %v3242_v59 = vadd.f32 %v6669_v6, %v3173_v3  ;;  %v3176_v25 = vadd.f32 %v6670_v62, %v2883_v61  ;;  %v2852_v33 = vmul.f32 %v5931_v5, %v1696_v63  ;;  %v4367_v17 = vpop.f32.mrb[78].mxu0  ;;  %v6676_v9 = vld [vmem:[#allocation33_spill] sm:$0xff]  ;;  %v6677_v3 = vld [vmem:[#allocation18_spill] sm:$0xff] }
 0x206   : > { %v3244_v24 = vadd.f32 %v6671_v28, %v3175_v12  ;;  %v2252_v48 = vadd.f32 %v6672_v54, %v1926_v39  ;;  %v2320_v8 = vadd.f32 %v6673_v38, %v2251_v13  ;;  %v2853_v50 = vmul.f32 %v5931_v5, %v1697_v46  ;;  %v1422_v13 = vpop.f32.mrb[79].mxu0 }
 0x207   : > { %v1428_v4 = vadd.f32 %v5634_v55, %v4366_v31  ;;  %v3243_v45 = vadd.f32 %v6674_v40, %v3174_v10  ;;  %v3281_v20 = vadd.f32 %v5987_v57, %v3242_v59  ;;  %v3245_v56 = vadd.f32 %v6675_v35, %v3176_v25  ;;  %v6680_v35 = vld [vmem:[#allocation42_spill] sm:$0xff] }
 0x208   : > { %v6047_v36 = vadd.f32 %v5634_v55, %v1419_v26  ;;  %v3283_v1 = vadd.f32 %v5987_v57, %v3244_v24  ;;  %v2321_v11 = vadd.f32 %v6676_v9, %v2252_v48  ;;  %v2421_v61 = vadd.f32 %v6677_v3, %v2320_v8  ;;  %v6678_v24 = vld [vmem:[#allocation20_spill] sm:$0xff] }
 0x209   : > { %v1704_v12 = vmax.f32 %v1428_v4, 0.0  ;;  %v1431_v39 = vadd.f32 %v5634_v55, %v4367_v17  ;;  %v3282_v0 = vadd.f32 %v5987_v57, %v3243_v45  ;;  %v3313_v10 = vmax.f32 %v3281_v20, 0.0  ;;  %v6679_v45 = vld [vmem:[#allocation45_spill] sm:$0xff]  ;;  %v6682_v17 = vld [vmem:[#allocation44_spill] sm:$0xff] }
 0x20a   : > { %v1702_v6 = vmax.f32 %v6047_v36, 0.0  ;;  %v6056_v59 = vadd.f32 %v5634_v55, %v1422_v13  ;;  %v3284_v62 = vadd.f32 %v5987_v57, %v3245_v56  ;;  %v3315_v25 = vmax.f32 %v3283_v1, 0.0  ;;  %v6681_v56 = vld [vmem:[#allocation43_spill] sm:$0xff]  ;;  %v6683_v3 = vld [vmem:[#allocation40_spill] sm:$0xff]  ;;  %v6712_v36 = vld [vmem:[#allocation46_spill] sm:$0xff] }
 0x20b   : > { %1832 = vst [vmem:[#allocation2 + $0x3f8] sm:$0xff] %v1704_v12  ;;  %v1705_v31 = vmax.f32 %v1431_v39, 0.0  ;;  %v3314_v28 = vmax.f32 %v3282_v0, 0.0  ;;  %v2422_v54 = vadd.f32 %v6678_v24, %v2321_v11  ;;  %v2714_v48 = vadd.f32 %v5696_v53, %v2421_v61  ;;  %v6684_v12 = vld [vmem:[#allocation41_spill] sm:$0xff] }
 0x20c   : > { %1830 = vst [vmem:[#allocation2 + $0x3e0] sm:$0xff] %v1702_v6  ;;  %v1703_v38 = vmax.f32 %v6056_v59, 0.0  ;;  %v3316_v8 = vmax.f32 %v3284_v62, 0.0  ;;  %v1927_v55 = vmul.f32 %v5939_v42, %v1696_v63  ;;  %v1928_v4 = vmul.f32 %v5939_v42, %v1697_v46  ;;  %v6686_v62 = vld [vmem:[#allocation21_spill] sm:$0xff] }
 0x20d   : > { %1833 = vst [vmem:[#allocation2 + $0x400] sm:$0xff] %v1705_v31  ;;  %v3344_v26 = vpack.c.bf16 %v3314_v28, %v3313_v10  ;;  %v2715_v40 = vadd.f32 %v5703_v14, %v2422_v54  ;;  %v2783_v53 = vadd.f32 %v6679_v45, %v2714_v48  ;;  %v2854_v20 = vmul.f32 %v5931_v5, %v1698_v15  ;;  %v6685_v10 = vld [vmem:[#allocation37_spill] sm:$0xff]  ;;  %v6687_v31 = vld [vmem:[#allocation23_spill] sm:$0xff]  ;;  %v6692_v45 = vld [vmem:[#allocation56_spill] sm:$0xff] }
 0x20e   : > { %1831 = vst [vmem:[#allocation2 + $0x3e8] sm:$0xff] %v1703_v38  ;;  %v3345_v51 = vpack.c.bf16 %v3316_v8, %v3315_v25  ;;  %v2253_v63 = vadd.f32 %v6680_v35, %v1927_v55  ;;  %v2254_v23 = vadd.f32 %v6681_v56, %v1928_v4  ;;  %v2855_v46 = vmul.f32 %v5931_v5, %v1699_v49  ;;  %v6688_v48 = vld [vmem:[#allocation39_spill] sm:$0xff]  ;;  %v6690_v4 = vld [vmem:[#allocation53_spill] sm:$0xff]  ;;  %v6694_v35 = vld [vmem:[#allocation68_spill] sm:$0xff] }
 0x20f   : > { %4433 = vmatmul.mubr.bf16.vlgmr.msra.gmra.mrb[48].mxu1 %v3344_v26  ;;  %v2784_v1 = vadd.f32 %v6682_v17, %v2715_v40  ;;  %v2884_v14 = vadd.f32 %v2852_v33, %v2783_v53  ;;  %v1929_v9 = vmul.f32 %v5939_v42, %v1698_v15  ;;  %v1930_v11 = vmul.f32 %v5939_v42, %v1699_v49  ;;  %v6689_v8 = vld [vmem:[#allocation35_spill] sm:$0xff]  ;;  %v6691_v26 = vld [vmem:[#allocation54_spill] sm:$0xff]  ;;  %v6697_v17 = vld [vmem:[#allocation24_spill] sm:$0xff] }
 0x210   : > { %4436 = vmatprep.mubr.bf16.mxu1 %v3345_v51  ;;  %v2322_v61 = vadd.f32 %v6683_v3, %v2253_v63  ;;  %v2323_v39 = vadd.f32 %v6684_v12, %v2254_v23  ;;  %v2856_v13 = vmul.f32 %v5931_v5, %v1700_v16  ;;  %v2857_v0 = vmul.f32 %v5931_v5, %v1701_v58  ;;  %v6693_v51 = vld [vmem:[#allocation67_spill] sm:$0xff]  ;;  %v6695_v63 = vld [vmem:[#allocation38_spill] sm:$0xff]  ;;  %v6701_v12 = vld [vmem:[#allocation65_spill] sm:$0xff] }
 0x211   : > { %v2885_v33 = vadd.f32 %v2853_v50, %v2784_v1  ;;  %v3177_v34 = vadd.f32 %v6685_v10, %v2884_v14  ;;  %v2255_v15 = vadd.f32 %v5731_v27, %v1929_v9  ;;  %v2256_v49 = vadd.f32 %v5740_v43, %v1930_v11  ;;  %v6696_v56 = vld [vmem:[#allocation22_spill] sm:$0xff]  ;;  %v6699_v9 = vld [vmem:[#allocation51_spill] sm:$0xff] }
 0x212   : > { %v2423_v25 = vadd.f32 %v6686_v62, %v2322_v61  ;;  %v2424_v28 = vadd.f32 %v6687_v31, %v2323_v39  ;;  %v1931_v24 = vmul.f32 %v5939_v42, %v1700_v16  ;;  %v1932_v54 = vmul.f32 %v5939_v42, %v1701_v58  ;;  %v6698_v14 = vld [vmem:[#allocation50_spill] sm:$0xff]  ;;  %v6700_v3 = vld [vmem:[#allocation63_spill] sm:$0xff] }
 0x213   : > { %v3178_v50 = vadd.f32 %v6688_v48, %v2885_v33  ;;  %v3246_v55 = vadd.f32 %v6689_v8, %v3177_v34  ;;  %v2324_v27 = vadd.f32 %v5727_v32, %v2255_v15  ;;  %v2325_v43 = vadd.f32 %v6690_v4, %v2256_v49  ;;  %v6702_v34 = vld [vmem:[#allocation57_spill] sm:$0xff]  ;;  %v6703_v49 = vld [vmem:[#allocation60_spill] sm:$0xff]  ;;  %v6706_v8 = vld [vmem:[#allocation55_spill] sm:$0xff] }
 0x214   : > { %v2716_v40 = vadd.f32 %v6691_v26, %v2423_v25  ;;  %v2717_v53 = vadd.f32 %v6692_v45, %v2424_v28  ;;  %v2257_v60 = vadd.f32 %v6693_v51, %v1931_v24  ;;  %v2258_v16 = vadd.f32 %v6694_v35, %v1932_v54  ;;  %v6704_v28 = vld [vmem:[#allocation70_spill] sm:$0xff]  ;;  %v6705_v54 = vld [vmem:[#allocation71_spill] sm:$0xff]  ;;  %v6708_v26 = vld [vmem:[#allocation48_spill] sm:$0xff] }
 0x215   : > { %v3247_v21 = vadd.f32 %v6695_v63, %v3178_v50  ;;  %v3285_v58 = vadd.f32 %v5987_v57, %v3246_v55  ;;  %v2425_v23 = vadd.f32 %v6696_v56, %v2324_v27  ;;  %v2426_v1 = vadd.f32 %v6697_v17, %v2325_v43  ;;  %v6707_v27 = vld [vmem:[#allocation59_spill] sm:$0xff]  ;;  %v6709_v45 = vld [vmem:[#allocation49_spill] sm:$0xff]  ;;  %v1896_v35 = vld [vmem:[#allocation2 + $0x3e0] sm:$0xff] }
 0x216   : > { %v2785_v32 = vadd.f32 %v6698_v14, %v2716_v40  ;;  %v2786_v11 = vadd.f32 %v6699_v9, %v2717_v53  ;;  %v2326_v61 = vadd.f32 %v6700_v3, %v2257_v60  ;;  %v2327_v39 = vadd.f32 %v6701_v12, %v2258_v16  ;;  %v6710_v51 = vld [vmem:[#allocation75_spill] sm:$0xff] }
 0x217   : > { %v3286_v33 = vadd.f32 %v5987_v57, %v3247_v21  ;;  %v3317_v10 = vmax.f32 %v3285_v58, 0.0  ;;  %v2718_v15 = vadd.f32 %v6702_v34, %v2425_v23  ;;  %v2719_v62 = vadd.f32 %v6703_v49, %v2426_v1  ;;  %v1897_v16 = vld [vmem:[#allocation2 + $0x3e8] sm:$0xff]  ;;  %v6714_v1 = vld [vmem:[#allocation72_spill] sm:$0xff] }
 0x218   : > { %v2886_v25 = vadd.f32 %v2854_v20, %v2785_v32  ;;  %v2887_v31 = vadd.f32 %v2855_v46, %v2786_v11  ;;  %v2427_v24 = vadd.f32 %v6704_v28, %v2326_v61  ;;  %v2428_v48 = vadd.f32 %v6705_v54, %v2327_v39  ;;  %v6711_v46 = vld [vmem:[#allocation77_spill] sm:$0xff]  ;;  %v6716_v11 = vld [vmem:[#allocation64_spill] sm:$0xff]  ;;  %v6717_v61 = vld [vmem:[#allocation66_spill] sm:$0xff] }
 0x219   : > { %v3318_v50 = vmax.f32 %v3286_v33, 0.0  ;;  %v2787_v55 = vadd.f32 %v6706_v8, %v2718_v15  ;;  %v2788_v4 = vadd.f32 %v6707_v27, %v2719_v62  ;;  %v2858_v43 = vmul.f32 %v5931_v5, %v1702_v6  ;;  %v6713_v6 = vld [vmem:[#allocation47_spill] sm:$0xff]  ;;  %v6715_v32 = vld [vmem:[#allocation73_spill] sm:$0xff]  ;;  %v6719_v15 = vld [vmem:[#allocation62_spill] sm:$0xff] }
 0x21a   : > { %v3179_v40 = vadd.f32 %v6708_v26, %v2886_v25  ;;  %v3180_v53 = vadd.f32 %v6709_v45, %v2887_v31  ;;  %v2720_v20 = vadd.f32 %v6710_v51, %v2427_v24  ;;  %v2721_v60 = vadd.f32 %v6711_v46, %v2428_v48  ;;  %v2823_v31 = vld [vmem:[#allocation2 + $0x3f8] sm:$0xff]  ;;  %v6720_v54 = vld [vmem:[#allocation78_spill] sm:$0xff] }
 0x21b   : > { %v3346_v63 = vpack.c.bf16 %v3318_v50, %v3317_v10  ;;  %v2888_v21 = vadd.f32 %v2856_v13, %v2787_v55  ;;  %v2889_v58 = vadd.f32 %v2857_v0, %v2788_v4  ;;  %v2859_v56 = vmul.f32 %v5931_v5, %v1703_v38  ;;  %v6718_v10 = vld [vmem:[#allocation61_spill] sm:$0xff]  ;;  %v6721_v50 = vld [vmem:[#allocation79_spill] sm:$0xff]  ;;  %v6722_v4 = vld [vmem:[#allocation80_spill] sm:$0xff] }
 0x21c   : > { %v3248_v23 = vadd.f32 %v6712_v36, %v3179_v40  ;;  %v3249_v17 = vadd.f32 %v6713_v6, %v3180_v53  ;;  %v2789_v14 = vadd.f32 %v6714_v1, %v2720_v20  ;;  %v2790_v9 = vadd.f32 %v6715_v32, %v2721_v60  ;;  %v6723_v26 = vld [vmem:[#allocation81_spill] sm:$0xff]  ;;  %v2824_v45 = vld [vmem:[#allocation2 + $0x400] sm:$0xff] }
 0x21d   : > { %4437 = vmatmul.mubr.bf16.gmra.mrb[52].mxu1 %v3346_v63  ;;  %v3181_v3 = vadd.f32 %v6716_v11, %v2888_v21  ;;  %v3182_v12 = vadd.f32 %v6717_v61, %v2889_v58  ;;  %v1933_v13 = vmul.f32 %v5939_v42, %v1896_v35  ;;  %v1934_v0 = vmul.f32 %v5939_v42, %v1897_v16  ;;  %v6726_v16 = vld [vmem:[#allocation82_spill] sm:$0xff]  ;;  %v6727_v21 = vld [vmem:[#allocation83_spill] sm:$0xff] }
 0x21e   : > { %v3287_v59 = vadd.f32 %v5987_v57, %v3248_v23  ;;  %v3288_v38 = vadd.f32 %v5987_v57, %v3249_v17  ;;  %v2890_v39 = vadd.f32 %v2858_v43, %v2789_v14  ;;  %v2891_v33 = vadd.f32 %v2859_v56, %v2790_v9  ;;  %v2934_v9 = vld [vmem:[#allocation2 + $0x5a0] sm:$0xff] }
 0x21f   : > { %v3250_v34 = vadd.f32 %v6718_v10, %v3181_v3  ;;  %v3251_v49 = vadd.f32 %v6719_v15, %v3182_v12  ;;  %v2259_v62 = vadd.f32 %v5859_v30, %v1933_v13  ;;  %v2260_v25 = vadd.f32 %v5867_v37, %v1934_v0  ;;  %v6724_v30 = vld [vmem:[#allocation74_spill] sm:$0xff]  ;;  %v6725_v37 = vld [vmem:[#allocation76_spill] sm:$0xff]  ;;  %v2935_v12 = vld [vmem:[#allocation2 + $0x5a8] sm:$0xff] }
 0x220   : > { %v3319_v28 = vmax.f32 %v3287_v59, 0.0  ;;  %v3320_v24 = vmax.f32 %v3288_v38, 0.0  ;;  %v3183_v48 = vadd.f32 %v6720_v54, %v2890_v39  ;;  %v3184_v8 = vadd.f32 %v6721_v50, %v2891_v33  ;;  %v6728_v13 = vld [vmem:[#allocation58_spill] sm:$0xff]  ;;  %v6729_v59 = vld [vmem:[#allocation84_spill] sm:$0xff]  ;;  %v6731_v54 = vld [vmem:[#allocation91_spill] sm:$0xff] }
 0x221   : > { %v3289_v55 = vadd.f32 %v5987_v57, %v3250_v34  ;;  %v3290_v27 = vadd.f32 %v5987_v57, %v3251_v49  ;;  %v2328_v43 = vadd.f32 %v6722_v4, %v2259_v62  ;;  %v2329_v40 = vadd.f32 %v6723_v26, %v2260_v25  ;;  %v6730_v25 = vld [vmem:[#allocation90_spill] sm:$0xff] }
 0x222   : > { %v3347_v53 = vpack.c.bf16 %v3320_v24, %v3319_v28  ;;  %v3252_v51 = vadd.f32 %v6724_v30, %v3183_v48  ;;  %v3253_v20 = vadd.f32 %v6725_v37, %v3184_v8  ;;  %v2860_v46 = vmul.f32 %v5931_v5, %v2823_v31  ;;  %v2826_v28 = vld [vmem:[#allocation2 + $0x418] sm:$0xff]  ;;  %v6732_v50 = vld [vmem:[#allocation86_spill] sm:$0xff]  ;;  %v6188_v30 = vld [vmem:[#allocation8] ss:$0 sm:$0xff] }
 0x223   : > { %v3321_v60 = vmax.f32 %v3289_v55, 0.0  ;;  %v3322_v35 = vmax.f32 %v3290_v27, 0.0  ;;  %v2429_v63 = vadd.f32 %v6726_v16, %v2328_v43  ;;  %v2430_v58 = vadd.f32 %v6727_v21, %v2329_v40  ;;  %v6733_v55 = vld [vmem:[#allocation85_spill] sm:$0xff]  ;;  %v6735_v37 = vld [vmem:[#allocation87_spill] sm:$0xff]  ;;  %v6737_v16 = vld [vmem:[#allocation92_spill] sm:$0xff] }
 0x224   : > { %4440 = vmatprep.mubr.bf16.mxu1 %v3347_v53  ;;  %v3291_v56 = vadd.f32 %v5987_v57, %v3252_v51  ;;  %v3292_v36 = vadd.f32 %v5987_v57, %v3253_v20  ;;  %v2861_v23 = vmul.f32 %v5931_v5, %v2824_v45  ;;  %v1935_v6 = vmul.f32 %v5939_v42, %v2823_v31 }
 0x225   : > { %v3348_v17 = vpack.c.bf16 %v3322_v35, %v3321_v60  ;;  %v2722_v1 = vadd.f32 %v5884_v19, %v2429_v63  ;;  %v2723_v14 = vadd.f32 %v5887_v22, %v2430_v58  ;;  %v1936_v32 = vmul.f32 %v5939_v42, %v2824_v45  ;;  %v2936_v19 = vld [vmem:[#allocation2 + $0x5b0] sm:$0xff] }
 0x226   : > { %v3323_v11 = vmax.f32 %v3291_v56, 0.0  ;;  %v3324_v3 = vmax.f32 %v3292_v36, 0.0  ;;  %v2261_v61 = vadd.f32 %v5921_v2, %v1935_v6  ;;  %v2987_v0 = vmul.f32 %v6728_v13, %v2934_v9 }
 0x227   : > { %4441 = vmatmul.mubr.bf16.gmra.mrb[56].mxu1 %v3348_v17  ;;  %v2791_v38 = vadd.f32 %v6729_v59, %v2722_v1  ;;  %v2792_v39 = vadd.f32 %v5880_v29, %v2723_v14  ;;  %v2262_v33 = vadd.f32 %v5934_v18, %v1936_v32  ;;  %v2988_v22 = vmul.f32 %v6728_v13, %v2935_v12  ;;  %v2364_v1 = vld [vmem:[#allocation2 + $0xf8] sm:$0xff]  ;;  %v6739_v32 = vld [vmem:[#allocation52_spill] sm:$0xff] }
 0x228   : > { %v3349_v10 = vpack.c.bf16 %v3324_v3, %v3323_v11  ;;  %v2330_v34 = vadd.f32 %v5907_v47, %v2261_v61  ;;  %v2989_v15 = vmul.f32 %v6728_v13, %v2936_v19  ;;  %v3099_v49 = vrot.slane %v2987_v0, 7  ;;  %v6734_v47 = vld [vmem:[#allocation89_spill] sm:$0xff]  ;;  %v2474_v3 = vld [vmem:[#allocation2 + $0x288] sm:$0xff] }
 0x229   : > { %v2892_v2 = vadd.f32 %v2860_v46, %v2791_v38  ;;  %v2893_v62 = vadd.f32 %v2861_v23, %v2792_v39  ;;  %v2331_v31 = vadd.f32 %v6730_v25, %v2262_v33  ;;  %v3100_v24 = vrot.slane %v2988_v22, 7  ;;  %v6736_v46 = vld [vmem:[#allocation88_spill] sm:$0xff]  ;;  %v6738_v23 = vld [vmem:[#allocation93_spill] sm:$0xff] }
 0x22a   : > { %4444 = vmatprep.mubr.bf16.mxu1 %v3349_v10  ;;  %v2431_v29 = vadd.f32 %v6731_v54, %v2330_v34  ;;  %v2863_v18 = vmul.f32 %v5931_v5, %v2826_v28  ;;  %v3102_v48 = vrot.slane %v2989_v15, 7  ;;  %v3224_v8 = vmul.f32 %v6732_v50, %v2935_v12  ;;  %v2475_v38 = vld [vmem:[#allocation2 + $0x290] sm:$0xff]  ;;  %v2476_v39 = vld [vmem:[#allocation2 + $0x298] sm:$0xff]  ;;  %v2365_v15 = vld [vmem:[#allocation2 + $0x100] sm:$0xff] }
 0x22b   : > { %v3185_v27 = vadd.f32 %v6733_v55, %v2892_v2  ;;  %v3186_v4 = vadd.f32 %v6734_v47, %v2893_v62  ;;  %v2432_v43 = vadd.f32 %v5924_v7, %v2331_v31  ;;  %v3225_v26 = vmul.f32 %v6732_v50, %v2936_v19  ;;  %v6740_v10 = vld [vmem:[#allocation25_spill] sm:$0xff] }
 0x22c   : > { %v2724_v40 = vadd.f32 %v5948_v44, %v2431_v29  ;;  %v3101_v45 = vsel %vm2132_vm1, %v3099_v49, %v3100_v24  ;;  %v3103_v53 = vsel %vm2132_vm1, %v3100_v24, %v3102_v48  ;;  %v2063_v51 = vmul.f32 %v6188_v30, %v2934_v9 }
 0x22d   : > { %v3254_v20 = vadd.f32 %v6735_v37, %v3185_v27  ;;  %v3255_v60 = vadd.f32 %v6736_v46, %v3186_v4  ;;  %v2725_v35 = vadd.f32 %v5956_v41, %v2432_v43  ;;  %v2064_v7 = vmul.f32 %v6188_v30, %v2935_v12  ;;  %v6215_v43 = vld [vmem:[#allocation8 + $0x5] ss:$0 sm:$0xff] }
 0x22e   : > { %v2793_v63 = vadd.f32 %v6737_v16, %v2724_v40  ;;  %v1938_v44 = vmul.f32 %v5939_v42, %v2826_v28  ;;  %v2065_v21 = vmul.f32 %v6188_v30, %v2936_v19  ;;  %v2178_v58 = vrot.slane %v2063_v51, 7  ;;  %v2827_v37 = vld [vmem:[#allocation2 + $0x428] sm:$0xff] }
 0x22f   : > { %v3293_v56 = vadd.f32 %v5987_v57, %v3254_v20  ;;  %v3294_v36 = vadd.f32 %v5987_v57, %v3255_v60  ;;  %v2794_v6 = vadd.f32 %v6738_v23, %v2725_v35  ;;  %v2179_v17 = vrot.slane %v2064_v7, 7  ;;  %v2937_v35 = vld [vmem:[#allocation2 + $0x5b8] sm:$0xff] }
 0x230   : > { %v2894_v14 = vadd.f32 %v5968_v52, %v2793_v63  ;;  %v2181_v41 = vrot.slane %v2065_v21, 7  ;;  %v2300_v9 = vmul.f32 %v6739_v32, %v2935_v12  ;;  %v2301_v11 = vmul.f32 %v6739_v32, %v2936_v19  ;;  %v6741_v52 = vld [vmem:[#allocation69_spill] sm:$0xff]  ;;  %v6208_v19 = vld [vmem:[#allocation8 + $0x3] ss:$0 sm:$0xff]  ;;  %v2938_v21 = vld [vmem:[#allocation2 + $0x5c0] sm:$0xff] }
 0x231   : > { %v3325_v61 = vmax.f32 %v3293_v56, 0.0  ;;  %v3326_v13 = vmax.f32 %v3294_v36, 0.0  ;;  %v2895_v0 = vadd.f32 %v2863_v18, %v2794_v6  ;;  %v2180_v59 = vsel %vm2132_vm1, %v2178_v58, %v2179_v17  ;;  %v2939_v58 = vld [vmem:[#allocation2 + $0x5c8] sm:$0xff] }
 0x232   : > { %v3187_v33 = vadd.f32 %v3101_v45, %v2894_v14  ;;  %v2182_v22 = vsel %vm2132_vm1, %v2179_v17, %v2181_v41  ;;  %v2263_v34 = vadd.f32 %v2180_v59, %v6740_v10  ;;  %v2401_v49 = vmul.f32 %v6741_v52, %v2364_v1  ;;  %v6223_v56 = vld [vmem:[#allocation8 + $0x6] ss:$0 sm:$0xff] }
 0x233   : > { %v3350_v2 = vpack.c.bf16 %v3326_v13, %v3325_v61  ;;  %v3188_v12 = vadd.f32 %v3103_v53, %v2895_v0  ;;  %v2264_v62 = vadd.f32 %v2182_v22, %v1938_v44  ;;  %v2527_v25 = vmul.f32 %v6208_v19, %v2474_v3  ;;  %v2828_v44 = vld [vmem:[#allocation2 + $0x430] sm:$0xff] }
 0x234   : > { %v3256_v31 = vadd.f32 %v3224_v8, %v3187_v33  ;;  %v2332_v28 = vadd.f32 %v2300_v9, %v2263_v34  ;;  %v2528_v24 = vmul.f32 %v6208_v19, %v2475_v38  ;;  %v2529_v54 = vmul.f32 %v6208_v19, %v2476_v39  ;;  %v2366_v33 = vld [vmem:[#allocation2 + $0x110] sm:$0xff] }
 0x235   : > { %4445 = vmatmul.mubr.bf16.gmra.mrb[60].mxu1 %v3350_v2  ;;  %v3257_v29 = vadd.f32 %v3225_v26, %v3188_v12  ;;  %v2333_v18 = vadd.f32 %v2301_v11, %v2264_v62  ;;  %v2402_v48 = vmul.f32 %v6741_v52, %v2365_v15  ;;  %v2641_v55 = vrot.slane %v2527_v25, 7 }
 0x236   : > { %v3295_v27 = vadd.f32 %v5987_v57, %v3256_v31  ;;  %v2642_v47 = vrot.slane %v2528_v24, 7  ;;  %v2644_v4 = vrot.slane %v2529_v54, 7  ;;  %v2763_v40 = vmul.f32 %v6215_v43, %v2475_v38  ;;  %v2478_v31 = vld [vmem:[#allocation2 + $0x2a8] sm:$0xff] }
 0x237   : > { %v3296_v8 = vadd.f32 %v5987_v57, %v3257_v29  ;;  %v2433_v45 = vadd.f32 %v2401_v49, %v2332_v28  ;;  %v2434_v53 = vadd.f32 %v2402_v48, %v2333_v18  ;;  %v2764_v51 = vmul.f32 %v6215_v43, %v2476_v39  ;;  %v2477_v49 = vld [vmem:[#allocation2 + $0x2a0] sm:$0xff]  ;;  %v2479_v28 = vld [vmem:[#allocation2 + $0x2b0] sm:$0xff]  ;;  %v6238_v54 = vld [vmem:[#allocation8 + $0x2] ss:$0 sm:$0xff] }
 0x238   : > { %v3327_v26 = vmax.f32 %v3295_v27, 0.0  ;;  %v2643_v20 = vsel %vm2132_vm1, %v2641_v55, %v2642_v47  ;;  %v2645_v46 = vsel %vm2132_vm1, %v2642_v47, %v2644_v4  ;;  %v2864_v60 = vmul.f32 %v5931_v5, %v2827_v37  ;;  %v2367_v4 = vld [vmem:[#allocation2 + $0x118] sm:$0xff] }
 0x239   : > { %v3328_v7 = vmax.f32 %v3296_v8, 0.0  ;;  %v2726_v16 = vadd.f32 %v2643_v20, %v2433_v45  ;;  %v2727_v63 = vadd.f32 %v2645_v46, %v2434_v53  ;;  %v2990_v36 = vmul.f32 %v6223_v56, %v2937_v35 }
 0x23a   : > { %v2865_v23 = vmul.f32 %v5931_v5, %v2828_v44  ;;  %v2991_v6 = vmul.f32 %v6223_v56, %v2938_v21  ;;  %v2992_v17 = vmul.f32 %v6223_v56, %v2939_v58  ;;  %v3226_v1 = vmul.f32 %v6732_v50, %v2938_v21 }
 0x23b   : > { %v3351_v14 = vpack.c.bf16 %v3328_v7, %v3327_v26  ;;  %v2795_v41 = vadd.f32 %v2763_v40, %v2726_v16  ;;  %v2796_v32 = vadd.f32 %v2764_v51, %v2727_v63  ;;  %v3104_v9 = vrot.slane %v2990_v36, 7 }
 0x23c   : > { %v3105_v11 = vrot.slane %v2991_v6, 7  ;;  %v3107_v3 = vrot.slane %v2992_v17, 7  ;;  %v3227_v61 = vmul.f32 %v6732_v50, %v2939_v58  ;;  %v1939_v13 = vmul.f32 %v5939_v42, %v2827_v37 }
 0x23d   : > { %4448 = vmatprep.mubr.bf16.mxu1 %v3351_v14  ;;  %v2896_v0 = vadd.f32 %v2864_v60, %v2795_v41  ;;  %v2897_v59 = vadd.f32 %v2865_v23, %v2796_v32  ;;  %v2066_v38 = vmul.f32 %v6188_v30, %v2937_v35  ;;  %v2067_v39 = vmul.f32 %v6188_v30, %v2938_v21  ;;  %v6250_v60 = vld [vmem:[#allocation8 + $0x4] ss:$0 sm:$0xff]  ;;  %v2940_v14 = vld [vmem:[#allocation2 + $0x5d0] sm:$0xff] }
 0x23e   : > { %v3106_v22 = vsel %vm2132_vm1, %v3104_v9, %v3105_v11  ;;  %v3108_v10 = vsel %vm2132_vm1, %v3105_v11, %v3107_v3  ;;  %v1940_v34 = vmul.f32 %v5939_v42, %v2828_v44  ;;  %v2068_v15 = vmul.f32 %v6188_v30, %v2939_v58  ;;  %v2830_v9 = vld [vmem:[#allocation2 + $0x448] sm:$0xff]  ;;  %v2941_v3 = vld [vmem:[#allocation2 + $0x5d8] sm:$0xff] }
 0x23f   : > { %v3189_v2 = vadd.f32 %v3106_v22, %v2896_v0  ;;  %v3190_v12 = vadd.f32 %v3108_v10, %v2897_v59  ;;  %v2183_v62 = vrot.slane %v2066_v38, 7  ;;  %v2184_v25 = vrot.slane %v2067_v39, 7 }
 0x240   : > { %v2186_v24 = vrot.slane %v2068_v15, 7  ;;  %v2302_v29 = vmul.f32 %v6238_v54, %v2938_v21  ;;  %v2303_v18 = vmul.f32 %v6238_v54, %v2939_v58  ;;  %v2403_v48 = vmul.f32 %v6741_v52, %v2366_v33 }
 0x241   : > { %v3258_v55 = vadd.f32 %v3226_v1, %v3189_v2  ;;  %v3259_v27 = vadd.f32 %v3227_v61, %v3190_v12  ;;  %v2185_v47 = vsel %vm2132_vm1, %v2183_v62, %v2184_v25  ;;  %v2530_v40 = vmul.f32 %v6208_v19, %v2477_v49  ;;  %v2829_v1 = vld [vmem:[#allocation2 + $0x440] sm:$0xff] }
 0x242   : > { %v2187_v8 = vsel %vm2132_vm1, %v2184_v25, %v2186_v24  ;;  %v2265_v45 = vadd.f32 %v2185_v47, %v1939_v13  ;;  %v2531_v53 = vmul.f32 %v6208_v19, %v2478_v31  ;;  %v2532_v51 = vmul.f32 %v6208_v19, %v2479_v28  ;;  %v2942_v61 = vld [vmem:[#allocation2 + $0x5e0] sm:$0xff]  ;;  %v2368_v24 = vld [vmem:[#allocation2 + $0x128] sm:$0xff] }
 0x243   : > { %v3297_v37 = vadd.f32 %v5987_v57, %v3258_v55  ;;  %v3298_v26 = vadd.f32 %v5987_v57, %v3259_v27  ;;  %v2266_v20 = vadd.f32 %v2187_v8, %v1940_v34  ;;  %v2646_v52 = vrot.slane %v2530_v40, 7  ;;  %v2480_v55 = vld [vmem:[#allocation2 + $0x2b8] sm:$0xff]  ;;  %v2481_v8 = vld [vmem:[#allocation2 + $0x2c0] sm:$0xff] }
 0x244   : > { %v2334_v46 = vadd.f32 %v2302_v29, %v2265_v45  ;;  %v2404_v35 = vmul.f32 %v6250_v60, %v2367_v4  ;;  %v2647_v7 = vrot.slane %v2531_v53, 7  ;;  %v2649_v16 = vrot.slane %v2532_v51, 7 }
 0x245   : > { %v3329_v63 = vmax.f32 %v3297_v37, 0.0  ;;  %v3330_v44 = vmax.f32 %v3298_v26, 0.0  ;;  %v2335_v21 = vadd.f32 %v2303_v18, %v2266_v20  ;;  %v2765_v58 = vmul.f32 %v6215_v43, %v2478_v31  ;;  %v2369_v37 = vld [vmem:[#allocation2 + $0x130] sm:$0xff]  ;;  %v2482_v20 = vld [vmem:[#allocation2 + $0x2c8] sm:$0xff] }
 0x246   : > { %v2435_v36 = vadd.f32 %v2403_v48, %v2334_v46  ;;  %v2648_v23 = vsel %vm2132_vm1, %v2646_v52, %v2647_v7  ;;  %v2650_v6 = vsel %vm2132_vm1, %v2647_v7, %v2649_v16  ;;  %v2766_v17 = vmul.f32 %v6215_v43, %v2479_v28 }
 0x247   : > { %v3352_v41 = vpack.c.bf16 %v3330_v44, %v3329_v63  ;;  %v2436_v32 = vadd.f32 %v2404_v35, %v2335_v21  ;;  %v2866_v11 = vmul.f32 %v5931_v5, %v2829_v1  ;;  %v2993_v13 = vmul.f32 %v6223_v56, %v2940_v14 }
 0x248   : > { %v2728_v0 = vadd.f32 %v2648_v23, %v2435_v36  ;;  %v2867_v59 = vmul.f32 %v5931_v5, %v2830_v9  ;;  %v2994_v38 = vmul.f32 %v6223_v56, %v2941_v3  ;;  %v2995_v39 = vmul.f32 %v6223_v56, %v2942_v61 }
 0x249   : > { %4449 = vmatmul.mubr.bf16.gmra.mrb[64].mxu1 %v3352_v41  ;;  %v2729_v33 = vadd.f32 %v2650_v6, %v2436_v32  ;;  %v3109_v22 = vrot.slane %v2993_v13, 7  ;;  %v3228_v10 = vmul.f32 %v6732_v50, %v2941_v3  ;;  %v3229_v34 = vmul.f32 %v6732_v50, %v2942_v61 }
 0x24a   : > { %v2797_v15 = vadd.f32 %v2765_v58, %v2728_v0  ;;  %v3110_v49 = vrot.slane %v2994_v38, 7  ;;  %v3112_v2 = vrot.slane %v2995_v39, 7  ;;  %v1941_v12 = vmul.f32 %v5939_v42, %v2829_v1  ;;  %v2943_v39 = vld [vmem:[#allocation2 + $0x5e8] sm:$0xff] }
 0x24b   : > { %v2798_v62 = vadd.f32 %v2766_v17, %v2729_v33  ;;  %v2069_v25 = vmul.f32 %v6188_v30, %v2940_v14  ;;  %v2070_v31 = vmul.f32 %v6188_v30, %v2941_v3  ;;  %v2071_v28 = vmul.f32 %v6188_v30, %v2942_v61 }
 0x24c   : > { %v2898_v29 = vadd.f32 %v2866_v11, %v2797_v15  ;;  %v3111_v18 = vsel %vm2132_vm1, %v3109_v22, %v3110_v49  ;;  %v3113_v48 = vsel %vm2132_vm1, %v3110_v49, %v3112_v2  ;;  %v1942_v50 = vmul.f32 %v5939_v42, %v2830_v9  ;;  %v2945_v15 = vld [vmem:[#allocation2 + $0x5f8] sm:$0xff] }
 0x24d   : > { %v2899_v27 = vadd.f32 %v2867_v59, %v2798_v62  ;;  %v2188_v47 = vrot.slane %v2069_v25, 7  ;;  %v2189_v4 = vrot.slane %v2070_v31, 7  ;;  %v2191_v40 = vrot.slane %v2071_v28, 7  ;;  %v2832_v62 = vld [vmem:[#allocation2 + $0x460] sm:$0xff] }
 0x24e   : > { %v3191_v45 = vadd.f32 %v3111_v18, %v2898_v29  ;;  %v2304_v53 = vmul.f32 %v6238_v54, %v2941_v3  ;;  %v2305_v51 = vmul.f32 %v6238_v54, %v2942_v61  ;;  %v2405_v26 = vmul.f32 %v6250_v60, %v2368_v24  ;;  %v2831_v61 = vld [vmem:[#allocation2 + $0x458] sm:$0xff]  ;;  %v6291_v18 = vld [vmem:[#allocation8 + $0x8] ss:$0 sm:$0xff] }
 0x24f   : > { %v3192_v52 = vadd.f32 %v3113_v48, %v2899_v27  ;;  %v2190_v46 = vsel %vm2132_vm1, %v2188_v47, %v2189_v4  ;;  %v2192_v35 = vsel %vm2132_vm1, %v2189_v4, %v2191_v40  ;;  %v2533_v7 = vmul.f32 %v6208_v19, %v2480_v55 }
 0x250   : > { %v3260_v16 = vadd.f32 %v3228_v10, %v3191_v45  ;;  %v2267_v63 = vadd.f32 %v2190_v46, %v1941_v12  ;;  %v2268_v44 = vadd.f32 %v2192_v35, %v1942_v50  ;;  %v2534_v21 = vmul.f32 %v6208_v19, %v2481_v8 }
 0x251   : > { %v3261_v58 = vadd.f32 %v3229_v34, %v3192_v52  ;;  %v2406_v36 = vmul.f32 %v6250_v60, %v2369_v37  ;;  %v2535_v23 = vmul.f32 %v6208_v19, %v2482_v20  ;;  %v2651_v6 = vrot.slane %v2533_v7, 7  ;;  %v2944_v34 = vld [vmem:[#allocation2 + $0x5f0] sm:$0xff] }
 0x252   : > { %v3299_v17 = vadd.f32 %v5987_v57, %v3260_v16  ;;  %v2336_v1 = vadd.f32 %v2304_v53, %v2267_v63  ;;  %v2337_v14 = vadd.f32 %v2305_v51, %v2268_v44  ;;  %v2652_v41 = vrot.slane %v2534_v21, 7  ;;  %v2484_v16 = vld [vmem:[#allocation2 + $0x2d8] sm:$0xff] }
 0x253   : > { %v3300_v32 = vadd.f32 %v5987_v57, %v3261_v58  ;;  %v2654_v9 = vrot.slane %v2535_v23, 7  ;;  %v2767_v11 = vmul.f32 %v6215_v43, %v2481_v8  ;;  %v2768_v3 = vmul.f32 %v6215_v43, %v2482_v20  ;;  %v2483_v20 = vld [vmem:[#allocation2 + $0x2d0] sm:$0xff]  ;;  %v2485_v23 = vld [vmem:[#allocation2 + $0x2e0] sm:$0xff] }
 0x254   : > { %v2437_v13 = vadd.f32 %v2405_v26, %v2336_v1  ;;  %v2438_v0 = vadd.f32 %v2406_v36, %v2337_v14  ;;  %v2653_v59 = vsel %vm2132_vm1, %v2651_v6, %v2652_v41  ;;  %v2868_v38 = vmul.f32 %v5931_v5, %v2831_v61  ;;  %v2370_v26 = vld [vmem:[#allocation2 + $0x140] sm:$0xff]  ;;  %v2371_v36 = vld [vmem:[#allocation2 + $0x148] sm:$0xff] }
 0x255   : > { %v3331_v33 = vmax.f32 %v3299_v17, 0.0  ;;  %v3332_v22 = vmax.f32 %v3300_v32, 0.0  ;;  %v2655_v10 = vsel %vm2132_vm1, %v2652_v41, %v2654_v9  ;;  %v2996_v49 = vmul.f32 %v6223_v56, %v2943_v39 }
 0x256   : > { %v2730_v2 = vadd.f32 %v2653_v59, %v2437_v13  ;;  %v2731_v12 = vadd.f32 %v2655_v10, %v2438_v0  ;;  %v2997_v25 = vmul.f32 %v6223_v56, %v2944_v34  ;;  %v2998_v31 = vmul.f32 %v6223_v56, %v2945_v15 }
 0x257   : > { %v3353_v28 = vpack.c.bf16 %v3332_v22, %v3331_v33  ;;  %v2869_v24 = vmul.f32 %v5931_v5, %v2832_v62  ;;  %v3114_v29 = vrot.slane %v2996_v49, 7  ;;  %v3230_v48 = vmul.f32 %v6291_v18, %v2944_v34 }
 0x258   : > { %v2799_v50 = vadd.f32 %v2767_v11, %v2730_v2  ;;  %v2800_v55 = vadd.f32 %v2768_v3, %v2731_v12  ;;  %v3115_v27 = vrot.slane %v2997_v25, 7  ;;  %v3117_v47 = vrot.slane %v2998_v31, 7  ;;  %v2946_v25 = vld [vmem:[#allocation2 + $0x600] sm:$0xff] }
 0x259   : > { %4452 = vmatprep.mubr.bf16.mxu1 %v3353_v28  ;;  %v3231_v4 = vmul.f32 %v6291_v18, %v2945_v15  ;;  %v1943_v40 = vmul.f32 %v5939_v42, %v2831_v61  ;;  %v2072_v8 = vmul.f32 %v6188_v30, %v2943_v39  ;;  %v2073_v45 = vmul.f32 %v6188_v30, %v2944_v34 }
 0x25a   : > { %v2900_v53 = vadd.f32 %v2868_v38, %v2799_v50  ;;  %v2901_v5 = vadd.f32 %v2869_v24, %v2800_v55  ;;  %v3116_v51 = vsel %vm2132_vm1, %v3114_v29, %v3115_v27  ;;  %v3118_v37 = vsel %vm2132_vm1, %v3115_v27, %v3117_v47  ;;  %v6317_v24 = vld [vmem:[#allocation8 + $0x7] ss:$0 sm:$0xff]  ;;  %v2834_v47 = vld [vmem:[#allocation2 + $0x478] sm:$0xff] }
 0x25b   : > { %v1944_v52 = vmul.f32 %v5939_v42, %v2832_v62  ;;  %v2074_v46 = vmul.f32 %v6188_v30, %v2945_v15  ;;  %v2193_v35 = vrot.slane %v2072_v8, 7  ;;  %v2194_v7 = vrot.slane %v2073_v45, 7  ;;  %v2833_v62 = vld [vmem:[#allocation2 + $0x470] sm:$0xff]  ;;  %v2947_v29 = vld [vmem:[#allocation2 + $0x608] sm:$0xff] }
 0x25c   : > { %v3193_v63 = vadd.f32 %v3116_v51, %v2900_v53  ;;  %v3194_v44 = vadd.f32 %v3118_v37, %v2901_v5  ;;  %v2306_v21 = vmul.f32 %v6238_v54, %v2944_v34  ;;  %v2307_v58 = vmul.f32 %v6238_v54, %v2945_v15 }
 0x25d   : > { %v2195_v6 = vsel %vm2132_vm1, %v2193_v35, %v2194_v7  ;;  %v2196_v17 = vrot.slane %v2074_v46, 7  ;;  %v2407_v1 = vmul.f32 %v6250_v60, %v2370_v26  ;;  %v2536_v42 = vmul.f32 %v6208_v19, %v2483_v20  ;;  %v6326_v46 = vld [vmem:[#allocation8 + $0x1] ss:$0 sm:$0xff] }
 0x25e   : > { %v3262_v14 = vadd.f32 %v3230_v48, %v3193_v63  ;;  %v3263_v41 = vadd.f32 %v3231_v4, %v3194_v44  ;;  %v2269_v32 = vadd.f32 %v2195_v6, %v1943_v40  ;;  %v2537_v9 = vmul.f32 %v6208_v19, %v2484_v16  ;;  %v2948_v4 = vld [vmem:[#allocation2 + $0x610] sm:$0xff] }
 0x25f   : > { %v2197_v11 = vsel %vm2132_vm1, %v2194_v7, %v2196_v17  ;;  %v2408_v3 = vmul.f32 %v6250_v60, %v2371_v36  ;;  %v2538_v61 = vmul.f32 %v6208_v19, %v2485_v23  ;;  %v2656_v13 = vrot.slane %v2536_v42, 7  ;;  %v2486_v36 = vld [vmem:[#allocation2 + $0x2e8] sm:$0xff] }
 0x260   : > { %v3301_v0 = vadd.f32 %v5987_v57, %v3262_v14  ;;  %v3302_v59 = vadd.f32 %v5987_v57, %v3263_v41  ;;  %v2270_v38 = vadd.f32 %v2197_v11, %v1944_v52  ;;  %v2338_v39 = vadd.f32 %v2306_v21, %v2269_v32  ;;  %v2488_v11 = vld [vmem:[#allocation2 + $0x2f8] sm:$0xff] }
 0x261   : > { %v2657_v33 = vrot.slane %v2537_v9, 7  ;;  %v2659_v22 = vrot.slane %v2538_v61, 7  ;;  %v2769_v10 = vmul.f32 %v6215_v43, %v2484_v16  ;;  %v2770_v34 = vmul.f32 %v6215_v43, %v2485_v23  ;;  %v2487_v9 = vld [vmem:[#allocation2 + $0x2f0] sm:$0xff] }
 0x262   : > { %v3333_v15 = vmax.f32 %v3301_v0, 0.0  ;;  %v3334_v49 = vmax.f32 %v3302_v59, 0.0  ;;  %v2339_v2 = vadd.f32 %v2307_v58, %v2270_v38  ;;  %v2439_v12 = vadd.f32 %v2407_v1, %v2338_v39 }
 0x263   : > { %v2658_v31 = vsel %vm2132_vm1, %v2656_v13, %v2657_v33  ;;  %v2660_v28 = vsel %vm2132_vm1, %v2657_v33, %v2659_v22  ;;  %v2870_v57 = vmul.f32 %v6317_v24, %v2833_v62  ;;  %v2999_v48 = vmul.f32 %v6223_v56, %v2946_v25  ;;  %v2372_v13 = vld [vmem:[#allocation2 + $0x158] sm:$0xff]  ;;  %v2373_v22 = vld [vmem:[#allocation2 + $0x160] sm:$0xff] }
 0x264   : > { %v3354_v50 = vpack.c.bf16 %v3334_v49, %v3333_v15  ;;  %v2440_v55 = vadd.f32 %v2408_v3, %v2339_v2  ;;  %v2732_v27 = vadd.f32 %v2658_v31, %v2439_v12  ;;  %v3000_v40 = vmul.f32 %v6223_v56, %v2947_v29  ;;  %v6345_v12 = vld [vmem:[%s6535_s4] ss:$0 sm:$0xff] }
 0x265   : > { %v2871_v8 = vmul.f32 %v6317_v24, %v2834_v47  ;;  %v3001_v45 = vmul.f32 %v6223_v56, %v2948_v4  ;;  %v3119_v53 = vrot.slane %v2999_v48, 7  ;;  %v3232_v5 = vmul.f32 %v6291_v18, %v2947_v29 }
 0x266   : > { %4453 = vmatmul.mubr.bf16.gmra.mrb[68].mxu1 %v3354_v50  ;;  %v2733_v51 = vadd.f32 %v2660_v28, %v2440_v55  ;;  %v2801_v37 = vadd.f32 %v2769_v10, %v2732_v27  ;;  %v3120_v26 = vrot.slane %v3000_v40, 7  ;;  %v3233_v20 = vmul.f32 %v6291_v18, %v2948_v4 }
 0x267   : > { %v3122_v52 = vrot.slane %v3001_v45, 7  ;;  %v1945_v35 = vmul.f32 %v6326_v46, %v2833_v62  ;;  %v2075_v7 = vmul.f32 %v6188_v30, %v2946_v25  ;;  %v2076_v16 = vmul.f32 %v6188_v30, %v2947_v29 }
 0x268   : > { %v2802_v63 = vadd.f32 %v2770_v34, %v2733_v51  ;;  %v2902_v44 = vadd.f32 %v2870_v57, %v2801_v37  ;;  %v3121_v21 = vsel %vm2132_vm1, %v3119_v53, %v3120_v26  ;;  %v2077_v58 = vmul.f32 %v6188_v30, %v2948_v4  ;;  %v2949_v53 = vld [vmem:[#allocation2 + $0x618] sm:$0xff] }
 0x269   : > { %v3123_v23 = vsel %vm2132_vm1, %v3120_v26, %v3122_v52  ;;  %v1946_v6 = vmul.f32 %v6326_v46, %v2834_v47  ;;  %v2198_v17 = vrot.slane %v2075_v7, 7  ;;  %v2199_v1 = vrot.slane %v2076_v16, 7  ;;  %v2835_v26 = vld [vmem:[#allocation2 + $0x488] sm:$0xff] }
 0x26a   : > { %v2903_v42 = vadd.f32 %v2871_v8, %v2802_v63  ;;  %v3195_v14 = vadd.f32 %v3121_v21, %v2902_v44  ;;  %v2201_v41 = vrot.slane %v2077_v58, 7  ;;  %v2308_v32 = vmul.f32 %v6238_v54, %v2947_v29  ;;  %v2951_v52 = vld [vmem:[#allocation2 + $0x628] sm:$0xff] }
 0x26b   : > { %v2200_v3 = vsel %vm2132_vm1, %v2198_v17, %v2199_v1  ;;  %v2309_v61 = vmul.f32 %v6238_v54, %v2948_v4  ;;  %v2539_v0 = vmul.f32 %v6208_v19, %v2486_v36  ;;  %v2540_v34 = vmul.f32 %v6208_v19, %v2487_v9 }
 0x26c   : > { %v3196_v59 = vadd.f32 %v3123_v23, %v2903_v42  ;;  %v3264_v38 = vadd.f32 %v3232_v5, %v3195_v14  ;;  %v2202_v39 = vsel %vm2132_vm1, %v2199_v1, %v2201_v41  ;;  %v2271_v33 = vadd.f32 %v2200_v3, %v1945_v35  ;;  %v2950_v5 = vld [vmem:[#allocation2 + $0x620] sm:$0xff] }
 0x26d   : > { %v2272_v10 = vadd.f32 %v2202_v39, %v1946_v6  ;;  %v2541_v15 = vmul.f32 %v6208_v19, %v2488_v11  ;;  %v2661_v49 = vrot.slane %v2539_v0, 7  ;;  %v2409_v31 = vmul.f32 %v6250_v60, %v2372_v13 }
 0x26e   : > { %v3265_v2 = vadd.f32 %v3233_v20, %v3196_v59  ;;  %v3303_v62 = vadd.f32 %v6345_v12, %v3264_v38  ;;  %v2340_v25 = vadd.f32 %v2308_v32, %v2271_v33  ;;  %v2410_v57 = vmul.f32 %v6250_v60, %v2373_v22  ;;  %v2836_v20 = vld [vmem:[#allocation2 + $0x490] sm:$0xff]  ;;  %v2489_v59 = vld [vmem:[#allocation2 + $0x300] sm:$0xff]  ;;  %v2490_v38 = vld [vmem:[#allocation2 + $0x308] sm:$0xff] }
 0x26f   : > { %v2341_v28 = vadd.f32 %v2309_v61, %v2272_v10  ;;  %v2662_v29 = vrot.slane %v2540_v34, 7  ;;  %v2664_v48 = vrot.slane %v2541_v15, 7  ;;  %v2771_v27 = vmul.f32 %v6215_v43, %v2487_v9  ;;  %v2491_v34 = vld [vmem:[#allocation2 + $0x310] sm:$0xff] }
 0x270   : > { %v3304_v50 = vadd.f32 %v6345_v12, %v3265_v2  ;;  %v2441_v55 = vadd.f32 %v2409_v31, %v2340_v25  ;;  %v2772_v47 = vmul.f32 %v6215_v43, %v2488_v11  ;;  %v3335_v4 = vmax.f32 %v3303_v62, 0.0 }
 0x271   : > { %v2442_v40 = vadd.f32 %v2410_v57, %v2341_v28  ;;  %v2663_v8 = vsel %vm2132_vm1, %v2661_v49, %v2662_v29  ;;  %v2665_v45 = vsel %vm2132_vm1, %v2662_v29, %v2664_v48  ;;  %v3002_v35 = vmul.f32 %v6223_v56, %v2949_v53  ;;  %v2374_v28 = vld [vmem:[#allocation2 + $0x170] sm:$0xff] }
 0x272   : > { %v3336_v51 = vmax.f32 %v3304_v50, 0.0  ;;  %v2734_v37 = vadd.f32 %v2663_v8, %v2441_v55  ;;  %v3003_v7 = vmul.f32 %v6223_v56, %v2950_v5  ;;  %v2872_v63 = vmul.f32 %v6317_v24, %v2835_v26 }
 0x273   : > { %v2735_v16 = vadd.f32 %v2665_v45, %v2442_v40  ;;  %v2873_v44 = vmul.f32 %v6317_v24, %v2836_v20  ;;  %v3004_v21 = vmul.f32 %v6223_v56, %v2951_v52  ;;  %v3124_v23 = vrot.slane %v3002_v35, 7 }
 0x274   : > { %v3355_v58 = vpack.c.bf16 %v3336_v51, %v3335_v4  ;;  %v2803_v36 = vadd.f32 %v2771_v27, %v2734_v37  ;;  %v3125_v6 = vrot.slane %v3003_v7, 7  ;;  %v3234_v42 = vmul.f32 %v6291_v18, %v2950_v5  ;;  %v2375_v27 = vld [vmem:[#allocation2 + $0x178] sm:$0xff] }
 0x275   : > { %v2804_v17 = vadd.f32 %v2772_v47, %v2735_v16  ;;  %v3127_v1 = vrot.slane %v3004_v21, 7  ;;  %v3235_v14 = vmul.f32 %v6291_v18, %v2951_v52  ;;  %v2078_v9 = vmul.f32 %v6188_v30, %v2949_v53  ;;  %v2952_v21 = vld [vmem:[#allocation2 + $0x630] sm:$0xff] }
 0x276   : > { %4456 = vmatprep.mubr.bf16.mxu1 %v3355_v58  ;;  %v2904_v41 = vadd.f32 %v2872_v63, %v2803_v36  ;;  %v3126_v32 = vsel %vm2132_vm1, %v3124_v23, %v3125_v6  ;;  %v2079_v11 = vmul.f32 %v6188_v30, %v2950_v5  ;;  %v1947_v13 = vmul.f32 %v6326_v46, %v2835_v26  ;;  %v2953_v58 = vld [vmem:[#allocation2 + $0x638] sm:$0xff] }
 0x277   : > { %v2905_v3 = vadd.f32 %v2873_v44, %v2804_v17  ;;  %v3128_v61 = vsel %vm2132_vm1, %v3125_v6, %v3127_v1  ;;  %v2080_v0 = vmul.f32 %v6188_v30, %v2951_v52  ;;  %v1948_v33 = vmul.f32 %v6326_v46, %v2836_v20  ;;  %v2837_v6 = vld [vmem:[#allocation2 + $0x4a0] sm:$0xff] }
 0x278   : > { %v3197_v39 = vadd.f32 %v3126_v32, %v2904_v41  ;;  %v2203_v22 = vrot.slane %v2078_v9, 7  ;;  %v2204_v10 = vrot.slane %v2079_v11, 7  ;;  %v2310_v2 = vmul.f32 %v6238_v54, %v2950_v5  ;;  %v2954_v17 = vld [vmem:[#allocation2 + $0x640] sm:$0xff]  ;;  %v2838_v32 = vld [vmem:[#allocation2 + $0x4a8] sm:$0xff] }
 0x279   : > { %v3198_v15 = vadd.f32 %v3128_v61, %v2905_v3  ;;  %v2206_v49 = vrot.slane %v2080_v0, 7  ;;  %v2311_v62 = vmul.f32 %v6238_v54, %v2951_v52  ;;  %v2542_v57 = vmul.f32 %v6208_v19, %v2489_v59 }
 0x27a   : > { %v3266_v25 = vadd.f32 %v3234_v42, %v3197_v39  ;;  %v2205_v31 = vsel %vm2132_vm1, %v2203_v22, %v2204_v10  ;;  %v2543_v29 = vmul.f32 %v6208_v19, %v2490_v38  ;;  %v2544_v47 = vmul.f32 %v6208_v19, %v2491_v34 }
 0x27b   : > { %v3267_v48 = vadd.f32 %v3235_v14, %v3198_v15  ;;  %v2207_v50 = vsel %vm2132_vm1, %v2204_v10, %v2206_v49  ;;  %v2273_v55 = vadd.f32 %v2205_v31, %v1947_v13  ;;  %v2666_v8 = vrot.slane %v2542_v57, 7  ;;  %v2492_v31 = vld [vmem:[#allocation2 + $0x318] sm:$0xff] }
 0x27c   : > { %v3305_v4 = vadd.f32 %v6345_v12, %v3266_v25  ;;  %v2274_v40 = vadd.f32 %v2207_v50, %v1948_v33  ;;  %v2667_v45 = vrot.slane %v2543_v29, 7  ;;  %v2411_v51 = vmul.f32 %v6250_v60, %v2374_v28  ;;  %v2493_v28 = vld [vmem:[#allocation2 + $0x320] sm:$0xff] }
 0x27d   : > { %v3306_v53 = vadd.f32 %v6345_v12, %v3267_v48  ;;  %v2342_v5 = vadd.f32 %v2310_v2, %v2273_v55  ;;  %v2669_v37 = vrot.slane %v2544_v47, 7  ;;  %v2412_v20 = vmul.f32 %v6250_v60, %v2375_v27  ;;  %v2494_v55 = vld [vmem:[#allocation2 + $0x328] sm:$0xff] }
 0x27e   : > { %v2343_v26 = vadd.f32 %v2311_v62, %v2274_v40  ;;  %v2668_v52 = vsel %vm2132_vm1, %v2666_v8, %v2667_v45  ;;  %v2773_v35 = vmul.f32 %v6215_v43, %v2490_v38  ;;  %v3337_v7 = vmax.f32 %v3305_v4, 0.0 }
 0x27f   : > { %v3338_v16 = vmax.f32 %v3306_v53, 0.0  ;;  %v2443_v63 = vadd.f32 %v2411_v51, %v2342_v5  ;;  %v2670_v44 = vsel %vm2132_vm1, %v2667_v45, %v2669_v37  ;;  %v2774_v23 = vmul.f32 %v6215_v43, %v2491_v34  ;;  %v2376_v53 = vld [vmem:[#allocation2 + $0x188] sm:$0xff] }
 0x280   : > { %v2444_v36 = vadd.f32 %v2412_v20, %v2343_v26  ;;  %v3005_v1 = vmul.f32 %v6223_v56, %v2952_v21  ;;  %v3006_v42 = vmul.f32 %v6223_v56, %v2953_v58  ;;  %v2874_v9 = vmul.f32 %v6317_v24, %v2837_v6  ;;  %v2377_v26 = vld [vmem:[#allocation2 + $0x190] sm:$0xff] }
 0x281   : > { %v3356_v14 = vpack.c.bf16 %v3338_v16, %v3337_v7  ;;  %v2736_v41 = vadd.f32 %v2668_v52, %v2443_v63  ;;  %v3007_v11 = vmul.f32 %v6223_v56, %v2954_v17  ;;  %v2875_v61 = vmul.f32 %v6317_v24, %v2838_v32 }
 0x282   : > { %v2737_v3 = vadd.f32 %v2670_v44, %v2444_v36  ;;  %v3129_v13 = vrot.slane %v3005_v1, 7  ;;  %v3130_v0 = vrot.slane %v3006_v42, 7  ;;  %v3236_v39 = vmul.f32 %v6291_v18, %v2953_v58  ;;  %v2956_v1 = vld [vmem:[#allocation2 + $0x650] sm:$0xff] }
 0x283   : > { %4457 = vmatmul.mubr.bf16.gmra.mrb[72].mxu1 %v3356_v14  ;;  %v2805_v59 = vadd.f32 %v2773_v35, %v2736_v41  ;;  %v3132_v38 = vrot.slane %v3007_v11, 7  ;;  %v3237_v33 = vmul.f32 %v6291_v18, %v2954_v17  ;;  %v2081_v34 = vmul.f32 %v6188_v30, %v2952_v21  ;;  %v2839_v11 = vld [vmem:[#allocation2 + $0x4b8] sm:$0xff] }
 0x284   : > { %v2806_v22 = vadd.f32 %v2774_v23, %v2737_v3  ;;  %v3131_v10 = vsel %vm2132_vm1, %v3129_v13, %v3130_v0  ;;  %v2082_v15 = vmul.f32 %v6188_v30, %v2953_v58  ;;  %v1949_v62 = vmul.f32 %v6326_v46, %v2837_v6 }
 0x285   : > { %v2906_v49 = vadd.f32 %v2874_v9, %v2805_v59  ;;  %v3133_v2 = vsel %vm2132_vm1, %v3130_v0, %v3132_v38  ;;  %v2083_v25 = vmul.f32 %v6188_v30, %v2954_v17  ;;  %v1950_v29 = vmul.f32 %v6326_v46, %v2838_v32  ;;  %v2840_v0 = vld [vmem:[#allocation2 + $0x4c0] sm:$0xff] }
 0x286   : > { %v2907_v57 = vadd.f32 %v2875_v61, %v2806_v22  ;;  %v2208_v48 = vrot.slane %v2081_v34, 7  ;;  %v2209_v50 = vrot.slane %v2082_v15, 7  ;;  %v2312_v4 = vmul.f32 %v6238_v54, %v2953_v58  ;;  %v2955_v58 = vld [vmem:[#allocation2 + $0x648] sm:$0xff] }
 0x287   : > { %v3199_v27 = vadd.f32 %v3131_v10, %v2906_v49  ;;  %v2211_v47 = vrot.slane %v2083_v25, 7  ;;  %v2313_v40 = vmul.f32 %v6238_v54, %v2954_v17  ;;  %v2545_v30 = vmul.f32 %v6208_v19, %v2492_v31 }
 0x288   : > { %v3200_v8 = vadd.f32 %v3133_v2, %v2907_v57  ;;  %v2210_v45 = vsel %vm2132_vm1, %v2208_v48, %v2209_v50  ;;  %v2546_v5 = vmul.f32 %v6208_v19, %v2493_v28  ;;  %v2547_v20 = vmul.f32 %v6208_v19, %v2494_v55  ;;  %v2957_v19 = vld [vmem:[#allocation2 + $0x658] sm:$0xff] }
 0x289   : > { %v3268_v51 = vadd.f32 %v3236_v39, %v3199_v27  ;;  %v2212_v46 = vsel %vm2132_vm1, %v2209_v50, %v2211_v47  ;;  %v2275_v37 = vadd.f32 %v2210_v45, %v1949_v62  ;;  %v2671_v7 = vrot.slane %v2545_v30, 7  ;;  %v6427_v45 = vld [vmem:[%s6537_s6] ss:$0 sm:$0xff] }
 0x28a   : > { %v3269_v52 = vadd.f32 %v3237_v33, %v3200_v8  ;;  %v2276_v35 = vadd.f32 %v2212_v46, %v1950_v29  ;;  %v2672_v16 = vrot.slane %v2546_v5, 7  ;;  %v2413_v44 = vmul.f32 %v6250_v60, %v2376_v53 }
 0x28b   : > { %v3307_v54 = vadd.f32 %v6345_v12, %v3268_v51  ;;  %v2344_v63 = vadd.f32 %v2312_v4, %v2275_v37  ;;  %v2674_v21 = vrot.slane %v2547_v20, 7  ;;  %v2414_v6 = vmul.f32 %v6250_v60, %v2377_v26 }
 0x28c   : > { %v3308_v36 = vadd.f32 %v6345_v12, %v3269_v52  ;;  %v2345_v23 = vadd.f32 %v2313_v40, %v2276_v35  ;;  %v2673_v17 = vsel %vm2132_vm1, %v2671_v7, %v2672_v16  ;;  %v3008_v3 = vmul.f32 %v6223_v56, %v2955_v58 }
 0x28d   : > { %v2445_v42 = vadd.f32 %v2413_v44, %v2344_v63  ;;  %v2675_v14 = vsel %vm2132_vm1, %v2672_v16, %v2674_v21  ;;  %v3339_v41 = vmax.f32 %v3307_v54, 0.0  ;;  %v2775_v13 = vmul.f32 %v6215_v43, %v2493_v28 }
 0x28e   : > { %v3340_v32 = vmax.f32 %v3308_v36, 0.0  ;;  %v2446_v9 = vadd.f32 %v2414_v6, %v2345_v23  ;;  %v3009_v59 = vmul.f32 %v6223_v56, %v2956_v1  ;;  %v3010_v60 = vmul.f32 %v6223_v56, %v2957_v19 }
 0x28f   : > { %v2738_v61 = vadd.f32 %v2673_v17, %v2445_v42  ;;  %v2776_v33 = vmul.f32 %v6215_v43, %v2494_v55  ;;  %v3134_v22 = vrot.slane %v3008_v3, 7  ;;  %v2876_v34 = vmul.f32 %v6317_v24, %v2839_v11 }
 0x290   : > { %v3357_v38 = vpack.c.bf16 %v3340_v32, %v3339_v41  ;;  %v2739_v39 = vadd.f32 %v2675_v14, %v2446_v9  ;;  %v3135_v15 = vrot.slane %v3009_v59, 7  ;;  %v3137_v49 = vrot.slane %v3010_v60, 7 }
 0x291   : > { %v2807_v10 = vadd.f32 %v2775_v13, %v2738_v61  ;;  %v2877_v62 = vmul.f32 %v6317_v24, %v2840_v0  ;;  %v3238_v56 = vmul.f32 %v6291_v18, %v2956_v1  ;;  %v3239_v43 = vmul.f32 %v6291_v18, %v2957_v19 }
 0x292   : > { %4460 = vmatprep.mubr.bf16.mxu1 %v3357_v38  ;;  %v2808_v2 = vadd.f32 %v2776_v33, %v2739_v39  ;;  %v3136_v31 = vsel %vm2132_vm1, %v3134_v22, %v3135_v15  ;;  %v3138_v28 = vsel %vm2132_vm1, %v3135_v15, %v3137_v49 }
 0x293   : > { %v2908_v25 = vadd.f32 %v2876_v34, %v2807_v10 }
 0x294   : > { %v2909_v57 = vadd.f32 %v2877_v62, %v2808_v2 }
 0x295   : > { %v3201_v29 = vadd.f32 %v3136_v31, %v2908_v25 }
 0x296   : > { %v3202_v48 = vadd.f32 %v3138_v28, %v2909_v57 }
 0x297   : > { %v3270_v50 = vadd.f32 %v3238_v56, %v3201_v29 }
 0x298   : > { %v3271_v55 = vadd.f32 %v3239_v43, %v3202_v48 }
 0x299   : > { %v3309_v27 = vadd.f32 %v6345_v12, %v3270_v50 }
 0x29a   : > { %v3310_v47 = vadd.f32 %v6345_v12, %v3271_v55 }
 0x29b   : > { %v3341_v24 = vmax.f32 %v3309_v27, 0.0 }
 0x29c   : > { %v3342_v4 = vmax.f32 %v3310_v47, 0.0 }
 0x29e   : > { %v3358_v40 = vpack.c.bf16 %v3342_v4, %v3341_v24 }
 0x2a0   : > { %4461 = vmatmul.mubr.bf16.gmra.mrb[76].mxu1 %v3358_v40 }
 0x2e2   : > { %v4434_v8 = vpop.f32.mrb[48].mxu1 }
 0x2e3   : > { %v3464_v53 = vpop.f32.mrb[49].mxu1  ;;  %v3473_v30 = vadd.f32 %v4434_v8, %v6427_v45 }
 0x2e4   : > { %v4435_v18 = vpop.f32.mrb[50].mxu1  ;;  %v3465_v12 = vadd.f32 %v6427_v45, %v3464_v53 }
 0x2e5   : > { %v3476_v5 = vadd.f32 %v4435_v18, %v6427_v45  ;;  %v3467_v51 = vpop.f32.mrb[51].mxu1 }
 0x2e6   : > { %v3468_v46 = vadd.f32 %v6427_v45, %v3467_v51 }
 0x2e7   : > { %v4110_v37 = vpack.c.bf16 %v3476_v5, %v3473_v30 }
 0x2e8   : > { %v4105_v26 = vpack.c.bf16 %v3468_v46, %v3465_v12 }
 0x2e9   : > { %4182 = vst [vmem:[%s6434_s17 + $0x8] sm:$0xff] %v4110_v37  }
 0x2ea   : > { %4106 = vst [vmem:[%s6434_s17] sm:$0xff] %v4105_v26  }
 0x2f0   : > { %v4438_v20 = vpop.f32.mrb[52].mxu1 }
 0x2f1   : > { %v3480_v52 = vpop.f32.mrb[53].mxu1  ;;  %v3489_v7 = vadd.f32 %v4438_v20, %v6427_v45 }
 0x2f2   : > { %v4439_v35 = vpop.f32.mrb[54].mxu1  ;;  %v3481_v63 = vadd.f32 %v6427_v45, %v3480_v52 }
 0x2f3   : > { %v3492_v16 = vadd.f32 %v4439_v35, %v6427_v45  ;;  %v3483_v54 = vpop.f32.mrb[55].mxu1 }
 0x2f4   : > { %v3484_v44 = vadd.f32 %v6427_v45, %v3483_v54 }
 0x2f5   : > { %v4120_v21 = vpack.c.bf16 %v3492_v16, %v3489_v7 }
 0x2f6   : > { %v4115_v58 = vpack.c.bf16 %v3484_v44, %v3481_v63 }
 0x2f7   : > { %4184 = vst [vmem:[%s6434_s17 + $0x18] sm:$0xff] %v4120_v21  }
 0x2f8   : > { %4183 = vst [vmem:[%s6434_s17 + $0x10] sm:$0xff] %v4115_v58  }
 0x2fa   : > { %v4442_v36 = vpop.f32.mrb[56].mxu1 }
 0x2fb   : > { %v3496_v23 = vpop.f32.mrb[57].mxu1  ;;  %v3505_v17 = vadd.f32 %v4442_v36, %v6427_v45 }
 0x2fc   : > { %v4443_v6 = vpop.f32.mrb[58].mxu1  ;;  %v3497_v42 = vadd.f32 %v6427_v45, %v3496_v23 }
 0x2fd   : > { %v3508_v1 = vadd.f32 %v4443_v6, %v6427_v45  ;;  %v3499_v19 = vpop.f32.mrb[59].mxu1 }
 0x2fe   : > { %v3500_v14 = vadd.f32 %v6427_v45, %v3499_v19 }
 0x2ff   : > { %v4130_v41 = vpack.c.bf16 %v3508_v1, %v3505_v17 }
 0x300   : > { %v4125_v32 = vpack.c.bf16 %v3500_v14, %v3497_v42 }
 0x301   : > { %4186 = vst [vmem:[%s6434_s17 + $0x28] sm:$0xff] %v4130_v41  }
 0x302   : > { %4185 = vst [vmem:[%s6434_s17 + $0x20] sm:$0xff] %v4125_v32  }
 0x308   : > { %v4446_v9 = vpop.f32.mrb[60].mxu1 }
 0x309   : > { %v3512_v11 = vpop.f32.mrb[61].mxu1  ;;  %v3521_v61 = vadd.f32 %v4446_v9, %v6427_v45 }
 0x30a   : > { %v4447_v3 = vpop.f32.mrb[62].mxu1  ;;  %v3513_v59 = vadd.f32 %v6427_v45, %v3512_v11 }
 0x30b   : > { %v3524_v13 = vadd.f32 %v4447_v3, %v6427_v45  ;;  %v3515_v0 = vpop.f32.mrb[63].mxu1 }
 0x30c   : > { %v3516_v60 = vadd.f32 %v6427_v45, %v3515_v0 }
 0x30d   : > { %v4140_v38 = vpack.c.bf16 %v3524_v13, %v3521_v61 }
 0x30e   : > { %v4135_v39 = vpack.c.bf16 %v3516_v60, %v3513_v59 }
 0x30f   : > { %4188 = vst [vmem:[%s6434_s17 + $0x38] sm:$0xff] %v4140_v38  }
 0x310   : > { %4187 = vst [vmem:[%s6434_s17 + $0x30] sm:$0xff] %v4135_v39  }
 0x31c   : > { %v4450_v33 = vpop.f32.mrb[64].mxu1 }
 0x31d   : > { %v3528_v22 = vpop.f32.mrb[65].mxu1  ;;  %v3537_v34 = vadd.f32 %v4450_v33, %v6427_v45 }
 0x31e   : > { %v4451_v10 = vpop.f32.mrb[66].mxu1  ;;  %v3529_v2 = vadd.f32 %v6427_v45, %v3528_v22 }
 0x31f   : > { %v3540_v15 = vadd.f32 %v4451_v10, %v6427_v45  ;;  %v3531_v49 = vpop.f32.mrb[67].mxu1 }
 0x320   : > { %v3532_v62 = vadd.f32 %v6427_v45, %v3531_v49 }
 0x321   : > { %v4150_v25 = vpack.c.bf16 %v3540_v15, %v3537_v34 }
 0x322   : > { %v4145_v31 = vpack.c.bf16 %v3532_v62, %v3529_v2 }
 0x323   : > { %4190 = vst [vmem:[%s6434_s17 + $0x48] sm:$0xff] %v4150_v25  }
 0x324   : > { %4189 = vst [vmem:[%s6434_s17 + $0x40] sm:$0xff] %v4145_v31  }
 0x339   : > { %v4454_v28 = vpop.f32.mrb[68].mxu1 }
 0x33a   : > { %v3544_v56 = vpop.f32.mrb[69].mxu1  ;;  %v3553_v43 = vadd.f32 %v4454_v28, %v6427_v45 }
 0x33b   : > { %v4455_v57 = vpop.f32.mrb[70].mxu1  ;;  %v3545_v50 = vadd.f32 %v6427_v45, %v3544_v56 }
 0x33c   : > { %v3556_v29 = vadd.f32 %v4455_v57, %v6427_v45  ;;  %v3547_v48 = vpop.f32.mrb[71].mxu1 }
 0x33d   : > { %v3548_v55 = vadd.f32 %v6427_v45, %v3547_v48 }
 0x33e   : > { %v4160_v27 = vpack.c.bf16 %v3556_v29, %v3553_v43 }
 0x33f   : > { %v4155_v47 = vpack.c.bf16 %v3548_v55, %v3545_v50 }
 0x340   : > { %4192 = vst [vmem:[%s6434_s17 + $0x58] sm:$0xff] %v4160_v27  }
 0x341   : > { %4191 = vst [vmem:[%s6434_s17 + $0x50] sm:$0xff] %v4155_v47  }
 0x356   : > { %v4458_v24 = vpop.f32.mrb[72].mxu1 }
 0x357   : > { %v3560_v4 = vpop.f32.mrb[73].mxu1  ;;  %v3569_v8 = vadd.f32 %v4458_v24, %v6427_v45 }
 0x358   : > { %v4459_v40 = vpop.f32.mrb[74].mxu1  ;;  %v3561_v30 = vadd.f32 %v6427_v45, %v3560_v4 }
 0x359   : > { %v3572_v53 = vadd.f32 %v4459_v40, %v6427_v45  ;;  %v3563_v18 = vpop.f32.mrb[75].mxu1 }
 0x35a   : > { %v3564_v5 = vadd.f32 %v6427_v45, %v3563_v18 }
 0x35b   : > { %v4170_v51 = vpack.c.bf16 %v3572_v53, %v3569_v8 }
 0x35c   : > { %v4165_v12 = vpack.c.bf16 %v3564_v5, %v3561_v30 }
 0x35d   : > { %4194 = vst [vmem:[%s6434_s17 + $0x68] sm:$0xff] %v4170_v51  }
 0x35e   : > { %4193 = vst [vmem:[%s6434_s17 + $0x60] sm:$0xff] %v4165_v12  }
 0x373   : > { %v4462_v46 = vpop.f32.mrb[76].mxu1 }
 0x374   : > { %v3576_v37 = vpop.f32.mrb[77].mxu1  ;;  %v3585_v20 = vadd.f32 %v4462_v46, %v6427_v45 }
 0x375   : > { %v4463_v26 = vpop.f32.mrb[78].mxu1  ;;  %v3577_v7 = vadd.f32 %v6427_v45, %v3576_v37 }
 0x376   : > { %v3588_v52 = vadd.f32 %v4463_v26, %v6427_v45  ;;  %v3579_v35 = vpop.f32.mrb[79].mxu1 }
 0x377   : > { %v3580_v16 = vadd.f32 %v6427_v45, %v3579_v35 }
 0x378   : > { %v4180_v54 = vpack.c.bf16 %v3588_v52, %v3585_v20 }
 0x379   : > { %v4175_v63 = vpack.c.bf16 %v3580_v16, %v3577_v7 }
 0x37a   : > { %4196 = vst [vmem:[%s6434_s17 + $0x78] sm:$0xff] %v4180_v54  }
 0x37b   : > { %4195 = vst [vmem:[%s6434_s17 + $0x70] sm:$0xff] %v4175_v63  }
 0x37c   : > { %4769 = shalt.err (!%p4766_p4)
}
 0x37d   : > { %s4770_s1 = scalar_lea.hbm %s6483_s9, 2048  ;;  %s4774_s11 = scalar_lea.hbm %s6538_s7, 4096 }
 0x37e   : > { %p4771_p9 = scmp.ne.s32.totalorder %s6483_s9, %s4770_s1  ;;  %p4775_p8 = scmp.lt.u32.totalorder %s6483_s9, %s6538_s7 }
 0x37f   : > { %p4776_p13 = scmp.lt.u32.totalorder %s4774_s11, %s4770_s1  ;;  %p4778_p10 = scmp.lt.u32.totalorder %s4770_s1, %s6483_s9 }
 0x380   : > { %p4772_p0 = pnand %p4771_p9, %p5032_p5 }
 0x381   : > { %p4777_p6 = por %p4776_p13, %p4775_p8 }
 0x382   : > { %p4773_p11 = pneg %p4772_p0 }
 0x383   : > { %p4779_p3 = por %p4778_p10, %p4777_p6 }
 0x385   : > { %p4780_p7 = pnand %p4779_p3, %p4773_p11 }
 0x387   : > { %4783 = shalt.err (!%p4780_p7)
}
 0x388   : > { %s4842_s18 = smov 64   ;;  %s4843_s23 = smov 4  }
 0x389   : > { %4480 = dma.vmem_to_hbm [thread:$0]  (%p5032_p5), %s6485_s22, 2048, %s6483_s9, %s3752_s28, %s4842_s18, %s4842_s18, %s4843_s23  }
 0x38a PF: > { %s6742_s30 = sld [smem:[#allocation16_spill]]  ;;  %s3780_s29 = sand.u32 1, %s4818_s24  }
 0x38b   : > { %p6744_p1 = scmp.ge.s32.totalorder %s4830_s27, 2  ;;  %s3781_s10 = scalar_lea.sflag [#allocation5], %s3780_s29 }
 0x390   : > { %p6743_p12 = scmp.ne.s32.totalorder %s6742_s30, 0 }
 0x392   : > { %p4497_p2 = pnand %p6744_p1, %p6743_p12 }
 0x394   : > { %4813 = dma.done.wait (!%p4497_p2), %s3781_s10, 2048  }
 0x395   : > { %4815 = vsyncadd (!%p4497_p2), %s3781_s10, 4294965248  ;;  %p22_p4 = scmp.ge.s32.totalorder %s4997_s21, 4   ;;  %s6745_s24 = smov %s4822_s25 }
 0x396   : > { %s6746_s25 = smov %s4826_s26  ;;  %s6747_s26 = smov %s5028_s13 }
 0x397   : > { %s6748_s27 = smov %s4997_s21  ;;  %24 = sbr.rel (!%p22_p4) target bundleno = 9 (0x9), region = 112 }
 0x39e   :  { %3786 = vsyncpa [#allocation4], 1 }
 0x39f   :  { %3788 = vsyncpa [#allocation4 + $0x1], 1 }
 0x3a0   :  { %3789 = vsyncpa [#allocation7], 1 }
 0x3a1   :  { %3790 = vsyncpa [#allocation10], 1 }
 0x3a2   :  { %3791 = vsyncpa [#allocation5], 1 }
 0x3a3   :  { %3793 = vsyncpa [#allocation5 + $0x1], 1 }

// kernel: tpu_custom_call.1
= control target key start
LH: loop header
LB: loop body
LE: loop exit
PB: predicated region body
PF: predicated region fallthrough
CT: control target
= control target key end

     0   :  { %s5941_s0 = inlined_call_operand.hbm [shape: bf16[2,2,2,16,16,16], index: 0, kind: input, shape index: {}]   ;;  %s5942_s1 = inlined_call_operand.hbm [shape: bf16[16,128], index: 1, kind: input, shape index: {}]   ;;  %s5943_s2 = inlined_call_operand.vmem [shape: f32[1,128], index: 2, kind: input, shape index: {}]   ;;  %s5944_s3 = inlined_call_operand.hbm [shape: f32[9,128], index: 3, kind: input, shape index: {}]   ;;  %s5945_s4 = inlined_call_operand.vmem [shape: f32[1,128], index: 4, kind: input, shape index: {}]   ;;  %s5946_s5 = inlined_call_operand.hbm [shape: bf16[128,128], index: 5, kind: input, shape index: {}]   ;;  %s5947_s6 = inlined_call_operand.vmem [shape: f32[1,128], index: 6, kind: input, shape index: {}]   ;;  %s5948_s7 = inlined_call_operand.hbm [shape: bf16[2,256,128], index: 7, kind: output, shape index: {}]  }
   0x1   :  { %5959 = sst [smem:[#allocation127_spill]] %s5942_s1 }
   0x2   :  { %12 = vsyncpa [#allocation4], 0 }
   0x3   :  { %14 = vsyncpa [#allocation4 + $0x1], 0 }
   0x4   :  { %15 = vsyncpa [#allocation7], 0 }
   0x5   :  { %16 = vsyncpa [#allocation10], 0 }
   0x6   :  { %17 = vsyncpa [#allocation5], 0 }
   0x7   :  { %19 = vsyncpa [#allocation5 + $0x1], 0  ;;  %s4399_s24 = smov 0   ;;  %s4401_s25 = smov 0  }
   0x8   :  { %s4403_s26 = smov 0   ;;  %s4405_s27 = smov 0  }
   0x9 LB: > { %s4420_s28 = sadd.s32 4294967295, %s4345_s27   ;;  %s3386_s29 = sadd.s32 4294967294, %s4345_s27   ;;  %s4345_s27 = sphi %s4405_s27, %s6204_s27   ;;  %s4341_s26 = sphi %s4403_s26, %s6203_s26   ;;  %s4337_s25 = sphi %s4401_s25, %s6202_s25   ;;  %s4333_s24 = sphi %s4399_s24, %s6201_s24  }
   0xa   : > { %p45_p0 = scmp.ne.s32.totalorder %s4337_s25, %s4333_s24  ;;  %p5949_p1 = scmp.eq.s32.totalorder %s4420_s28, 0 }
   0xb   : > { %p201_p3 = scmp.eq.s32.totalorder %s3386_s29, 1  ;;  %p3387_p5 = scmp.ge.s32.totalorder %s4345_s27, 1 }
   0xc   : > { %p4429_p4 = por %p5949_p1, %p45_p0  ;;  %p208_p7 = scmp.lt.s32.totalorder %s4345_s27, 3 }
   0xd   : > { %p4434_p6 = por %p201_p3, %p45_p0  ;;  %s4347_s10 = smov [#allocation6]  }
   0xe   : > { %s5960_s30 = scalar_select %p4429_p4, 1, 0 }
   0xf   : > { %s5961_s8 = scalar_select %p4434_p6, 1, 0 }
  0x10   : > { %p4439_p8 = pnand %p3387_p5, %p208_p7  ;;  %s220_s11 = sshll.u32 %s4347_s10, 4  ;;  %s4443_s11 = int_to_ptr.vmem [resolvable:$true] %s220_s11 }
  0x11   : > { %5962 = sst [smem:[#allocation16_spill]] %s5961_s8  ;;  %s4348_s13 = smov [#allocation8]  }
  0x12   : > { %s5963_s9 = scalar_select %p4439_p8, 1, 0 }
  0x13   : > { %p4001_p9 = pneg %p4439_p8  ;;  %s236_s14 = sshll.u32 %s4348_s13, 4  ;;  %s4454_s14 = int_to_ptr.vmem [resolvable:$true] %s236_s14 }
  0x14   : > { %s5965_s1 = sld [smem:[#allocation127_spill]] }
  0x15   : > { %p4450_p11 = pnand %p4001_p9, %p5949_p1 }
  0x17   : > { %p4464_p13 = pneg %p4450_p11 }
  0x1a   : > { %s4157_s17 = scalar_lea.hbm %s5965_s1, 128 }
  0x1b   : > { %p4158_p12 = scmp.ne.s32.totalorder %s5965_s1, %s4157_s17  ;;  %p4164_p5 = scmp.lt.u32.totalorder %s4157_s17, %s5965_s1 }
  0x1d   : > { %p4160_p0 = pnand %p4464_p13, %p4158_p12 }
  0x1f   : > { %p4161_p3 = pneg %p4160_p0 }
  0x21   : > { %p4166_p7 = pnand %p4164_p5, %p4161_p3 }
  0x23   : > { %4169 = shalt.err (!%p4166_p7)
}
  0x24   : > { %s4170_s23 = scalar_lea.vmem %s4443_s11, 128  ;;  %p4178_p2 = scmp.lt.s32.totalorder %s4443_s11, %s4443_s11 }
  0x25   : > { %p4171_p9 = scmp.ne.s32.totalorder %s4443_s11, %s4170_s23  ;;  %p4179_p6 = scmp.lt.s32.totalorder %s4170_s23, %s4170_s23 }
  0x27   : > { %p4173_p10 = pnand %p4171_p9, %p4464_p13  ;;  %p4180_p12 = por %p4179_p6, %p4178_p2 }
  0x29   : > { %p4174_p1 = pneg %p4173_p10 }
  0x2b   : > { %p4181_p0 = pnand %p4180_p12, %p4174_p1 }
  0x2d   : > { %4184 = shalt.err (!%p4181_p0)
}
  0x2e   : > { %s5950_s29 = smov 64   ;;  %s5952_s10 = smov 4  }
  0x2f   : > { %4004 = dma.hbm_to_vmem [thread:$0]  (!%p4450_p11), %s5965_s1, 128, %s4443_s11, [#allocation7], %s5950_s29, %s5950_s29, %s5952_s10  }
  0x30   : > { %s4185_s18 = scalar_lea.hbm %s5944_s3, 256 }
  0x31   : > { %p4186_p1 = scmp.ne.s32.totalorder %s5944_s3, %s4185_s18  ;;  %p4192_p10 = scmp.lt.u32.totalorder %s4185_s18, %s5944_s3 }
  0x33   : > { %p4188_p2 = pnand %p4186_p1, %p4464_p13 }
  0x35   : > { %p4189_p6 = pneg %p4188_p2 }
  0x37   : > { %p4194_p3 = pnand %p4192_p10, %p4189_p6 }
  0x39   : > { %4197 = shalt.err (!%p4194_p3)
}
  0x3a   : > { %s4198_s11 = scalar_lea.vmem %s4454_s14, 256  ;;  %p4206_p12 = scmp.lt.s32.totalorder %s4454_s14, %s4454_s14 }
  0x3b   : > { %p4199_p5 = scmp.ne.s32.totalorder %s4454_s14, %s4198_s11  ;;  %p4207_p0 = scmp.lt.s32.totalorder %s4198_s11, %s4198_s11 }
  0x3d   : > { %p4201_p7 = pnand %p4199_p5, %p4464_p13  ;;  %p4208_p1 = por %p4207_p0, %p4206_p12 }
  0x3f   : > { %p4202_p9 = pneg %p4201_p7 }
  0x41   : > { %p4209_p2 = pnand %p4208_p1, %p4202_p9 }
  0x43   : > { %4212 = shalt.err (!%p4209_p2)
}
  0x44   : > { %s4351_s13 = smov 128   ;;  %s4352_s15 = smov 8  }
  0x45   : > { %4007 = dma.hbm_to_vmem [thread:$0]  (!%p4450_p11), %s5944_s3, 256, %s4454_s14, [#allocation7], %s4351_s13, %s4351_s13, %s4352_s15  }
  0x46   : > { %s4353_s18 = smov [#allocation9]   ;;  %s4512_s21 = sadd.s32 1, %s4345_s27  }
  0x47   : > { %s252_s19 = sshll.u32 %s4353_s18, 4  ;;  %s4213_s11 = scalar_lea.hbm %s5946_s5, 1024  ;;  %s253_s19 = int_to_ptr.vmem [resolvable:$true] %s252_s19 }
  0x48   : > { %p4214_p6 = scmp.ne.s32.totalorder %s5946_s5, %s4213_s11  ;;  %p4220_p5 = scmp.lt.u32.totalorder %s4213_s11, %s5946_s5 }
  0x4a   : > { %p4216_p10 = pnand %p4214_p6, %p4464_p13 }
  0x4c   : > { %p4217_p3 = pneg %p4216_p10 }
  0x4e   : > { %p4222_p7 = pnand %p4220_p5, %p4217_p3 }
  0x50   : > { %4225 = shalt.err (!%p4222_p7)
}
  0x51   : > { %s4226_s14 = scalar_lea.vmem %s253_s19, 1024  ;;  %p4234_p1 = scmp.lt.s32.totalorder %s253_s19, %s253_s19 }
  0x52   : > { %p4227_p9 = scmp.ne.s32.totalorder %s253_s19, %s4226_s14  ;;  %p4235_p2 = scmp.lt.s32.totalorder %s4226_s14, %s4226_s14 }
  0x54   : > { %p4229_p12 = pnand %p4227_p9, %p4464_p13  ;;  %p4236_p4 = por %p4235_p2, %p4234_p1 }
  0x56   : > { %p4230_p0 = pneg %p4229_p12 }
  0x58   : > { %p4237_p8 = pnand %p4236_p4, %p4230_p0 }
  0x5a   : > { %4240 = shalt.err (!%p4237_p8)
}
  0x5b   : > { %s5967_s29 = smov 4   ;;  %s5968_s10 = smov 64  }
  0x5c   : > { %4010 = dma.hbm_to_vmem [thread:$0]  (!%p4450_p11), %s5946_s5, 1024, %s253_s19, [#allocation10], %s5968_s10, %s5968_s10, %s5967_s29  }
  0x5d   : > { %s29_s20 = ssub.s32 %s4345_s27, %s4512_s21  ;;  %s32_s12 = sadd.s32 1, %s4341_s26 }
  0x5e   : > { %p30_p4 = scmp.eq.s32.totalorder %s29_s20, 0  ;;  %p39_p8 = scmp.ne.s32.totalorder %s4341_s26, %s4337_s25 }
  0x5f   : > { %p40_p13 = scmp.eq.s32.totalorder %s4345_s27, 0  ;;  %p4022_p6 = scmp.lt.s32.totalorder %s4345_s27, 2 }
  0x60   : > { %s4543_s13 = scalar_select %p30_p4, %s4341_s26, %s32_s12  }
  0x61   : > { %p41_p10 = por %p40_p13, %p39_p8  ;;  %p5969_p3 = scmp.eq.s32.totalorder %s4420_s28, 1 }
  0x62   : > { %s269_s16 = sand.u32 1, %s4341_s26   ;;  %s3587_s17 = sshll.u32 %s4345_s27, 13 }
  0x63   : > { %p4547_p5 = por %p5969_p3, %p39_p8  ;;  %s3392_s18 = sshll.u32 %s269_s16, 9 }
  0x64   : > { %s4556_s19 = scalar_lea.hbm %s5941_s0, %s3587_s17  ;;  %s273_s11 = scalar_lea.vmem [#allocation3], %s3392_s18 }
  0x65   : > { %s280_s14 = sshll.u32 %s273_s11, 4  ;;  %p4558_p11 = pnand %p4022_p6, %p41_p10  ;;  %s4562_s14 = int_to_ptr.vmem [resolvable:$true] %s280_s14 }
  0x66   : > { %s4564_s8 = scalar_lea.sflag [#allocation4], %s269_s16  ;;  %s4241_s20 = scalar_lea.hbm %s4556_s19, 8192 }
  0x67   : > { %p4242_p7 = scmp.ne.s32.totalorder %s4556_s19, %s4241_s20  ;;  %p4243_p9 = pneg %p4558_p11 }
  0x68   : > { %s4246_s18 = scalar_lea.hbm %s5941_s0, 16384  ;;  %p4247_p1 = scmp.lt.u32.totalorder %s4556_s19, %s5941_s0 }
  0x69   : > { %p4244_p12 = pnand %p4243_p9, %p4242_p7  ;;  %p4248_p2 = scmp.lt.u32.totalorder %s4246_s18, %s4241_s20 }
  0x6a   : > { %p4250_p8 = scmp.lt.u32.totalorder %s4241_s20, %s4556_s19 }
  0x6b   : > { %p4245_p0 = pneg %p4244_p12  ;;  %p4249_p4 = por %p4248_p2, %p4247_p1 }
  0x6d   : > { %p4251_p13 = por %p4250_p8, %p4249_p4 }
  0x6f   : > { %p4252_p6 = pnand %p4251_p13, %p4245_p0 }
  0x71   : > { %4255 = shalt.err (!%p4252_p6)
}
  0x72   : > { %s4256_s16 = scalar_lea.vmem %s4562_s14, 8192  ;;  %s4354_s11 = smov [#allocation3]  }
  0x73   : > { %p4257_p10 = scmp.ne.s32.totalorder %s4562_s14, %s4256_s16  ;;  %s4261_s12 = sshll.u32 %s4354_s11, 4  ;;  %s4262_s12 = int_to_ptr.vmem [resolvable:$false] %s4261_s12 }
  0x74   : > { %s4263_s17 = scalar_lea.vmem %s4262_s12, 16384  ;;  %p4264_p12 = scmp.lt.s32.totalorder %s4562_s14, %s4262_s12 }
  0x75   : > { %p4259_p3 = pnand %p4257_p10, %p4243_p9  ;;  %p4265_p1 = scmp.lt.s32.totalorder %s4263_s17, %s4256_s16 }
  0x77   : > { %p4260_p7 = pneg %p4259_p3  ;;  %p4266_p2 = por %p4265_p1, %p4264_p12 }
  0x79   : > { %p4267_p4 = pnand %p4266_p2, %p4260_p7 }
  0x7b   : > { %4270 = shalt.err (!%p4267_p4)
}
  0x7c   : > { %4014 = dma.hbm_to_vmem [thread:$0]  (!%p4558_p11), %s4556_s19, 8192, %s4562_s14, %s4564_s8, %s5968_s10, %s5968_s10, %s5967_s29  }
  0x7d   : > { %p5972_p9 = scmp.ne.s32.totalorder %s5963_s9, 0 }
  0x7f   : > { %292 = sbr.rel (%p5972_p9) target bundleno = 852 (0x354), region = 48 }
  0x86   : > { %s4598_s20 = sand.u32 1, %s4337_s25   ;;  %p5973_p0 = scmp.ne.s32.totalorder %s5960_s30, 0 }
  0x87   : > { %s3396_s18 = sshll.u32 %s4598_s20, 9  ;;  %s295_s22 = scalar_lea.sflag [#allocation4], %s4598_s20 }
  0x88   : > { %s4602_s23 = scalar_lea.vmem [#allocation3], %s3396_s18 }
  0x89   : > { %4316 = dma.done.wait (%p5973_p0), %s295_s22, 8192  }
  0x8a   : > { %4318 = vsyncadd (%p5973_p0), %s295_s22, 4294959104  ;;  %p5974_p11 = scmp.eq.s32.totalorder %s4420_s28, 0 }
  0x8c   : > { %4320 = dma.done.wait (%p5974_p11), [#allocation7], 384   ;;  %p5975_p8 = pmov %p5974_p11 }
  0x8e   : > { %4322 = vsyncadd (%p5975_p8), [#allocation7], 4294966912  ;;  %p5976_p13 = pmov %p5975_p8 }
  0x8f   : > { %p5977_p6 = pmov %p5975_p8 }
  0x90   : > { %4324 = dma.done.wait (%p5976_p13), [#allocation10], 1024  }
  0x91   : > { %4326 = vsyncadd (%p5977_p6), [#allocation10], 4294966272  ;;  %v4355_v0 = vmov 0.0   ;;  %v4069_v1 = vld [vmem:[#allocation6] sm:$0xff]   ;;  %vm888_vm0 = vcmask 130048   ;;  %v4072_v4 = vld [vmem:[%s4602_s23 + $0x8] sm:$0xff]  }
  0x92   : > { %367 = vst [vmem:[#allocation2 + $0x1b7] sm:$0x1] %v4355_v0  ;;  %368 = vst [vmem:[#allocation2 + $0x1cf] sm:$0x1] %v4355_v0  ;;  %v4070_v2 = vld [vmem:[%s4602_s23] sm:$0xff]   ;;  %3805 = vmatprep.subr.bf16.mxu0 %v4069_v1  ;;  %3983 = vmatprep.subr.bf16.mxu1 %v4069_v1  ;;  %v4073_v5 = vld [vmem:[%s4602_s23 + $0x148] sm:$0xff]  }
  0x93   : > { %369 = vst [vmem:[#allocation2 + $0x1e7] sm:$0x1] %v4355_v0  ;;  %370 = vst [vmem:[#allocation2 + $0x1ff] sm:$0x1] %v4355_v0  ;;  %v4071_v3 = vld [vmem:[%s4602_s23 + $0x140] sm:$0xff]   ;;  %3806 = vmatpush3.bf16.msra.mxu0 %v4069_v1  ;;  %3984 = vmatpush3.bf16.msra.mxu1 %v4069_v1  ;;  %v4074_v6 = vld [vmem:[%s4602_s23 + $0x10] sm:$0xff]  }
  0x94   : > { %371 = vst [vmem:[#allocation2 + $0x217] sm:$0x1] %v4355_v0  ;;  %372 = vst [vmem:[#allocation2 + $0x22f] sm:$0x1] %v4355_v0  ;;  %3807 = vmatprep.mubr.msk.bf16.mxu0 %vm888_vm0, %v4070_v2  ;;  %3887 = vmatprep.mubr.msk.bf16.mxu1 %vm888_vm0, %v4071_v3  ;;  %v4075_v7 = vld [vmem:[%s4602_s23 + $0x150] sm:$0xff]   ;;  %v4076_v8 = vld [vmem:[%s4602_s23 + $0x18] sm:$0xff]  }
  0x95   : > { %373 = vst [vmem:[#allocation2 + $0x247] sm:$0x1] %v4355_v0  ;;  %374 = vst [vmem:[#allocation2 + $0x25f] sm:$0x1] %v4355_v0  ;;  %v4077_v9 = vld [vmem:[%s4602_s23 + $0x158] sm:$0xff]   ;;  %v4078_v10 = vld [vmem:[%s4602_s23 + $0x20] sm:$0xff]  }
  0x96   : > { %375 = vst [vmem:[#allocation2 + $0x277] sm:$0x1] %v4355_v0  ;;  %376 = vst [vmem:[#allocation2 + $0x28f] sm:$0x1] %v4355_v0  ;;  %3808 = vmatmul.mubr.msk.bf16.vlgmr.msra.gmra.mrb[0].mxu0 %vm888_vm0, %v4072_v4  ;;  %3888 = vmatmul.mubr.msk.bf16.vlgmr.msra.gmra.mrb[0].mxu1 %vm888_vm0, %v4073_v5  ;;  %v4079_v11 = vld [vmem:[%s4602_s23 + $0x160] sm:$0xff]   ;;  %v4080_v12 = vld [vmem:[%s4602_s23 + $0x28] sm:$0xff]  }
  0x97   : > { %377 = vst [vmem:[#allocation2 + $0x2a7] sm:$0x1] %v4355_v0  ;;  %378 = vst [vmem:[#allocation2 + $0x2bf] sm:$0x1] %v4355_v0  ;;  %3811 = vmatprep.mubr.msk.bf16.mxu0 %vm888_vm0, %v4074_v6  ;;  %3891 = vmatprep.mubr.msk.bf16.mxu1 %vm888_vm0, %v4075_v7  ;;  %v4081_v13 = vld [vmem:[%s4602_s23 + $0x168] sm:$0xff]   ;;  %v4082_v14 = vld [vmem:[%s4602_s23 + $0x30] sm:$0xff]  }
  0x98   : > { %379 = vst [vmem:[#allocation2 + $0x2d7] sm:$0x1] %v4355_v0  ;;  %380 = vst [vmem:[#allocation2 + $0x2ef] sm:$0x1] %v4355_v0  ;;  %v4083_v15 = vld [vmem:[%s4602_s23 + $0x170] sm:$0xff]   ;;  %v4084_v16 = vld [vmem:[%s4602_s23 + $0x38] sm:$0xff]  }
  0x99   : > { %381 = vst [vmem:[#allocation2 + $0x307] sm:$0x1] %v4355_v0  ;;  %382 = vst [vmem:[#allocation2 + $0x31f] sm:$0x1] %v4355_v0  ;;  %v4085_v17 = vld [vmem:[%s4602_s23 + $0x178] sm:$0xff]   ;;  %v4086_v18 = vld [vmem:[%s4602_s23 + $0x40] sm:$0xff]  }
  0x9a   : > { %405 = vst [vmem:[#allocation2 + $0x4c8] sm:$0xff] %v4355_v0  ;;  %406 = vst [vmem:[#allocation2 + $0x4d0] sm:$0xff] %v4355_v0  ;;  %v4087_v19 = vld [vmem:[%s4602_s23 + $0x180] sm:$0xff]   ;;  %v4088_v20 = vld [vmem:[%s4602_s23 + $0x48] sm:$0xff]   ;;  %s3400_s12 = sshll.u32 %s4598_s20, 7  ;;  %s3620_s18 = sshll.u32 %s4420_s28, 11 }
  0x9b   : > { %407 = vst [vmem:[#allocation2 + $0x4d8] sm:$0xff] %v4355_v0  ;;  %409 = vst [vmem:[#allocation2 + $0x4e7] sm:$0x1] %v4355_v0  ;;  %v4089_v21 = vld [vmem:[%s4602_s23 + $0x188] sm:$0xff]   ;;  %v4090_v22 = vld [vmem:[%s4602_s23 + $0x50] sm:$0xff]   ;;  %s5844_s17 = scalar_lea.vmem [#allocation11], %s3400_s12  ;;  %s5893_s9 = scalar_lea.hbm %s5948_s7, %s3620_s18 }
  0x9c   : > { %410 = vst [vmem:[#allocation2 + $0x4ff] sm:$0x1] %v4355_v0  ;;  %411 = vst [vmem:[#allocation2 + $0x517] sm:$0x1] %v4355_v0  ;;  %v4091_v23 = vld [vmem:[%s4602_s23 + $0x190] sm:$0xff]   ;;  %v4092_v24 = vld [vmem:[%s4602_s23 + $0x58] sm:$0xff]  }
  0x9d   : > { %412 = vst [vmem:[#allocation2 + $0x52f] sm:$0x1] %v4355_v0  ;;  %413 = vst [vmem:[#allocation2 + $0x547] sm:$0x1] %v4355_v0  ;;  %v4093_v25 = vld [vmem:[%s4602_s23 + $0x198] sm:$0xff]   ;;  %v4094_v26 = vld [vmem:[%s4602_s23 + $0x60] sm:$0xff]  }
  0x9e   : > { %414 = vst [vmem:[#allocation2 + $0x55f] sm:$0x1] %v4355_v0  ;;  %415 = vst [vmem:[#allocation2 + $0x577] sm:$0x1] %v4355_v0  ;;  %3812 = vmatmul.mubr.msk.bf16.gmra.mrb[4].mxu0 %vm888_vm0, %v4076_v8  ;;  %3892 = vmatmul.mubr.msk.bf16.gmra.mrb[4].mxu1 %vm888_vm0, %v4077_v9  ;;  %v4095_v27 = vld [vmem:[%s4602_s23 + $0x1a0] sm:$0xff]   ;;  %v4096_v28 = vld [vmem:[%s4602_s23 + $0x68] sm:$0xff]  }
  0x9f   : > { %416 = vst [vmem:[#allocation2 + $0x58f] sm:$0x1] %v4355_v0  ;;  %417 = vst [vmem:[#allocation2 + $0x5a7] sm:$0x1] %v4355_v0  ;;  %3815 = vmatprep.mubr.msk.bf16.mxu0 %vm888_vm0, %v4078_v10  ;;  %3895 = vmatprep.mubr.msk.bf16.mxu1 %vm888_vm0, %v4079_v11  ;;  %v4097_v29 = vld [vmem:[%s4602_s23 + $0x1a8] sm:$0xff]   ;;  %v4098_v30 = vld [vmem:[%s4602_s23 + $0x70] sm:$0xff]  }
  0xa0   : > { %418 = vst [vmem:[#allocation2 + $0x5bf] sm:$0x1] %v4355_v0  ;;  %419 = vst [vmem:[#allocation2 + $0x5d7] sm:$0x1] %v4355_v0  ;;  %v4099_v31 = vld [vmem:[%s4602_s23 + $0x1b0] sm:$0xff]   ;;  %v4100_v32 = vld [vmem:[%s4602_s23 + $0x78] sm:$0xff]  }
  0xa1   : > { %420 = vst [vmem:[#allocation2 + $0x5ef] sm:$0x1] %v4355_v0  ;;  %421 = vst [vmem:[#allocation2 + $0x607] sm:$0x1] %v4355_v0  ;;  %v4101_v33 = vld [vmem:[%s4602_s23 + $0x1b8] sm:$0xff]   ;;  %v4102_v34 = vld [vmem:[%s4602_s23 + $0x80] sm:$0xff]  }
  0xa2   : > { %422 = vst [vmem:[#allocation2 + $0x61f] sm:$0x1] %v4355_v0  ;;  %423 = vst [vmem:[#allocation2 + $0x637] sm:$0x1] %v4355_v0  ;;  %v4103_v35 = vld [vmem:[%s4602_s23 + $0x1c0] sm:$0xff]   ;;  %v4104_v36 = vld [vmem:[%s4602_s23 + $0x88] sm:$0xff]  }
  0xa3   : > { %424 = vst [vmem:[#allocation2 + $0x64f] sm:$0x1] %v4355_v0  ;;  %v4105_v37 = vld [vmem:[%s4602_s23 + $0x1c8] sm:$0xff]   ;;  %v4106_v38 = vld [vmem:[%s4602_s23 + $0x90] sm:$0xff]   ;;  %v4108_v40 = vld [vmem:[%s4602_s23 + $0x98] sm:$0xff]   ;;  %s3284_s22 = sshll.u32 %s5844_s17, 4  ;;  %s5895_s22 = int_to_ptr.vmem [resolvable:$true] %s3284_s22 }
  0xa4   : > { %v4107_v39 = vld [vmem:[%s4602_s23 + $0x1d0] sm:$0xff]   ;;  %v4109_v41 = vld [vmem:[%s4602_s23 + $0x1d8] sm:$0xff]   ;;  %v4110_v42 = vld [vmem:[%s4602_s23 + $0xa0] sm:$0xff]   ;;  %s3271_s28 = scalar_lea.sflag [#allocation5], %s4598_s20  ;;  %s4271_s29 = scalar_lea.vmem %s5895_s22, 2048 }
  0xa5   : > { %v4111_v43 = vld [vmem:[%s4602_s23 + $0x1e0] sm:$0xff]   ;;  %v4112_v44 = vld [vmem:[%s4602_s23 + $0xa8] sm:$0xff]   ;;  %v4114_v46 = vld [vmem:[%s4602_s23 + $0xb0] sm:$0xff]   ;;  %p4272_p10 = scmp.ne.s32.totalorder %s5895_s22, %s4271_s29  ;;  %s4356_s10 = smov [#allocation11]  }
  0xa6   : > { %3816 = vmatmul.mubr.msk.bf16.gmra.mrb[8].mxu0 %vm888_vm0, %v4080_v12  ;;  %3896 = vmatmul.mubr.msk.bf16.gmra.mrb[8].mxu1 %vm888_vm0, %v4081_v13  ;;  %v4113_v45 = vld [vmem:[%s4602_s23 + $0x1e8] sm:$0xff]   ;;  %v4115_v47 = vld [vmem:[%s4602_s23 + $0x1f0] sm:$0xff]   ;;  %v4116_v48 = vld [vmem:[%s4602_s23 + $0xb8] sm:$0xff]   ;;  %s4275_s19 = sshll.u32 %s4356_s10, 4  ;;  %s4276_s19 = int_to_ptr.vmem [resolvable:$false] %s4275_s19 }
  0xa7   : > { %3819 = vmatprep.mubr.msk.bf16.mxu0 %vm888_vm0, %v4082_v14  ;;  %3899 = vmatprep.mubr.msk.bf16.mxu1 %vm888_vm0, %v4083_v15  ;;  %v4117_v49 = vld [vmem:[%s4602_s23 + $0x1f8] sm:$0xff]   ;;  %v4118_v50 = vld [vmem:[%s4602_s23 + $0xc0] sm:$0xff]   ;;  %v4119_v51 = vld [vmem:[%s4602_s23 + $0xc8] sm:$0xff]   ;;  %p4273_p3 = pnand %p4272_p10, %p4547_p5  ;;  %s4277_s14 = scalar_lea.vmem %s4276_s19, 4096 }
  0xa8   : > { %v4120_v52 = vld [vmem:[%s4602_s23 + $0xd0] sm:$0xff]   ;;  %v4121_v53 = vld [vmem:[%s4602_s23 + $0xd8] sm:$0xff]   ;;  %v4122_v54 = vld [vmem:[%s4602_s23 + $0xe0] sm:$0xff]   ;;  %p4278_p12 = scmp.lt.s32.totalorder %s5895_s22, %s4276_s19  ;;  %p4279_p1 = scmp.lt.s32.totalorder %s4277_s14, %s4271_s29 }
  0xa9   : > { %v4123_v55 = vld [vmem:[%s4602_s23 + $0xe8] sm:$0xff]   ;;  %v4124_v56 = vld [vmem:[%s4602_s23 + $0xf0] sm:$0xff]   ;;  %v4125_v57 = vld [vmem:[%s4602_s23 + $0xf8] sm:$0xff]   ;;  %p4274_p7 = pneg %p4273_p3 }
  0xaa   : > { %v4126_v58 = vld [vmem:[%s4602_s23 + $0x100] sm:$0xff]   ;;  %v4127_v59 = vld [vmem:[%s4602_s23 + $0x108] sm:$0xff]   ;;  %v4128_v60 = vld [vmem:[%s4602_s23 + $0x110] sm:$0xff]   ;;  %p4280_p2 = por %p4279_p1, %p4278_p12 }
  0xab   : > { %v4129_v61 = vld [vmem:[%s4602_s23 + $0x118] sm:$0xff]   ;;  %v4130_v62 = vld [vmem:[%s4602_s23 + $0x120] sm:$0xff]   ;;  %v4131_v63 = vld [vmem:[%s4602_s23 + $0x128] sm:$0xff]  }
  0xac   : > { %v4132_v0 = vld [vmem:[%s4602_s23 + $0x130] sm:$0xff]   ;;  %v4133_v1 = vld [vmem:[%s4602_s23 + $0x138] sm:$0xff]   ;;  %v4135_v3 = vld [vmem:[#allocation9 + $0x8] sm:$0xff]   ;;  %p4281_p4 = pnand %p4280_p2, %p4274_p7 }
  0xad   : > { %v4134_v2 = vld [vmem:[#allocation9] sm:$0xff]   ;;  %v4136_v4 = vld [vmem:[#allocation9 + $0x10] sm:$0xff]   ;;  %v4137_v5 = vld [vmem:[#allocation9 + $0x18] sm:$0xff]  }
  0xae   : > { %3820 = vmatmul.mubr.msk.bf16.gmra.mrb[12].mxu0 %vm888_vm0, %v4084_v16  ;;  %3900 = vmatmul.mubr.msk.bf16.gmra.mrb[12].mxu1 %vm888_vm0, %v4085_v17  ;;  %v4138_v6 = vld [vmem:[#allocation9 + $0x20] sm:$0xff]   ;;  %v4747_v7 = vld [vmem:[%s5943_s2] ss:$0 sm:$0xff] }
  0xaf   : > { %3823 = vmatprep.mubr.msk.bf16.mxu0 %vm888_vm0, %v4086_v18  ;;  %3903 = vmatprep.mubr.msk.bf16.mxu1 %vm888_vm0, %v4087_v19 }
  0xb0   : > { %3935 = vmatprep.subr.bf16.mxu1 %v4134_v2 }
  0xb1   : > { %3936 = vmatpush3.bf16.msra.mxu1 %v4134_v2 }
  0xb2   : > { %3937 = vmatprep.subr.bf16.mxu1 %v4135_v3 }
  0xb5   : > { %3938 = vmatpush3.bf16.msra.mxu1 %v4135_v3  ;;  %v4140_v3 = vld [vmem:[#allocation9 + $0x30] sm:$0xff]  }
  0xb6   : > { %3824 = vmatmul.mubr.msk.bf16.gmra.mrb[16].mxu0 %vm888_vm0, %v4088_v20  ;;  %3904 = vmatmul.mubr.msk.bf16.gmra.mrb[16].mxu1 %vm888_vm0, %v4089_v21 }
  0xb7   : > { %3827 = vmatprep.mubr.msk.bf16.mxu0 %vm888_vm0, %v4090_v22  ;;  %3907 = vmatprep.mubr.msk.bf16.mxu1 %vm888_vm0, %v4091_v23 }
  0xb8   : > { %3939 = vmatprep.subr.bf16.mxu1 %v4136_v4 }
  0xb9   : > { %3940 = vmatpush3.bf16.msra.mxu1 %v4136_v4 }
  0xba   : > { %3941 = vmatprep.subr.bf16.mxu1 %v4137_v5 }
  0xbd   : > { %3942 = vmatpush3.bf16.msra.mxu1 %v4137_v5 }
  0xbe   : > { %3828 = vmatmul.mubr.msk.bf16.gmra.mrb[20].mxu0 %vm888_vm0, %v4092_v24  ;;  %3908 = vmatmul.mubr.msk.bf16.gmra.mrb[20].mxu1 %vm888_vm0, %v4093_v25 }
  0xbf   : > { %3831 = vmatprep.mubr.msk.bf16.mxu0 %vm888_vm0, %v4094_v26  ;;  %3911 = vmatprep.mubr.msk.bf16.mxu1 %vm888_vm0, %v4095_v27 }
  0xc0   : > { %3943 = vmatprep.subr.bf16.mxu1 %v4138_v6 }
  0xc1   : > { %3944 = vmatpush3.bf16.msra.mxu1 %v4138_v6 }
  0xc6   : > { %3832 = vmatmul.mubr.msk.bf16.gmra.mrb[24].mxu0 %vm888_vm0, %v4096_v28  ;;  %3912 = vmatmul.mubr.msk.bf16.gmra.mrb[24].mxu1 %vm888_vm0, %v4097_v29 }
  0xc7   : > { %3835 = vmatprep.mubr.msk.bf16.mxu0 %vm888_vm0, %v4098_v30  ;;  %3915 = vmatprep.mubr.msk.bf16.mxu1 %vm888_vm0, %v4099_v31 }
  0xce   : > { %3836 = vmatmul.mubr.msk.bf16.gmra.mrb[28].mxu0 %vm888_vm0, %v4100_v32  ;;  %3916 = vmatmul.mubr.msk.bf16.gmra.mrb[28].mxu1 %vm888_vm0, %v4101_v33 }
  0xcf   : > { %3839 = vmatprep.mubr.msk.bf16.mxu0 %vm888_vm0, %v4102_v34  ;;  %3919 = vmatprep.mubr.msk.bf16.mxu1 %vm888_vm0, %v4103_v35  ;;  %v4139_v34 = vld [vmem:[#allocation9 + $0x28] sm:$0xff]  }
  0xd0   : > { %3945 = vmatprep.subr.bf16.mxu1 %v4139_v34 }
  0xd1   : > { %3946 = vmatpush3.bf16.msra.mxu1 %v4139_v34 }
  0xd2   : > { %3947 = vmatprep.subr.bf16.mxu1 %v4140_v3 }
  0xd5   : > { %3948 = vmatpush3.bf16.msra.mxu1 %v4140_v3 }
  0xd6   : > { %3840 = vmatmul.mubr.msk.bf16.gmra.mrb[32].mxu0 %vm888_vm0, %v4104_v36  ;;  %3920 = vmatmul.mubr.msk.bf16.gmra.mrb[32].mxu1 %vm888_vm0, %v4105_v37 }
  0xd7   : > { %3843 = vmatprep.mubr.msk.bf16.mxu0 %vm888_vm0, %v4106_v38  ;;  %3923 = vmatprep.mubr.msk.bf16.mxu1 %vm888_vm0, %v4107_v39  ;;  %v4759_v39 = vld [vmem:[#allocation8 + $0x1] ss:$0 sm:$0xff] }
  0xde   : > { %3844 = vmatmul.mubr.msk.bf16.gmra.mrb[36].mxu0 %vm888_vm0, %v4108_v40  ;;  %3924 = vmatmul.mubr.msk.bf16.gmra.mrb[36].mxu1 %vm888_vm0, %v4109_v41 }
  0xdf   : > { %3847 = vmatprep.mubr.msk.bf16.mxu0 %vm888_vm0, %v4110_v42  ;;  %3927 = vmatprep.mubr.msk.bf16.mxu1 %vm888_vm0, %v4111_v43 }
  0xe6   : > { %3848 = vmatmul.mubr.msk.bf16.gmra.mrb[40].mxu0 %vm888_vm0, %v4112_v44  ;;  %3928 = vmatmul.mubr.msk.bf16.gmra.mrb[40].mxu1 %vm888_vm0, %v4113_v45  ;;  %v1983_v44 = vld [vmem:[#allocation2 + $0x4cf] sm:$0xff]  ;;  %v4763_v45 = vld [vmem:[#allocation8] ss:$0 sm:$0xff] }
  0xe7   : > { %3851 = vmatprep.mubr.msk.bf16.mxu0 %vm888_vm0, %v4114_v46  ;;  %3931 = vmatprep.mubr.msk.bf16.mxu1 %vm888_vm0, %v4115_v47 }
  0xee   : > { %3852 = vmatmul.mubr.msk.bf16.gmra.mrb[44].mxu0 %vm888_vm0, %v4116_v48  ;;  %3932 = vmatmul.mubr.msk.bf16.gmra.mrb[44].mxu1 %vm888_vm0, %v4117_v49 }
  0xef   : > { %3855 = vmatprep.mubr.msk.bf16.mxu0 %vm888_vm0, %v4118_v50 }
  0xf6   : > { %3856 = vmatmul.mubr.msk.bf16.gmra.mrb[48].mxu0 %vm888_vm0, %v4119_v51 }
  0xf7   : > { %3859 = vmatprep.mubr.msk.bf16.mxu0 %vm888_vm0, %v4120_v52  ;;  %v1984_v52 = vld [vmem:[#allocation2 + $0x4d7] sm:$0xff] }
  0xfe   : > { %3860 = vmatmul.mubr.msk.bf16.gmra.mrb[52].mxu0 %vm888_vm0, %v4121_v53 }
  0xff   : > { %3863 = vmatprep.mubr.msk.bf16.mxu0 %vm888_vm0, %v4122_v54 }
 0x106   : > { %3864 = vmatmul.mubr.msk.bf16.gmra.mrb[56].mxu0 %vm888_vm0, %v4123_v55 }
 0x107   : > { %3867 = vmatprep.mubr.msk.bf16.mxu0 %vm888_vm0, %v4124_v56 }
 0x10e   : > { %3868 = vmatmul.mubr.msk.bf16.gmra.mrb[60].mxu0 %vm888_vm0, %v4125_v57 }
 0x10f   : > { %3871 = vmatprep.mubr.msk.bf16.mxu0 %vm888_vm0, %v4126_v58 }
 0x116   : > { %3872 = vmatmul.mubr.msk.bf16.gmra.mrb[64].mxu0 %vm888_vm0, %v4127_v59  ;;  %v1919_v59 = vmul.f32 0.0, %v4759_v39 }
 0x117   : > { %3875 = vmatprep.mubr.msk.bf16.mxu0 %vm888_vm0, %v4128_v60  ;;  %v2020_v60 = vmul.f32 %v4763_v45, %v1983_v44 }
 0x11e   : > { %3876 = vmatmul.mubr.msk.bf16.gmra.mrb[68].mxu0 %vm888_vm0, %v4129_v61 }
 0x11f   : > { %3879 = vmatprep.mubr.msk.bf16.mxu0 %vm888_vm0, %v4130_v62 }
 0x126   : > { %3880 = vmatmul.mubr.msk.bf16.gmra.mrb[72].mxu0 %vm888_vm0, %v4131_v63  ;;  %v2021_v63 = vmul.f32 %v4763_v45, %v1984_v52  ;;  %v4141_v52 = vld [vmem:[#allocation9 + $0x38] sm:$0xff]  }
 0x127   : > { %3883 = vmatprep.mubr.msk.bf16.mxu0 %vm888_vm0, %v4132_v0  ;;  %v4772_v0 = vld [vmem:[#allocation8 + $0x2] ss:$0 sm:$0xff]  ;;  %3949 = vmatprep.subr.bf16.mxu1 %v4141_v52 }
 0x128   : > { %3950 = vmatpush3.bf16.msra.mxu1 %v4141_v52 }
 0x12e   : > { %3884 = vmatmul.mubr.msk.bf16.gmra.mrb[76].mxu0 %vm888_vm0, %v4133_v1 }
 0x169   : > { %v3809_v8 = vpop.f32.mrb[0].mxu0  ;;  %v3889_v9 = vpop.f32.mrb[0].mxu1 }
 0x16a   : > { %v1124_v10 = vadd.f32 %v3809_v8, %v4747_v7  ;;  %v1115_v11 = vpop.f32.mrb[1].mxu0  ;;  %v1444_v12 = vadd.f32 %v3889_v9, %v4747_v7  ;;  %v1435_v13 = vpop.f32.mrb[1].mxu1  ;;  %v2052_v9 = vadd.f32 %v2020_v60, %v1919_v59 }
 0x16b   : > { %v1116_v14 = vadd.f32 %v4747_v7, %v1115_v11  ;;  %v3810_v15 = vpop.f32.mrb[2].mxu0  ;;  %v1436_v16 = vadd.f32 %v4747_v7, %v1435_v13  ;;  %v3890_v17 = vpop.f32.mrb[2].mxu1 }
 0x16c   : > { %v1628_v18 = vmax.f32 %v1124_v10, 0.0  ;;  %v1127_v19 = vadd.f32 %v3810_v15, %v4747_v7  ;;  %v1118_v20 = vpop.f32.mrb[3].mxu0  ;;  %v1708_v21 = vmax.f32 %v1444_v12, 0.0  ;;  %v1447_v22 = vadd.f32 %v3890_v17, %v4747_v7  ;;  %v1438_v23 = vpop.f32.mrb[3].mxu1 }
 0x16d   : > { %v1626_v24 = vmax.f32 %v1116_v14, 0.0  ;;  %v1119_v25 = vadd.f32 %v4747_v7, %v1118_v20  ;;  %v1706_v26 = vmax.f32 %v1436_v16, 0.0  ;;  %v1439_v27 = vadd.f32 %v4747_v7, %v1438_v23 }
 0x16e   : > { %1756 = vst [vmem:[#allocation2 + $0x38] sm:$0xff] %v1628_v18  ;;  %v1629_v28 = vmax.f32 %v1127_v19, 0.0  ;;  %1836 = vst [vmem:[#allocation2 + $0x428] sm:$0xff] %v1708_v21  ;;  %v1709_v29 = vmax.f32 %v1447_v22, 0.0  ;;  %v2053_v14 = vadd.f32 %v2021_v63, %v1919_v59  ;;  %v2121_v15 = vmul.f32 0.0, %v4772_v0 }
 0x16f   : > { %1754 = vst [vmem:[#allocation2 + $0x20] sm:$0xff] %v1626_v24  ;;  %v1627_v30 = vmax.f32 %v1119_v25, 0.0  ;;  %1834 = vst [vmem:[#allocation2 + $0x410] sm:$0xff] %v1706_v26  ;;  %v1707_v31 = vmax.f32 %v1439_v27, 0.0 }
 0x170   : > { %1757 = vst [vmem:[#allocation2 + $0x40] sm:$0xff] %v1629_v28  ;;  %1837 = vst [vmem:[#allocation2 + $0x430] sm:$0xff] %v1709_v29  ;;  %v4783_v28 = vld [vmem:[#allocation8 + $0x4] ss:$0 sm:$0xff] }
 0x171   : > { %1755 = vst [vmem:[#allocation2 + $0x28] sm:$0xff] %v1627_v30  ;;  %v3813_v32 = vpop.f32.mrb[4].mxu0  ;;  %1835 = vst [vmem:[#allocation2 + $0x418] sm:$0xff] %v1707_v31  ;;  %v3893_v33 = vpop.f32.mrb[4].mxu1  ;;  %v4785_v31 = vld [vmem:[#allocation8 + $0x7] ss:$0 sm:$0xff] }
 0x172   : > { %v1140_v35 = vadd.f32 %v3813_v32, %v4747_v7  ;;  %v1131_v36 = vpop.f32.mrb[5].mxu0  ;;  %v1460_v37 = vadd.f32 %v3893_v33, %v4747_v7  ;;  %v1451_v38 = vpop.f32.mrb[5].mxu1 }
 0x173   : > { %v1132_v40 = vadd.f32 %v4747_v7, %v1131_v36  ;;  %v3814_v41 = vpop.f32.mrb[6].mxu0  ;;  %v1452_v42 = vadd.f32 %v4747_v7, %v1451_v38  ;;  %v3894_v43 = vpop.f32.mrb[6].mxu1  ;;  %v2154_v38 = vadd.f32 %v2121_v15, %v2053_v14 }
 0x174   : > { %v1632_v46 = vmax.f32 %v1140_v35, 0.0  ;;  %v1143_v47 = vadd.f32 %v3814_v41, %v4747_v7  ;;  %v1134_v48 = vpop.f32.mrb[7].mxu0  ;;  %v1712_v49 = vmax.f32 %v1460_v37, 0.0  ;;  %v1463_v50 = vadd.f32 %v3894_v43, %v4747_v7  ;;  %v1454_v51 = vpop.f32.mrb[7].mxu1 }
 0x175   : > { %v1630_v53 = vmax.f32 %v1132_v40, 0.0  ;;  %v1135_v54 = vadd.f32 %v4747_v7, %v1134_v48  ;;  %v1710_v55 = vmax.f32 %v1452_v42, 0.0  ;;  %v1455_v56 = vadd.f32 %v4747_v7, %v1454_v51  ;;  %v2187_v32 = vld [vmem:[#allocation2 + $0x38] sm:$0xff]  ;;  %v2506_v40 = vld [vmem:[#allocation2 + $0x428] sm:$0xff] }
 0x176   : > { %1760 = vst [vmem:[#allocation2 + $0x68] sm:$0xff] %v1632_v46  ;;  %v1633_v57 = vmax.f32 %v1143_v47, 0.0  ;;  %1840 = vst [vmem:[#allocation2 + $0x458] sm:$0xff] %v1712_v49  ;;  %v1713_v58 = vmax.f32 %v1463_v50, 0.0  ;;  %v2185_v33 = vld [vmem:[#allocation2 + $0x20] sm:$0xff]  ;;  %v2153_v37 = vadd.f32 %v2121_v15, %v2052_v9  ;;  %v4790_v46 = vmul.f32 %v4783_v28, %v2187_v32 }
 0x177   : > { %1758 = vst [vmem:[#allocation2 + $0x50] sm:$0xff] %v1630_v53  ;;  %v1631_v61 = vmax.f32 %v1135_v54, 0.0  ;;  %1838 = vst [vmem:[#allocation2 + $0x440] sm:$0xff] %v1710_v55  ;;  %v1711_v62 = vmax.f32 %v1455_v56, 0.0  ;;  %v4793_v47 = vmul.f32 %v4785_v31, %v2506_v40  ;;  %v2222_v53 = vmul.f32 %v4783_v28, %v2185_v33  ;;  %v2188_v55 = vld [vmem:[#allocation2 + $0x40] sm:$0xff] }
 0x178   : > { %1761 = vst [vmem:[#allocation2 + $0x70] sm:$0xff] %v1633_v57  ;;  %1841 = vst [vmem:[#allocation2 + $0x460] sm:$0xff] %v1713_v58  ;;  %v2186_v34 = vld [vmem:[#allocation2 + $0x28] sm:$0xff] }
 0x179   : > { %1759 = vst [vmem:[#allocation2 + $0x58] sm:$0xff] %v1631_v61  ;;  %v3817_v1 = vpop.f32.mrb[8].mxu0  ;;  %1839 = vst [vmem:[#allocation2 + $0x448] sm:$0xff] %v1711_v62  ;;  %v3897_v2 = vpop.f32.mrb[8].mxu1  ;;  %v2223_v54 = vmul.f32 %v4783_v28, %v2186_v34  ;;  %v2504_v62 = vld [vmem:[#allocation2 + $0x410] sm:$0xff] }
 0x17a   : > { %v1156_v4 = vadd.f32 %v3817_v1, %v4747_v7  ;;  %v1147_v5 = vpop.f32.mrb[9].mxu0  ;;  %v1476_v6 = vadd.f32 %v3897_v2, %v4747_v7  ;;  %v1467_v8 = vpop.f32.mrb[9].mxu1  ;;  %5978 = vst [vmem:[#allocation17_spill] sm:$0xff] %v4790_v46 }
 0x17b   : > { %v1148_v10 = vadd.f32 %v4747_v7, %v1147_v5  ;;  %v3818_v11 = vpop.f32.mrb[10].mxu0  ;;  %v1468_v12 = vadd.f32 %v4747_v7, %v1467_v8  ;;  %v3898_v13 = vpop.f32.mrb[10].mxu1  ;;  %v4804_v8 = vmul.f32 %v4783_v28, %v2188_v55 }
 0x17c   : > { %v1636_v16 = vmax.f32 %v1156_v4, 0.0  ;;  %v1159_v17 = vadd.f32 %v3818_v11, %v4747_v7  ;;  %v1150_v18 = vpop.f32.mrb[11].mxu0  ;;  %v1716_v19 = vmax.f32 %v1476_v6, 0.0  ;;  %v1479_v20 = vadd.f32 %v3898_v13, %v4747_v7  ;;  %v1470_v21 = vpop.f32.mrb[11].mxu1  ;;  %v2505_v4 = vld [vmem:[#allocation2 + $0x418] sm:$0xff]  ;;  %v2507_v11 = vld [vmem:[#allocation2 + $0x430] sm:$0xff] }
 0x17d   : > { %v1634_v22 = vmax.f32 %v1148_v10, 0.0  ;;  %v1151_v23 = vadd.f32 %v4747_v7, %v1150_v18  ;;  %v1714_v24 = vmax.f32 %v1468_v12, 0.0  ;;  %v1471_v25 = vadd.f32 %v4747_v7, %v1470_v21  ;;  %5979 = vst [vmem:[#allocation18_spill] sm:$0xff] %v4804_v8  ;;  %v2191_v9 = vld [vmem:[#allocation2 + $0x68] sm:$0xff]  ;;  %v4809_v12 = vld [vmem:[#allocation2 + $0x458] sm:$0xff] }
 0x17e   : > { %1764 = vst [vmem:[#allocation2 + $0x98] sm:$0xff] %v1636_v16  ;;  %v1637_v26 = vmax.f32 %v1159_v17, 0.0  ;;  %1844 = vst [vmem:[#allocation2 + $0x488] sm:$0xff] %v1716_v19  ;;  %v1717_v27 = vmax.f32 %v1479_v20, 0.0  ;;  %v4807_v10 = vmul.f32 %v4785_v31, %v2504_v62  ;;  %v2189_v15 = vld [vmem:[#allocation2 + $0x50] sm:$0xff]  ;;  %v4812_v16 = vmul.f32 %v4759_v39, %v2504_v62  ;;  %v2508_v18 = vld [vmem:[#allocation2 + $0x440] sm:$0xff] }
 0x17f   : > { %1762 = vst [vmem:[#allocation2 + $0x80] sm:$0xff] %v1634_v22  ;;  %v1635_v29 = vmax.f32 %v1151_v23, 0.0  ;;  %1842 = vst [vmem:[#allocation2 + $0x470] sm:$0xff] %v1714_v24  ;;  %v1715_v30 = vmax.f32 %v1471_v25, 0.0  ;;  %v4815_v17 = vmul.f32 %v4785_v31, %v2507_v11  ;;  %v4817_v19 = vadd.f32 %v2222_v53, %v2153_v37  ;;  %v2192_v20 = vld [vmem:[#allocation2 + $0x70] sm:$0xff]  ;;  %v4828_v24 = vld [vmem:[#allocation2 + $0x460] sm:$0xff] }
 0x180   : > { %1765 = vst [vmem:[#allocation2 + $0xa0] sm:$0xff] %v1637_v26  ;;  %1845 = vst [vmem:[#allocation2 + $0x490] sm:$0xff] %v1717_v27  ;;  %v4820_v21 = vmul.f32 %v4785_v31, %v2505_v4  ;;  %v4823_v22 = vmul.f32 %v4759_v39, %v2505_v4  ;;  %v4826_v23 = vmul.f32 %v4759_v39, %v2506_v40 }
 0x181   : > { %1763 = vst [vmem:[#allocation2 + $0x88] sm:$0xff] %v1635_v29  ;;  %v3821_v35 = vpop.f32.mrb[12].mxu0  ;;  %1843 = vst [vmem:[#allocation2 + $0x478] sm:$0xff] %v1715_v30  ;;  %v3901_v36 = vpop.f32.mrb[12].mxu1  ;;  %v4830_v27 = vadd.f32 %v2223_v54, %v2154_v38  ;;  %v4833_v29 = vmul.f32 %v4783_v28, %v2191_v9  ;;  %v4836_v30 = vmul.f32 %v4759_v39, %v2507_v11 }
 0x182   : > { %v1172_v41 = vadd.f32 %v3821_v35, %v4747_v7  ;;  %v1163_v42 = vpop.f32.mrb[13].mxu0  ;;  %v1492_v43 = vadd.f32 %v3901_v36, %v4747_v7  ;;  %v1483_v44 = vpop.f32.mrb[13].mxu1  ;;  %5980 = vst [vmem:[#allocation19_spill] sm:$0xff] %v4807_v10  ;;  %5981 = vst [vmem:[#allocation20_spill] sm:$0xff] %v4820_v21  ;;  %v4840_v32 = vmul.f32 %v4759_v39, %v4809_v12 }
 0x183   : > { %v1164_v48 = vadd.f32 %v4747_v7, %v1163_v42  ;;  %v3822_v49 = vpop.f32.mrb[14].mxu0  ;;  %v1484_v50 = vadd.f32 %v4747_v7, %v1483_v44  ;;  %v3902_v51 = vpop.f32.mrb[14].mxu1  ;;  %5982 = vst [vmem:[#allocation21_spill] sm:$0xff] %v4833_v29  ;;  %v4845_v37 = vmul.f32 %v4783_v28, %v2189_v15  ;;  %v4848_v38 = vmul.f32 %v4759_v39, %v2508_v18  ;;  %v2190_v44 = vld [vmem:[#allocation2 + $0x58] sm:$0xff]  ;;  %v4875_v15 = vld [vmem:[#allocation8 + $0x8] ss:$0 sm:$0xff] }
 0x184   : > { %v1640_v56 = vmax.f32 %v1172_v41, 0.0  ;;  %v1175_v57 = vadd.f32 %v3822_v49, %v4747_v7  ;;  %v1166_v58 = vpop.f32.mrb[15].mxu0  ;;  %v1720_v59 = vmax.f32 %v1492_v43, 0.0  ;;  %v1495_v60 = vadd.f32 %v3902_v51, %v4747_v7  ;;  %v1486_v61 = vpop.f32.mrb[15].mxu1  ;;  %v2509_v49 = vld [vmem:[#allocation2 + $0x448] sm:$0xff] }
 0x185   : > { %v1638_v63 = vmax.f32 %v1164_v48, 0.0  ;;  %v1167_v1 = vadd.f32 %v4747_v7, %v1166_v58  ;;  %v1718_v2 = vmax.f32 %v1484_v50, 0.0  ;;  %v1487_v3 = vadd.f32 %v4747_v7, %v1486_v61  ;;  %5983 = vst [vmem:[#allocation22_spill] sm:$0xff] %v4845_v37 }
 0x186   : > { %1768 = vst [vmem:[#allocation2 + $0xc8] sm:$0xff] %v1640_v56  ;;  %v1641_v5 = vmax.f32 %v1175_v57, 0.0  ;;  %1848 = vst [vmem:[#allocation2 + $0x4b8] sm:$0xff] %v1720_v59  ;;  %v1721_v6 = vmax.f32 %v1495_v60, 0.0  ;;  %v4853_v48 = vmul.f32 %v4783_v28, %v2192_v20  ;;  %v4857_v50 = vmul.f32 %v4759_v39, %v4828_v24  ;;  %v2195_v57 = vld [vmem:[#allocation2 + $0x98] sm:$0xff]  ;;  %v2193_v62 = vld [vmem:[#allocation2 + $0x80] sm:$0xff] }
 0x187   : > { %1766 = vst [vmem:[#allocation2 + $0xb0] sm:$0xff] %v1638_v63  ;;  %v1639_v13 = vmax.f32 %v1167_v1, 0.0  ;;  %1846 = vst [vmem:[#allocation2 + $0x4a0] sm:$0xff] %v1718_v2  ;;  %v1719_v14 = vmax.f32 %v1487_v3, 0.0  ;;  %v2196_v1 = vld [vmem:[#allocation2 + $0xa0] sm:$0xff]  ;;  %v4864_v4 = vmul.f32 %v4783_v28, %v2190_v44  ;;  %v4878_v20 = vmul.f32 %v4783_v28, %v2193_v62 }
 0x188   : > { %1769 = vst [vmem:[#allocation2 + $0xd0] sm:$0xff] %v1641_v5  ;;  %1849 = vst [vmem:[#allocation2 + $0x4c0] sm:$0xff] %v1721_v6  ;;  %v2194_v63 = vld [vmem:[#allocation2 + $0x88] sm:$0xff]  ;;  %v4867_v6 = vmul.f32 %v4759_v39, %v2509_v49 }
 0x189   : > { %1767 = vst [vmem:[#allocation2 + $0xb8] sm:$0xff] %v1639_v13  ;;  %v3825_v25 = vpop.f32.mrb[16].mxu0  ;;  %1847 = vst [vmem:[#allocation2 + $0x4a8] sm:$0xff] %v1719_v14  ;;  %v3905_v26 = vpop.f32.mrb[16].mxu1  ;;  %v4870_v13 = vmul.f32 %v4785_v31, %v2508_v18  ;;  %v4873_v14 = vmul.f32 %v4785_v31, %v2509_v49  ;;  %v4881_v39 = vmul.f32 %v4783_v28, %v2194_v63 }
 0x18a   : > { %v1188_v33 = vadd.f32 %v3825_v25, %v4747_v7  ;;  %v1179_v34 = vpop.f32.mrb[17].mxu0  ;;  %v1508_v35 = vadd.f32 %v3905_v26, %v4747_v7  ;;  %v1499_v36 = vpop.f32.mrb[17].mxu1  ;;  %5984 = vst [vmem:[#allocation23_spill] sm:$0xff] %v4853_v48  ;;  %5985 = vst [vmem:[#allocation24_spill] sm:$0xff] %v4864_v4  ;;  %v4884_v25 = vmul.f32 %v4783_v28, %v2195_v57 }
 0x18b   : > { %v1180_v40 = vadd.f32 %v4747_v7, %v1179_v34  ;;  %v3826_v41 = vpop.f32.mrb[18].mxu0  ;;  %v1500_v42 = vadd.f32 %v4747_v7, %v1499_v36  ;;  %v3906_v43 = vpop.f32.mrb[18].mxu1  ;;  %5986 = vst [vmem:[#allocation25_spill] sm:$0xff] %v4878_v20  ;;  %5987 = vst [vmem:[#allocation26_spill] sm:$0xff] %v4881_v39  ;;  %v4887_v26 = vmul.f32 %v4783_v28, %v2196_v1 }
 0x18c   : > { %v1644_v51 = vmax.f32 %v1188_v33, 0.0  ;;  %v1191_v52 = vadd.f32 %v3826_v41, %v4747_v7  ;;  %v1182_v53 = vpop.f32.mrb[19].mxu0  ;;  %v1724_v54 = vmax.f32 %v1508_v35, 0.0  ;;  %v1511_v55 = vadd.f32 %v3906_v43, %v4747_v7  ;;  %v1502_v56 = vpop.f32.mrb[19].mxu1  ;;  %5988 = vst [vmem:[#allocation27_spill] sm:$0xff] %v4884_v25 }
 0x18d   : > { %v1642_v58 = vmax.f32 %v1180_v40, 0.0  ;;  %v1183_v59 = vadd.f32 %v4747_v7, %v1182_v53  ;;  %v1722_v60 = vmax.f32 %v1500_v42, 0.0  ;;  %v1503_v61 = vadd.f32 %v4747_v7, %v1502_v56  ;;  %v2199_v5 = vld [vmem:[#allocation2 + $0xc8] sm:$0xff]  ;;  %5989 = vst [vmem:[#allocation28_spill] sm:$0xff] %v4887_v26 }
 0x18e   : > { %1772 = vst [vmem:[#allocation2 + $0xf8] sm:$0xff] %v1644_v51  ;;  %v1645_v2 = vmax.f32 %v1191_v52, 0.0  ;;  %1852 = vst [vmem:[#allocation2 + $0x500] sm:$0xff] %v1724_v54  ;;  %v1725_v3 = vmax.f32 %v1511_v55, 0.0  ;;  %v2197_v18 = vld [vmem:[#allocation2 + $0xb0] sm:$0xff]  ;;  %v4896_v41 = vmul.f32 %v4875_v15, %v1724_v54  ;;  %v4899_v42 = vmul.f32 %v4783_v28, %v2199_v5 }
 0x18f   : > { %1770 = vst [vmem:[#allocation2 + $0xe0] sm:$0xff] %v1642_v58  ;;  %v1643_v9 = vmax.f32 %v1183_v59, 0.0  ;;  %1850 = vst [vmem:[#allocation2 + $0x4e8] sm:$0xff] %v1722_v60  ;;  %v1723_v11 = vmax.f32 %v1503_v61, 0.0  ;;  %v2200_v33 = vld [vmem:[#allocation2 + $0xd0] sm:$0xff]  ;;  %v4890_v36 = vmul.f32 %v4875_v15, %v1722_v60  ;;  %v4893_v40 = vmul.f32 %v4772_v0, %v1722_v60 }
 0x190   : > { %1773 = vst [vmem:[#allocation2 + $0x100] sm:$0xff] %v1645_v2  ;;  %1853 = vst [vmem:[#allocation2 + $0x508] sm:$0xff] %v1725_v3  ;;  %v4904_v52 = vmul.f32 %v4875_v15, %v1725_v3  ;;  %v4907_v53 = vmul.f32 %v4772_v0, %v1725_v3  ;;  %v4912_v58 = vmul.f32 %v4783_v28, %v2197_v18  ;;  %v2198_v3 = vld [vmem:[#allocation2 + $0xb8] sm:$0xff] }
 0x191   : > { %1771 = vst [vmem:[#allocation2 + $0xe8] sm:$0xff] %v1643_v9  ;;  %v3829_v34 = vpop.f32.mrb[20].mxu0  ;;  %1851 = vst [vmem:[#allocation2 + $0x4f0] sm:$0xff] %v1723_v11  ;;  %v3909_v35 = vpop.f32.mrb[20].mxu1  ;;  %v4915_v59 = vmul.f32 %v4783_v28, %v2200_v33 }
 0x192   : > { %5990 = vst [vmem:[#allocation29_spill] sm:$0xff] %v4890_v36  ;;  %5991 = vst [vmem:[#allocation30_spill] sm:$0xff] %v4896_v41  ;;  %v1204_v43 = vadd.f32 %v3829_v34, %v4747_v7  ;;  %v1195_v44 = vpop.f32.mrb[21].mxu0  ;;  %v1524_v49 = vadd.f32 %v3909_v35, %v4747_v7  ;;  %v1515_v51 = vpop.f32.mrb[21].mxu1 }
 0x193   : > { %5992 = vst [vmem:[#allocation31_spill] sm:$0xff] %v4899_v42  ;;  %5993 = vst [vmem:[#allocation32_spill] sm:$0xff] %v4904_v52  ;;  %v1196_v55 = vadd.f32 %v4747_v7, %v1195_v44  ;;  %v3830_v56 = vpop.f32.mrb[22].mxu0  ;;  %v1516_v54 = vadd.f32 %v4747_v7, %v1515_v51  ;;  %v3910_v57 = vpop.f32.mrb[22].mxu1  ;;  %v4922_v51 = vmul.f32 %v4875_v15, %v1723_v11 }
 0x194   : > { %5994 = vst [vmem:[#allocation33_spill] sm:$0xff] %v4912_v58  ;;  %5995 = vst [vmem:[#allocation34_spill] sm:$0xff] %v4915_v59  ;;  %v1648_v60 = vmax.f32 %v1204_v43, 0.0  ;;  %v1207_v61 = vadd.f32 %v3830_v56, %v4747_v7  ;;  %v1198_v62 = vpop.f32.mrb[23].mxu0  ;;  %v1728_v63 = vmax.f32 %v1524_v49, 0.0  ;;  %v1527_v1 = vadd.f32 %v3910_v57, %v4747_v7  ;;  %v1518_v2 = vpop.f32.mrb[23].mxu1 }
 0x195   : > { %v1646_v5 = vmax.f32 %v1196_v55, 0.0  ;;  %v1199_v9 = vadd.f32 %v4747_v7, %v1198_v62  ;;  %v1726_v34 = vmax.f32 %v1516_v54, 0.0  ;;  %v1519_v35 = vadd.f32 %v4747_v7, %v1518_v2  ;;  %v2591_v18 = vld [vmem:[#allocation2 + $0x4ff] sm:$0xff]  ;;  %5996 = vst [vmem:[#allocation35_spill] sm:$0xff] %v4922_v51  ;;  %v4927_v54 = vld [vmem:[#allocation8 + $0x6] ss:$0 sm:$0xff] }
 0x196   : > { %1776 = vst [vmem:[#allocation2 + $0x128] sm:$0xff] %v1648_v60  ;;  %v1649_v44 = vmax.f32 %v1207_v61, 0.0  ;;  %1856 = vst [vmem:[#allocation2 + $0x530] sm:$0xff] %v1728_v63  ;;  %v1729_v33 = vmax.f32 %v1527_v1, 0.0  ;;  %v2589_v43 = vld [vmem:[#allocation2 + $0x4e7] sm:$0xff]  ;;  %v4925_v49 = vmul.f32 %v4772_v0, %v1723_v11  ;;  %v4930_v60 = vmul.f32 %v4783_v28, %v2198_v3 }
 0x197   : > { %v2088_v56 = vld [vmem:[#allocation2 + $0x500] sm:$0xff]  ;;  %1774 = vst [vmem:[#allocation2 + $0x110] sm:$0xff] %v1646_v5  ;;  %v1647_v55 = vmax.f32 %v1199_v9, 0.0  ;;  %1854 = vst [vmem:[#allocation2 + $0x518] sm:$0xff] %v1726_v34  ;;  %v1727_v57 = vmax.f32 %v1519_v35, 0.0  ;;  %v4934_v63 = vmul.f32 %v4785_v31, %v4809_v12  ;;  %v4937_v1 = vmul.f32 %v4927_v54, %v2589_v43 }
 0x198   : > { %5997 = vst [vmem:[#allocation36_spill] sm:$0xff] %v4925_v49  ;;  %v2592_v62 = vld [vmem:[#allocation2 + $0x507] sm:$0xff]  ;;  %5998 = vst [vmem:[#allocation37_spill] sm:$0xff] %v4930_v60  ;;  %v2590_v11 = vld [vmem:[#allocation2 + $0x4ef] sm:$0xff]  ;;  %v4940_v2 = vmul.f32 %v4927_v54, %v2591_v18  ;;  %v4943_v5 = vmul.f32 %v4763_v45, %v2591_v18  ;;  %v4947_v3 = vmul.f32 %v4785_v31, %v4828_v24 }
 0x199   : > { %v2201_v61 = vld [vmem:[#allocation2 + $0xe0] sm:$0xff]  ;;  %1777 = vst [vmem:[#allocation2 + $0x130] sm:$0xff] %v1649_v44  ;;  %1857 = vst [vmem:[#allocation2 + $0x538] sm:$0xff] %v1729_v33  ;;  %v2202_v9 = vld [vmem:[#allocation2 + $0xe8] sm:$0xff]  ;;  %v3833_v12 = vpop.f32.mrb[24].mxu0  ;;  %v3913_v34 = vpop.f32.mrb[24].mxu1  ;;  %v4950_v35 = vmul.f32 %v4763_v45, %v2589_v43  ;;  %v4953_v44 = vmul.f32 %v4927_v54, %v2592_v62  ;;  %v4956_v33 = vmul.f32 %v4763_v45, %v2592_v62 }
 0x19a   : > { %5999 = vst [vmem:[#allocation38_spill] sm:$0xff] %v4940_v2  ;;  %1775 = vst [vmem:[#allocation2 + $0x118] sm:$0xff] %v1647_v55  ;;  %v4959_v18 = vmul.f32 %v4772_v0, %v2088_v56  ;;  %v1220_v21 = vadd.f32 %v3833_v12, %v4747_v7  ;;  %v1211_v31 = vpop.f32.mrb[25].mxu0  ;;  %v1540_v24 = vadd.f32 %v3913_v34, %v4747_v7  ;;  %v1531_v55 = vpop.f32.mrb[25].mxu1  ;;  %v2203_v34 = vld [vmem:[#allocation2 + $0xf8] sm:$0xff]  ;;  %v2204_v60 = vld [vmem:[#allocation2 + $0x100] sm:$0xff] }
 0x19b   : > { %1855 = vst [vmem:[#allocation2 + $0x520] sm:$0xff] %v1727_v57  ;;  %6000 = vst [vmem:[#allocation39_spill] sm:$0xff] %v4953_v44  ;;  %v4964_v57 = vmul.f32 %v4927_v54, %v2590_v11  ;;  %v4967_v43 = vmul.f32 %v4783_v28, %v2201_v61  ;;  %v1212_v10 = vadd.f32 %v4747_v7, %v1211_v31  ;;  %v3834_v59 = vpop.f32.mrb[26].mxu0  ;;  %v3914_v42 = vpop.f32.mrb[26].mxu1 }
 0x19c   : > { %v1532_v62 = vadd.f32 %v4747_v7, %v1531_v55  ;;  %v4972_v56 = vmul.f32 %v4763_v45, %v2590_v11  ;;  %v4975_v12 = vmul.f32 %v4783_v28, %v2202_v9  ;;  %v1652_v58 = vmax.f32 %v1220_v21, 0.0  ;;  %v1214_v25 = vpop.f32.mrb[27].mxu0  ;;  %v1534_v31 = vpop.f32.mrb[27].mxu1 }
 0x19d   : > { %6001 = vst [vmem:[#allocation40_spill] sm:$0xff] %v4964_v57  ;;  %6002 = vst [vmem:[#allocation41_spill] sm:$0xff] %v4967_v43  ;;  %v1223_v26 = vadd.f32 %v3834_v59, %v4747_v7  ;;  %v1732_v61 = vmax.f32 %v1540_v24, 0.0  ;;  %v1543_v43 = vadd.f32 %v3914_v42, %v4747_v7  ;;  %v1650_v39 = vmax.f32 %v1212_v10, 0.0  ;;  %v2595_v48 = vld [vmem:[#allocation2 + $0x52f] sm:$0xff] }
 0x19e   : > { %6003 = vst [vmem:[#allocation42_spill] sm:$0xff] %v4975_v12  ;;  %v1215_v55 = vadd.f32 %v4747_v7, %v1214_v25  ;;  %v1730_v20 = vmax.f32 %v1532_v62, 0.0  ;;  %v1535_v11 = vadd.f32 %v4747_v7, %v1534_v31  ;;  %v2696_v29 = vld [vmem:[#allocation2 + $0x530] sm:$0xff]  ;;  %1780 = vst [vmem:[#allocation2 + $0x158] sm:$0xff] %v1652_v58  ;;  %v2694_v52 = vld [vmem:[#allocation2 + $0x518] sm:$0xff]  ;;  %v4982_v59 = vmul.f32 %v4783_v28, %v2203_v34 }
 0x19f   : > { %v1653_v9 = vmax.f32 %v1223_v26, 0.0  ;;  %1860 = vst [vmem:[#allocation2 + $0x560] sm:$0xff] %v1732_v61  ;;  %v1733_v12 = vmax.f32 %v1543_v43, 0.0  ;;  %v2593_v21 = vld [vmem:[#allocation2 + $0x517] sm:$0xff]  ;;  %v4985_v42 = vmul.f32 %v4783_v28, %v2204_v60  ;;  %1778 = vst [vmem:[#allocation2 + $0x140] sm:$0xff] %v1650_v39  ;;  %v4988_v62 = vmul.f32 %v4927_v54, %v2595_v48 }
 0x1a0   : > { %v1651_v10 = vmax.f32 %v1215_v55, 0.0  ;;  %1858 = vst [vmem:[#allocation2 + $0x548] sm:$0xff] %v1730_v20  ;;  %v1731_v25 = vmax.f32 %v1535_v11, 0.0  ;;  %v2596_v24 = vld [vmem:[#allocation2 + $0x537] sm:$0xff]  ;;  %v4991_v26 = vmul.f32 %v4875_v15, %v2696_v29  ;;  %v4994_v34 = vmul.f32 %v4927_v54, %v2593_v21 }
 0x1a1   : > { %6004 = vst [vmem:[#allocation43_spill] sm:$0xff] %v4988_v62  ;;  %v2697_v58 = vld [vmem:[#allocation2 + $0x538] sm:$0xff]  ;;  %1781 = vst [vmem:[#allocation2 + $0x160] sm:$0xff] %v1653_v9  ;;  %v4997_v39 = vmul.f32 %v4875_v15, %v2694_v52  ;;  %v5000_v20 = vmul.f32 %v4763_v45, %v2593_v21  ;;  %v5003_v60 = vmul.f32 %v4772_v0, %v2694_v52  ;;  %v3837_v61 = vpop.f32.mrb[28].mxu0  ;;  %v3917_v31 = vpop.f32.mrb[28].mxu1 }
 0x1a2   : > { %6005 = vst [vmem:[#allocation44_spill] sm:$0xff] %v4991_v26  ;;  %1861 = vst [vmem:[#allocation2 + $0x568] sm:$0xff] %v1733_v12  ;;  %v2594_v43 = vld [vmem:[#allocation2 + $0x51f] sm:$0xff]  ;;  %v5012_v11 = vmul.f32 %v4927_v54, %v2596_v24  ;;  %v5015_v9 = vmul.f32 %v4875_v15, %v2697_v58  ;;  %v1236_v21 = vadd.f32 %v3837_v61, %v4747_v7  ;;  %v1227_v52 = vpop.f32.mrb[29].mxu0  ;;  %v1547_v26 = vpop.f32.mrb[29].mxu1 }
 0x1a3   : > { %6006 = vst [vmem:[#allocation45_spill] sm:$0xff] %v4994_v34  ;;  %v2695_v28 = vld [vmem:[#allocation2 + $0x520] sm:$0xff]  ;;  %6007 = vst [vmem:[#allocation46_spill] sm:$0xff] %v4997_v39  ;;  %v5006_v12 = vmul.f32 %v4927_v54, %v2594_v43  ;;  %v3918_v39 = vpop.f32.mrb[30].mxu1  ;;  %v5031_v61 = vmul.f32 %v4763_v45, %v2596_v24 }
 0x1a4   : > { %6008 = vst [vmem:[#allocation47_spill] sm:$0xff] %v5000_v20  ;;  %6009 = vst [vmem:[#allocation48_spill] sm:$0xff] %v5003_v60  ;;  %v5009_v55 = vmul.f32 %v4875_v15, %v2695_v28  ;;  %v5023_v62 = vmul.f32 %v4772_v0, %v2695_v28  ;;  %v3838_v60 = vpop.f32.mrb[30].mxu0  ;;  %v1559_v28 = vadd.f32 %v3918_v39, %v4747_v7 }
 0x1a5   : > { %1779 = vst [vmem:[#allocation2 + $0x148] sm:$0xff] %v1651_v10  ;;  %1859 = vst [vmem:[#allocation2 + $0x550] sm:$0xff] %v1731_v25  ;;  %v1556_v10 = vadd.f32 %v3917_v31, %v4747_v7  ;;  %v5020_v25 = vmul.f32 %v4763_v45, %v2594_v43  ;;  %v1656_v31 = vmax.f32 %v1236_v21, 0.0  ;;  %v1230_v43 = vpop.f32.mrb[31].mxu0  ;;  %v5038_v21 = vmul.f32 %v4772_v0, %v2696_v29 }
 0x1a6   : > { %6010 = vst [vmem:[#allocation49_spill] sm:$0xff] %v5006_v12  ;;  %6011 = vst [vmem:[#allocation50_spill] sm:$0xff] %v5009_v55  ;;  %v1228_v55 = vadd.f32 %v4747_v7, %v1227_v52  ;;  %v1239_v12 = vadd.f32 %v3838_v60, %v4747_v7  ;;  %v1231_v52 = vadd.f32 %v4747_v7, %v1230_v43  ;;  %v2599_v20 = vld [vmem:[#allocation2 + $0x55f] sm:$0xff]  ;;  %v1737_v24 = vmax.f32 %v1559_v28, 0.0 }
 0x1a7   : > { %6012 = vst [vmem:[#allocation51_spill] sm:$0xff] %v5012_v11  ;;  %6013 = vst [vmem:[#allocation52_spill] sm:$0xff] %v5015_v9  ;;  %v1548_v11 = vadd.f32 %v4747_v7, %v1547_v26  ;;  %v5028_v9 = vmul.f32 %v4763_v45, %v2595_v48  ;;  %v2700_v48 = vld [vmem:[#allocation2 + $0x560] sm:$0xff]  ;;  %v5041_v60 = vmul.f32 %v4772_v0, %v2697_v58 }
 0x1a8   : > { %6014 = vst [vmem:[#allocation53_spill] sm:$0xff] %v5020_v25  ;;  %6015 = vst [vmem:[#allocation54_spill] sm:$0xff] %v5023_v62  ;;  %v1736_v25 = vmax.f32 %v1556_v10, 0.0  ;;  %v1550_v62 = vpop.f32.mrb[31].mxu1  ;;  %v1654_v41 = vmax.f32 %v1228_v55, 0.0  ;;  %v2597_v39 = vld [vmem:[#allocation2 + $0x547] sm:$0xff] }
 0x1a9   : > { %6016 = vst [vmem:[#allocation55_spill] sm:$0xff] %v5028_v9  ;;  %6017 = vst [vmem:[#allocation56_spill] sm:$0xff] %v5031_v61  ;;  %v1734_v44 = vmax.f32 %v1548_v11, 0.0  ;;  %v1551_v26 = vadd.f32 %v4747_v7, %v1550_v62  ;;  %v1657_v9 = vmax.f32 %v1239_v12, 0.0  ;;  %v2698_v10 = vld [vmem:[#allocation2 + $0x548] sm:$0xff]  ;;  %v1655_v55 = vmax.f32 %v1231_v52, 0.0 }
 0x1aa   : > { %1784 = vst [vmem:[#allocation2 + $0x188] sm:$0xff] %v1656_v31  ;;  %1864 = vst [vmem:[#allocation2 + $0x590] sm:$0xff] %v1736_v25  ;;  %v2600_v43 = vld [vmem:[#allocation2 + $0x567] sm:$0xff]  ;;  %v5044_v62 = vmul.f32 %v4927_v54, %v2599_v20  ;;  %v5047_v12 = vmul.f32 %v4875_v15, %v2700_v48  ;;  %v5050_v58 = vmul.f32 %v4927_v54, %v2597_v39  ;;  %v3841_v52 = vpop.f32.mrb[32].mxu0 }
 0x1ab   : > { %6018 = vst [vmem:[#allocation57_spill] sm:$0xff] %v5038_v21  ;;  %6019 = vst [vmem:[#allocation58_spill] sm:$0xff] %v5041_v60  ;;  %v1735_v11 = vmax.f32 %v1551_v26, 0.0  ;;  %v2701_v31 = vld [vmem:[#allocation2 + $0x568] sm:$0xff]  ;;  %v5059_v28 = vmul.f32 %v4772_v0, %v2698_v10  ;;  %v3921_v26 = vpop.f32.mrb[32].mxu1 }
 0x1ac   : > { %1782 = vst [vmem:[#allocation2 + $0x170] sm:$0xff] %v1654_v41  ;;  %1862 = vst [vmem:[#allocation2 + $0x578] sm:$0xff] %v1734_v44  ;;  %v2598_v29 = vld [vmem:[#allocation2 + $0x54f] sm:$0xff]  ;;  %v5053_v41 = vmul.f32 %v4875_v15, %v2698_v10  ;;  %v5056_v44 = vmul.f32 %v4763_v45, %v2597_v39  ;;  %v1252_v39 = vadd.f32 %v3841_v52, %v4747_v7  ;;  %v5091_v60 = vld [vmem:[#allocation8 + $0x5] ss:$0 sm:$0xff] }
 0x1ad   : > { %6020 = vst [vmem:[#allocation59_spill] sm:$0xff] %v5044_v62  ;;  %6021 = vst [vmem:[#allocation60_spill] sm:$0xff] %v5047_v12  ;;  %v2699_v25 = vld [vmem:[#allocation2 + $0x550] sm:$0xff]  ;;  %v5068_v12 = vmul.f32 %v4927_v54, %v2600_v43  ;;  %v5071_v62 = vmul.f32 %v4875_v15, %v2701_v31  ;;  %v1572_v10 = vadd.f32 %v3921_v26, %v4747_v7 }
 0x1ae   : > { %1785 = vst [vmem:[#allocation2 + $0x190] sm:$0xff] %v1657_v9  ;;  %1865 = vst [vmem:[#allocation2 + $0x598] sm:$0xff] %v1737_v24  ;;  %v5062_v9 = vmul.f32 %v4927_v54, %v2598_v29  ;;  %v5065_v24 = vmul.f32 %v4875_v15, %v2699_v25  ;;  %v5087_v52 = vmul.f32 %v4763_v45, %v2600_v43  ;;  %v1660_v26 = vmax.f32 %v1252_v39, 0.0 }
 0x1af   : > { %6022 = vst [vmem:[#allocation61_spill] sm:$0xff] %v5050_v58  ;;  %6023 = vst [vmem:[#allocation62_spill] sm:$0xff] %v5053_v41  ;;  %v5076_v41 = vmul.f32 %v4763_v45, %v2598_v29 }
 0x1b0   : > { %6024 = vst [vmem:[#allocation63_spill] sm:$0xff] %v5056_v44  ;;  %6025 = vst [vmem:[#allocation64_spill] sm:$0xff] %v5059_v28  ;;  %v1740_v44 = vmax.f32 %v1572_v10, 0.0 }
 0x1b1   : > { %1783 = vst [vmem:[#allocation2 + $0x178] sm:$0xff] %v1655_v55  ;;  %1863 = vst [vmem:[#allocation2 + $0x580] sm:$0xff] %v1735_v11  ;;  %v1243_v55 = vpop.f32.mrb[33].mxu0  ;;  %v1563_v11 = vpop.f32.mrb[33].mxu1 }
 0x1b2   : > { %6026 = vst [vmem:[#allocation65_spill] sm:$0xff] %v5062_v9  ;;  %6027 = vst [vmem:[#allocation66_spill] sm:$0xff] %v5065_v24  ;;  %v5079_v9 = vmul.f32 %v4772_v0, %v2699_v25  ;;  %v1244_v24 = vadd.f32 %v4747_v7, %v1243_v55  ;;  %v1564_v58 = vadd.f32 %v4747_v7, %v1563_v11  ;;  %v3922_v28 = vpop.f32.mrb[34].mxu1 }
 0x1b3   : > { %6028 = vst [vmem:[#allocation67_spill] sm:$0xff] %v5068_v12  ;;  %6029 = vst [vmem:[#allocation68_spill] sm:$0xff] %v5071_v62  ;;  %v3842_v12 = vpop.f32.mrb[34].mxu0  ;;  %v5084_v62 = vmul.f32 %v4763_v45, %v2599_v20  ;;  %v2601_v10 = vld [vmem:[#allocation2 + $0x577] sm:$0xff] }
 0x1b4   : > { %6030 = vst [vmem:[#allocation69_spill] sm:$0xff] %v5076_v41  ;;  %6031 = vst [vmem:[#allocation70_spill] sm:$0xff] %v5079_v9  ;;  %v1255_v29 = vadd.f32 %v3842_v12, %v4747_v7  ;;  %v1575_v41 = vadd.f32 %v3922_v28, %v4747_v7  ;;  %v1246_v25 = vpop.f32.mrb[35].mxu0  ;;  %v1566_v9 = vpop.f32.mrb[35].mxu1  ;;  %v1658_v55 = vmax.f32 %v1244_v24, 0.0  ;;  %v1738_v11 = vmax.f32 %v1564_v58, 0.0 }
 0x1b5   : > { %6032 = vst [vmem:[#allocation71_spill] sm:$0xff] %v5084_v62  ;;  %6033 = vst [vmem:[#allocation72_spill] sm:$0xff] %v5087_v52  ;;  %v1247_v21 = vadd.f32 %v4747_v7, %v1246_v25  ;;  %v1567_v20 = vadd.f32 %v4747_v7, %v1566_v9  ;;  %v5095_v62 = vld [vmem:[#allocation2 + $0x58f] sm:$0xff]  ;;  %v5098_v12 = vmul.f32 %v4772_v0, %v2700_v48  ;;  %v2702_v52 = vld [vmem:[#allocation2 + $0x578] sm:$0xff] }
 0x1b6   : > { %1788 = vst [vmem:[#allocation2 + $0x1d0] sm:$0xff] %v1660_v26  ;;  %1868 = vst [vmem:[#allocation2 + $0x5c0] sm:$0xff] %v1740_v44  ;;  %v1661_v43 = vmax.f32 %v1255_v29, 0.0  ;;  %v1741_v39 = vmax.f32 %v1575_v41, 0.0  ;;  %v5101_v28 = vmul.f32 %v4772_v0, %v2701_v31  ;;  %v5104_v9 = vmul.f32 %v5091_v60, %v1660_v26  ;;  %v5122_v25 = vld [vmem:[#allocation2 + $0x597] sm:$0xff] }
 0x1b7   : > { %6034 = vst [vmem:[#allocation73_spill] sm:$0xff] %v5098_v12  ;;  %1786 = vst [vmem:[#allocation2 + $0x1b8] sm:$0xff] %v1658_v55  ;;  %v1659_v58 = vmax.f32 %v1247_v21, 0.0  ;;  %v1739_v24 = vmax.f32 %v1567_v20, 0.0  ;;  %v5108_v44 = vmul.f32 %v4927_v54, %v5095_v62  ;;  %v5111_v48 = vmul.f32 %v5091_v60, %v1658_v55  ;;  %v3925_v20 = vpop.f32.mrb[36].mxu1 }
 0x1b8   : > { %6035 = vst [vmem:[#allocation74_spill] sm:$0xff] %v5101_v28  ;;  %1866 = vst [vmem:[#allocation2 + $0x5a8] sm:$0xff] %v1738_v11  ;;  %v5114_v31 = vmul.f32 %v5091_v60, %v1661_v43  ;;  %v2602_v41 = vld [vmem:[#allocation2 + $0x57f] sm:$0xff]  ;;  %v5117_v29 = vmul.f32 %v4927_v54, %v2601_v10  ;;  %v5120_v26 = vmul.f32 %v4875_v15, %v2702_v52  ;;  %v3845_v11 = vpop.f32.mrb[36].mxu0 }
 0x1b9   : > { %6036 = vst [vmem:[#allocation75_spill] sm:$0xff] %v5104_v9  ;;  %6037 = vst [vmem:[#allocation76_spill] sm:$0xff] %v5108_v44  ;;  %v2703_v21 = vld [vmem:[#allocation2 + $0x580] sm:$0xff]  ;;  %v5125_v55 = vmul.f32 %v5091_v60, %v1659_v58  ;;  %v5134_v44 = vmul.f32 %v4772_v0, %v2702_v52  ;;  %v1259_v28 = vpop.f32.mrb[37].mxu0 }
 0x1ba   : > { %1789 = vst [vmem:[#allocation2 + $0x1d8] sm:$0xff] %v1661_v43  ;;  %1869 = vst [vmem:[#allocation2 + $0x5c8] sm:$0xff] %v1741_v39  ;;  %v5128_v43 = vmul.f32 %v4927_v54, %v2602_v41  ;;  %v5131_v39 = vmul.f32 %v4763_v45, %v2601_v10  ;;  %v5139_v12 = vmul.f32 %v4875_v15, %v2703_v21 }
 0x1bb   : > { %6038 = vst [vmem:[#allocation77_spill] sm:$0xff] %v5114_v31  ;;  %6039 = vst [vmem:[#allocation78_spill] sm:$0xff] %v5117_v29  ;;  %v1588_v29 = vadd.f32 %v3925_v20, %v4747_v7  ;;  %v5147_v52 = vmul.f32 %v4772_v0, %v2703_v21  ;;  %v2704_v20 = vld [vmem:[#allocation2 + $0x590] sm:$0xff] }
 0x1bc   : > { %6040 = vst [vmem:[#allocation79_spill] sm:$0xff] %v5120_v26  ;;  %1787 = vst [vmem:[#allocation2 + $0x1c0] sm:$0xff] %v1659_v58  ;;  %v1268_v26 = vadd.f32 %v3845_v11, %v4747_v7  ;;  %v5142_v58 = vmul.f32 %v4763_v45, %v2602_v41  ;;  %v5151_v11 = vmul.f32 %v4927_v54, %v5122_v25 }
 0x1bd   : > { %1867 = vst [vmem:[#allocation2 + $0x5b0] sm:$0xff] %v1739_v24  ;;  %6041 = vst [vmem:[#allocation80_spill] sm:$0xff] %v5128_v43  ;;  %v1579_v24 = vpop.f32.mrb[37].mxu1  ;;  %v1260_v43 = vadd.f32 %v4747_v7, %v1259_v28  ;;  %v2288_v8 = vld [vmem:[#allocation2 + $0x1cf] sm:$0xff] }
 0x1be   : > { %6042 = vst [vmem:[#allocation81_spill] sm:$0xff] %v5131_v39  ;;  %6043 = vst [vmem:[#allocation82_spill] sm:$0xff] %v5134_v44  ;;  %v1580_v10 = vadd.f32 %v4747_v7, %v1579_v24  ;;  %v3846_v39 = vpop.f32.mrb[38].mxu0  ;;  %v3926_v61 = vpop.f32.mrb[38].mxu1  ;;  %v2705_v44 = vld [vmem:[#allocation2 + $0x598] sm:$0xff]  ;;  %v1664_v34 = vmax.f32 %v1268_v26, 0.0 }
 0x1bf   : > { %6044 = vst [vmem:[#allocation83_spill] sm:$0xff] %v5139_v12  ;;  %6045 = vst [vmem:[#allocation84_spill] sm:$0xff] %v5142_v58  ;;  %v1744_v12 = vmax.f32 %v1588_v29, 0.0  ;;  %v1271_v41 = vadd.f32 %v3846_v39, %v4747_v7  ;;  %v1591_v58 = vadd.f32 %v3926_v61, %v4747_v7  ;;  %v1262_v28 = vpop.f32.mrb[39].mxu0  ;;  %v1582_v2 = vpop.f32.mrb[39].mxu1  ;;  %v1662_v31 = vmax.f32 %v1260_v43, 0.0 }
 0x1c0   : > { %6046 = vst [vmem:[#allocation85_spill] sm:$0xff] %v5147_v52  ;;  %6047 = vst [vmem:[#allocation86_spill] sm:$0xff] %v5151_v11  ;;  %v5155_v24 = vld [vmem:[#allocation8 + $0x3] ss:$0 sm:$0xff]  ;;  %v1742_v9 = vmax.f32 %v1580_v10, 0.0  ;;  %v1263_v21 = vadd.f32 %v4747_v7, %v1262_v28  ;;  %v1583_v52 = vadd.f32 %v4747_v7, %v1582_v2  ;;  %v2286_v29 = vld [vmem:[#allocation2 + $0x1b7] sm:$0xff]  ;;  %v5160_v39 = vmul.f32 %v4875_v15, %v2704_v20 }
 0x1c1   : > { %1792 = vst [vmem:[#allocation2 + $0x200] sm:$0xff] %v1664_v34  ;;  %1872 = vst [vmem:[#allocation2 + $0x5f0] sm:$0xff] %v1744_v12  ;;  %v1665_v11 = vmax.f32 %v1271_v41, 0.0  ;;  %v1745_v26 = vmax.f32 %v1591_v58, 0.0  ;;  %v5163_v61 = vmul.f32 %v4875_v15, %v2705_v44  ;;  %v2323_v28 = vmul.f32 %v5155_v24, %v2286_v29  ;;  %v2289_v4 = vld [vmem:[#allocation2 + $0x1d7] sm:$0xff] }
 0x1c2   : > { %6048 = vst [vmem:[#allocation87_spill] sm:$0xff] %v5160_v39  ;;  %1790 = vst [vmem:[#allocation2 + $0x1e8] sm:$0xff] %v1662_v31  ;;  %v1663_v43 = vmax.f32 %v1263_v21, 0.0  ;;  %v1743_v10 = vmax.f32 %v1583_v52, 0.0  ;;  %v5167_v7 = vmul.f32 %v5155_v24, %v2288_v8  ;;  %v5170_v12 = vmul.f32 %v5155_v24, %v2289_v4  ;;  %v3849_v52 = vpop.f32.mrb[40].mxu0  ;;  %v3929_v8 = vpop.f32.mrb[40].mxu1 }
 0x1c3   : > { %6049 = vst [vmem:[#allocation88_spill] sm:$0xff] %v5163_v61  ;;  %1870 = vst [vmem:[#allocation2 + $0x5d8] sm:$0xff] %v1742_v9  ;;  %v2287_v2 = vld [vmem:[#allocation2 + $0x1bf] sm:$0xff]  ;;  %v5173_v58 = vmul.f32 %v5091_v60, %v1662_v31  ;;  %v5176_v41 = vmul.f32 %v5091_v60, %v1664_v34  ;;  %v5179_v9 = vmul.f32 %v5091_v60, %v1665_v11 }
 0x1c4   : > { %6050 = vst [vmem:[#allocation89_spill] sm:$0xff] %v5167_v7  ;;  %1793 = vst [vmem:[#allocation2 + $0x208] sm:$0xff] %v1665_v11  ;;  %v2324_v21 = vmul.f32 %v5155_v24, %v2287_v2  ;;  %v5185_v4 = vmul.f32 %v4763_v45, %v5095_v62  ;;  %v5189_v31 = vmul.f32 %v4763_v45, %v5122_v25  ;;  %v5194_v34 = vld [vmem:[%s5943_s2] ss:$0 sm:$0xff]  ;;  %v1595_v2 = vpop.f32.mrb[41].mxu1 }
 0x1c5   : > { %1873 = vst [vmem:[#allocation2 + $0x5f8] sm:$0xff] %v1745_v26  ;;  %6051 = vst [vmem:[#allocation90_spill] sm:$0xff] %v5170_v12  ;;  %v2355_v26 = vadd.f32 %v2323_v28, %v4817_v19  ;;  %v1284_v11 = vadd.f32 %v5194_v34, %v3849_v52  ;;  %v1604_v29 = vadd.f32 %v5194_v34, %v3929_v8  ;;  %v3930_v61 = vpop.f32.mrb[42].mxu1 }
 0x1c6   : > { %6052 = vst [vmem:[#allocation91_spill] sm:$0xff] %v5173_v58  ;;  %6053 = vst [vmem:[#allocation92_spill] sm:$0xff] %v5176_v41  ;;  %v5199_v19 = vmul.f32 %v5091_v60, %v1663_v43  ;;  %v5202_v62 = vmul.f32 %v4772_v0, %v2704_v20  ;;  %v1596_v25 = vadd.f32 %v5194_v34, %v1595_v2  ;;  %v1598_v20 = vpop.f32.mrb[43].mxu1 }
 0x1c7   : > { %6054 = vst [vmem:[#allocation93_spill] sm:$0xff] %v5179_v9  ;;  %1791 = vst [vmem:[#allocation2 + $0x1f0] sm:$0xff] %v1663_v43  ;;  %v2356_v39 = vadd.f32 %v2324_v21, %v4830_v27  ;;  %v5208_v52 = vmul.f32 %v4772_v0, %v2705_v44  ;;  %v1668_v8 = vmax.f32 %v1284_v11, 0.0  ;;  %v1607_v43 = vadd.f32 %v5194_v34, %v3930_v61  ;;  %v2605_v27 = vld [vmem:[#allocation2 + $0x5a7] sm:$0xff]  ;;  %v2606_v61 = vld [vmem:[#allocation2 + $0x5af] sm:$0xff] }
 0x1c8   : > { %1871 = vst [vmem:[#allocation2 + $0x5e0] sm:$0xff] %v1743_v10  ;;  %6055 = vst [vmem:[#allocation94_spill] sm:$0xff] %v5185_v4  ;;  %v1275_v10 = vpop.f32.mrb[41].mxu0  ;;  %v1746_v41 = vmax.f32 %v1596_v25, 0.0  ;;  %v1599_v2 = vadd.f32 %v5194_v34, %v1598_v20  ;;  %v5217_v11 = vadd.f32 %v5111_v48, %v2355_v26  ;;  %v2707_v48 = vld [vmem:[#allocation2 + $0x5b0] sm:$0xff] }
 0x1c9   : > { %6056 = vst [vmem:[#allocation95_spill] sm:$0xff] %v5189_v31  ;;  %6057 = vst [vmem:[#allocation96_spill] sm:$0xff] %v5199_v19  ;;  %v1276_v45 = vadd.f32 %v5194_v34, %v1275_v10  ;;  %v3850_v28 = vpop.f32.mrb[42].mxu0  ;;  %v1748_v31 = vmax.f32 %v1604_v29, 0.0  ;;  %v2292_v19 = vld [vmem:[#allocation2 + $0x1ff] sm:$0xff]  ;;  %v1749_v21 = vmax.f32 %v1607_v43, 0.0  ;;  %v5224_v25 = vadd.f32 %v5125_v55, %v2356_v39 }
 0x1ca   : > { %6058 = vst [vmem:[#allocation97_spill] sm:$0xff] %v5202_v62  ;;  %6059 = vst [vmem:[#allocation98_spill] sm:$0xff] %v5208_v52  ;;  %v1287_v4 = vadd.f32 %v5194_v34, %v3850_v28  ;;  %v1278_v9 = vpop.f32.mrb[43].mxu0  ;;  %v2290_v29 = vld [vmem:[#allocation2 + $0x1e7] sm:$0xff]  ;;  %v5220_v28 = vmul.f32 %v4927_v54, %v2605_v27  ;;  %v5239_v55 = vmul.f32 %v4927_v54, %v2606_v61 }
 0x1cb   : > { %v1666_v62 = vmax.f32 %v1276_v45, 0.0  ;;  %v5213_v10 = vadd.f32 %v5194_v34, %v1278_v9  ;;  %1796 = vst [vmem:[#allocation2 + $0x230] sm:$0xff] %v1668_v8  ;;  %1876 = vst [vmem:[#allocation2 + $0x620] sm:$0xff] %v1748_v31  ;;  %v1747_v45 = vmax.f32 %v1599_v2, 0.0  ;;  %v2293_v8 = vld [vmem:[#allocation2 + $0x207] sm:$0xff]  ;;  %v5230_v26 = vmul.f32 %v5155_v24, %v2290_v29  ;;  %v3853_v39 = vpop.f32.mrb[44].mxu0 }
 0x1cc   : > { %v1669_v44 = vmax.f32 %v1287_v4, 0.0  ;;  %6060 = vst [vmem:[#allocation99_spill] sm:$0xff] %v5220_v28  ;;  %1874 = vst [vmem:[#allocation2 + $0x608] sm:$0xff] %v1746_v41  ;;  %v5227_v4 = vmul.f32 %v5155_v24, %v2292_v19  ;;  %v2706_v31 = vld [vmem:[#allocation2 + $0x5a8] sm:$0xff]  ;;  %v5233_v43 = vmul.f32 %v5155_v24, %v2293_v8  ;;  %v3933_v19 = vpop.f32.mrb[44].mxu1  ;;  %v1291_v8 = vpop.f32.mrb[45].mxu0  ;;  %v2140_v28 = vmul.f32 %v4772_v0, %v2707_v48 }
 0x1cd   : > { %1794 = vst [vmem:[#allocation2 + $0x218] sm:$0xff] %v1666_v62  ;;  %v1667_v9 = vmax.f32 %v5213_v10, 0.0  ;;  %1877 = vst [vmem:[#allocation2 + $0x628] sm:$0xff] %v1749_v21  ;;  %v5236_v41 = vmul.f32 %v5091_v60, %v1666_v62  ;;  %v5242_v20 = vmul.f32 %v4875_v15, %v2706_v31  ;;  %v5245_v10 = vmul.f32 %v4875_v15, %v2707_v48  ;;  %v5247_v2 = vld [vmem:[#allocation8] ss:$0 sm:$0xff]  ;;  %v3854_v52 = vpop.f32.mrb[46].mxu0 }
 0x1ce   : > { %6061 = vst [vmem:[#allocation100_spill] sm:$0xff] %v5227_v4  ;;  %1797 = vst [vmem:[#allocation2 + $0x238] sm:$0xff] %v1669_v44  ;;  %v2038_v44 = vmul.f32 %v5247_v2, %v2605_v27  ;;  %v2039_v62 = vmul.f32 %v5247_v2, %v2606_v61  ;;  %v1300_v21 = vadd.f32 %v5194_v34, %v3853_v39 }
 0x1cf   : > { %6062 = vst [vmem:[#allocation101_spill] sm:$0xff] %v5230_v26  ;;  %6063 = vst [vmem:[#allocation102_spill] sm:$0xff] %v5233_v43  ;;  %v1620_v29 = vadd.f32 %v5194_v34, %v3933_v19  ;;  %v2291_v43 = vld [vmem:[#allocation2 + $0x1ef] sm:$0xff]  ;;  %v1303_v19 = vadd.f32 %v5194_v34, %v3854_v52 }
 0x1d0   : > { %6064 = vst [vmem:[#allocation103_spill] sm:$0xff] %v5236_v41  ;;  %6065 = vst [vmem:[#allocation104_spill] sm:$0xff] %v5239_v55  ;;  %v2139_v55 = vmul.f32 %v4772_v0, %v2706_v31  ;;  %v2070_v27 = vadd.f32 %v2038_v44, %v4812_v16  ;;  %v2071_v61 = vadd.f32 %v2039_v62, %v4823_v22  ;;  %v1672_v39 = vmax.f32 %v1300_v21, 0.0  ;;  %v1294_v31 = vpop.f32.mrb[47].mxu0  ;;  %v2607_v62 = vld [vmem:[#allocation2 + $0x5bf] sm:$0xff] }
 0x1d1   : > { %1795 = vst [vmem:[#allocation2 + $0x220] sm:$0xff] %v1667_v9  ;;  %1875 = vst [vmem:[#allocation2 + $0x610] sm:$0xff] %v1747_v45  ;;  %v1611_v45 = vpop.f32.mrb[45].mxu1  ;;  %v1752_v4 = vmax.f32 %v1620_v29, 0.0  ;;  %v1673_v16 = vmax.f32 %v1303_v19, 0.0  ;;  %v5264_v44 = vmul.f32 %v5155_v24, %v2291_v43 }
 0x1d2   : > { %6066 = vst [vmem:[#allocation105_spill] sm:$0xff] %v5242_v20  ;;  %6067 = vst [vmem:[#allocation106_spill] sm:$0xff] %v5245_v10  ;;  %v1292_v20 = vadd.f32 %v5194_v34, %v1291_v8  ;;  %v1612_v10 = vadd.f32 %v5194_v34, %v1611_v45  ;;  %v3934_v41 = vpop.f32.mrb[46].mxu1  ;;  %v1295_v8 = vadd.f32 %v5194_v34, %v1294_v31  ;;  %v2296_v26 = vld [vmem:[#allocation2 + $0x22f] sm:$0xff] }
 0x1d3   : > { %v1623_v58 = vadd.f32 %v5194_v34, %v3934_v41  ;;  %v1614_v12 = vpop.f32.mrb[47].mxu1  ;;  %v2397_v7 = vld [vmem:[#allocation2 + $0x230] sm:$0xff]  ;;  %1800 = vst [vmem:[#allocation2 + $0x260] sm:$0xff] %v1672_v39  ;;  %1880 = vst [vmem:[#allocation2 + $0x650] sm:$0xff] %v1752_v4  ;;  %v5267_v41 = vmul.f32 %v5091_v60, %v1667_v9  ;;  %v2171_v4 = vadd.f32 %v2139_v55, %v2070_v27  ;;  %v2708_v39 = vld [vmem:[#allocation2 + $0x5c0] sm:$0xff] }
 0x1d4   : > { %v1670_v0 = vmax.f32 %v1292_v20, 0.0  ;;  %v1750_v48 = vmax.f32 %v1612_v10, 0.0  ;;  %v1615_v45 = vadd.f32 %v5194_v34, %v1614_v12  ;;  %6068 = vst [vmem:[#allocation107_spill] sm:$0xff] %v5264_v44  ;;  %v2294_v52 = vld [vmem:[#allocation2 + $0x217] sm:$0xff]  ;;  %v1671_v20 = vmax.f32 %v1295_v8, 0.0  ;;  %1801 = vst [vmem:[#allocation2 + $0x268] sm:$0xff] %v1673_v16 }
 0x1d5   : > { %v1753_v22 = vmax.f32 %v1623_v58, 0.0  ;;  %6069 = vst [vmem:[#allocation108_spill] sm:$0xff] %v5267_v41  ;;  %v2297_v21 = vld [vmem:[#allocation2 + $0x237] sm:$0xff]  ;;  %v5270_v12 = vmul.f32 %v5155_v24, %v2296_v26  ;;  %v5273_v43 = vmul.f32 %v5155_v24, %v2294_v52  ;;  %v5279_v19 = vmul.f32 %v5091_v60, %v2397_v7  ;;  %v3857_v26 = vpop.f32.mrb[48].mxu0 }
 0x1d6   : > { %1798 = vst [vmem:[#allocation2 + $0x248] sm:$0xff] %v1670_v0  ;;  %1878 = vst [vmem:[#allocation2 + $0x638] sm:$0xff] %v1750_v48  ;;  %v1751_v10 = vmax.f32 %v1615_v45, 0.0  ;;  %v2398_v29 = vld [vmem:[#allocation2 + $0x238] sm:$0xff]  ;;  %v5276_v9 = vmul.f32 %v5155_v24, %v2297_v21  ;;  %v2172_v31 = vadd.f32 %v2140_v28, %v2071_v61  ;;  %v2608_v0 = vld [vmem:[#allocation2 + $0x5c7] sm:$0xff]  ;;  %v5288_v8 = vadd.f32 %v4982_v59, %v2171_v4  ;;  %v1307_v28 = vpop.f32.mrb[49].mxu0 }
 0x1d7   : > { %6070 = vst [vmem:[#allocation109_spill] sm:$0xff] %v5270_v12  ;;  %1881 = vst [vmem:[#allocation2 + $0x658] sm:$0xff] %v1753_v22  ;;  %v2709_v48 = vld [vmem:[#allocation2 + $0x5c8] sm:$0xff]  ;;  %v5285_v27 = vmul.f32 %v5091_v60, %v2398_v29  ;;  %v5291_v45 = vmul.f32 %v4927_v54, %v2607_v62  ;;  %v1316_v7 = vadd.f32 %v5194_v34, %v3857_v26  ;;  %v2205_v4 = vld [vmem:[#allocation2 + $0x110] sm:$0xff] }
 0x1d8   : > { %v2295_v58 = vld [vmem:[#allocation2 + $0x21f] sm:$0xff]  ;;  %6071 = vst [vmem:[#allocation110_spill] sm:$0xff] %v5273_v43  ;;  %6072 = vst [vmem:[#allocation111_spill] sm:$0xff] %v5276_v9  ;;  %v5295_v61 = vmul.f32 %v4927_v54, %v2608_v0  ;;  %v5298_v16 = vmul.f32 %v4875_v15, %v2708_v39  ;;  %v2040_v22 = vmul.f32 %v5247_v2, %v2607_v62  ;;  %v2609_v43 = vld [vmem:[#allocation2 + $0x5d7] sm:$0xff] }
 0x1d9   : > { %6073 = vst [vmem:[#allocation112_spill] sm:$0xff] %v5279_v19  ;;  %1799 = vst [vmem:[#allocation2 + $0x250] sm:$0xff] %v1671_v20  ;;  %v5282_v55 = vmul.f32 %v5155_v24, %v2295_v58  ;;  %v1308_v52 = vadd.f32 %v5194_v34, %v1307_v28  ;;  %v3858_v20 = vpop.f32.mrb[50].mxu0  ;;  %v2041_v59 = vmul.f32 %v5247_v2, %v2608_v0  ;;  %v2206_v58 = vld [vmem:[#allocation2 + $0x118] sm:$0xff]  ;;  %v1676_v26 = vmax.f32 %v1316_v7, 0.0 }
 0x1da   : > { %1879 = vst [vmem:[#allocation2 + $0x640] sm:$0xff] %v1751_v10  ;;  %6075 = vst [vmem:[#allocation114_spill] sm:$0xff] %v5285_v27  ;;  %v5303_v10 = vld [vmem:[#allocation8 + $0x2] ss:$0 sm:$0xff]  ;;  %v1319_v27 = vadd.f32 %v5194_v34, %v3858_v20  ;;  %v1310_v19 = vpop.f32.mrb[51].mxu0  ;;  %v5309_v9 = vadd.f32 %v4985_v42, %v2172_v31  ;;  %v2072_v62 = vadd.f32 %v2040_v22, %v4826_v23  ;;  %v2300_v12 = vld [vmem:[#allocation2 + $0x25f] sm:$0xff] }
 0x1db   : > { %6074 = vst [vmem:[#allocation113_spill] sm:$0xff] %v5282_v55  ;;  %v2141_v21 = vmul.f32 %v5303_v10, %v2708_v39  ;;  %v2142_v29 = vmul.f32 %v5303_v10, %v2709_v48  ;;  %v1674_v28 = vmax.f32 %v1308_v52, 0.0  ;;  %v1311_v0 = vadd.f32 %v5194_v34, %v1310_v19  ;;  %v2401_v41 = vld [vmem:[#allocation2 + $0x260] sm:$0xff]  ;;  %1804 = vst [vmem:[#allocation2 + $0x290] sm:$0xff] %v1676_v26  ;;  %v5317_v42 = vld [vmem:[#allocation8 + $0x4] ss:$0 sm:$0xff] }
 0x1dc   : > { %v5314_v39 = vmul.f32 %v4875_v15, %v2709_v48  ;;  %v2073_v55 = vadd.f32 %v2041_v59, %v4836_v30  ;;  %v1677_v7 = vmax.f32 %v1319_v27, 0.0  ;;  %v2242_v23 = vmul.f32 %v5317_v42, %v2205_v4  ;;  %v2710_v19 = vld [vmem:[#allocation2 + $0x5d8] sm:$0xff]  ;;  %v2301_v52 = vld [vmem:[#allocation2 + $0x267] sm:$0xff] }
 0x1dd   : > { %v2298_v20 = vld [vmem:[#allocation2 + $0x247] sm:$0xff]  ;;  %v2173_v51 = vadd.f32 %v2141_v21, %v2072_v62  ;;  %v2243_v31 = vmul.f32 %v5317_v42, %v2206_v58  ;;  %1802 = vst [vmem:[#allocation2 + $0x278] sm:$0xff] %v1674_v28  ;;  %v1675_v22 = vmax.f32 %v1311_v0, 0.0  ;;  %v5322_v48 = vmul.f32 %v5155_v24, %v2300_v12  ;;  %v2610_v26 = vld [vmem:[#allocation2 + $0x5df] sm:$0xff] }
 0x1de   : > { %v2399_v44 = vld [vmem:[#allocation2 + $0x248] sm:$0xff]  ;;  %v5325_v59 = vmul.f32 %v5091_v60, %v2401_v41  ;;  %v2174_v27 = vadd.f32 %v2142_v29, %v2073_v55  ;;  %1805 = vst [vmem:[#allocation2 + $0x298] sm:$0xff] %v1677_v7  ;;  %v5328_v62 = vmul.f32 %v5155_v24, %v2298_v20  ;;  %v5334_v28 = vmul.f32 %v5155_v24, %v2301_v52  ;;  %v2711_v0 = vld [vmem:[#allocation2 + $0x5e0] sm:$0xff]  ;;  %v3861_v41 = vpop.f32.mrb[52].mxu0 }
 0x1df   : > { %6076 = vst [vmem:[#allocation115_spill] sm:$0xff] %v5322_v48  ;;  %v2402_v30 = vld [vmem:[#allocation2 + $0x268] sm:$0xff]  ;;  %v5331_v58 = vmul.f32 %v5091_v60, %v2399_v44  ;;  %1803 = vst [vmem:[#allocation2 + $0x280] sm:$0xff] %v1675_v22  ;;  %v5345_v7 = vadd.f32 %v2242_v23, %v2173_v51  ;;  %v5348_v44 = vmul.f32 %v4927_v54, %v2609_v43  ;;  %v1323_v52 = vpop.f32.mrb[53].mxu0 }
 0x1e0   : > { %6077 = vst [vmem:[#allocation116_spill] sm:$0xff] %v5325_v59  ;;  %v2299_v21 = vld [vmem:[#allocation2 + $0x24f] sm:$0xff]  ;;  %6078 = vst [vmem:[#allocation117_spill] sm:$0xff] %v5328_v62  ;;  %v5337_v12 = vmul.f32 %v5091_v60, %v2402_v30  ;;  %v1332_v20 = vadd.f32 %v5194_v34, %v3861_v41  ;;  %v5351_v59 = vadd.f32 %v2243_v31, %v2174_v27 }
 0x1e1   : > { %v2400_v4 = vld [vmem:[#allocation2 + $0x250] sm:$0xff]  ;;  %6079 = vst [vmem:[#allocation118_spill] sm:$0xff] %v5331_v58  ;;  %6080 = vst [vmem:[#allocation119_spill] sm:$0xff] %v5334_v28  ;;  %v5340_v55 = vmul.f32 %v5155_v24, %v2299_v21  ;;  %v5354_v30 = vmul.f32 %v4927_v54, %v2610_v26  ;;  %v2042_v22 = vmul.f32 %v5247_v2, %v2609_v43  ;;  %v2207_v28 = vld [vmem:[#allocation2 + $0x128] sm:$0xff] }
 0x1e2   : > { %6081 = vst [vmem:[#allocation120_spill] sm:$0xff] %v5337_v12  ;;  %v5343_v29 = vmul.f32 %v5091_v60, %v2400_v4  ;;  %v1324_v21 = vadd.f32 %v5194_v34, %v1323_v52  ;;  %v3862_v12 = vpop.f32.mrb[54].mxu0  ;;  %v2043_v4 = vmul.f32 %v5247_v2, %v2610_v26  ;;  %v2143_v51 = vmul.f32 %v5303_v10, %v2710_v19  ;;  %v2208_v43 = vld [vmem:[#allocation2 + $0x130] sm:$0xff] }
 0x1e3   : > { %6082 = vst [vmem:[#allocation121_spill] sm:$0xff] %v5340_v55  ;;  %v2144_v23 = vmul.f32 %v5303_v10, %v2711_v0  ;;  %v1680_v48 = vmax.f32 %v1332_v20, 0.0  ;;  %v1335_v41 = vadd.f32 %v5194_v34, %v3862_v12  ;;  %v1326_v31 = vpop.f32.mrb[55].mxu0  ;;  %v5363_v27 = vmul.f32 %v4875_v15, %v2710_v19  ;;  %v2304_v55 = vld [vmem:[#allocation2 + $0x28f] sm:$0xff] }
 0x1e4   : > { %6083 = vst [vmem:[#allocation122_spill] sm:$0xff] %v5343_v29  ;;  %v2074_v29 = vadd.f32 %v2042_v22, %v4848_v38  ;;  %v1678_v58 = vmax.f32 %v1324_v21, 0.0  ;;  %v1327_v52 = vadd.f32 %v5194_v34, %v1326_v31  ;;  %v2405_v26 = vld [vmem:[#allocation2 + $0x290] sm:$0xff]  ;;  %v5368_v62 = vmul.f32 %v4875_v15, %v2711_v0  ;;  %v2403_v46 = vld [vmem:[#allocation2 + $0x278] sm:$0xff] }
 0x1e5   : > { %v2075_v37 = vadd.f32 %v2043_v4, %v4867_v6  ;;  %1808 = vst [vmem:[#allocation2 + $0x2c0] sm:$0xff] %v1680_v48  ;;  %v1681_v20 = vmax.f32 %v1335_v41, 0.0  ;;  %v2302_v12 = vld [vmem:[#allocation2 + $0x277] sm:$0xff]  ;;  %v2341_v19 = vmul.f32 %v5155_v24, %v2304_v55  ;;  %v2244_v38 = vmul.f32 %v5317_v42, %v2207_v28 }
 0x1e6   : > { %v2175_v49 = vadd.f32 %v2143_v51, %v2074_v29  ;;  %1806 = vst [vmem:[#allocation2 + $0x2a8] sm:$0xff] %v1678_v58  ;;  %v1679_v22 = vmax.f32 %v1327_v52, 0.0  ;;  %v2305_v21 = vld [vmem:[#allocation2 + $0x297] sm:$0xff]  ;;  %v2442_v36 = vmul.f32 %v5091_v60, %v2405_v26  ;;  %v2245_v15 = vmul.f32 %v5317_v42, %v2208_v43  ;;  %v2303_v6 = vld [vmem:[#allocation2 + $0x27f] sm:$0xff]  ;;  %v3865_v29 = vpop.f32.mrb[56].mxu0 }
 0x1e7   : > { %v2406_v31 = vld [vmem:[#allocation2 + $0x298] sm:$0xff]  ;;  %v2176_v57 = vadd.f32 %v2144_v23, %v2075_v37  ;;  %1809 = vst [vmem:[#allocation2 + $0x2c8] sm:$0xff] %v1681_v20  ;;  %v5376_v48 = vmul.f32 %v5155_v24, %v2302_v12  ;;  %v2404_v0 = vld [vmem:[#allocation2 + $0x280] sm:$0xff]  ;;  %v5379_v55 = vmul.f32 %v5091_v60, %v2403_v46  ;;  %v2342_v28 = vmul.f32 %v5155_v24, %v2305_v21  ;;  %v1339_v43 = vpop.f32.mrb[57].mxu0  ;;  %v2611_v20 = vld [vmem:[#allocation2 + $0x5ef] sm:$0xff] }
 0x1e8   : > { %v2373_v58 = vadd.f32 %v2341_v19, %v5288_v8  ;;  %1807 = vst [vmem:[#allocation2 + $0x2b0] sm:$0xff] %v1679_v22  ;;  %v5384_v4 = vmul.f32 %v5155_v24, %v2303_v6  ;;  %v5387_v37 = vmul.f32 %v5091_v60, %v2404_v0  ;;  %v2443_v51 = vmul.f32 %v5091_v60, %v2406_v31  ;;  %v2612_v8 = vld [vmem:[#allocation2 + $0x5f7] sm:$0xff]  ;;  %v3866_v22 = vpop.f32.mrb[58].mxu0 }
 0x1e9   : > { %6084 = vst [vmem:[#allocation123_spill] sm:$0xff] %v5379_v55  ;;  %v2276_v23 = vadd.f32 %v2244_v38, %v2175_v49  ;;  %v1348_v41 = vadd.f32 %v5194_v34, %v3865_v29  ;;  %v2374_v46 = vadd.f32 %v2342_v28, %v5309_v9  ;;  %v2277_v26 = vadd.f32 %v2245_v15, %v2176_v57  ;;  %v5392_v12 = vld [vmem:[#allocation2 + $0x5f0] sm:$0xff]  ;;  %v1342_v38 = vpop.f32.mrb[59].mxu0  ;;  %v5409_v0 = vld [vmem:[#allocation2 + $0x5f8] sm:$0xff] }
 0x1ea   : > { %6085 = vst [vmem:[#allocation124_spill] sm:$0xff] %v5384_v4  ;;  %6086 = vst [vmem:[#allocation125_spill] sm:$0xff] %v5387_v37  ;;  %v2474_v52 = vadd.f32 %v2442_v36, %v2373_v58  ;;  %v1340_v19 = vadd.f32 %v5194_v34, %v1339_v43  ;;  %v5396_v21 = vmul.f32 %v4927_v54, %v2611_v20  ;;  %v5401_v49 = vld [vmem:[#allocation8 + $0x8] ss:$0 sm:$0xff] }
 0x1eb   : > { %v5399_v31 = vmul.f32 %v4927_v54, %v2612_v8  ;;  %6087 = vst [vmem:[#allocation126_spill] sm:$0xff] %v5401_v49  ;;  %v5405_v9 = vmul.f32 %v5401_v49, %v5392_v12  ;;  %v1684_v36 = vmax.f32 %v1348_v41, 0.0  ;;  %v1351_v57 = vadd.f32 %v5194_v34, %v3866_v22 }
 0x1ec   : > { %v2475_v15 = vadd.f32 %v2443_v51, %v2374_v46  ;;  %v2575_v6 = vadd.f32 %v4793_v47, %v2474_v52  ;;  %v1682_v28 = vmax.f32 %v1340_v19, 0.0  ;;  %v1343_v58 = vadd.f32 %v5194_v34, %v1342_v38  ;;  %v2308_v54 = vld [vmem:[#allocation2 + $0x2bf] sm:$0xff] }
 0x1ed   : > { %v5414_v29 = vmul.f32 %v5401_v49, %v5409_v0  ;;  %v2044_v43 = vmul.f32 %v5247_v2, %v2611_v20  ;;  %1812 = vst [vmem:[#allocation2 + $0x2f0] sm:$0xff] %v1684_v36  ;;  %v1685_v41 = vmax.f32 %v1351_v57, 0.0  ;;  %v2306_v46 = vld [vmem:[#allocation2 + $0x2a7] sm:$0xff]  ;;  %v2345_v52 = vmul.f32 %v5155_v24, %v2308_v54 }
 0x1ee   : > { %v2576_v22 = vadd.f32 %v4815_v17, %v2475_v15  ;;  %v2676_v51 = vadd.f32 %v5291_v45, %v2575_v6  ;;  %v2407_v47 = vld [vmem:[#allocation2 + $0x2a8] sm:$0xff]  ;;  %v2409_v19 = vld [vmem:[#allocation2 + $0x2c0] sm:$0xff]  ;;  %1810 = vst [vmem:[#allocation2 + $0x2d8] sm:$0xff] %v1682_v28  ;;  %v1683_v38 = vmax.f32 %v1343_v58, 0.0  ;;  %v2343_v37 = vmul.f32 %v5155_v24, %v2306_v46  ;;  %v3869_v28 = vpop.f32.mrb[60].mxu0 }
 0x1ef   : > { %v2444_v49 = vmul.f32 %v5091_v60, %v2407_v47  ;;  %v2309_v55 = vld [vmem:[#allocation2 + $0x2c7] sm:$0xff]  ;;  %v2045_v20 = vmul.f32 %v5247_v2, %v2612_v8  ;;  %1813 = vst [vmem:[#allocation2 + $0x2f8] sm:$0xff] %v1685_v41  ;;  %v2307_v36 = vld [vmem:[#allocation2 + $0x2af] sm:$0xff]  ;;  %v2377_v6 = vadd.f32 %v2345_v52, %v2276_v23  ;;  %v5429_v58 = vld [vmem:[%s5945_s4] ss:$0 sm:$0xff]  ;;  %v1364_v8 = vadd.f32 %v5194_v34, %v3869_v28  ;;  %v1355_v41 = vpop.f32.mrb[61].mxu0 }
 0x1f0   : > { %v2410_v4 = vld [vmem:[#allocation2 + $0x2c8] sm:$0xff]  ;;  %v2677_v17 = vadd.f32 %v5295_v61, %v2576_v22  ;;  %v2777_v45 = vadd.f32 %v5298_v16, %v2676_v51  ;;  %v2408_v57 = vld [vmem:[#allocation2 + $0x2b0] sm:$0xff]  ;;  %v2346_v15 = vmul.f32 %v5155_v24, %v2309_v55  ;;  %1811 = vst [vmem:[#allocation2 + $0x2e0] sm:$0xff] %v1683_v38  ;;  %v2344_v54 = vmul.f32 %v5155_v24, %v2307_v36  ;;  %v3870_v46 = vpop.f32.mrb[62].mxu0 }
 0x1f1   : > { %v2375_v2 = vadd.f32 %v2343_v37, %v5345_v7  ;;  %v2445_v61 = vmul.f32 %v5091_v60, %v2408_v57  ;;  %v2446_v16 = vmul.f32 %v5091_v60, %v2409_v19  ;;  %v2447_v22 = vmul.f32 %v5091_v60, %v2410_v4  ;;  %v1358_v38 = vpop.f32.mrb[63].mxu0 }
 0x1f2   : > { %v2778_v55 = vadd.f32 %v5314_v39, %v2677_v17  ;;  %v2378_v23 = vadd.f32 %v2346_v15, %v2277_v26  ;;  %v1356_v51 = vadd.f32 %v5194_v34, %v1355_v41  ;;  %v2376_v47 = vadd.f32 %v2344_v54, %v5351_v59 }
 0x1f3   : > { %v2476_v24 = vadd.f32 %v2444_v49, %v2375_v2  ;;  %v2478_v52 = vadd.f32 %v2446_v16, %v2377_v6  ;;  %v1688_v7 = vmax.f32 %v1364_v8, 0.0  ;;  %v1367_v37 = vadd.f32 %v5194_v34, %v3870_v46  ;;  %v2209_v16 = vld [vmem:[#allocation2 + $0x140] sm:$0xff] }
 0x1f4   : > { %v2816_v19 = vadd.f32 %v5429_v58, %v2777_v45  ;;  %v2817_v36 = vadd.f32 %v5429_v58, %v2778_v55  ;;  %v1686_v57 = vmax.f32 %v1356_v51, 0.0  ;;  %v1359_v39 = vadd.f32 %v5194_v34, %v1358_v38  ;;  %v5488_v38 = vld [vmem:[#allocation8 + $0x7] ss:$0 sm:$0xff] }
 0x1f5   : > { %v2477_v26 = vadd.f32 %v2445_v61, %v2376_v47  ;;  %v2577_v60 = vadd.f32 %v4870_v13, %v2476_v24  ;;  %1816 = vst [vmem:[#allocation2 + $0x320] sm:$0xff] %v1688_v7  ;;  %v1689_v4 = vmax.f32 %v1367_v37, 0.0  ;;  %v2479_v59 = vadd.f32 %v2447_v22, %v2378_v23  ;;  %v5481_v24 = vld [vmem:[#allocation8 + $0x1] ss:$0 sm:$0xff] }
 0x1f6   : > { %v2849_v17 = vmax.f32 %v2817_v36, 0.0  ;;  %v2579_v49 = vadd.f32 %v4934_v63, %v2478_v52  ;;  %1814 = vst [vmem:[#allocation2 + $0x308] sm:$0xff] %v1686_v57  ;;  %v1687_v15 = vmax.f32 %v1359_v39, 0.0  ;;  %v2076_v28 = vadd.f32 %v2044_v43, %v4840_v32  ;;  %v3873_v63 = vpop.f32.mrb[64].mxu0 }
 0x1f7   : > { %v2578_v6 = vadd.f32 %v4873_v14, %v2477_v26  ;;  %v2678_v45 = vadd.f32 %v5348_v44, %v2577_v60  ;;  %1817 = vst [vmem:[#allocation2 + $0x328] sm:$0xff] %v1689_v4  ;;  %v2848_v54 = vmax.f32 %v2816_v19, 0.0  ;;  %v2580_v2 = vadd.f32 %v4947_v3, %v2479_v59  ;;  %v1371_v3 = vpop.f32.mrb[65].mxu0 }
 0x1f8   : > { %v2680_v13 = vadd.f32 %v5396_v21, %v2579_v49  ;;  %v2145_v61 = vmul.f32 %v5303_v10, %v5392_v12  ;;  %1815 = vst [vmem:[#allocation2 + $0x310] sm:$0xff] %v1687_v15  ;;  %v2077_v44 = vadd.f32 %v2045_v20, %v4857_v50  ;;  %v2146_v32 = vmul.f32 %v5303_v10, %v5409_v0  ;;  %v3874_v23 = vpop.f32.mrb[66].mxu0 }
 0x1f9   : > { %v2679_v8 = vadd.f32 %v5354_v30, %v2578_v6  ;;  %v2779_v14 = vadd.f32 %v5363_v27, %v2678_v45  ;;  %v1380_v43 = vadd.f32 %v5194_v34, %v3873_v63  ;;  %v5459_v41 = vpack.c.bf16 %v2849_v17, %v2848_v54  ;;  %v1374_v20 = vpop.f32.mrb[67].mxu0 }
 0x1fa   : > { %v2681_v21 = vadd.f32 %v5399_v31, %v2580_v2  ;;  %v2781_v12 = vadd.f32 %v5405_v9, %v2680_v13  ;;  %v1372_v55 = vadd.f32 %v5194_v34, %v1371_v3  ;;  %v5469_v50 = vmul.f32 %v5317_v42, %v2209_v16  ;;  %v3877_v17 = vpop.f32.mrb[68].mxu0 }
 0x1fb   : > { %v2780_v30 = vadd.f32 %v5368_v62, %v2679_v8  ;;  %v5466_v27 = vadd.f32 %v5429_v58, %v2779_v14  ;;  %v1692_v10 = vmax.f32 %v1380_v43, 0.0  ;;  %v1383_v0 = vadd.f32 %v5194_v34, %v3874_v23  ;;  %v6088_v43 = vld [vmem:[#allocation40_spill] sm:$0xff] }
 0x1fc   : > { %v2782_v22 = vadd.f32 %v5414_v29, %v2681_v21  ;;  %v5473_v31 = vadd.f32 %v2145_v61, %v2076_v28  ;;  %v1690_v9 = vmax.f32 %v1372_v55, 0.0  ;;  %v1375_v51 = vadd.f32 %v5194_v34, %v1374_v20  ;;  %v1387_v28 = vpop.f32.mrb[69].mxu0  ;;  %v6091_v55 = vld [vmem:[#allocation17_spill] sm:$0xff]  ;;  %v6093_v20 = vld [vmem:[#allocation35_spill] sm:$0xff] }
 0x1fd   : > { %v5477_v46 = vadd.f32 %v5429_v58, %v2780_v30  ;;  %v5479_v62 = vadd.f32 %v2146_v32, %v2077_v44  ;;  %v1693_v47 = vmax.f32 %v1383_v0, 0.0  ;;  %v1923_v52 = vmul.f32 %v5481_v24, %v1692_v10  ;;  %v3878_v61 = vpop.f32.mrb[70].mxu0  ;;  %v6092_v30 = vld [vmem:[#allocation22_spill] sm:$0xff] }
 0x1fe   : > { %v2850_v7 = vmax.f32 %v5466_v27, 0.0  ;;  %v5486_v37 = vadd.f32 %v5429_v58, %v2781_v12  ;;  %v1691_v29 = vmax.f32 %v1375_v51, 0.0  ;;  %v2525_v19 = vmul.f32 %v5488_v38, %v1690_v9  ;;  %v1390_v14 = vpop.f32.mrb[71].mxu0  ;;  %v6095_v51 = vld [vmem:[#allocation18_spill] sm:$0xff] }
 0x1ff   : > { %v1921_v36 = vmul.f32 %v5481_v24, %v1690_v9  ;;  %v2527_v57 = vmul.f32 %v5488_v38, %v1692_v10  ;;  %v1924_v39 = vmul.f32 %v5481_v24, %v1693_v47  ;;  %v2056_v26 = vadd.f32 %v4943_v5, %v1923_v52  ;;  %v6096_v52 = vld [vmem:[#allocation89_spill] sm:$0xff] }
 0x200   : > { %v2851_v60 = vmax.f32 %v5477_v46, 0.0  ;;  %v5497_v4 = vadd.f32 %v5429_v58, %v2782_v22  ;;  %v2526_v59 = vmul.f32 %v5488_v38, %v1691_v29  ;;  %v2557_v49 = vadd.f32 %v2525_v19, %v5217_v11  ;;  %v6094_v22 = vld [vmem:[#allocation24_spill] sm:$0xff]  ;;  %v6097_v19 = vld [vmem:[#allocation101_spill] sm:$0xff]  ;;  %v2616_v46 = vld [vmem:[#allocation2 + $0x627] sm:$0xff] }
 0x201   : > { %v1922_v15 = vmul.f32 %v5481_v24, %v1691_v29  ;;  %v2054_v6 = vadd.f32 %v4950_v35, %v1921_v36  ;;  %v5504_v45 = vadd.f32 %v5194_v34, %v3877_v17  ;;  %v2528_v5 = vmul.f32 %v5488_v38, %v1693_v47 }
 0x202   : > { %v2057_v54 = vadd.f32 %v4956_v33, %v1924_v39  ;;  %v2157_v2 = vadd.f32 %v4959_v18, %v2056_v26  ;;  %v1388_v13 = vadd.f32 %v5194_v34, %v1387_v28  ;;  %v2558_v16 = vadd.f32 %v2526_v59, %v5224_v25  ;;  %v6089_v25 = vld [vmem:[#allocation29_spill] sm:$0xff]  ;;  %v3881_v26 = vpop.f32.mrb[72].mxu0 }
 0x203   : > { %v2658_v11 = vadd.f32 %v4937_v1, %v2557_v49  ;;  %v2055_v63 = vadd.f32 %v4972_v56, %v1922_v15  ;;  %v1696_v35 = vmax.f32 %v5504_v45, 0.0  ;;  %v5515_v8 = vadd.f32 %v5194_v34, %v3878_v61  ;;  %v6090_v56 = vld [vmem:[#allocation36_spill] sm:$0xff]  ;;  %v6098_v49 = vld [vmem:[#allocation107_spill] sm:$0xff] }
 0x204   : > { %v2155_v44 = vadd.f32 %v4893_v40, %v2054_v6  ;;  %v2158_v33 = vadd.f32 %v4907_v53, %v2057_v54  ;;  %v1694_v18 = vmax.f32 %v1388_v13, 0.0  ;;  %v1391_v32 = vadd.f32 %v5194_v34, %v1390_v14  ;;  %v1403_v54 = vpop.f32.mrb[73].mxu0  ;;  %v6100_v61 = vld [vmem:[#allocation75_spill] sm:$0xff] }
 0x205   : > { %v2659_v3 = vadd.f32 %v6088_v43, %v2558_v16  ;;  %v2759_v21 = vadd.f32 %v6089_v25, %v2658_v11  ;;  %v1697_v1 = vmax.f32 %v5515_v8, 0.0  ;;  %v2156_v12 = vadd.f32 %v6090_v56, %v2055_v63  ;;  %v6101_v11 = vld [vmem:[#allocation91_spill] sm:$0xff] }
 0x206   : > { %v2256_v23 = vadd.f32 %v6091_v55, %v2155_v44  ;;  %v2258_v10 = vadd.f32 %v6092_v30, %v2157_v2  ;;  %v1695_v0 = vmax.f32 %v1391_v32, 0.0  ;;  %v2259_v9 = vadd.f32 %v6094_v22, %v2158_v33  ;;  %v6099_v2 = vld [vmem:[#allocation90_spill] sm:$0xff]  ;;  %v3882_v44 = vpop.f32.mrb[74].mxu0  ;;  %v6102_v32 = vld [vmem:[#allocation96_spill] sm:$0xff] }
 0x207   : > { %v2760_v40 = vadd.f32 %v6093_v20, %v2659_v3  ;;  %v2798_v53 = vadd.f32 %v5429_v58, %v2759_v21  ;;  %v2257_v47 = vadd.f32 %v6095_v51, %v2156_v12  ;;  %v2529_v39 = vmul.f32 %v5488_v38, %v1694_v18  ;;  %v1406_v56 = vpop.f32.mrb[75].mxu0  ;;  %v6103_v12 = vld [vmem:[#allocation77_spill] sm:$0xff] }
 0x208   : > { %v2357_v29 = vadd.f32 %v6096_v52, %v2256_v23  ;;  %v2359_v36 = vadd.f32 %v6097_v19, %v2258_v10  ;;  %v2360_v15 = vadd.f32 %v6098_v49, %v2259_v9  ;;  %v2530_v6 = vmul.f32 %v5488_v38, %v1695_v0  ;;  %v6104_v9 = vld [vmem:[#allocation38_spill] sm:$0xff]  ;;  %v6105_v52 = vld [vmem:[#allocation45_spill] sm:$0xff] }
 0x209   : > { %v2799_v17 = vadd.f32 %v5429_v58, %v2760_v40  ;;  %v2830_v59 = vmax.f32 %v2798_v53, 0.0  ;;  %v5537_v28 = vadd.f32 %v5194_v34, %v3881_v26  ;;  %v2358_v13 = vadd.f32 %v6099_v2, %v2257_v47  ;;  %v6107_v26 = vld [vmem:[#allocation39_spill] sm:$0xff]  ;;  %v6108_v49 = vld [vmem:[#allocation30_spill] sm:$0xff] }
 0x20a   : > { %v2458_v16 = vadd.f32 %v6100_v61, %v2357_v29  ;;  %v2460_v63 = vadd.f32 %v6101_v11, %v2359_v36  ;;  %v5543_v14 = vadd.f32 %v5194_v34, %v1403_v54  ;;  %v2461_v43 = vadd.f32 %v6102_v32, %v2360_v15  ;;  %v6106_v36 = vld [vmem:[#allocation47_spill] sm:$0xff]  ;;  %v3885_v54 = vpop.f32.mrb[76].mxu0 }
 0x20b   : > { %v2831_v33 = vmax.f32 %v2799_v17, 0.0  ;;  %v1925_v3 = vmul.f32 %v5481_v24, %v1694_v18  ;;  %v1700_v25 = vmax.f32 %v5537_v28, 0.0  ;;  %v5549_v21 = vadd.f32 %v5194_v34, %v3882_v44  ;;  %v6113_v44 = vld [vmem:[#allocation32_spill] sm:$0xff] }
 0x20c   : > { %v2459_v55 = vadd.f32 %v6103_v12, %v2358_v13  ;;  %v2559_v23 = vadd.f32 %v2527_v57, %v2458_v16  ;;  %v1698_v30 = vmax.f32 %v5543_v14, 0.0  ;;  %v1407_v10 = vadd.f32 %v5194_v34, %v1406_v56  ;;  %v6111_v13 = vld [vmem:[#allocation53_spill] sm:$0xff]  ;;  %v6112_v16 = vld [vmem:[#allocation48_spill] sm:$0xff]  ;;  %v1419_v14 = vpop.f32.mrb[77].mxu0 }
 0x20d   : > { %v2862_v20 = vpack.c.bf16 %v2831_v33, %v2830_v59  ;;  %v2561_v40 = vadd.f32 %v2529_v39, %v2460_v63  ;;  %v1701_v53 = vmax.f32 %v5549_v21, 0.0  ;;  %v2562_v51 = vadd.f32 %v2530_v6, %v2461_v43  ;;  %v6109_v59 = vld [vmem:[#allocation49_spill] sm:$0xff]  ;;  %v6110_v6 = vld [vmem:[#allocation46_spill] sm:$0xff]  ;;  %v3886_v12 = vpop.f32.mrb[78].mxu0 }
 0x20e   : > { %v2560_v22 = vadd.f32 %v2528_v5, %v2459_v55  ;;  %v2660_v18 = vadd.f32 %v6104_v9, %v2559_v23  ;;  %v1699_v47 = vmax.f32 %v1407_v10, 0.0  ;;  %v1926_v19 = vmul.f32 %v5481_v24, %v1695_v0  ;;  %v6114_v43 = vld [vmem:[#allocation50_spill] sm:$0xff] }
 0x20f   : > { %3951 = vmatprep.mubr.bf16.mxu1 %v2862_v20  ;;  %v2662_v29 = vadd.f32 %v6105_v52, %v2561_v40  ;;  %v2058_v57 = vadd.f32 %v6106_v36, %v1925_v3  ;;  %v2663_v39 = vadd.f32 %v6109_v59, %v2562_v51  ;;  %v2531_v5 = vmul.f32 %v5488_v38, %v1696_v35  ;;  %v6115_v23 = vld [vmem:[#allocation54_spill] sm:$0xff]  ;;  %v6116_v20 = vld [vmem:[#allocation21_spill] sm:$0xff]  ;;  %v6118_v59 = vld [vmem:[#allocation100_spill] sm:$0xff] }
 0x210   : > { %v2661_v17 = vadd.f32 %v6107_v26, %v2560_v22  ;;  %v2761_v15 = vadd.f32 %v6108_v49, %v2660_v18  ;;  %v2059_v61 = vadd.f32 %v6111_v13, %v1926_v19  ;;  %v2532_v0 = vmul.f32 %v5488_v38, %v1697_v1  ;;  %v1422_v18 = vpop.f32.mrb[79].mxu0  ;;  %v6117_v49 = vld [vmem:[#allocation23_spill] sm:$0xff] }
 0x211   : > { %v2763_v2 = vadd.f32 %v6110_v6, %v2662_v29  ;;  %v2159_v11 = vadd.f32 %v6112_v16, %v2058_v57  ;;  %v5572_v63 = vadd.f32 %v5194_v34, %v3885_v54  ;;  %v2764_v3 = vadd.f32 %v6114_v43, %v2663_v39 }
 0x212   : > { %v2762_v33 = vadd.f32 %v6113_v44, %v2661_v17  ;;  %v2800_v32 = vadd.f32 %v5429_v58, %v2761_v15  ;;  %v5578_v56 = vadd.f32 %v5194_v34, %v1419_v14  ;;  %v2160_v10 = vadd.f32 %v6115_v23, %v2059_v61  ;;  %v6119_v61 = vld [vmem:[#allocation102_spill] sm:$0xff] }
 0x213   : > { %v2802_v55 = vadd.f32 %v5429_v58, %v2763_v2  ;;  %v2260_v40 = vadd.f32 %v6116_v20, %v2159_v11  ;;  %v1704_v22 = vmax.f32 %v5572_v63, 0.0  ;;  %v5585_v9 = vadd.f32 %v5194_v34, %v3886_v12  ;;  %v6120_v11 = vld [vmem:[#allocation92_spill] sm:$0xff] }
 0x214   : > { %v2801_v51 = vadd.f32 %v5429_v58, %v2762_v33  ;;  %v2832_v52 = vmax.f32 %v2800_v32, 0.0  ;;  %v1702_v29 = vmax.f32 %v5578_v56, 0.0  ;;  %v5590_v19 = vadd.f32 %v5194_v34, %v1422_v18  ;;  %v6121_v32 = vld [vmem:[#allocation55_spill] sm:$0xff] }
 0x215   : > { %v2803_v36 = vadd.f32 %v5429_v58, %v2764_v3  ;;  %v2834_v57 = vmax.f32 %v2802_v55, 0.0  ;;  %v1705_v26 = vmax.f32 %v5585_v9, 0.0  ;;  %v2261_v15 = vadd.f32 %v6117_v49, %v2160_v10  ;;  %v6122_v3 = vld [vmem:[#allocation56_spill] sm:$0xff]  ;;  %v6124_v10 = vld [vmem:[#allocation57_spill] sm:$0xff] }
 0x216   : > { %v2833_v17 = vmax.f32 %v2801_v51, 0.0  ;;  %v2361_v39 = vadd.f32 %v6118_v59, %v2260_v40  ;;  %v1703_v54 = vmax.f32 %v5590_v19, 0.0  ;;  %v1927_v2 = vmul.f32 %v5481_v24, %v1696_v35  ;;  %v6123_v35 = vld [vmem:[#allocation93_spill] sm:$0xff]  ;;  %v6125_v40 = vld [vmem:[#allocation58_spill] sm:$0xff] }
 0x217   : > { %v2835_v6 = vmax.f32 %v2803_v36, 0.0  ;;  %v1928_v34 = vmul.f32 %v5481_v24, %v1697_v1  ;;  %v2362_v16 = vadd.f32 %v6119_v61, %v2261_v15  ;;  %v2533_v44 = vmul.f32 %v5488_v38, %v1698_v30  ;;  %v6128_v49 = vld [vmem:[#allocation69_spill] sm:$0xff]  ;;  %v6132_v61 = vld [vmem:[#allocation44_spill] sm:$0xff] }
 0x218   : > { %v2863_v13 = vpack.c.bf16 %v2833_v17, %v2832_v52  ;;  %v2462_v14 = vadd.f32 %v6120_v11, %v2361_v39  ;;  %v2060_v43 = vadd.f32 %v6121_v32, %v1927_v2  ;;  %v2534_v45 = vmul.f32 %v5488_v38, %v1699_v47  ;;  %v6127_v17 = vld [vmem:[#allocation63_spill] sm:$0xff]  ;;  %v6129_v15 = vld [vmem:[#allocation25_spill] sm:$0xff]  ;;  %v6130_v39 = vld [vmem:[#allocation26_spill] sm:$0xff] }
 0x219   : > { %v2864_v33 = vpack.c.bf16 %v2835_v6, %v2834_v57  ;;  %v2061_v12 = vadd.f32 %v6122_v3, %v1928_v34  ;;  %v2463_v55 = vadd.f32 %v6123_v35, %v2362_v16  ;;  %v1929_v1 = vmul.f32 %v5481_v24, %v1698_v30  ;;  %v6126_v57 = vld [vmem:[#allocation43_spill] sm:$0xff]  ;;  %v6133_v11 = vld [vmem:[#allocation64_spill] sm:$0xff] }
 0x21a   : > { %3952 = vmatmul.mubr.bf16.vlgmr.msra.gmra.mrb[48].mxu1 %v2863_v13  ;;  %v2563_v8 = vadd.f32 %v2531_v5, %v2462_v14  ;;  %v1930_v23 = vmul.f32 %v5481_v24, %v1699_v47  ;;  %v2161_v20 = vadd.f32 %v6124_v10, %v2060_v43  ;;  %v2535_v51 = vmul.f32 %v5488_v38, %v1700_v25  ;;  %v6131_v13 = vld [vmem:[#allocation51_spill] sm:$0xff]  ;;  %v6135_v43 = vld [vmem:[#allocation110_spill] sm:$0xff] }
 0x21b   : > { %3955 = vmatprep.mubr.bf16.mxu1 %v2864_v33  ;;  %v2162_v18 = vadd.f32 %v6125_v40, %v2061_v12  ;;  %v2536_v52 = vmul.f32 %v5488_v38, %v1701_v53  ;;  %v2564_v36 = vadd.f32 %v2532_v0, %v2463_v55  ;;  %v2062_v30 = vadd.f32 %v6127_v17, %v1929_v1  ;;  %v6134_v33 = vld [vmem:[#allocation70_spill] sm:$0xff]  ;;  %v6136_v12 = vld [vmem:[#allocation113_spill] sm:$0xff]  ;;  %v6137_v55 = vld [vmem:[#allocation71_spill] sm:$0xff] }
 0x21c   : > { %v2664_v5 = vadd.f32 %v6126_v57, %v2563_v8  ;;  %v2063_v47 = vadd.f32 %v6128_v49, %v1930_v23  ;;  %v2262_v59 = vadd.f32 %v6129_v15, %v2161_v20  ;;  %v1931_v2 = vmul.f32 %v5481_v24, %v1700_v25  ;;  %v6138_v8 = vld [vmem:[#allocation72_spill] sm:$0xff]  ;;  %v6140_v23 = vld [vmem:[#allocation27_spill] sm:$0xff]  ;;  %v6144_v17 = vld [vmem:[#allocation73_spill] sm:$0xff] }
 0x21d   : > { %v2263_v6 = vadd.f32 %v6130_v39, %v2162_v18  ;;  %v1932_v34 = vmul.f32 %v5481_v24, %v1701_v53  ;;  %v2665_v0 = vadd.f32 %v6131_v13, %v2564_v36  ;;  %v2163_v14 = vadd.f32 %v6133_v11, %v2062_v30  ;;  %v6139_v1 = vld [vmem:[#allocation52_spill] sm:$0xff]  ;;  %v6142_v18 = vld [vmem:[#allocation103_spill] sm:$0xff]  ;;  %v6145_v49 = vld [vmem:[#allocation74_spill] sm:$0xff] }
 0x21e   : > { %v2765_v16 = vadd.f32 %v6132_v61, %v2664_v5  ;;  %v2164_v32 = vadd.f32 %v6134_v33, %v2063_v47  ;;  %v2363_v3 = vadd.f32 %v6135_v43, %v2262_v59  ;;  %v2064_v28 = vadd.f32 %v6137_v55, %v1931_v2  ;;  %v6141_v20 = vld [vmem:[#allocation28_spill] sm:$0xff]  ;;  %v6146_v39 = vld [vmem:[#allocation109_spill] sm:$0xff]  ;;  %v6147_v2 = vld [vmem:[#allocation111_spill] sm:$0xff] }
 0x21f   : > { %v2364_v35 = vadd.f32 %v6136_v12, %v2263_v6  ;;  %v2065_v25 = vadd.f32 %v6138_v8, %v1932_v34  ;;  %v2766_v21 = vadd.f32 %v6139_v1, %v2665_v0  ;;  %v2264_v10 = vadd.f32 %v6140_v23, %v2163_v14  ;;  %v6143_v57 = vld [vmem:[#allocation108_spill] sm:$0xff]  ;;  %v6148_v61 = vld [vmem:[#allocation33_spill] sm:$0xff] }
 0x220   : > { %v2804_v53 = vadd.f32 %v5429_v58, %v2765_v16  ;;  %v2265_v40 = vadd.f32 %v6141_v20, %v2164_v32  ;;  %v2464_v36 = vadd.f32 %v6142_v18, %v2363_v3  ;;  %v2165_v30 = vadd.f32 %v6144_v17, %v2064_v28  ;;  %v6149_v11 = vld [vmem:[#allocation37_spill] sm:$0xff]  ;;  %v6150_v32 = vld [vmem:[#allocation112_spill] sm:$0xff]  ;;  %v6151_v3 = vld [vmem:[#allocation114_spill] sm:$0xff] }
 0x221   : > { %v2465_v5 = vadd.f32 %v6143_v57, %v2364_v35  ;;  %v2166_v47 = vadd.f32 %v6145_v49, %v2065_v25  ;;  %v2805_v15 = vadd.f32 %v5429_v58, %v2766_v21  ;;  %v2365_v6 = vadd.f32 %v6146_v39, %v2264_v10  ;;  %v6152_v55 = vld [vmem:[#allocation61_spill] sm:$0xff]  ;;  %v6161_v39 = vld [vmem:[#allocation67_spill] sm:$0xff] }
 0x222   : > { %v2836_v59 = vmax.f32 %v2804_v53, 0.0  ;;  %v2366_v34 = vadd.f32 %v6147_v2, %v2265_v40  ;;  %v2565_v13 = vadd.f32 %v2533_v44, %v2464_v36  ;;  %v2266_v16 = vadd.f32 %v6148_v61, %v2165_v30  ;;  %v6153_v8 = vld [vmem:[#allocation65_spill] sm:$0xff]  ;;  %v6156_v40 = vld [vmem:[#allocation62_spill] sm:$0xff] }
 0x223   : > { %v2566_v0 = vadd.f32 %v2534_v45, %v2465_v5  ;;  %v2267_v14 = vadd.f32 %v6149_v11, %v2166_v47  ;;  %v2837_v33 = vmax.f32 %v2805_v15, 0.0  ;;  %v2466_v43 = vadd.f32 %v6150_v32, %v2365_v6  ;;  %v6154_v1 = vld [vmem:[#allocation117_spill] sm:$0xff]  ;;  %v6157_v36 = vld [vmem:[#allocation66_spill] sm:$0xff]  ;;  %v6160_v47 = vld [vmem:[#allocation59_spill] sm:$0xff] }
 0x224   : > { %v2467_v12 = vadd.f32 %v6151_v3, %v2366_v34  ;;  %v2537_v35 = vmul.f32 %v5488_v38, %v1702_v29  ;;  %v2666_v28 = vadd.f32 %v6152_v55, %v2565_v13  ;;  %v2367_v44 = vadd.f32 %v6154_v1, %v2266_v16  ;;  %v6155_v45 = vld [vmem:[#allocation121_spill] sm:$0xff]  ;;  %v6158_v5 = vld [vmem:[#allocation118_spill] sm:$0xff]  ;;  %v6163_v16 = vld [vmem:[#allocation68_spill] sm:$0xff] }
 0x225   : > { %v2667_v25 = vadd.f32 %v6153_v8, %v2566_v0  ;;  %v2368_v21 = vadd.f32 %v6155_v45, %v2267_v14  ;;  %v2865_v53 = vpack.c.bf16 %v2837_v33, %v2836_v59  ;;  %v2567_v23 = vadd.f32 %v2535_v51, %v2466_v43  ;;  %v6159_v30 = vld [vmem:[#allocation122_spill] sm:$0xff]  ;;  %v6162_v0 = vld [vmem:[#allocation60_spill] sm:$0xff]  ;;  %v6164_v14 = vld [vmem:[#allocation81_spill] sm:$0xff] }
 0x226   : > { %v2568_v10 = vadd.f32 %v2536_v52, %v2467_v12  ;;  %v2538_v20 = vmul.f32 %v5488_v38, %v1703_v54  ;;  %v2767_v18 = vadd.f32 %v6156_v40, %v2666_v28  ;;  %v2468_v17 = vadd.f32 %v6158_v5, %v2367_v44  ;;  %v6165_v32 = vld [vmem:[#allocation84_spill] sm:$0xff]  ;;  %v6166_v3 = vld [vmem:[#allocation78_spill] sm:$0xff]  ;;  %v6170_v45 = vld [vmem:[#allocation79_spill] sm:$0xff] }
 0x227   : > { %v2768_v57 = vadd.f32 %v6157_v36, %v2667_v25  ;;  %v2469_v49 = vadd.f32 %v6159_v30, %v2368_v21  ;;  %3956 = vmatmul.mubr.bf16.gmra.mrb[52].mxu1 %v2865_v53  ;;  %v2668_v15 = vadd.f32 %v6160_v47, %v2567_v23  ;;  %v1933_v51 = vmul.f32 %v5481_v24, %v1702_v29  ;;  %v6167_v12 = vld [vmem:[#allocation80_spill] sm:$0xff]  ;;  %v6169_v25 = vld [vmem:[#allocation85_spill] sm:$0xff]  ;;  %v6171_v53 = vld [vmem:[#allocation83_spill] sm:$0xff] }
 0x228   : > { %v2669_v6 = vadd.f32 %v6161_v39, %v2568_v10  ;;  %v1934_v52 = vmul.f32 %v5481_v24, %v1703_v54  ;;  %v2806_v59 = vadd.f32 %v5429_v58, %v2767_v18  ;;  %v2569_v34 = vadd.f32 %v2537_v35, %v2468_v17  ;;  %v6168_v35 = vld [vmem:[#allocation82_spill] sm:$0xff]  ;;  %v6172_v18 = vld [vmem:[#allocation31_spill] sm:$0xff] }
 0x229   : > { %v2807_v2 = vadd.f32 %v5429_v58, %v2768_v57  ;;  %v2570_v13 = vadd.f32 %v2538_v20, %v2469_v49  ;;  %v2769_v61 = vadd.f32 %v6162_v0, %v2668_v15  ;;  %v2066_v33 = vadd.f32 %v6164_v14, %v1933_v51  ;;  %v6173_v57 = vld [vmem:[#allocation34_spill] sm:$0xff]  ;;  %v2210_v15 = vld [vmem:[#allocation2 + $0x148] sm:$0xff] }
 0x22a   : > { %v2770_v11 = vadd.f32 %v6163_v16, %v2669_v6  ;;  %v2067_v56 = vadd.f32 %v6165_v32, %v1934_v52  ;;  %v2838_v43 = vmax.f32 %v2806_v59, 0.0  ;;  %v2670_v19 = vadd.f32 %v6166_v3, %v2569_v34  ;;  %v6174_v6 = vld [vmem:[#allocation115_spill] sm:$0xff]  ;;  %v2411_v3 = vld [vmem:[#allocation2 + $0x2d8] sm:$0xff] }
 0x22b   : > { %v2839_v29 = vmax.f32 %v2807_v2, 0.0  ;;  %v2671_v54 = vadd.f32 %v6167_v12, %v2570_v13  ;;  %v2808_v55 = vadd.f32 %v5429_v58, %v2769_v61  ;;  %v2167_v8 = vadd.f32 %v6168_v35, %v2066_v33  ;;  %v6175_v52 = vld [vmem:[#allocation119_spill] sm:$0xff]  ;;  %v6176_v61 = vld [vmem:[#allocation94_spill] sm:$0xff]  ;;  %v6180_v12 = vld [vmem:[#allocation97_spill] sm:$0xff] }
 0x22c   : > { %v2809_v28 = vadd.f32 %v5429_v58, %v2770_v11  ;;  %v2168_v1 = vadd.f32 %v6169_v25, %v2067_v56  ;;  %v2771_v21 = vadd.f32 %v6170_v45, %v2670_v19  ;;  %v2852_v10 = vmax.f32 %v5486_v37, 0.0  ;;  %v6178_v11 = vld [vmem:[#allocation120_spill] sm:$0xff]  ;;  %v6179_v33 = vld [vmem:[#allocation95_spill] sm:$0xff] }
 0x22d   : > { %v2866_v44 = vpack.c.bf16 %v2839_v29, %v2838_v43  ;;  %v2772_v23 = vadd.f32 %v6171_v53, %v2671_v54  ;;  %v2840_v20 = vmax.f32 %v2808_v55, 0.0  ;;  %v2268_v36 = vadd.f32 %v6172_v18, %v2167_v8  ;;  %v2310_v43 = vld [vmem:[#allocation2 + $0x2d7] sm:$0xff]  ;;  %v2311_v29 = vld [vmem:[#allocation2 + $0x2df] sm:$0xff]  ;;  %v5721_v45 = vld [vmem:[#allocation8 + $0x3] ss:$0 sm:$0xff] }
 0x22e   : > { %v2841_v40 = vmax.f32 %v2809_v28, 0.0  ;;  %v2269_v5 = vadd.f32 %v6173_v57, %v2168_v1  ;;  %v2810_v17 = vadd.f32 %v5429_v58, %v2771_v21  ;;  %v2539_v49 = vmul.f32 %v5488_v38, %v1704_v22  ;;  %v2412_v55 = vld [vmem:[#allocation2 + $0x2e0] sm:$0xff] }
 0x22f   : > { %3959 = vmatprep.mubr.bf16.mxu1 %v2866_v44  ;;  %v2811_v30 = vadd.f32 %v5429_v58, %v2772_v23  ;;  %v1935_v47 = vmul.f32 %v5481_v24, %v1704_v22  ;;  %v2369_v51 = vadd.f32 %v6174_v6, %v2268_v36  ;;  %v1936_v2 = vmul.f32 %v5481_v24, %v1705_v26  ;;  %v6177_v22 = vld [vmem:[#allocation116_spill] sm:$0xff]  ;;  %v6181_v8 = vld [vmem:[#allocation98_spill] sm:$0xff]  ;;  %v5725_v23 = vld [vmem:[#allocation8 + $0x5] ss:$0 sm:$0xff] }
 0x230   : > { %v2867_v39 = vpack.c.bf16 %v2841_v40, %v2840_v20  ;;  %v2370_v59 = vadd.f32 %v6175_v52, %v2269_v5  ;;  %v2842_v34 = vmax.f32 %v2810_v17, 0.0  ;;  %v2540_v0 = vmul.f32 %v5488_v38, %v1705_v26  ;;  %v6184_v40 = vld [vmem:[#allocation86_spill] sm:$0xff]  ;;  %v2512_v5 = vld [vmem:[#allocation2 + $0x470] sm:$0xff] }
 0x231   : > { %v2843_v13 = vmax.f32 %v2811_v30, 0.0  ;;  %v2068_v63 = vadd.f32 %v6176_v61, %v1935_v47  ;;  %v2470_v16 = vadd.f32 %v6177_v22, %v2369_v51  ;;  %v2069_v32 = vadd.f32 %v6179_v33, %v1936_v2  ;;  %v6185_v36 = vld [vmem:[#allocation42_spill] sm:$0xff]  ;;  %v2513_v47 = vld [vmem:[#allocation2 + $0x478] sm:$0xff]  ;;  %v6187_v51 = vld [vmem:[#allocation88_spill] sm:$0xff] }
 0x232   : > { %3960 = vmatmul.mubr.bf16.gmra.mrb[56].mxu1 %v2867_v39  ;;  %v2471_v14 = vadd.f32 %v6178_v11, %v2370_v59  ;;  %v2247_v56 = vmul.f32 %v5317_v42, %v2210_v15  ;;  %v2853_v9 = vmax.f32 %v5497_v4, 0.0  ;;  %v2278_v26 = vadd.f32 %v5469_v50, %v5473_v31  ;;  %v6182_v42 = vld [vmem:[#allocation41_spill] sm:$0xff]  ;;  %v6183_v31 = vld [vmem:[#allocation76_spill] sm:$0xff]  ;;  %v6186_v39 = vld [vmem:[#allocation87_spill] sm:$0xff] }
 0x233   : > { %v2868_v19 = vpack.c.bf16 %v2843_v13, %v2842_v34  ;;  %v2169_v54 = vadd.f32 %v6180_v12, %v2068_v63  ;;  %v2571_v28 = vadd.f32 %v2539_v49, %v2470_v16  ;;  %v2170_v25 = vadd.f32 %v6181_v8, %v2069_v32  ;;  %v6188_v59 = vld [vmem:[#allocation124_spill] sm:$0xff]  ;;  %v2613_v13 = vld [vmem:[#allocation2 + $0x607] sm:$0xff]  ;;  %v6190_v32 = vld [vmem:[#allocation125_spill] sm:$0xff] }
 0x234   : > { %v2572_v35 = vadd.f32 %v2540_v0, %v2471_v14  ;;  %v2279_v1 = vadd.f32 %v2247_v56, %v5479_v62  ;;  %v2347_v21 = vmul.f32 %v5721_v45, %v2310_v43  ;;  %v2348_v53 = vmul.f32 %v5721_v45, %v2311_v29  ;;  %v6189_v0 = vld [vmem:[#allocation123_spill] sm:$0xff] }
 0x235   : > { %3963 = vmatprep.mubr.bf16.mxu1 %v2868_v19  ;;  %v2270_v44 = vadd.f32 %v6182_v42, %v2169_v54  ;;  %v2448_v50 = vmul.f32 %v5725_v23, %v2411_v3  ;;  %v2672_v20 = vadd.f32 %v6183_v31, %v2571_v28  ;;  %v2271_v57 = vadd.f32 %v6185_v36, %v2170_v25  ;;  %v2614_v16 = vld [vmem:[#allocation2 + $0x60f] sm:$0xff] }
 0x236   : > { %v2673_v18 = vadd.f32 %v6184_v40, %v2572_v35  ;;  %v2449_v62 = vmul.f32 %v5725_v23, %v2412_v55  ;;  %v2379_v30 = vadd.f32 %v2347_v21, %v2278_v26  ;;  %v2380_v49 = vadd.f32 %v2348_v53, %v2279_v1  ;;  %v2714_v29 = vld [vmem:[#allocation2 + $0x608] sm:$0xff]  ;;  %v2715_v26 = vld [vmem:[#allocation2 + $0x610] sm:$0xff]  ;;  %v6192_v55 = vld [vmem:[#allocation126_spill] sm:$0xff] }
 0x237   : > { %v2371_v17 = vadd.f32 %v5376_v48, %v2270_v44  ;;  %v2549_v15 = vmul.f32 %v5488_v38, %v2512_v5  ;;  %v2773_v6 = vadd.f32 %v6186_v39, %v2672_v20  ;;  %v2372_v2 = vadd.f32 %v6188_v59, %v2271_v57  ;;  %v5739_v48 = vld [vmem:[#allocation8 + $0x6] ss:$0 sm:$0xff]  ;;  %v6193_v25 = vld [vmem:[#allocation20_spill] sm:$0xff]  ;;  %v5754_v57 = vld [vmem:[#allocation8] ss:$0 sm:$0xff] }
 0x238   : > { %v2774_v52 = vadd.f32 %v6187_v51, %v2673_v18  ;;  %v2550_v34 = vmul.f32 %v5488_v38, %v2513_v47  ;;  %v2480_v63 = vadd.f32 %v2448_v50, %v2379_v30  ;;  %v2481_v22 = vadd.f32 %v2449_v62, %v2380_v49  ;;  %v6191_v3 = vld [vmem:[#allocation19_spill] sm:$0xff]  ;;  %v6195_v40 = vld [vmem:[#allocation104_spill] sm:$0xff]  ;;  %v2212_v51 = vld [vmem:[#allocation2 + $0x160] sm:$0xff] }
 0x239   : > { %v2472_v61 = vadd.f32 %v6189_v0, %v2371_v17  ;;  %v2650_v11 = vmul.f32 %v5739_v48, %v2613_v13  ;;  %v2812_v14 = vadd.f32 %v5429_v58, %v2773_v6  ;;  %v2473_v56 = vadd.f32 %v6190_v32, %v2372_v2  ;;  %v6194_v44 = vld [vmem:[#allocation99_spill] sm:$0xff]  ;;  %v6196_v17 = vld [vmem:[#allocation105_spill] sm:$0xff] }
 0x23a   : > { %v2813_v33 = vadd.f32 %v5429_v58, %v2774_v52  ;;  %v2651_v43 = vmul.f32 %v5739_v48, %v2614_v16  ;;  %v2581_v12 = vadd.f32 %v2549_v15, %v2480_v63  ;;  %v2582_v54 = vadd.f32 %v2550_v34, %v2481_v22  ;;  %v2211_v6 = vld [vmem:[#allocation2 + $0x158] sm:$0xff]  ;;  %v6197_v52 = vld [vmem:[#allocation106_spill] sm:$0xff]  ;;  %v5760_v2 = vld [vmem:[#allocation8 + $0x2] ss:$0 sm:$0xff] }
 0x23b   : > { %v2573_v19 = vadd.f32 %v6191_v3, %v2472_v61  ;;  %v2751_v28 = vmul.f32 %v6192_v55, %v2714_v29  ;;  %v2844_v35 = vmax.f32 %v2812_v14, 0.0  ;;  %v2574_v1 = vadd.f32 %v6193_v25, %v2473_v56  ;;  %v2312_v22 = vld [vmem:[#allocation2 + $0x2ef] sm:$0xff] }
 0x23c   : > { %v2845_v8 = vmax.f32 %v2813_v33, 0.0  ;;  %v2752_v42 = vmul.f32 %v6192_v55, %v2715_v26  ;;  %v2682_v53 = vadd.f32 %v2650_v11, %v2581_v12  ;;  %v2683_v50 = vadd.f32 %v2651_v43, %v2582_v54  ;;  %v5768_v33 = vld [vmem:[#allocation8 + $0x4] ss:$0 sm:$0xff]  ;;  %v2413_v12 = vld [vmem:[#allocation2 + $0x2f0] sm:$0xff]  ;;  %v2414_v54 = vld [vmem:[#allocation2 + $0x2f8] sm:$0xff] }
 0x23d   : > { %v2674_v21 = vadd.f32 %v6194_v44, %v2573_v19  ;;  %v1945_v31 = vmul.f32 %v5481_v24, %v2512_v5  ;;  %v2675_v18 = vadd.f32 %v6195_v40, %v2574_v1  ;;  %v1946_v36 = vmul.f32 %v5481_v24, %v2513_v47  ;;  %v2615_v40 = vld [vmem:[#allocation2 + $0x61f] sm:$0xff] }
 0x23e   : > { %v2869_v20 = vpack.c.bf16 %v2845_v8, %v2844_v35  ;;  %v2046_v62 = vmul.f32 %v5754_v57, %v2613_v13  ;;  %v2783_v49 = vadd.f32 %v2751_v28, %v2682_v53  ;;  %v2784_v15 = vadd.f32 %v2752_v42, %v2683_v50  ;;  %v2515_v53 = vld [vmem:[#allocation2 + $0x490] sm:$0xff] }
 0x23f   : > { %v2775_v30 = vadd.f32 %v6196_v17, %v2674_v21  ;;  %v2047_v39 = vmul.f32 %v5754_v57, %v2614_v16  ;;  %v2776_v5 = vadd.f32 %v6197_v52, %v2675_v18  ;;  %v2147_v47 = vmul.f32 %v5760_v2, %v2714_v29  ;;  %v2313_v16 = vld [vmem:[#allocation2 + $0x2f7] sm:$0xff]  ;;  %v2514_v21 = vld [vmem:[#allocation2 + $0x488] sm:$0xff] }
 0x240   : > { %3964 = vmatmul.mubr.bf16.gmra.mrb[60].mxu1 %v2869_v20  ;;  %v2078_v59 = vadd.f32 %v2046_v62, %v1945_v31  ;;  %v2148_v34 = vmul.f32 %v5760_v2, %v2715_v26  ;;  %v2822_v0 = vadd.f32 %v5429_v58, %v2783_v49  ;;  %v2823_v61 = vadd.f32 %v5429_v58, %v2784_v15  ;;  %v2314_v52 = vld [vmem:[#allocation2 + $0x307] sm:$0xff] }
 0x241   : > { %v2814_v13 = vadd.f32 %v5429_v58, %v2775_v30  ;;  %v2079_v63 = vadd.f32 %v2047_v39, %v1946_v36  ;;  %v2815_v11 = vadd.f32 %v5429_v58, %v2776_v5  ;;  %v2248_v32 = vmul.f32 %v5768_v33, %v2211_v6  ;;  %v2213_v30 = vld [vmem:[#allocation2 + $0x170] sm:$0xff] }
 0x242   : > { %v2179_v14 = vadd.f32 %v2147_v47, %v2078_v59  ;;  %v2249_v56 = vmul.f32 %v5768_v33, %v2212_v51  ;;  %v2854_v29 = vmax.f32 %v2822_v0, 0.0  ;;  %v2855_v3 = vmax.f32 %v2823_v61, 0.0  ;;  %v2214_v51 = vld [vmem:[#allocation2 + $0x178] sm:$0xff]  ;;  %v2315_v5 = vld [vmem:[#allocation2 + $0x30f] sm:$0xff] }
 0x243   : > { %v2846_v43 = vmax.f32 %v2814_v13, 0.0  ;;  %v2180_v19 = vadd.f32 %v2148_v34, %v2079_v63  ;;  %v2847_v26 = vmax.f32 %v2815_v11, 0.0  ;;  %v2349_v35 = vmul.f32 %v5721_v45, %v2312_v22  ;;  %v2415_v0 = vld [vmem:[#allocation2 + $0x308] sm:$0xff] }
 0x244   : > { %v2280_v28 = vadd.f32 %v2248_v32, %v2179_v14  ;;  %v2350_v8 = vmul.f32 %v5721_v45, %v2313_v16  ;;  %v2872_v25 = vpack.c.bf16 %v2851_v60, %v2850_v7  ;;  %v5782_v1 = vpack.c.bf16 %v2853_v9, %v2852_v10  ;;  %v2716_v7 = vld [vmem:[#allocation2 + $0x620] sm:$0xff]  ;;  %v2717_v9 = vld [vmem:[#allocation2 + $0x628] sm:$0xff]  ;;  %v2416_v16 = vld [vmem:[#allocation2 + $0x310] sm:$0xff] }
 0x245   : > { %v5784_v42 = vpack.c.bf16 %v2855_v3, %v2854_v29  ;;  %v2281_v44 = vadd.f32 %v2249_v56, %v2180_v19  ;;  %v2870_v50 = vpack.c.bf16 %v2847_v26, %v2846_v43  ;;  %v2450_v20 = vmul.f32 %v5725_v23, %v2413_v12  ;;  %v2516_v19 = vld [vmem:[#allocation2 + $0x4a0] sm:$0xff]  ;;  %v2517_v12 = vld [vmem:[#allocation2 + $0x4a8] sm:$0xff] }
 0x246   : > { %v2381_v31 = vadd.f32 %v2349_v35, %v2280_v28  ;;  %v2451_v27 = vmul.f32 %v5725_v23, %v2414_v54  ;;  %v2551_v37 = vmul.f32 %v5488_v38, %v2514_v21  ;;  %v2552_v4 = vmul.f32 %v5488_v38, %v2515_v53 }
 0x247   : > { %v2382_v60 = vadd.f32 %v2350_v8, %v2281_v44  ;;  %v2652_v10 = vmul.f32 %v5739_v48, %v2615_v40  ;;  %3967 = vmatprep.mubr.bf16.mxu1 %v2870_v50  ;;  %v2653_v36 = vmul.f32 %v5739_v48, %v2616_v46  ;;  %v1947_v62 = vmul.f32 %v5481_v24, %v2514_v21  ;;  %v2617_v8 = vld [vmem:[#allocation2 + $0x637] sm:$0xff] }
 0x248   : > { %v2482_v18 = vadd.f32 %v2450_v20, %v2381_v31  ;;  %v1948_v17 = vmul.f32 %v5481_v24, %v2515_v53  ;;  %3968 = vmatmul.mubr.bf16.gmra.mrb[64].mxu1 %v5459_v41  ;;  %v2048_v15 = vmul.f32 %v5754_v57, %v2615_v40  ;;  %v2049_v39 = vmul.f32 %v5754_v57, %v2616_v46  ;;  %v2618_v53 = vld [vmem:[#allocation2 + $0x63f] sm:$0xff] }
 0x249   : > { %v2483_v49 = vadd.f32 %v2451_v27, %v2382_v60  ;;  %v2149_v6 = vmul.f32 %v5760_v2, %v2716_v7  ;;  %3971 = vmatprep.mubr.bf16.mxu1 %v2872_v25  ;;  %v2753_v47 = vmul.f32 %v6192_v55, %v2716_v7  ;;  %v2754_v34 = vmul.f32 %v6192_v55, %v2717_v9  ;;  %v2718_v31 = vld [vmem:[#allocation2 + $0x638] sm:$0xff]  ;;  %v2719_v20 = vld [vmem:[#allocation2 + $0x640] sm:$0xff] }
 0x24a   : > { %v2583_v59 = vadd.f32 %v2551_v37, %v2482_v18  ;;  %v2150_v13 = vmul.f32 %v5760_v2, %v2717_v9  ;;  %v2080_v61 = vadd.f32 %v2048_v15, %v1947_v62  ;;  %v2081_v63 = vadd.f32 %v2049_v39, %v1948_v17  ;;  %v2215_v9 = vld [vmem:[#allocation2 + $0x188] sm:$0xff]  ;;  %v4155_v18 = vld [vmem:[#allocation8 + $0x8] ss:$0 sm:$0xff] }
 0x24b   : > { %v2584_v41 = vadd.f32 %v2552_v4, %v2483_v49  ;;  %v2250_v22 = vmul.f32 %v5768_v33, %v2213_v30  ;;  %v2251_v14 = vmul.f32 %v5768_v33, %v2214_v51  ;;  %v2351_v32 = vmul.f32 %v5721_v45, %v2314_v52  ;;  %v2216_v39 = vld [vmem:[#allocation2 + $0x190] sm:$0xff] }
 0x24c   : > { %v2684_v11 = vadd.f32 %v2652_v10, %v2583_v59  ;;  %v2352_v56 = vmul.f32 %v5721_v45, %v2315_v5  ;;  %v2181_v29 = vadd.f32 %v2149_v6, %v2080_v61  ;;  %v2182_v3 = vadd.f32 %v2150_v13, %v2081_v63  ;;  %v2317_v6 = vld [vmem:[#allocation2 + $0x327] sm:$0xff] }
 0x24d   : > { %v2685_v43 = vadd.f32 %v2653_v36, %v2584_v41  ;;  %v2452_v55 = vmul.f32 %v5725_v23, %v2415_v0  ;;  %v2453_v26 = vmul.f32 %v5725_v23, %v2416_v16  ;;  %v2553_v28 = vmul.f32 %v5488_v38, %v2516_v19  ;;  %v2417_v41 = vld [vmem:[#allocation2 + $0x320] sm:$0xff] }
 0x24e   : > { %v2785_v54 = vadd.f32 %v2753_v47, %v2684_v11  ;;  %v2554_v35 = vmul.f32 %v5488_v38, %v2517_v12  ;;  %v2282_v44 = vadd.f32 %v2250_v22, %v2181_v29  ;;  %v2283_v21 = vadd.f32 %v2251_v14, %v2182_v3  ;;  %v2418_v11 = vld [vmem:[#allocation2 + $0x328] sm:$0xff]  ;;  %v2518_v14 = vld [vmem:[#allocation2 + $0x4b8] sm:$0xff] }
 0x24f   : > { %v2786_v25 = vadd.f32 %v2754_v34, %v2685_v43  ;;  %v2654_v50 = vmul.f32 %v5739_v48, %v2617_v8  ;;  %v2655_v40 = vmul.f32 %v5739_v48, %v2618_v53  ;;  %v1949_v46 = vmul.f32 %v5481_v24, %v2516_v19  ;;  %v2519_v19 = vld [vmem:[#allocation2 + $0x4c0] sm:$0xff] }
 0x250   : > { %v2824_v27 = vadd.f32 %v5429_v58, %v2785_v54  ;;  %v1950_v7 = vmul.f32 %v5481_v24, %v2517_v12  ;;  %3972 = vmatmul.mubr.bf16.gmra.mrb[68].mxu1 %v5782_v1  ;;  %v2383_v37 = vadd.f32 %v2351_v32, %v2282_v44  ;;  %v2384_v4 = vadd.f32 %v2352_v56, %v2283_v21  ;;  %v2316_v24 = vld [vmem:[#allocation2 + $0x31f] sm:$0xff]  ;;  %v2619_v56 = vld [vmem:[#allocation2 + $0x64f] sm:$0xff]  ;;  %v2620_v12 = vld [vmem:[#allocation2 + $0x657] sm:$0xff] }
 0x251   : > { %v2825_v60 = vadd.f32 %v5429_v58, %v2786_v25  ;;  %v2050_v10 = vmul.f32 %v5754_v57, %v2617_v8  ;;  %3975 = vmatprep.mubr.bf16.mxu1 %v5784_v42  ;;  %v2755_v36 = vmul.f32 %v4155_v18, %v2718_v31  ;;  %v2051_v62 = vmul.f32 %v5754_v57, %v2618_v53  ;;  %v2721_v21 = vld [vmem:[#allocation2 + $0x658] sm:$0xff] }
 0x252   : > { %v2151_v17 = vmul.f32 %v5760_v2, %v2718_v31  ;;  %v2152_v30 = vmul.f32 %v5760_v2, %v2719_v20  ;;  %v2484_v1 = vadd.f32 %v2452_v55, %v2383_v37  ;;  %v2485_v15 = vadd.f32 %v2453_v26, %v2384_v4  ;;  %v2720_v26 = vld [vmem:[#allocation2 + $0x650] sm:$0xff] }
 0x253   : > { %v2857_v49 = vmax.f32 %v2825_v60, 0.0  ;;  %v2082_v58 = vadd.f32 %v2050_v10, %v1949_v46  ;;  %v2856_v51 = vmax.f32 %v2824_v27, 0.0  ;;  %v2756_v52 = vmul.f32 %v4155_v18, %v2719_v20 }
 0x254   : > { %v2083_v5 = vadd.f32 %v2051_v62, %v1950_v7  ;;  %v2252_v42 = vmul.f32 %v5768_v33, %v2215_v9  ;;  %v2585_v59 = vadd.f32 %v2553_v28, %v2484_v1  ;;  %v2586_v47 = vadd.f32 %v2554_v35, %v2485_v15  ;;  %v4156_v28 = vld [vmem:[%s5945_s4] ss:$0 sm:$0xff] }
 0x255   : > { %v2183_v34 = vadd.f32 %v2151_v17, %v2082_v58  ;;  %v2353_v57 = vmul.f32 %v5721_v45, %v2316_v24  ;;  %v2253_v2 = vmul.f32 %v5768_v33, %v2216_v39  ;;  %v2354_v0 = vmul.f32 %v5721_v45, %v2317_v6  ;;  %v5837_v24 = vld [vmem:[%s5947_s6] ss:$0 sm:$0xff] }
 0x256   : > { %v2184_v13 = vadd.f32 %v2152_v30, %v2083_v5  ;;  %v2875_v61 = vpack.c.bf16 %v2857_v49, %v2856_v51  ;;  %v2686_v63 = vadd.f32 %v2654_v50, %v2585_v59  ;;  %v2687_v22 = vadd.f32 %v2655_v40, %v2586_v47 }
 0x257   : > { %v2284_v16 = vadd.f32 %v2252_v42, %v2183_v34  ;;  %v2454_v55 = vmul.f32 %v5725_v23, %v2417_v41  ;;  %v2455_v45 = vmul.f32 %v5725_v23, %v2418_v11  ;;  %v2555_v54 = vmul.f32 %v5488_v38, %v2518_v14 }
 0x258   : > { %v2285_v32 = vadd.f32 %v2253_v2, %v2184_v13  ;;  %3976 = vmatmul.mubr.bf16.gmra.mrb[72].mxu1 %v2875_v61  ;;  %v2787_v43 = vadd.f32 %v2755_v36, %v2686_v63  ;;  %v2788_v29 = vadd.f32 %v2756_v52, %v2687_v22  ;;  %v2656_v44 = vmul.f32 %v5739_v48, %v2619_v56 }
 0x259   : > { %v2385_v3 = vadd.f32 %v2353_v57, %v2284_v16  ;;  %v2556_v50 = vmul.f32 %v5488_v38, %v2519_v19  ;;  %v2657_v31 = vmul.f32 %v5739_v48, %v2620_v12  ;;  %v2757_v40 = vmul.f32 %v4155_v18, %v2720_v26 }
 0x25a   : > { %v2386_v33 = vadd.f32 %v2354_v0, %v2285_v32  ;;  %v2826_v35 = vadd.f32 %v4156_v28, %v2787_v43  ;;  %v2827_v8 = vadd.f32 %v4156_v28, %v2788_v29  ;;  %v2758_v7 = vmul.f32 %v4155_v18, %v2721_v21 }
 0x25b   : > { %v2486_v25 = vadd.f32 %v2454_v55, %v2385_v3 }
 0x25c   : > { %v2487_v53 = vadd.f32 %v2455_v45, %v2386_v33  ;;  %v2858_v20 = vmax.f32 %v2826_v35, 0.0  ;;  %v2859_v23 = vmax.f32 %v2827_v8, 0.0 }
 0x25d   : > { %v2587_v27 = vadd.f32 %v2555_v54, %v2486_v25 }
 0x25e   : > { %v2588_v46 = vadd.f32 %v2556_v50, %v2487_v53  ;;  %v2876_v60 = vpack.c.bf16 %v2859_v23, %v2858_v20 }
 0x25f   : > { %v2688_v37 = vadd.f32 %v2656_v44, %v2587_v27 }
 0x260   : > { %v2689_v4 = vadd.f32 %v2657_v31, %v2588_v46  ;;  %3979 = vmatprep.mubr.bf16.mxu1 %v2876_v60 }
 0x261   : > { %v2789_v10 = vadd.f32 %v2757_v40, %v2688_v37 }
 0x262   : > { %v2790_v9 = vadd.f32 %v2758_v7, %v2689_v4 }
 0x263   : > { %v2828_v36 = vadd.f32 %v4156_v28, %v2789_v10 }
 0x264   : > { %v2829_v62 = vadd.f32 %v4156_v28, %v2790_v9 }
 0x265   : > { %v2860_v17 = vmax.f32 %v2828_v36, 0.0 }
 0x266   : > { %v2861_v30 = vmax.f32 %v2829_v62, 0.0 }
 0x268   : > { %v2877_v38 = vpack.c.bf16 %v2861_v30, %v2860_v17 }
 0x26a   : > { %3980 = vmatmul.mubr.bf16.gmra.mrb[76].mxu1 %v2877_v38 }
 0x2ed   : > { %v3953_v48 = vpop.f32.mrb[48].mxu1 }
 0x2ee   : > { %v2983_v18 = vpop.f32.mrb[49].mxu1  ;;  %v2992_v1 = vadd.f32 %v3953_v48, %v5837_v24 }
 0x2ef   : > { %v3954_v49 = vpop.f32.mrb[50].mxu1  ;;  %v2984_v39 = vadd.f32 %v5837_v24, %v2983_v18 }
 0x2f0   : > { %v2995_v15 = vadd.f32 %v3954_v49, %v5837_v24  ;;  %v2986_v58 = vpop.f32.mrb[51].mxu1 }
 0x2f1   : > { %v2987_v6 = vadd.f32 %v5837_v24, %v2986_v58 }
 0x2f2   : > { %v3629_v51 = vpack.c.bf16 %v2995_v15, %v2992_v1 }
 0x2f3   : > { %v3624_v52 = vpack.c.bf16 %v2987_v6, %v2984_v39 }
 0x2f4   : > { %3701 = vst [vmem:[%s5844_s17 + $0x8] sm:$0xff] %v3629_v51  }
 0x2f5   : > { %3625 = vst [vmem:[%s5844_s17] sm:$0xff] %v3624_v52  }
 0x2fa   : > { %v3957_v5 = vpop.f32.mrb[52].mxu1 }
 0x2fb   : > { %v2999_v42 = vpop.f32.mrb[53].mxu1  ;;  %v3008_v47 = vadd.f32 %v3957_v5, %v5837_v24 }
 0x2fc   : > { %v3958_v59 = vpop.f32.mrb[54].mxu1  ;;  %v3000_v13 = vadd.f32 %v5837_v24, %v2999_v42 }
 0x2fd   : > { %v3011_v34 = vadd.f32 %v3958_v59, %v5837_v24  ;;  %v3002_v57 = vpop.f32.mrb[55].mxu1 }
 0x2fe   : > { %v3003_v2 = vadd.f32 %v5837_v24, %v3002_v57 }
 0x2ff   : > { %v3639_v0 = vpack.c.bf16 %v3011_v34, %v3008_v47 }
 0x300   : > { %v3634_v41 = vpack.c.bf16 %v3003_v2, %v3000_v13 }
 0x301   : > { %3703 = vst [vmem:[%s5844_s17 + $0x18] sm:$0xff] %v3639_v0  }
 0x302   : > { %3702 = vst [vmem:[%s5844_s17 + $0x10] sm:$0xff] %v3634_v41  }
 0x305   : > { %v3961_v61 = vpop.f32.mrb[56].mxu1 }
 0x306   : > { %v3015_v63 = vpop.f32.mrb[57].mxu1  ;;  %v3024_v16 = vadd.f32 %v3961_v61, %v5837_v24 }
 0x307   : > { %v3962_v22 = vpop.f32.mrb[58].mxu1  ;;  %v3016_v32 = vadd.f32 %v5837_v24, %v3015_v63 }
 0x308   : > { %v3027_v11 = vadd.f32 %v3962_v22, %v5837_v24  ;;  %v3018_v14 = vpop.f32.mrb[59].mxu1 }
 0x309   : > { %v3019_v56 = vadd.f32 %v5837_v24, %v3018_v14 }
 0x30a   : > { %v3649_v43 = vpack.c.bf16 %v3027_v11, %v3024_v16 }
 0x30b   : > { %v3644_v29 = vpack.c.bf16 %v3019_v56, %v3016_v32 }
 0x30c   : > { %3705 = vst [vmem:[%s5844_s17 + $0x28] sm:$0xff] %v3649_v43  }
 0x30d   : > { %3704 = vst [vmem:[%s5844_s17 + $0x20] sm:$0xff] %v3644_v29  }
 0x313   : > { %v3965_v3 = vpop.f32.mrb[60].mxu1 }
 0x314   : > { %v3031_v55 = vpop.f32.mrb[61].mxu1  ;;  %v3040_v12 = vadd.f32 %v3965_v3, %v5837_v24 }
 0x315   : > { %v3966_v19 = vpop.f32.mrb[62].mxu1  ;;  %v3032_v54 = vadd.f32 %v5837_v24, %v3031_v55 }
 0x316   : > { %v3043_v33 = vadd.f32 %v3966_v19, %v5837_v24  ;;  %v3034_v45 = vpop.f32.mrb[63].mxu1 }
 0x317   : > { %v3035_v26 = vadd.f32 %v5837_v24, %v3034_v45 }
 0x318   : > { %v3659_v28 = vpack.c.bf16 %v3043_v33, %v3040_v12 }
 0x319   : > { %v3654_v35 = vpack.c.bf16 %v3035_v26, %v3032_v54 }
 0x31a   : > { %3707 = vst [vmem:[%s5844_s17 + $0x38] sm:$0xff] %v3659_v28  }
 0x31b   : > { %3706 = vst [vmem:[%s5844_s17 + $0x30] sm:$0xff] %v3654_v35   ;;  %v3969_v8 = vpop.f32.mrb[64].mxu1 }
 0x31c   : > { %v3047_v25 = vpop.f32.mrb[65].mxu1  ;;  %v3056_v21 = vadd.f32 %v3969_v8, %v5837_v24 }
 0x31d   : > { %v3970_v44 = vpop.f32.mrb[66].mxu1  ;;  %v3048_v31 = vadd.f32 %v5837_v24, %v3047_v25 }
 0x31e   : > { %v3059_v53 = vadd.f32 %v3970_v44, %v5837_v24  ;;  %v3050_v50 = vpop.f32.mrb[67].mxu1 }
 0x31f   : > { %v3051_v20 = vadd.f32 %v5837_v24, %v3050_v50 }
 0x320   : > { %v3669_v23 = vpack.c.bf16 %v3059_v53, %v3056_v21 }
 0x321   : > { %v3664_v27 = vpack.c.bf16 %v3051_v20, %v3048_v31 }
 0x322   : > { %3709 = vst [vmem:[%s5844_s17 + $0x48] sm:$0xff] %v3669_v23  }
 0x323   : > { %3708 = vst [vmem:[%s5844_s17 + $0x40] sm:$0xff] %v3664_v27   ;;  %v3973_v40 = vpop.f32.mrb[68].mxu1 }
 0x324   : > { %v3063_v46 = vpop.f32.mrb[69].mxu1  ;;  %v3072_v60 = vadd.f32 %v3973_v40, %v5837_v24 }
 0x325   : > { %v3974_v7 = vpop.f32.mrb[70].mxu1  ;;  %v3064_v10 = vadd.f32 %v5837_v24, %v3063_v46 }
 0x326   : > { %v3075_v37 = vadd.f32 %v3974_v7, %v5837_v24  ;;  %v3066_v4 = vpop.f32.mrb[71].mxu1 }
 0x327   : > { %v3067_v9 = vadd.f32 %v5837_v24, %v3066_v4 }
 0x328   : > { %v3679_v36 = vpack.c.bf16 %v3075_v37, %v3072_v60 }
 0x329   : > { %v3674_v62 = vpack.c.bf16 %v3067_v9, %v3064_v10 }
 0x32a   : > { %3711 = vst [vmem:[%s5844_s17 + $0x58] sm:$0xff] %v3679_v36  }
 0x32b   : > { %3710 = vst [vmem:[%s5844_s17 + $0x50] sm:$0xff] %v3674_v62   ;;  %v3977_v17 = vpop.f32.mrb[72].mxu1 }
 0x32c   : > { %v3079_v30 = vpop.f32.mrb[73].mxu1  ;;  %v3088_v48 = vadd.f32 %v3977_v17, %v5837_v24 }
 0x32d   : > { %v3978_v38 = vpop.f32.mrb[74].mxu1  ;;  %v3080_v1 = vadd.f32 %v5837_v24, %v3079_v30 }
 0x32e   : > { %v3091_v18 = vadd.f32 %v3978_v38, %v5837_v24  ;;  %v3082_v49 = vpop.f32.mrb[75].mxu1 }
 0x32f   : > { %v3083_v15 = vadd.f32 %v5837_v24, %v3082_v49 }
 0x330   : > { %v3689_v58 = vpack.c.bf16 %v3091_v18, %v3088_v48 }
 0x331   : > { %v3684_v39 = vpack.c.bf16 %v3083_v15, %v3080_v1 }
 0x332   : > { %3713 = vst [vmem:[%s5844_s17 + $0x68] sm:$0xff] %v3689_v58  }
 0x333   : > { %3712 = vst [vmem:[%s5844_s17 + $0x60] sm:$0xff] %v3684_v39  }
 0x33d   : > { %v3981_v6 = vpop.f32.mrb[76].mxu1 }
 0x33e   : > { %v3095_v51 = vpop.f32.mrb[77].mxu1  ;;  %v3104_v5 = vadd.f32 %v3981_v6, %v5837_v24 }
 0x33f   : > { %v3982_v52 = vpop.f32.mrb[78].mxu1  ;;  %v3096_v47 = vadd.f32 %v5837_v24, %v3095_v51 }
 0x340   : > { %v3107_v42 = vadd.f32 %v3982_v52, %v5837_v24  ;;  %v3098_v59 = vpop.f32.mrb[79].mxu1 }
 0x341   : > { %v3099_v34 = vadd.f32 %v5837_v24, %v3098_v59 }
 0x342   : > { %v3699_v57 = vpack.c.bf16 %v3107_v42, %v3104_v5 }
 0x343   : > { %v3694_v13 = vpack.c.bf16 %v3099_v34, %v3096_v47 }
 0x344   : > { %3715 = vst [vmem:[%s5844_s17 + $0x78] sm:$0xff] %v3699_v57  }
 0x345   : > { %3714 = vst [vmem:[%s5844_s17 + $0x70] sm:$0xff] %v3694_v13  }
 0x346   : > { %4284 = shalt.err (!%p4281_p4)
}
 0x347   : > { %s4285_s1 = scalar_lea.hbm %s5893_s9, 2048  ;;  %s4289_s11 = scalar_lea.hbm %s5948_s7, 4096 }
 0x348   : > { %p4286_p9 = scmp.ne.s32.totalorder %s5893_s9, %s4285_s1  ;;  %p4290_p8 = scmp.lt.u32.totalorder %s5893_s9, %s5948_s7 }
 0x349   : > { %p4291_p13 = scmp.lt.u32.totalorder %s4289_s11, %s4285_s1  ;;  %p4293_p10 = scmp.lt.u32.totalorder %s4285_s1, %s5893_s9 }
 0x34a   : > { %p4287_p0 = pnand %p4286_p9, %p4547_p5 }
 0x34b   : > { %p4292_p6 = por %p4291_p13, %p4290_p8 }
 0x34c   : > { %p4288_p11 = pneg %p4287_p0 }
 0x34d   : > { %p4294_p3 = por %p4293_p10, %p4292_p6 }
 0x34f   : > { %p4295_p7 = pnand %p4294_p3, %p4288_p11 }
 0x351   : > { %4298 = shalt.err (!%p4295_p7)
}
 0x352   : > { %s4357_s18 = smov 64   ;;  %s4358_s23 = smov 4  }
 0x353   : > { %3999 = dma.vmem_to_hbm [thread:$0]  (%p4547_p5), %s5895_s22, 2048, %s5893_s9, %s3271_s28, %s4357_s18, %s4357_s18, %s4358_s23  }
 0x354 PF: > { %s6198_s30 = sld [smem:[#allocation16_spill]]  ;;  %s3299_s29 = sand.u32 1, %s4333_s24  }
 0x355   : > { %p6200_p1 = scmp.ge.s32.totalorder %s4345_s27, 2  ;;  %s3300_s10 = scalar_lea.sflag [#allocation5], %s3299_s29 }
 0x35a   : > { %p6199_p12 = scmp.ne.s32.totalorder %s6198_s30, 0 }
 0x35c   : > { %p4016_p2 = pnand %p6200_p1, %p6199_p12 }
 0x35e   : > { %4328 = dma.done.wait (!%p4016_p2), %s3300_s10, 2048  }
 0x35f   : > { %4330 = vsyncadd (!%p4016_p2), %s3300_s10, 4294965248  ;;  %p22_p4 = scmp.ge.s32.totalorder %s4512_s21, 4   ;;  %s6201_s24 = smov %s4337_s25 }
 0x360   : > { %s6202_s25 = smov %s4341_s26  ;;  %s6203_s26 = smov %s4543_s13 }
 0x361   : > { %s6204_s27 = smov %s4512_s21  ;;  %24 = sbr.rel (!%p22_p4) target bundleno = 9 (0x9), region = 112 }
 0x368   :  { %3305 = vsyncpa [#allocation4], 1 }
 0x369   :  { %3307 = vsyncpa [#allocation4 + $0x1], 1 }
 0x36a   :  { %3308 = vsyncpa [#allocation7], 1 }
 0x36b   :  { %3309 = vsyncpa [#allocation10], 1 }
 0x36c   :  { %3310 = vsyncpa [#allocation5], 1 }
 0x36d   :  { %3312 = vsyncpa [#allocation5 + $0x1], 1 }

</bundles_post_ra>
